<compile_context>
chip_gen: v5e
topology: v5e:2x2
jax: 0.10.0
libtpu: 0.0.40
codegen_flags: <defaults>
</compile_context>

<pallas_src>
import functools

import jax
import jax.numpy as jnp
from jax.experimental import pallas as pl
from jax.experimental.pallas import tpu as pltpu


# -----------------------------------------------------------------------------
# Helpers
# -----------------------------------------------------------------------------
def _round_up(x, m):
    return ((x + m - 1) // m) * m


def _pad2d(x, rows, cols):
    r, c = x.shape
    if r == rows and c == cols:
        return x
    return jnp.pad(x, ((0, rows - r), (0, cols - c)))


# -----------------------------------------------------------------------------
# Tiled matmul + bias kernel (bf16 operands, f32 accumulation).
# Used for (a) the hoisted LSTM input projection over all timesteps and
# (b) the final fc layer.
# -----------------------------------------------------------------------------
def _matmul_bias_kernel(x_ref, w_ref, b_ref, o_ref, acc_ref):
    k = pl.program_id(2)

    @pl.when(k == 0)
    def _():
        acc_ref[...] = jnp.zeros_like(acc_ref)

    acc_ref[...] += jnp.dot(x_ref[...], w_ref[...],
                            preferred_element_type=jnp.float32)

    @pl.when(k == pl.num_programs(2) - 1)
    def _():
        o_ref[...] = (acc_ref[...] + b_ref[...]).astype(o_ref.dtype)


def matmul_bias(x, w_t, bias, out_dtype=jnp.float32, *, tm=256, tn=512, tk=512):
    """(M, K) @ (K, N) + bias -> (M, N).  Operands cast to bf16, f32 acc."""
    M, K = x.shape
    N = w_t.shape[1]

    tm = min(tm, _round_up(M, 8))
    tk = min(tk, _round_up(K, 128))
    tn = min(tn, _round_up(N, 128))
    Mp, Kp, Np = _round_up(M, tm), _round_up(K, tk), _round_up(N, tn)

    xp = _pad2d(x.astype(jnp.bfloat16), Mp, Kp)
    wp = _pad2d(w_t.astype(jnp.bfloat16), Kp, Np)
    bp = _pad2d(bias.reshape(1, N).astype(jnp.float32), 1, Np)

    out = pl.pallas_call(
        _matmul_bias_kernel,
        out_shape=jax.ShapeDtypeStruct((Mp, Np), out_dtype),
        grid_spec=pltpu.PrefetchScalarGridSpec(
            num_scalar_prefetch=0,
            grid=(Mp // tm, Np // tn, Kp // tk),
            in_specs=[
                pl.BlockSpec((tm, tk), lambda i, j, k: (i, k)),
                pl.BlockSpec((tk, tn), lambda i, j, k: (k, j)),
                pl.BlockSpec((1, tn), lambda i, j, k: (0, j)),
            ],
            out_specs=pl.BlockSpec((tm, tn), lambda i, j, k: (i, j)),
            scratch_shapes=[pltpu.VMEM((tm, tn), jnp.float32)],
        ),
        compiler_params=pltpu.CompilerParams(
            dimension_semantics=("parallel", "parallel", "arbitrary"),
            vmem_limit_bytes=64 * 1024 * 1024),
    )(xp, wp, bp)
    if Mp != M or Np != N:
        out = out[:M, :N]
    return out


# -----------------------------------------------------------------------------
# LSTM recurrence kernel.  The input projection (x @ W_ih^T + b) has already
# been computed for every timestep (gx).  Grid = (batch_tiles, time_blocks),
# time axis sequential ("arbitrary"), batch axis "parallel".  h/c state lives
# in f32 VMEM scratch and is carried across the time blocks of one batch tile.
# PyTorch gate order: i, f, g, o.
# -----------------------------------------------------------------------------
def _lstm_recurrent_kernel(gx_ref, whh_t_ref, h0_ref, c0_ref,
                           out_ref, hN_ref, cN_ref, h_sc, c_sc,
                           *, hidden_dim, t_blk):
    t = pl.program_id(1)

    @pl.when(t == 0)
    def _():
        h_sc[...] = h0_ref[...]
        c_sc[...] = c0_ref[...]

    H = hidden_dim
    whh_t = whh_t_ref[...]                       # (H, 4H) bf16, loaded once

    def step(i, carry):
        h, c = carry                             # f32 (tb, H)
        gates = gx_ref[i, :, :] + jnp.dot(h.astype(jnp.bfloat16), whh_t,
                                          preferred_element_type=jnp.float32)
        i_g = jax.nn.sigmoid(gates[:, 0 * H:1 * H])
        f_g = jax.nn.sigmoid(gates[:, 1 * H:2 * H])
        g_g = jnp.tanh(gates[:, 2 * H:3 * H])
        o_g = jax.nn.sigmoid(gates[:, 3 * H:4 * H])
        c_new = f_g * c + i_g * g_g
        h_new = o_g * jnp.tanh(c_new)
        out_ref[i, :, :] = h_new.astype(out_ref.dtype)
        return h_new, c_new

    h, c = jax.lax.fori_loop(0, t_blk, step, (h_sc[...], c_sc[...]),
                             unroll=True)
    h_sc[...] = h
    c_sc[...] = c

    # Only the final time block writes the final states.
    @pl.when(t == pl.num_programs(1) - 1)
    def _():
        hN_ref[...] = h
        cN_ref[...] = c


def lstm_layer(x, wih_t, whh_t, bias, h0, c0):
    """One LSTM layer over the whole sequence.

    x:     (S, B, Din) f32 or bf16
    wih_t: (Din, 4H) bf16    whh_t: (H, 4H) bf16    bias: (4H,) f32
    h0/c0: (B, H) f32
    returns: out (S, B, H) bf16, h_n (B, H) f32, c_n (B, H) f32
    """
    S, B, Din = x.shape
    H = whh_t.shape[0]

    # --- 1) Input projection for all timesteps in one big MXU matmul. ---
    gx = matmul_bias(x.reshape(S * B, Din), wih_t, bias,
                     out_dtype=jnp.float32)            # (S*B, 4H)
    gx = gx.reshape(S, B, 4 * H)

    # --- 2) Sequential recurrence, blocked over time. ---
    t_blk = 1
    for cand in (32, 16, 8, 4, 2, 1):                  # largest divisor of S
        if S % cand == 0:
            t_blk = cand
            break
    # Split batch into 2 tiles when each tile keeps >= 8 sublane rows
    # (lets v7x use both TensorCores; no-op elsewhere).
    tb = B // 2 if (B % 16 == 0) else B

    kernel = functools.partial(_lstm_recurrent_kernel,
                               hidden_dim=H, t_blk=t_blk)

    out, h_n, c_n = pl.pallas_call(
        kernel,
        out_shape=(
            jax.ShapeDtypeStruct((S, B, H), jnp.bfloat16),
            jax.ShapeDtypeStruct((B, H), jnp.float32),
            jax.ShapeDtypeStruct((B, H), jnp.float32),
        ),
        grid_spec=pltpu.PrefetchScalarGridSpec(
            num_scalar_prefetch=0,
            grid=(B // tb, S // t_blk),
            in_specs=[
                pl.BlockSpec((t_blk, tb, 4 * H), lambda bi, ti: (ti, bi, 0)),
                pl.BlockSpec((H, 4 * H), lambda bi, ti: (0, 0)),
                pl.BlockSpec((tb, H), lambda bi, ti: (bi, 0)),
                pl.BlockSpec((tb, H), lambda bi, ti: (bi, 0)),
            ],
            out_specs=[
                pl.BlockSpec((t_blk, tb, H), lambda bi, ti: (ti, bi, 0)),
                pl.BlockSpec((tb, H), lambda bi, ti: (bi, 0)),
                pl.BlockSpec((tb, H), lambda bi, ti: (bi, 0)),
            ],
            scratch_shapes=[
                pltpu.VMEM((tb, H), jnp.float32),      # h carry
                pltpu.VMEM((tb, H), jnp.float32),      # c carry
            ],
        ),
        compiler_params=pltpu.CompilerParams(
            dimension_semantics=("parallel", "arbitrary"),
            vmem_limit_bytes=64 * 1024 * 1024),
    )(gx, whh_t, h0, c0)
    return out, h_n, c_n


# -----------------------------------------------------------------------------
# Parameters
# -----------------------------------------------------------------------------
def init_params(key, vocab_size, embedding_dim, hidden_dim, n_layers):
    """PyTorch-layout parameters (f32), as nn.Embedding / nn.LSTM / nn.Linear."""
    ks = jax.random.split(key, 2 + 4 * n_layers + 2)
    stdv = 1.0 / jnp.sqrt(hidden_dim)
    params = {
        "embedding": jax.random.normal(ks[0], (vocab_size, embedding_dim),
                                       jnp.float32),
        "layers": [],
        "fc_w": jax.random.uniform(ks[1], (vocab_size, hidden_dim), jnp.float32,
                                   -stdv, stdv),
        "fc_b": jnp.zeros((vocab_size,), jnp.float32),
    }
    for layer in range(n_layers):
        in_dim = embedding_dim if layer == 0 else hidden_dim
        kb = 2 + 4 * layer
        params["layers"].append({
            "w_ih": jax.random.uniform(ks[kb + 0], (4 * hidden_dim, in_dim),
                                       jnp.float32, -stdv, stdv),
            "w_hh": jax.random.uniform(ks[kb + 1], (4 * hidden_dim, hidden_dim),
                                       jnp.float32, -stdv, stdv),
            "b_ih": jax.random.uniform(ks[kb + 2], (4 * hidden_dim,),
                                       jnp.float32, -stdv, stdv),
            "b_hh": jax.random.uniform(ks[kb + 3], (4 * hidden_dim,),
                                       jnp.float32, -stdv, stdv),
        })
    return params


def prepare_params(params):
    """One-time conversion to kernel layout: transposed bf16 weights, folded bias."""
    prep = {
        "embedding": params["embedding"].astype(jnp.float32),
        "fc_w_t": params["fc_w"].T.astype(jnp.bfloat16),       # (H, V)
        "fc_b": params["fc_b"].astype(jnp.float32),
        "layers": [],
    }
    for lp in params["layers"]:
        prep["layers"].append({
            "wih_t": lp["w_ih"].T.astype(jnp.bfloat16),         # (Din, 4H)
            "whh_t": lp["w_hh"].T.astype(jnp.bfloat16),         # (H, 4H)
            "bias": (lp["b_ih"] + lp["b_hh"]).astype(jnp.float32),
        })
    return prep


# -----------------------------------------------------------------------------
# Full RNNModel forward (model_type='LSTM')
# -----------------------------------------------------------------------------
def rnn_model_forward(prep, text, hidden=None):
    """text: int32 (seq_len, batch).  Returns (output, (h_n, c_n))."""
    S, B = text.shape
    n_layers = len(prep["layers"])
    H = prep["layers"][0]["whh_t"].shape[0]

    # Embedding lookup (gather) stays in plain JAX; dropout = identity (eval).
    x = jnp.take(prep["embedding"], text, axis=0)               # (S, B, E) f32

    if hidden is None:
        h0 = jnp.zeros((n_layers, B, H), jnp.float32)
        c0 = jnp.zeros((n_layers, B, H), jnp.float32)
    else:
        h0, c0 = hidden

    layer_in = x
    h_fs, c_fs = [], []
    for l, lp in enumerate(prep["layers"]):
        # Inter-layer dropout is identity in eval mode.
        layer_in, h_n, c_n = lstm_layer(layer_in, lp["wih_t"], lp["whh_t"],
                                        lp["bias"], h0[l], c0[l])
        h_fs.append(h_n)
        c_fs.append(c_n)

    V = prep["fc_w_t"].shape[1]
    logits = matmul_bias(layer_in.reshape(S * B, H), prep["fc_w_t"],
                         prep["fc_b"], out_dtype=jnp.float32)
    output = logits.reshape(S, B, V)
    return output, (jnp.stack(h_fs), jnp.stack(c_fs))


# -----------------------------------------------------------------------------
# Pure-JAX reference with matched numerics (bf16 matmul operands, f32 acc,
# bf16 inter-layer activations) for the correctness check.
# -----------------------------------------------------------------------------
def _ref_forward(params, text, hidden=None):
    bf16 = jnp.bfloat16
    S, B = text.shape
    n_layers = len(params["layers"])
    H = params["layers"][0]["w_hh"].shape[1]
    x = jnp.take(params["embedding"], text, axis=0)

    if hidden is None:
        h0 = jnp.zeros((n_layers, B, H), jnp.float32)
        c0 = jnp.zeros((n_layers, B, H), jnp.float32)
    else:
        h0, c0 = hidden

    layer_in = x
    h_fs, c_fs = [], []
    for l, lp in enumerate(params["layers"]):
        Din = layer_in.shape[-1]
        wih_t = lp["w_ih"].T.astype(bf16)
        whh_t = lp["w_hh"].T.astype(bf16)
        bias = (lp["b_ih"] + lp["b_hh"]).astype(jnp.float32)
        gx = (jnp.dot(layer_in.reshape(S * B, Din).astype(bf16), wih_t,
                      preferred_element_type=jnp.float32) + bias
              ).reshape(S, B, 4 * H)

        def cell(carry, g_t, whh_t=whh_t):
            h, c = carry
            g = g_t + jnp.dot(h.astype(bf16), whh_t,
                              preferred_element_type=jnp.float32)
            i, f, gg, o = jnp.split(g, 4, axis=-1)
            c = jax.nn.sigmoid(f) * c + jax.nn.sigmoid(i) * jnp.tanh(gg)
            h = jax.nn.sigmoid(o) * jnp.tanh(c)
            return (h, c), h

        (h_n, c_n), outs = jax.lax.scan(cell, (h0[l], c0[l]), gx)
        layer_in = outs.astype(bf16)
        h_fs.append(h_n)
        c_fs.append(c_n)

    logits = (jnp.dot(layer_in.reshape(S * B, H),
                      params["fc_w"].T.astype(bf16),
                      preferred_element_type=jnp.float32)
              + params["fc_b"]).reshape(S, B, -1)
    return logits, (jnp.stack(h_fs), jnp.stack(c_fs))


if __name__ == "__main__":
    vocab_size = 256
    embedding_dim = 128
    hidden_dim = 128
    n_layers = 2
    seq_len = 16
    batch = 8

    key = jax.random.PRNGKey(0)
    k_params, k_text = jax.random.split(key)
    params = init_params(k_params, vocab_size, embedding_dim, hidden_dim,
                         n_layers)
    text = jax.random.randint(k_text, (seq_len, batch), 0, vocab_size,
                              dtype=jnp.int32)

    prep = prepare_params(params)
    fwd = jax.jit(rnn_model_forward)
    output, (h_n, c_n) = fwd(prep, text)
    jax.block_until_ready((output, h_n, c_n))

    ref_out, (ref_h, ref_c) = jax.jit(_ref_forward)(params, text)
    jax.block_until_ready((ref_out, ref_h, ref_c))

    assert output.shape == (seq_len, batch, vocab_size)
    assert h_n.shape == (n_layers, batch, hidden_dim)
    assert c_n.shape == (n_layers, batch, hidden_dim)
    assert jnp.allclose(output, ref_out, rtol=5e-3, atol=5e-3)
    assert jnp.allclose(h_n, ref_h, rtol=5e-3, atol=5e-3)
    assert jnp.allclose(c_n, ref_c, rtol=5e-3, atol=5e-3)

    print("KERNEL_OK")
</pallas_src>

<mosaic_0001>
module attributes {stable_mosaic.version = 11 : i64} {
  func.func @_lstm_recurrent_kernel(%arg0: i32, %arg1: i32, %arg2: memref<16x8x512xf32, #tpu.memory_space<vmem>>, %arg3: memref<128x512xbf16, #tpu.memory_space<vmem>>, %arg4: memref<8x128xf32, #tpu.memory_space<vmem>>, %arg5: memref<8x128xf32, #tpu.memory_space<vmem>>, %arg6: memref<16x8x128xbf16, #tpu.memory_space<vmem>>, %arg7: memref<8x128xf32, #tpu.memory_space<vmem>>, %arg8: memref<8x128xf32, #tpu.memory_space<vmem>>, %arg9: memref<8x128xf32, #tpu.memory_space<vmem>>, %arg10: memref<8x128xf32, #tpu.memory_space<vmem>>) attributes {dimension_semantics = [#tpu.dimension_semantics<parallel>, #tpu.dimension_semantics<arbitrary>], iteration_bounds = array<i64: 1, 1>, scalar_prefetch = 0 : i64, scratch_operands = 2 : i64, tpu.core_type = #tpu.core_type<tc>, window_params = [{transform_indices = @transform_0, window_bounds = array<i64: 16, 8, 512>}, {pipeline_mode = #tpu.pipeline_mode<synchronous>, transform_indices = @transform_1, window_bounds = array<i64: 128, 512>}, {transform_indices = @transform_2, window_bounds = array<i64: 8, 128>}, {transform_indices = @transform_3, window_bounds = array<i64: 8, 128>}, {transform_indices = @transform_4, window_bounds = array<i64: 16, 8, 128>}, {transform_indices = @transform_5, window_bounds = array<i64: 8, 128>}, {transform_indices = @transform_6, window_bounds = array<i64: 8, 128>}]} {
    %c0_i32 = arith.constant 0 : i32
    %0 = arith.cmpi eq, %arg1, %c0_i32 : i32
    %1 = arith.extui %0 : i1 to i32
    %c0_i32_0 = arith.constant 0 : i32
    %2 = arith.cmpi ne, %1, %c0_i32_0 : i32
    scf.if %2 {
      %c0_140 = arith.constant 0 : index
      %c0_141 = arith.constant 0 : index
      %587 = vector.load %arg4[%c0_140, %c0_141] : memref<8x128xf32, #tpu.memory_space<vmem>>, vector<8x128xf32>
      %c0_142 = arith.constant 0 : index
      %c0_143 = arith.constant 0 : index
      %588 = vector.load %arg9[%c0_142, %c0_143] : memref<8x128xf32, #tpu.memory_space<vmem>>, vector<8x128xf32>
      tpu.vector_store %arg9[%c0_142, %c0_143], %587 {strides = array<i32>} : memref<8x128xf32, #tpu.memory_space<vmem>>, vector<8x128xf32>,
      %c0_144 = arith.constant 0 : index
      %c0_145 = arith.constant 0 : index
      %589 = vector.load %arg5[%c0_144, %c0_145] : memref<8x128xf32, #tpu.memory_space<vmem>>, vector<8x128xf32>
      %c0_146 = arith.constant 0 : index
      %c0_147 = arith.constant 0 : index
      %590 = vector.load %arg10[%c0_146, %c0_147] : memref<8x128xf32, #tpu.memory_space<vmem>>, vector<8x128xf32>
      tpu.vector_store %arg10[%c0_146, %c0_147], %589 {strides = array<i32>} : memref<8x128xf32, #tpu.memory_space<vmem>>, vector<8x128xf32>,
    } else {
    }
    %c0 = arith.constant 0 : index
    %c0_1 = arith.constant 0 : index
    %3 = vector.load %arg3[%c0, %c0_1] : memref<128x512xbf16, #tpu.memory_space<vmem>>, vector<128x512xbf16>
    %c0_2 = arith.constant 0 : index
    %c0_3 = arith.constant 0 : index
    %4 = vector.load %arg9[%c0_2, %c0_3] : memref<8x128xf32, #tpu.memory_space<vmem>>, vector<8x128xf32>
    %c0_4 = arith.constant 0 : index
    %c0_5 = arith.constant 0 : index
    %5 = vector.load %arg10[%c0_4, %c0_5] : memref<8x128xf32, #tpu.memory_space<vmem>>, vector<8x128xf32>
    %c0_i32_6 = arith.constant 0 : i32
    %6 = arith.index_cast %c0_i32_6 : i32 to index
    %c0_7 = arith.constant 0 : index
    %c0_8 = arith.constant 0 : index
    %7 = vector.load %arg2[%6, %c0_7, %c0_8] : memref<16x8x512xf32, #tpu.memory_space<vmem>>, vector<1x8x512xf32>
    %8 = vector.shape_cast %7 : vector<1x8x512xf32> to vector<8x512xf32>
    %9 = arith.truncf %4 : vector<8x128xf32> to vector<8x128xbf16>
    %cst = arith.constant dense<0.000000e+00> : vector<8x512xf32>
    %10 = tpu.matmul %9, %3, %cst {dimension_numbers = #tpu.dot_dimension_numbers<[1], [0], [0], [1], [0, 0, 1, 1], [], []>} : vector<8x128xbf16>, vector<128x512xbf16>, vector<8x512xf32> -> vector<8x512xf32>
    %11 = arith.addf %8, %10 : vector<8x512xf32>
    %12 = vector.extract_strided_slice %11 {offsets = [0, 0], sizes = [8, 128], strides = [1, 1]} : vector<8x512xf32> to vector<8x128xf32>
    %13 = arith.negf %12 : vector<8x128xf32>
    %14 = math.exp %13 : vector<8x128xf32>
    %cst_9 = arith.constant 1.000000e+00 : f32
    %15 = vector.broadcast %cst_9 : f32 to vector<8x128xf32>
    %16 = arith.addf %15, %14 : vector<8x128xf32>
    %17 = arith.divf %15, %16 : vector<8x128xf32>
    %18 = vector.extract_strided_slice %11 {offsets = [0, 128], sizes = [8, 128], strides = [1, 1]} : vector<8x512xf32> to vector<8x128xf32>
    %19 = arith.negf %18 : vector<8x128xf32>
    %20 = math.exp %19 : vector<8x128xf32>
    %cst_10 = arith.constant 1.000000e+00 : f32
    %21 = vector.broadcast %cst_10 : f32 to vector<8x128xf32>
    %22 = arith.addf %21, %20 : vector<8x128xf32>
    %23 = arith.divf %21, %22 : vector<8x128xf32>
    %24 = vector.extract_strided_slice %11 {offsets = [0, 256], sizes = [8, 128], strides = [1, 1]} : vector<8x512xf32> to vector<8x128xf32>
    %25 = math.tanh %24 : vector<8x128xf32>
    %26 = vector.extract_strided_slice %11 {offsets = [0, 384], sizes = [8, 128], strides = [1, 1]} : vector<8x512xf32> to vector<8x128xf32>
    %27 = arith.negf %26 : vector<8x128xf32>
    %28 = math.exp %27 : vector<8x128xf32>
    %cst_11 = arith.constant 1.000000e+00 : f32
    %29 = vector.broadcast %cst_11 : f32 to vector<8x128xf32>
    %30 = arith.addf %29, %28 : vector<8x128xf32>
    %31 = arith.divf %29, %30 : vector<8x128xf32>
    %32 = arith.mulf %23, %5 : vector<8x128xf32>
    %33 = arith.mulf %17, %25 : vector<8x128xf32>
    %34 = arith.addf %32, %33 : vector<8x128xf32>
    %35 = math.tanh %34 : vector<8x128xf32>
    %36 = arith.mulf %31, %35 : vector<8x128xf32>
    %37 = arith.truncf %36 : vector<8x128xf32> to vector<8x128xbf16>
    %38 = arith.index_cast %c0_i32_6 : i32 to index
    %c0_12 = arith.constant 0 : index
    %c0_13 = arith.constant 0 : index
    %39 = vector.load %arg6[%38, %c0_12, %c0_13] : memref<16x8x128xbf16, #tpu.memory_space<vmem>>, vector<1x8x128xbf16>
    %40 = vector.shape_cast %39 : vector<1x8x128xbf16> to vector<8x128xbf16>
    %41 = vector.shape_cast %37 : vector<8x128xbf16> to vector<1x8x128xbf16>
    tpu.vector_store %arg6[%38, %c0_12, %c0_13], %41 {strides = array<i32>} : memref<16x8x128xbf16, #tpu.memory_space<vmem>>, vector<1x8x128xbf16>,
    %c1_i32 = arith.constant 1 : i32
    %42 = arith.index_cast %c1_i32 : i32 to index
    %c0_14 = arith.constant 0 : index
    %c0_15 = arith.constant 0 : index
    %43 = vector.load %arg2[%42, %c0_14, %c0_15] : memref<16x8x512xf32, #tpu.memory_space<vmem>>, vector<1x8x512xf32>
    %44 = vector.shape_cast %43 : vector<1x8x512xf32> to vector<8x512xf32>
    %45 = arith.truncf %36 : vector<8x128xf32> to vector<8x128xbf16>
    %cst_16 = arith.constant dense<0.000000e+00> : vector<8x512xf32>
    %46 = tpu.matmul %45, %3, %cst_16 {dimension_numbers = #tpu.dot_dimension_numbers<[1], [0], [0], [1], [0, 0, 1, 1], [], []>} : vector<8x128xbf16>, vector<128x512xbf16>, vector<8x512xf32> -> vector<8x512xf32>
    %47 = arith.addf %44, %46 : vector<8x512xf32>
    %48 = vector.extract_strided_slice %47 {offsets = [0, 0], sizes = [8, 128], strides = [1, 1]} : vector<8x512xf32> to vector<8x128xf32>
    %49 = arith.negf %48 : vector<8x128xf32>
    %50 = math.exp %49 : vector<8x128xf32>
    %cst_17 = arith.constant 1.000000e+00 : f32
    %51 = vector.broadcast %cst_17 : f32 to vector<8x128xf32>
    %52 = arith.addf %51, %50 : vector<8x128xf32>
    %53 = arith.divf %51, %52 : vector<8x128xf32>
    %54 = vector.extract_strided_slice %47 {offsets = [0, 128], sizes = [8, 128], strides = [1, 1]} : vector<8x512xf32> to vector<8x128xf32>
    %55 = arith.negf %54 : vector<8x128xf32>
    %56 = math.exp %55 : vector<8x128xf32>
    %cst_18 = arith.constant 1.000000e+00 : f32
    %57 = vector.broadcast %cst_18 : f32 to vector<8x128xf32>
    %58 = arith.addf %57, %56 : vector<8x128xf32>
    %59 = arith.divf %57, %58 : vector<8x128xf32>
    %60 = vector.extract_strided_slice %47 {offsets = [0, 256], sizes = [8, 128], strides = [1, 1]} : vector<8x512xf32> to vector<8x128xf32>
    %61 = math.tanh %60 : vector<8x128xf32>
    %62 = vector.extract_strided_slice %47 {offsets = [0, 384], sizes = [8, 128], strides = [1, 1]} : vector<8x512xf32> to vector<8x128xf32>
    %63 = arith.negf %62 : vector<8x128xf32>
    %64 = math.exp %63 : vector<8x128xf32>
    %cst_19 = arith.constant 1.000000e+00 : f32
    %65 = vector.broadcast %cst_19 : f32 to vector<8x128xf32>
    %66 = arith.addf %65, %64 : vector<8x128xf32>
    %67 = arith.divf %65, %66 : vector<8x128xf32>
    %68 = arith.mulf %59, %34 : vector<8x128xf32>
    %69 = arith.mulf %53, %61 : vector<8x128xf32>
    %70 = arith.addf %68, %69 : vector<8x128xf32>
    %71 = math.tanh %70 : vector<8x128xf32>
    %72 = arith.mulf %67, %71 : vector<8x128xf32>
    %73 = arith.truncf %72 : vector<8x128xf32> to vector<8x128xbf16>
    %74 = arith.index_cast %c1_i32 : i32 to index
    %c0_20 = arith.constant 0 : index
    %c0_21 = arith.constant 0 : index
    %75 = vector.load %arg6[%74, %c0_20, %c0_21] : memref<16x8x128xbf16, #tpu.memory_space<vmem>>, vector<1x8x128xbf16>
    %76 = vector.shape_cast %75 : vector<1x8x128xbf16> to vector<8x128xbf16>
    %77 = vector.shape_cast %73 : vector<8x128xbf16> to vector<1x8x128xbf16>
    tpu.vector_store %arg6[%74, %c0_20, %c0_21], %77 {strides = array<i32>} : memref<16x8x128xbf16, #tpu.memory_space<vmem>>, vector<1x8x128xbf16>,
    %c2_i32 = arith.constant 2 : i32
    %78 = arith.index_cast %c2_i32 : i32 to index
    %c0_22 = arith.constant 0 : index
    %c0_23 = arith.constant 0 : index
    %79 = vector.load %arg2[%78, %c0_22, %c0_23] : memref<16x8x512xf32, #tpu.memory_space<vmem>>, vector<1x8x512xf32>
    %80 = vector.shape_cast %79 : vector<1x8x512xf32> to vector<8x512xf32>
    %81 = arith.truncf %72 : vector<8x128xf32> to vector<8x128xbf16>
    %cst_24 = arith.constant dense<0.000000e+00> : vector<8x512xf32>
    %82 = tpu.matmul %81, %3, %cst_24 {dimension_numbers = #tpu.dot_dimension_numbers<[1], [0], [0], [1], [0, 0, 1, 1], [], []>} : vector<8x128xbf16>, vector<128x512xbf16>, vector<8x512xf32> -> vector<8x512xf32>
    %83 = arith.addf %80, %82 : vector<8x512xf32>
    %84 = vector.extract_strided_slice %83 {offsets = [0, 0], sizes = [8, 128], strides = [1, 1]} : vector<8x512xf32> to vector<8x128xf32>
    %85 = arith.negf %84 : vector<8x128xf32>
    %86 = math.exp %85 : vector<8x128xf32>
    %cst_25 = arith.constant 1.000000e+00 : f32
    %87 = vector.broadcast %cst_25 : f32 to vector<8x128xf32>
    %88 = arith.addf %87, %86 : vector<8x128xf32>
    %89 = arith.divf %87, %88 : vector<8x128xf32>
    %90 = vector.extract_strided_slice %83 {offsets = [0, 128], sizes = [8, 128], strides = [1, 1]} : vector<8x512xf32> to vector<8x128xf32>
    %91 = arith.negf %90 : vector<8x128xf32>
    %92 = math.exp %91 : vector<8x128xf32>
    %cst_26 = arith.constant 1.000000e+00 : f32
    %93 = vector.broadcast %cst_26 : f32 to vector<8x128xf32>
    %94 = arith.addf %93, %92 : vector<8x128xf32>
    %95 = arith.divf %93, %94 : vector<8x128xf32>
    %96 = vector.extract_strided_slice %83 {offsets = [0, 256], sizes = [8, 128], strides = [1, 1]} : vector<8x512xf32> to vector<8x128xf32>
    %97 = math.tanh %96 : vector<8x128xf32>
    %98 = vector.extract_strided_slice %83 {offsets = [0, 384], sizes = [8, 128], strides = [1, 1]} : vector<8x512xf32> to vector<8x128xf32>
    %99 = arith.negf %98 : vector<8x128xf32>
    %100 = math.exp %99 : vector<8x128xf32>
    %cst_27 = arith.constant 1.000000e+00 : f32
    %101 = vector.broadcast %cst_27 : f32 to vector<8x128xf32>
    %102 = arith.addf %101, %100 : vector<8x128xf32>
    %103 = arith.divf %101, %102 : vector<8x128xf32>
    %104 = arith.mulf %95, %70 : vector<8x128xf32>
    %105 = arith.mulf %89, %97 : vector<8x128xf32>
    %106 = arith.addf %104, %105 : vector<8x128xf32>
    %107 = math.tanh %106 : vector<8x128xf32>
    %108 = arith.mulf %103, %107 : vector<8x128xf32>
    %109 = arith.truncf %108 : vector<8x128xf32> to vector<8x128xbf16>
    %110 = arith.index_cast %c2_i32 : i32 to index
    %c0_28 = arith.constant 0 : index
    %c0_29 = arith.constant 0 : index
    %111 = vector.load %arg6[%110, %c0_28, %c0_29] : memref<16x8x128xbf16, #tpu.memory_space<vmem>>, vector<1x8x128xbf16>
    %112 = vector.shape_cast %111 : vector<1x8x128xbf16> to vector<8x128xbf16>
    %113 = vector.shape_cast %109 : vector<8x128xbf16> to vector<1x8x128xbf16>
    tpu.vector_store %arg6[%110, %c0_28, %c0_29], %113 {strides = array<i32>} : memref<16x8x128xbf16, #tpu.memory_space<vmem>>, vector<1x8x128xbf16>,
    %c3_i32 = arith.constant 3 : i32
    %114 = arith.index_cast %c3_i32 : i32 to index
    %c0_30 = arith.constant 0 : index
    %c0_31 = arith.constant 0 : index
    %115 = vector.load %arg2[%114, %c0_30, %c0_31] : memref<16x8x512xf32, #tpu.memory_space<vmem>>, vector<1x8x512xf32>
    %116 = vector.shape_cast %115 : vector<1x8x512xf32> to vector<8x512xf32>
    %117 = arith.truncf %108 : vector<8x128xf32> to vector<8x128xbf16>
    %cst_32 = arith.constant dense<0.000000e+00> : vector<8x512xf32>
    %118 = tpu.matmul %117, %3, %cst_32 {dimension_numbers = #tpu.dot_dimension_numbers<[1], [0], [0], [1], [0, 0, 1, 1], [], []>} : vector<8x128xbf16>, vector<128x512xbf16>, vector<8x512xf32> -> vector<8x512xf32>
    %119 = arith.addf %116, %118 : vector<8x512xf32>
    %120 = vector.extract_strided_slice %119 {offsets = [0, 0], sizes = [8, 128], strides = [1, 1]} : vector<8x512xf32> to vector<8x128xf32>
    %121 = arith.negf %120 : vector<8x128xf32>
    %122 = math.exp %121 : vector<8x128xf32>
    %cst_33 = arith.constant 1.000000e+00 : f32
    %123 = vector.broadcast %cst_33 : f32 to vector<8x128xf32>
    %124 = arith.addf %123, %122 : vector<8x128xf32>
    %125 = arith.divf %123, %124 : vector<8x128xf32>
    %126 = vector.extract_strided_slice %119 {offsets = [0, 128], sizes = [8, 128], strides = [1, 1]} : vector<8x512xf32> to vector<8x128xf32>
    %127 = arith.negf %126 : vector<8x128xf32>
    %128 = math.exp %127 : vector<8x128xf32>
    %cst_34 = arith.constant 1.000000e+00 : f32
    %129 = vector.broadcast %cst_34 : f32 to vector<8x128xf32>
    %130 = arith.addf %129, %128 : vector<8x128xf32>
    %131 = arith.divf %129, %130 : vector<8x128xf32>
    %132 = vector.extract_strided_slice %119 {offsets = [0, 256], sizes = [8, 128], strides = [1, 1]} : vector<8x512xf32> to vector<8x128xf32>
    %133 = math.tanh %132 : vector<8x128xf32>
    %134 = vector.extract_strided_slice %119 {offsets = [0, 384], sizes = [8, 128], strides = [1, 1]} : vector<8x512xf32> to vector<8x128xf32>
    %135 = arith.negf %134 : vector<8x128xf32>
    %136 = math.exp %135 : vector<8x128xf32>
    %cst_35 = arith.constant 1.000000e+00 : f32
    %137 = vector.broadcast %cst_35 : f32 to vector<8x128xf32>
    %138 = arith.addf %137, %136 : vector<8x128xf32>
    %139 = arith.divf %137, %138 : vector<8x128xf32>
    %140 = arith.mulf %131, %106 : vector<8x128xf32>
    %141 = arith.mulf %125, %133 : vector<8x128xf32>
    %142 = arith.addf %140, %141 : vector<8x128xf32>
    %143 = math.tanh %142 : vector<8x128xf32>
    %144 = arith.mulf %139, %143 : vector<8x128xf32>
    %145 = arith.truncf %144 : vector<8x128xf32> to vector<8x128xbf16>
    %146 = arith.index_cast %c3_i32 : i32 to index
    %c0_36 = arith.constant 0 : index
    %c0_37 = arith.constant 0 : index
    %147 = vector.load %arg6[%146, %c0_36, %c0_37] : memref<16x8x128xbf16, #tpu.memory_space<vmem>>, vector<1x8x128xbf16>
    %148 = vector.shape_cast %147 : vector<1x8x128xbf16> to vector<8x128xbf16>
    %149 = vector.shape_cast %145 : vector<8x128xbf16> to vector<1x8x128xbf16>
    tpu.vector_store %arg6[%146, %c0_36, %c0_37], %149 {strides = array<i32>} : memref<16x8x128xbf16, #tpu.memory_space<vmem>>, vector<1x8x128xbf16>,
    %c4_i32 = arith.constant 4 : i32
    %150 = arith.index_cast %c4_i32 : i32 to index
    %c0_38 = arith.constant 0 : index
    %c0_39 = arith.constant 0 : index
    %151 = vector.load %arg2[%150, %c0_38, %c0_39] : memref<16x8x512xf32, #tpu.memory_space<vmem>>, vector<1x8x512xf32>
    %152 = vector.shape_cast %151 : vector<1x8x512xf32> to vector<8x512xf32>
    %153 = arith.truncf %144 : vector<8x128xf32> to vector<8x128xbf16>
    %cst_40 = arith.constant dense<0.000000e+00> : vector<8x512xf32>
    %154 = tpu.matmul %153, %3, %cst_40 {dimension_numbers = #tpu.dot_dimension_numbers<[1], [0], [0], [1], [0, 0, 1, 1], [], []>} : vector<8x128xbf16>, vector<128x512xbf16>, vector<8x512xf32> -> vector<8x512xf32>
    %155 = arith.addf %152, %154 : vector<8x512xf32>
    %156 = vector.extract_strided_slice %155 {offsets = [0, 0], sizes = [8, 128], strides = [1, 1]} : vector<8x512xf32> to vector<8x128xf32>
    %157 = arith.negf %156 : vector<8x128xf32>
    %158 = math.exp %157 : vector<8x128xf32>
    %cst_41 = arith.constant 1.000000e+00 : f32
    %159 = vector.broadcast %cst_41 : f32 to vector<8x128xf32>
    %160 = arith.addf %159, %158 : vector<8x128xf32>
    %161 = arith.divf %159, %160 : vector<8x128xf32>
    %162 = vector.extract_strided_slice %155 {offsets = [0, 128], sizes = [8, 128], strides = [1, 1]} : vector<8x512xf32> to vector<8x128xf32>
    %163 = arith.negf %162 : vector<8x128xf32>
    %164 = math.exp %163 : vector<8x128xf32>
    %cst_42 = arith.constant 1.000000e+00 : f32
    %165 = vector.broadcast %cst_42 : f32 to vector<8x128xf32>
    %166 = arith.addf %165, %164 : vector<8x128xf32>
    %167 = arith.divf %165, %166 : vector<8x128xf32>
    %168 = vector.extract_strided_slice %155 {offsets = [0, 256], sizes = [8, 128], strides = [1, 1]} : vector<8x512xf32> to vector<8x128xf32>
    %169 = math.tanh %168 : vector<8x128xf32>
    %170 = vector.extract_strided_slice %155 {offsets = [0, 384], sizes = [8, 128], strides = [1, 1]} : vector<8x512xf32> to vector<8x128xf32>
    %171 = arith.negf %170 : vector<8x128xf32>
    %172 = math.exp %171 : vector<8x128xf32>
    %cst_43 = arith.constant 1.000000e+00 : f32
    %173 = vector.broadcast %cst_43 : f32 to vector<8x128xf32>
    %174 = arith.addf %173, %172 : vector<8x128xf32>
    %175 = arith.divf %173, %174 : vector<8x128xf32>
    %176 = arith.mulf %167, %142 : vector<8x128xf32>
    %177 = arith.mulf %161, %169 : vector<8x128xf32>
    %178 = arith.addf %176, %177 : vector<8x128xf32>
    %179 = math.tanh %178 : vector<8x128xf32>
    %180 = arith.mulf %175, %179 : vector<8x128xf32>
    %181 = arith.truncf %180 : vector<8x128xf32> to vector<8x128xbf16>
    %182 = arith.index_cast %c4_i32 : i32 to index
    %c0_44 = arith.constant 0 : index
    %c0_45 = arith.constant 0 : index
    %183 = vector.load %arg6[%182, %c0_44, %c0_45] : memref<16x8x128xbf16, #tpu.memory_space<vmem>>, vector<1x8x128xbf16>
    %184 = vector.shape_cast %183 : vector<1x8x128xbf16> to vector<8x128xbf16>
    %185 = vector.shape_cast %181 : vector<8x128xbf16> to vector<1x8x128xbf16>
    tpu.vector_store %arg6[%182, %c0_44, %c0_45], %185 {strides = array<i32>} : memref<16x8x128xbf16, #tpu.memory_space<vmem>>, vector<1x8x128xbf16>,
    %c5_i32 = arith.constant 5 : i32
    %186 = arith.index_cast %c5_i32 : i32 to index
    %c0_46 = arith.constant 0 : index
    %c0_47 = arith.constant 0 : index
    %187 = vector.load %arg2[%186, %c0_46, %c0_47] : memref<16x8x512xf32, #tpu.memory_space<vmem>>, vector<1x8x512xf32>
    %188 = vector.shape_cast %187 : vector<1x8x512xf32> to vector<8x512xf32>
    %189 = arith.truncf %180 : vector<8x128xf32> to vector<8x128xbf16>
    %cst_48 = arith.constant dense<0.000000e+00> : vector<8x512xf32>
    %190 = tpu.matmul %189, %3, %cst_48 {dimension_numbers = #tpu.dot_dimension_numbers<[1], [0], [0], [1], [0, 0, 1, 1], [], []>} : vector<8x128xbf16>, vector<128x512xbf16>, vector<8x512xf32> -> vector<8x512xf32>
    %191 = arith.addf %188, %190 : vector<8x512xf32>
    %192 = vector.extract_strided_slice %191 {offsets = [0, 0], sizes = [8, 128], strides = [1, 1]} : vector<8x512xf32> to vector<8x128xf32>
    %193 = arith.negf %192 : vector<8x128xf32>
    %194 = math.exp %193 : vector<8x128xf32>
    %cst_49 = arith.constant 1.000000e+00 : f32
    %195 = vector.broadcast %cst_49 : f32 to vector<8x128xf32>
    %196 = arith.addf %195, %194 : vector<8x128xf32>
    %197 = arith.divf %195, %196 : vector<8x128xf32>
    %198 = vector.extract_strided_slice %191 {offsets = [0, 128], sizes = [8, 128], strides = [1, 1]} : vector<8x512xf32> to vector<8x128xf32>
    %199 = arith.negf %198 : vector<8x128xf32>
    %200 = math.exp %199 : vector<8x128xf32>
    %cst_50 = arith.constant 1.000000e+00 : f32
    %201 = vector.broadcast %cst_50 : f32 to vector<8x128xf32>
    %202 = arith.addf %201, %200 : vector<8x128xf32>
    %203 = arith.divf %201, %202 : vector<8x128xf32>
    %204 = vector.extract_strided_slice %191 {offsets = [0, 256], sizes = [8, 128], strides = [1, 1]} : vector<8x512xf32> to vector<8x128xf32>
    %205 = math.tanh %204 : vector<8x128xf32>
    %206 = vector.extract_strided_slice %191 {offsets = [0, 384], sizes = [8, 128], strides = [1, 1]} : vector<8x512xf32> to vector<8x128xf32>
    %207 = arith.negf %206 : vector<8x128xf32>
    %208 = math.exp %207 : vector<8x128xf32>
    %cst_51 = arith.constant 1.000000e+00 : f32
    %209 = vector.broadcast %cst_51 : f32 to vector<8x128xf32>
    %210 = arith.addf %209, %208 : vector<8x128xf32>
    %211 = arith.divf %209, %210 : vector<8x128xf32>
    %212 = arith.mulf %203, %178 : vector<8x128xf32>
    %213 = arith.mulf %197, %205 : vector<8x128xf32>
    %214 = arith.addf %212, %213 : vector<8x128xf32>
    %215 = math.tanh %214 : vector<8x128xf32>
    %216 = arith.mulf %211, %215 : vector<8x128xf32>
    %217 = arith.truncf %216 : vector<8x128xf32> to vector<8x128xbf16>
    %218 = arith.index_cast %c5_i32 : i32 to index
    %c0_52 = arith.constant 0 : index
    %c0_53 = arith.constant 0 : index
    %219 = vector.load %arg6[%218, %c0_52, %c0_53] : memref<16x8x128xbf16, #tpu.memory_space<vmem>>, vector<1x8x128xbf16>
    %220 = vector.shape_cast %219 : vector<1x8x128xbf16> to vector<8x128xbf16>
    %221 = vector.shape_cast %217 : vector<8x128xbf16> to vector<1x8x128xbf16>
    tpu.vector_store %arg6[%218, %c0_52, %c0_53], %221 {strides = array<i32>} : memref<16x8x128xbf16, #tpu.memory_space<vmem>>, vector<1x8x128xbf16>,
    %c6_i32 = arith.constant 6 : i32
    %222 = arith.index_cast %c6_i32 : i32 to index
    %c0_54 = arith.constant 0 : index
    %c0_55 = arith.constant 0 : index
    %223 = vector.load %arg2[%222, %c0_54, %c0_55] : memref<16x8x512xf32, #tpu.memory_space<vmem>>, vector<1x8x512xf32>
    %224 = vector.shape_cast %223 : vector<1x8x512xf32> to vector<8x512xf32>
    %225 = arith.truncf %216 : vector<8x128xf32> to vector<8x128xbf16>
    %cst_56 = arith.constant dense<0.000000e+00> : vector<8x512xf32>
    %226 = tpu.matmul %225, %3, %cst_56 {dimension_numbers = #tpu.dot_dimension_numbers<[1], [0], [0], [1], [0, 0, 1, 1], [], []>} : vector<8x128xbf16>, vector<128x512xbf16>, vector<8x512xf32> -> vector<8x512xf32>
    %227 = arith.addf %224, %226 : vector<8x512xf32>
    %228 = vector.extract_strided_slice %227 {offsets = [0, 0], sizes = [8, 128], strides = [1, 1]} : vector<8x512xf32> to vector<8x128xf32>
    %229 = arith.negf %228 : vector<8x128xf32>
    %230 = math.exp %229 : vector<8x128xf32>
    %cst_57 = arith.constant 1.000000e+00 : f32
    %231 = vector.broadcast %cst_57 : f32 to vector<8x128xf32>
    %232 = arith.addf %231, %230 : vector<8x128xf32>
    %233 = arith.divf %231, %232 : vector<8x128xf32>
    %234 = vector.extract_strided_slice %227 {offsets = [0, 128], sizes = [8, 128], strides = [1, 1]} : vector<8x512xf32> to vector<8x128xf32>
    %235 = arith.negf %234 : vector<8x128xf32>
    %236 = math.exp %235 : vector<8x128xf32>
    %cst_58 = arith.constant 1.000000e+00 : f32
    %237 = vector.broadcast %cst_58 : f32 to vector<8x128xf32>
    %238 = arith.addf %237, %236 : vector<8x128xf32>
    %239 = arith.divf %237, %238 : vector<8x128xf32>
    %240 = vector.extract_strided_slice %227 {offsets = [0, 256], sizes = [8, 128], strides = [1, 1]} : vector<8x512xf32> to vector<8x128xf32>
    %241 = math.tanh %240 : vector<8x128xf32>
    %242 = vector.extract_strided_slice %227 {offsets = [0, 384], sizes = [8, 128], strides = [1, 1]} : vector<8x512xf32> to vector<8x128xf32>
    %243 = arith.negf %242 : vector<8x128xf32>
    %244 = math.exp %243 : vector<8x128xf32>
    %cst_59 = arith.constant 1.000000e+00 : f32
    %245 = vector.broadcast %cst_59 : f32 to vector<8x128xf32>
    %246 = arith.addf %245, %244 : vector<8x128xf32>
    %247 = arith.divf %245, %246 : vector<8x128xf32>
    %248 = arith.mulf %239, %214 : vector<8x128xf32>
    %249 = arith.mulf %233, %241 : vector<8x128xf32>
    %250 = arith.addf %248, %249 : vector<8x128xf32>
    %251 = math.tanh %250 : vector<8x128xf32>
    %252 = arith.mulf %247, %251 : vector<8x128xf32>
    %253 = arith.truncf %252 : vector<8x128xf32> to vector<8x128xbf16>
    %254 = arith.index_cast %c6_i32 : i32 to index
    %c0_60 = arith.constant 0 : index
    %c0_61 = arith.constant 0 : index
    %255 = vector.load %arg6[%254, %c0_60, %c0_61] : memref<16x8x128xbf16, #tpu.memory_space<vmem>>, vector<1x8x128xbf16>
    %256 = vector.shape_cast %255 : vector<1x8x128xbf16> to vector<8x128xbf16>
    %257 = vector.shape_cast %253 : vector<8x128xbf16> to vector<1x8x128xbf16>
    tpu.vector_store %arg6[%254, %c0_60, %c0_61], %257 {strides = array<i32>} : memref<16x8x128xbf16, #tpu.memory_space<vmem>>, vector<1x8x128xbf16>,
    %c7_i32 = arith.constant 7 : i32
    %258 = arith.index_cast %c7_i32 : i32 to index
    %c0_62 = arith.constant 0 : index
    %c0_63 = arith.constant 0 : index
    %259 = vector.load %arg2[%258, %c0_62, %c0_63] : memref<16x8x512xf32, #tpu.memory_space<vmem>>, vector<1x8x512xf32>
    %260 = vector.shape_cast %259 : vector<1x8x512xf32> to vector<8x512xf32>
    %261 = arith.truncf %252 : vector<8x128xf32> to vector<8x128xbf16>
    %cst_64 = arith.constant dense<0.000000e+00> : vector<8x512xf32>
    %262 = tpu.matmul %261, %3, %cst_64 {dimension_numbers = #tpu.dot_dimension_numbers<[1], [0], [0], [1], [0, 0, 1, 1], [], []>} : vector<8x128xbf16>, vector<128x512xbf16>, vector<8x512xf32> -> vector<8x512xf32>
    %263 = arith.addf %260, %262 : vector<8x512xf32>
    %264 = vector.extract_strided_slice %263 {offsets = [0, 0], sizes = [8, 128], strides = [1, 1]} : vector<8x512xf32> to vector<8x128xf32>
    %265 = arith.negf %264 : vector<8x128xf32>
    %266 = math.exp %265 : vector<8x128xf32>
    %cst_65 = arith.constant 1.000000e+00 : f32
    %267 = vector.broadcast %cst_65 : f32 to vector<8x128xf32>
    %268 = arith.addf %267, %266 : vector<8x128xf32>
    %269 = arith.divf %267, %268 : vector<8x128xf32>
    %270 = vector.extract_strided_slice %263 {offsets = [0, 128], sizes = [8, 128], strides = [1, 1]} : vector<8x512xf32> to vector<8x128xf32>
    %271 = arith.negf %270 : vector<8x128xf32>
    %272 = math.exp %271 : vector<8x128xf32>
    %cst_66 = arith.constant 1.000000e+00 : f32
    %273 = vector.broadcast %cst_66 : f32 to vector<8x128xf32>
    %274 = arith.addf %273, %272 : vector<8x128xf32>
    %275 = arith.divf %273, %274 : vector<8x128xf32>
    %276 = vector.extract_strided_slice %263 {offsets = [0, 256], sizes = [8, 128], strides = [1, 1]} : vector<8x512xf32> to vector<8x128xf32>
    %277 = math.tanh %276 : vector<8x128xf32>
    %278 = vector.extract_strided_slice %263 {offsets = [0, 384], sizes = [8, 128], strides = [1, 1]} : vector<8x512xf32> to vector<8x128xf32>
    %279 = arith.negf %278 : vector<8x128xf32>
    %280 = math.exp %279 : vector<8x128xf32>
    %cst_67 = arith.constant 1.000000e+00 : f32
    %281 = vector.broadcast %cst_67 : f32 to vector<8x128xf32>
    %282 = arith.addf %281, %280 : vector<8x128xf32>
    %283 = arith.divf %281, %282 : vector<8x128xf32>
    %284 = arith.mulf %275, %250 : vector<8x128xf32>
    %285 = arith.mulf %269, %277 : vector<8x128xf32>
    %286 = arith.addf %284, %285 : vector<8x128xf32>
    %287 = math.tanh %286 : vector<8x128xf32>
    %288 = arith.mulf %283, %287 : vector<8x128xf32>
    %289 = arith.truncf %288 : vector<8x128xf32> to vector<8x128xbf16>
    %290 = arith.index_cast %c7_i32 : i32 to index
    %c0_68 = arith.constant 0 : index
    %c0_69 = arith.constant 0 : index
    %291 = vector.load %arg6[%290, %c0_68, %c0_69] : memref<16x8x128xbf16, #tpu.memory_space<vmem>>, vector<1x8x128xbf16>
    %292 = vector.shape_cast %291 : vector<1x8x128xbf16> to vector<8x128xbf16>
    %293 = vector.shape_cast %289 : vector<8x128xbf16> to vector<1x8x128xbf16>
    tpu.vector_store %arg6[%290, %c0_68, %c0_69], %293 {strides = array<i32>} : memref<16x8x128xbf16, #tpu.memory_space<vmem>>, vector<1x8x128xbf16>,
    %c8_i32 = arith.constant 8 : i32
    %294 = arith.index_cast %c8_i32 : i32 to index
    %c0_70 = arith.constant 0 : index
    %c0_71 = arith.constant 0 : index
    %295 = vector.load %arg2[%294, %c0_70, %c0_71] : memref<16x8x512xf32, #tpu.memory_space<vmem>>, vector<1x8x512xf32>
    %296 = vector.shape_cast %295 : vector<1x8x512xf32> to vector<8x512xf32>
    %297 = arith.truncf %288 : vector<8x128xf32> to vector<8x128xbf16>
    %cst_72 = arith.constant dense<0.000000e+00> : vector<8x512xf32>
    %298 = tpu.matmul %297, %3, %cst_72 {dimension_numbers = #tpu.dot_dimension_numbers<[1], [0], [0], [1], [0, 0, 1, 1], [], []>} : vector<8x128xbf16>, vector<128x512xbf16>, vector<8x512xf32> -> vector<8x512xf32>
    %299 = arith.addf %296, %298 : vector<8x512xf32>
    %300 = vector.extract_strided_slice %299 {offsets = [0, 0], sizes = [8, 128], strides = [1, 1]} : vector<8x512xf32> to vector<8x128xf32>
    %301 = arith.negf %300 : vector<8x128xf32>
    %302 = math.exp %301 : vector<8x128xf32>
    %cst_73 = arith.constant 1.000000e+00 : f32
    %303 = vector.broadcast %cst_73 : f32 to vector<8x128xf32>
    %304 = arith.addf %303, %302 : vector<8x128xf32>
    %305 = arith.divf %303, %304 : vector<8x128xf32>
    %306 = vector.extract_strided_slice %299 {offsets = [0, 128], sizes = [8, 128], strides = [1, 1]} : vector<8x512xf32> to vector<8x128xf32>
    %307 = arith.negf %306 : vector<8x128xf32>
    %308 = math.exp %307 : vector<8x128xf32>
    %cst_74 = arith.constant 1.000000e+00 : f32
    %309 = vector.broadcast %cst_74 : f32 to vector<8x128xf32>
    %310 = arith.addf %309, %308 : vector<8x128xf32>
    %311 = arith.divf %309, %310 : vector<8x128xf32>
    %312 = vector.extract_strided_slice %299 {offsets = [0, 256], sizes = [8, 128], strides = [1, 1]} : vector<8x512xf32> to vector<8x128xf32>
    %313 = math.tanh %312 : vector<8x128xf32>
    %314 = vector.extract_strided_slice %299 {offsets = [0, 384], sizes = [8, 128], strides = [1, 1]} : vector<8x512xf32> to vector<8x128xf32>
    %315 = arith.negf %314 : vector<8x128xf32>
    %316 = math.exp %315 : vector<8x128xf32>
    %cst_75 = arith.constant 1.000000e+00 : f32
    %317 = vector.broadcast %cst_75 : f32 to vector<8x128xf32>
    %318 = arith.addf %317, %316 : vector<8x128xf32>
    %319 = arith.divf %317, %318 : vector<8x128xf32>
    %320 = arith.mulf %311, %286 : vector<8x128xf32>
    %321 = arith.mulf %305, %313 : vector<8x128xf32>
    %322 = arith.addf %320, %321 : vector<8x128xf32>
    %323 = math.tanh %322 : vector<8x128xf32>
    %324 = arith.mulf %319, %323 : vector<8x128xf32>
    %325 = arith.truncf %324 : vector<8x128xf32> to vector<8x128xbf16>
    %326 = arith.index_cast %c8_i32 : i32 to index
    %c0_76 = arith.constant 0 : index
    %c0_77 = arith.constant 0 : index
    %327 = vector.load %arg6[%326, %c0_76, %c0_77] : memref<16x8x128xbf16, #tpu.memory_space<vmem>>, vector<1x8x128xbf16>
    %328 = vector.shape_cast %327 : vector<1x8x128xbf16> to vector<8x128xbf16>
    %329 = vector.shape_cast %325 : vector<8x128xbf16> to vector<1x8x128xbf16>
    tpu.vector_store %arg6[%326, %c0_76, %c0_77], %329 {strides = array<i32>} : memref<16x8x128xbf16, #tpu.memory_space<vmem>>, vector<1x8x128xbf16>,
    %c9_i32 = arith.constant 9 : i32
    %330 = arith.index_cast %c9_i32 : i32 to index
    %c0_78 = arith.constant 0 : index
    %c0_79 = arith.constant 0 : index
    %331 = vector.load %arg2[%330, %c0_78, %c0_79] : memref<16x8x512xf32, #tpu.memory_space<vmem>>, vector<1x8x512xf32>
    %332 = vector.shape_cast %331 : vector<1x8x512xf32> to vector<8x512xf32>
    %333 = arith.truncf %324 : vector<8x128xf32> to vector<8x128xbf16>
    %cst_80 = arith.constant dense<0.000000e+00> : vector<8x512xf32>
    %334 = tpu.matmul %333, %3, %cst_80 {dimension_numbers = #tpu.dot_dimension_numbers<[1], [0], [0], [1], [0, 0, 1, 1], [], []>} : vector<8x128xbf16>, vector<128x512xbf16>, vector<8x512xf32> -> vector<8x512xf32>
    %335 = arith.addf %332, %334 : vector<8x512xf32>
    %336 = vector.extract_strided_slice %335 {offsets = [0, 0], sizes = [8, 128], strides = [1, 1]} : vector<8x512xf32> to vector<8x128xf32>
    %337 = arith.negf %336 : vector<8x128xf32>
    %338 = math.exp %337 : vector<8x128xf32>
    %cst_81 = arith.constant 1.000000e+00 : f32
    %339 = vector.broadcast %cst_81 : f32 to vector<8x128xf32>
    %340 = arith.addf %339, %338 : vector<8x128xf32>
    %341 = arith.divf %339, %340 : vector<8x128xf32>
    %342 = vector.extract_strided_slice %335 {offsets = [0, 128], sizes = [8, 128], strides = [1, 1]} : vector<8x512xf32> to vector<8x128xf32>
    %343 = arith.negf %342 : vector<8x128xf32>
    %344 = math.exp %343 : vector<8x128xf32>
    %cst_82 = arith.constant 1.000000e+00 : f32
    %345 = vector.broadcast %cst_82 : f32 to vector<8x128xf32>
    %346 = arith.addf %345, %344 : vector<8x128xf32>
    %347 = arith.divf %345, %346 : vector<8x128xf32>
    %348 = vector.extract_strided_slice %335 {offsets = [0, 256], sizes = [8, 128], strides = [1, 1]} : vector<8x512xf32> to vector<8x128xf32>
    %349 = math.tanh %348 : vector<8x128xf32>
    %350 = vector.extract_strided_slice %335 {offsets = [0, 384], sizes = [8, 128], strides = [1, 1]} : vector<8x512xf32> to vector<8x128xf32>
    %351 = arith.negf %350 : vector<8x128xf32>
    %352 = math.exp %351 : vector<8x128xf32>
    %cst_83 = arith.constant 1.000000e+00 : f32
    %353 = vector.broadcast %cst_83 : f32 to vector<8x128xf32>
    %354 = arith.addf %353, %352 : vector<8x128xf32>
    %355 = arith.divf %353, %354 : vector<8x128xf32>
    %356 = arith.mulf %347, %322 : vector<8x128xf32>
    %357 = arith.mulf %341, %349 : vector<8x128xf32>
    %358 = arith.addf %356, %357 : vector<8x128xf32>
    %359 = math.tanh %358 : vector<8x128xf32>
    %360 = arith.mulf %355, %359 : vector<8x128xf32>
    %361 = arith.truncf %360 : vector<8x128xf32> to vector<8x128xbf16>
    %362 = arith.index_cast %c9_i32 : i32 to index
    %c0_84 = arith.constant 0 : index
    %c0_85 = arith.constant 0 : index
    %363 = vector.load %arg6[%362, %c0_84, %c0_85] : memref<16x8x128xbf16, #tpu.memory_space<vmem>>, vector<1x8x128xbf16>
    %364 = vector.shape_cast %363 : vector<1x8x128xbf16> to vector<8x128xbf16>
    %365 = vector.shape_cast %361 : vector<8x128xbf16> to vector<1x8x128xbf16>
    tpu.vector_store %arg6[%362, %c0_84, %c0_85], %365 {strides = array<i32>} : memref<16x8x128xbf16, #tpu.memory_space<vmem>>, vector<1x8x128xbf16>,
    %c10_i32 = arith.constant 10 : i32
    %366 = arith.index_cast %c10_i32 : i32 to index
    %c0_86 = arith.constant 0 : index
    %c0_87 = arith.constant 0 : index
    %367 = vector.load %arg2[%366, %c0_86, %c0_87] : memref<16x8x512xf32, #tpu.memory_space<vmem>>, vector<1x8x512xf32>
    %368 = vector.shape_cast %367 : vector<1x8x512xf32> to vector<8x512xf32>
    %369 = arith.truncf %360 : vector<8x128xf32> to vector<8x128xbf16>
    %cst_88 = arith.constant dense<0.000000e+00> : vector<8x512xf32>
    %370 = tpu.matmul %369, %3, %cst_88 {dimension_numbers = #tpu.dot_dimension_numbers<[1], [0], [0], [1], [0, 0, 1, 1], [], []>} : vector<8x128xbf16>, vector<128x512xbf16>, vector<8x512xf32> -> vector<8x512xf32>
    %371 = arith.addf %368, %370 : vector<8x512xf32>
    %372 = vector.extract_strided_slice %371 {offsets = [0, 0], sizes = [8, 128], strides = [1, 1]} : vector<8x512xf32> to vector<8x128xf32>
    %373 = arith.negf %372 : vector<8x128xf32>
    %374 = math.exp %373 : vector<8x128xf32>
    %cst_89 = arith.constant 1.000000e+00 : f32
    %375 = vector.broadcast %cst_89 : f32 to vector<8x128xf32>
    %376 = arith.addf %375, %374 : vector<8x128xf32>
    %377 = arith.divf %375, %376 : vector<8x128xf32>
    %378 = vector.extract_strided_slice %371 {offsets = [0, 128], sizes = [8, 128], strides = [1, 1]} : vector<8x512xf32> to vector<8x128xf32>
    %379 = arith.negf %378 : vector<8x128xf32>
    %380 = math.exp %379 : vector<8x128xf32>
    %cst_90 = arith.constant 1.000000e+00 : f32
    %381 = vector.broadcast %cst_90 : f32 to vector<8x128xf32>
    %382 = arith.addf %381, %380 : vector<8x128xf32>
    %383 = arith.divf %381, %382 : vector<8x128xf32>
    %384 = vector.extract_strided_slice %371 {offsets = [0, 256], sizes = [8, 128], strides = [1, 1]} : vector<8x512xf32> to vector<8x128xf32>
    %385 = math.tanh %384 : vector<8x128xf32>
    %386 = vector.extract_strided_slice %371 {offsets = [0, 384], sizes = [8, 128], strides = [1, 1]} : vector<8x512xf32> to vector<8x128xf32>
    %387 = arith.negf %386 : vector<8x128xf32>
    %388 = math.exp %387 : vector<8x128xf32>
    %cst_91 = arith.constant 1.000000e+00 : f32
    %389 = vector.broadcast %cst_91 : f32 to vector<8x128xf32>
    %390 = arith.addf %389, %388 : vector<8x128xf32>
    %391 = arith.divf %389, %390 : vector<8x128xf32>
    %392 = arith.mulf %383, %358 : vector<8x128xf32>
    %393 = arith.mulf %377, %385 : vector<8x128xf32>
    %394 = arith.addf %392, %393 : vector<8x128xf32>
    %395 = math.tanh %394 : vector<8x128xf32>
    %396 = arith.mulf %391, %395 : vector<8x128xf32>
    %397 = arith.truncf %396 : vector<8x128xf32> to vector<8x128xbf16>
    %398 = arith.index_cast %c10_i32 : i32 to index
    %c0_92 = arith.constant 0 : index
    %c0_93 = arith.constant 0 : index
    %399 = vector.load %arg6[%398, %c0_92, %c0_93] : memref<16x8x128xbf16, #tpu.memory_space<vmem>>, vector<1x8x128xbf16>
    %400 = vector.shape_cast %399 : vector<1x8x128xbf16> to vector<8x128xbf16>
    %401 = vector.shape_cast %397 : vector<8x128xbf16> to vector<1x8x128xbf16>
    tpu.vector_store %arg6[%398, %c0_92, %c0_93], %401 {strides = array<i32>} : memref<16x8x128xbf16, #tpu.memory_space<vmem>>, vector<1x8x128xbf16>,
    %c11_i32 = arith.constant 11 : i32
    %402 = arith.index_cast %c11_i32 : i32 to index
    %c0_94 = arith.constant 0 : index
    %c0_95 = arith.constant 0 : index
    %403 = vector.load %arg2[%402, %c0_94, %c0_95] : memref<16x8x512xf32, #tpu.memory_space<vmem>>, vector<1x8x512xf32>
    %404 = vector.shape_cast %403 : vector<1x8x512xf32> to vector<8x512xf32>
    %405 = arith.truncf %396 : vector<8x128xf32> to vector<8x128xbf16>
    %cst_96 = arith.constant dense<0.000000e+00> : vector<8x512xf32>
    %406 = tpu.matmul %405, %3, %cst_96 {dimension_numbers = #tpu.dot_dimension_numbers<[1], [0], [0], [1], [0, 0, 1, 1], [], []>} : vector<8x128xbf16>, vector<128x512xbf16>, vector<8x512xf32> -> vector<8x512xf32>
    %407 = arith.addf %404, %406 : vector<8x512xf32>
    %408 = vector.extract_strided_slice %407 {offsets = [0, 0], sizes = [8, 128], strides = [1, 1]} : vector<8x512xf32> to vector<8x128xf32>
    %409 = arith.negf %408 : vector<8x128xf32>
    %410 = math.exp %409 : vector<8x128xf32>
    %cst_97 = arith.constant 1.000000e+00 : f32
    %411 = vector.broadcast %cst_97 : f32 to vector<8x128xf32>
    %412 = arith.addf %411, %410 : vector<8x128xf32>
    %413 = arith.divf %411, %412 : vector<8x128xf32>
    %414 = vector.extract_strided_slice %407 {offsets = [0, 128], sizes = [8, 128], strides = [1, 1]} : vector<8x512xf32> to vector<8x128xf32>
    %415 = arith.negf %414 : vector<8x128xf32>
    %416 = math.exp %415 : vector<8x128xf32>
    %cst_98 = arith.constant 1.000000e+00 : f32
    %417 = vector.broadcast %cst_98 : f32 to vector<8x128xf32>
    %418 = arith.addf %417, %416 : vector<8x128xf32>
    %419 = arith.divf %417, %418 : vector<8x128xf32>
    %420 = vector.extract_strided_slice %407 {offsets = [0, 256], sizes = [8, 128], strides = [1, 1]} : vector<8x512xf32> to vector<8x128xf32>
    %421 = math.tanh %420 : vector<8x128xf32>
    %422 = vector.extract_strided_slice %407 {offsets = [0, 384], sizes = [8, 128], strides = [1, 1]} : vector<8x512xf32> to vector<8x128xf32>
    %423 = arith.negf %422 : vector<8x128xf32>
    %424 = math.exp %423 : vector<8x128xf32>
    %cst_99 = arith.constant 1.000000e+00 : f32
    %425 = vector.broadcast %cst_99 : f32 to vector<8x128xf32>
    %426 = arith.addf %425, %424 : vector<8x128xf32>
    %427 = arith.divf %425, %426 : vector<8x128xf32>
    %428 = arith.mulf %419, %394 : vector<8x128xf32>
    %429 = arith.mulf %413, %421 : vector<8x128xf32>
    %430 = arith.addf %428, %429 : vector<8x128xf32>
    %431 = math.tanh %430 : vector<8x128xf32>
    %432 = arith.mulf %427, %431 : vector<8x128xf32>
    %433 = arith.truncf %432 : vector<8x128xf32> to vector<8x128xbf16>
    %434 = arith.index_cast %c11_i32 : i32 to index
    %c0_100 = arith.constant 0 : index
    %c0_101 = arith.constant 0 : index
    %435 = vector.load %arg6[%434, %c0_100, %c0_101] : memref<16x8x128xbf16, #tpu.memory_space<vmem>>, vector<1x8x128xbf16>
    %436 = vector.shape_cast %435 : vector<1x8x128xbf16> to vector<8x128xbf16>
    %437 = vector.shape_cast %433 : vector<8x128xbf16> to vector<1x8x128xbf16>
    tpu.vector_store %arg6[%434, %c0_100, %c0_101], %437 {strides = array<i32>} : memref<16x8x128xbf16, #tpu.memory_space<vmem>>, vector<1x8x128xbf16>,
    %c12_i32 = arith.constant 12 : i32
    %438 = arith.index_cast %c12_i32 : i32 to index
    %c0_102 = arith.constant 0 : index
    %c0_103 = arith.constant 0 : index
    %439 = vector.load %arg2[%438, %c0_102, %c0_103] : memref<16x8x512xf32, #tpu.memory_space<vmem>>, vector<1x8x512xf32>
    %440 = vector.shape_cast %439 : vector<1x8x512xf32> to vector<8x512xf32>
    %441 = arith.truncf %432 : vector<8x128xf32> to vector<8x128xbf16>
    %cst_104 = arith.constant dense<0.000000e+00> : vector<8x512xf32>
    %442 = tpu.matmul %441, %3, %cst_104 {dimension_numbers = #tpu.dot_dimension_numbers<[1], [0], [0], [1], [0, 0, 1, 1], [], []>} : vector<8x128xbf16>, vector<128x512xbf16>, vector<8x512xf32> -> vector<8x512xf32>
    %443 = arith.addf %440, %442 : vector<8x512xf32>
    %444 = vector.extract_strided_slice %443 {offsets = [0, 0], sizes = [8, 128], strides = [1, 1]} : vector<8x512xf32> to vector<8x128xf32>
    %445 = arith.negf %444 : vector<8x128xf32>
    %446 = math.exp %445 : vector<8x128xf32>
    %cst_105 = arith.constant 1.000000e+00 : f32
    %447 = vector.broadcast %cst_105 : f32 to vector<8x128xf32>
    %448 = arith.addf %447, %446 : vector<8x128xf32>
    %449 = arith.divf %447, %448 : vector<8x128xf32>
    %450 = vector.extract_strided_slice %443 {offsets = [0, 128], sizes = [8, 128], strides = [1, 1]} : vector<8x512xf32> to vector<8x128xf32>
    %451 = arith.negf %450 : vector<8x128xf32>
    %452 = math.exp %451 : vector<8x128xf32>
    %cst_106 = arith.constant 1.000000e+00 : f32
    %453 = vector.broadcast %cst_106 : f32 to vector<8x128xf32>
    %454 = arith.addf %453, %452 : vector<8x128xf32>
    %455 = arith.divf %453, %454 : vector<8x128xf32>
    %456 = vector.extract_strided_slice %443 {offsets = [0, 256], sizes = [8, 128], strides = [1, 1]} : vector<8x512xf32> to vector<8x128xf32>
    %457 = math.tanh %456 : vector<8x128xf32>
    %458 = vector.extract_strided_slice %443 {offsets = [0, 384], sizes = [8, 128], strides = [1, 1]} : vector<8x512xf32> to vector<8x128xf32>
    %459 = arith.negf %458 : vector<8x128xf32>
    %460 = math.exp %459 : vector<8x128xf32>
    %cst_107 = arith.constant 1.000000e+00 : f32
    %461 = vector.broadcast %cst_107 : f32 to vector<8x128xf32>
    %462 = arith.addf %461, %460 : vector<8x128xf32>
    %463 = arith.divf %461, %462 : vector<8x128xf32>
    %464 = arith.mulf %455, %430 : vector<8x128xf32>
    %465 = arith.mulf %449, %457 : vector<8x128xf32>
    %466 = arith.addf %464, %465 : vector<8x128xf32>
    %467 = math.tanh %466 : vector<8x128xf32>
    %468 = arith.mulf %463, %467 : vector<8x128xf32>
    %469 = arith.truncf %468 : vector<8x128xf32> to vector<8x128xbf16>
    %470 = arith.index_cast %c12_i32 : i32 to index
    %c0_108 = arith.constant 0 : index
    %c0_109 = arith.constant 0 : index
    %471 = vector.load %arg6[%470, %c0_108, %c0_109] : memref<16x8x128xbf16, #tpu.memory_space<vmem>>, vector<1x8x128xbf16>
    %472 = vector.shape_cast %471 : vector<1x8x128xbf16> to vector<8x128xbf16>
    %473 = vector.shape_cast %469 : vector<8x128xbf16> to vector<1x8x128xbf16>
    tpu.vector_store %arg6[%470, %c0_108, %c0_109], %473 {strides = array<i32>} : memref<16x8x128xbf16, #tpu.memory_space<vmem>>, vector<1x8x128xbf16>,
    %c13_i32 = arith.constant 13 : i32
    %474 = arith.index_cast %c13_i32 : i32 to index
    %c0_110 = arith.constant 0 : index
    %c0_111 = arith.constant 0 : index
    %475 = vector.load %arg2[%474, %c0_110, %c0_111] : memref<16x8x512xf32, #tpu.memory_space<vmem>>, vector<1x8x512xf32>
    %476 = vector.shape_cast %475 : vector<1x8x512xf32> to vector<8x512xf32>
    %477 = arith.truncf %468 : vector<8x128xf32> to vector<8x128xbf16>
    %cst_112 = arith.constant dense<0.000000e+00> : vector<8x512xf32>
    %478 = tpu.matmul %477, %3, %cst_112 {dimension_numbers = #tpu.dot_dimension_numbers<[1], [0], [0], [1], [0, 0, 1, 1], [], []>} : vector<8x128xbf16>, vector<128x512xbf16>, vector<8x512xf32> -> vector<8x512xf32>
    %479 = arith.addf %476, %478 : vector<8x512xf32>
    %480 = vector.extract_strided_slice %479 {offsets = [0, 0], sizes = [8, 128], strides = [1, 1]} : vector<8x512xf32> to vector<8x128xf32>
    %481 = arith.negf %480 : vector<8x128xf32>
    %482 = math.exp %481 : vector<8x128xf32>
    %cst_113 = arith.constant 1.000000e+00 : f32
    %483 = vector.broadcast %cst_113 : f32 to vector<8x128xf32>
    %484 = arith.addf %483, %482 : vector<8x128xf32>
    %485 = arith.divf %483, %484 : vector<8x128xf32>
    %486 = vector.extract_strided_slice %479 {offsets = [0, 128], sizes = [8, 128], strides = [1, 1]} : vector<8x512xf32> to vector<8x128xf32>
    %487 = arith.negf %486 : vector<8x128xf32>
    %488 = math.exp %487 : vector<8x128xf32>
    %cst_114 = arith.constant 1.000000e+00 : f32
    %489 = vector.broadcast %cst_114 : f32 to vector<8x128xf32>
    %490 = arith.addf %489, %488 : vector<8x128xf32>
    %491 = arith.divf %489, %490 : vector<8x128xf32>
    %492 = vector.extract_strided_slice %479 {offsets = [0, 256], sizes = [8, 128], strides = [1, 1]} : vector<8x512xf32> to vector<8x128xf32>
    %493 = math.tanh %492 : vector<8x128xf32>
    %494 = vector.extract_strided_slice %479 {offsets = [0, 384], sizes = [8, 128], strides = [1, 1]} : vector<8x512xf32> to vector<8x128xf32>
    %495 = arith.negf %494 : vector<8x128xf32>
    %496 = math.exp %495 : vector<8x128xf32>
    %cst_115 = arith.constant 1.000000e+00 : f32
    %497 = vector.broadcast %cst_115 : f32 to vector<8x128xf32>
    %498 = arith.addf %497, %496 : vector<8x128xf32>
    %499 = arith.divf %497, %498 : vector<8x128xf32>
    %500 = arith.mulf %491, %466 : vector<8x128xf32>
    %501 = arith.mulf %485, %493 : vector<8x128xf32>
    %502 = arith.addf %500, %501 : vector<8x128xf32>
    %503 = math.tanh %502 : vector<8x128xf32>
    %504 = arith.mulf %499, %503 : vector<8x128xf32>
    %505 = arith.truncf %504 : vector<8x128xf32> to vector<8x128xbf16>
    %506 = arith.index_cast %c13_i32 : i32 to index
    %c0_116 = arith.constant 0 : index
    %c0_117 = arith.constant 0 : index
    %507 = vector.load %arg6[%506, %c0_116, %c0_117] : memref<16x8x128xbf16, #tpu.memory_space<vmem>>, vector<1x8x128xbf16>
    %508 = vector.shape_cast %507 : vector<1x8x128xbf16> to vector<8x128xbf16>
    %509 = vector.shape_cast %505 : vector<8x128xbf16> to vector<1x8x128xbf16>
    tpu.vector_store %arg6[%506, %c0_116, %c0_117], %509 {strides = array<i32>} : memref<16x8x128xbf16, #tpu.memory_space<vmem>>, vector<1x8x128xbf16>,
    %c14_i32 = arith.constant 14 : i32
    %510 = arith.index_cast %c14_i32 : i32 to index
    %c0_118 = arith.constant 0 : index
    %c0_119 = arith.constant 0 : index
    %511 = vector.load %arg2[%510, %c0_118, %c0_119] : memref<16x8x512xf32, #tpu.memory_space<vmem>>, vector<1x8x512xf32>
    %512 = vector.shape_cast %511 : vector<1x8x512xf32> to vector<8x512xf32>
    %513 = arith.truncf %504 : vector<8x128xf32> to vector<8x128xbf16>
    %cst_120 = arith.constant dense<0.000000e+00> : vector<8x512xf32>
    %514 = tpu.matmul %513, %3, %cst_120 {dimension_numbers = #tpu.dot_dimension_numbers<[1], [0], [0], [1], [0, 0, 1, 1], [], []>} : vector<8x128xbf16>, vector<128x512xbf16>, vector<8x512xf32> -> vector<8x512xf32>
    %515 = arith.addf %512, %514 : vector<8x512xf32>
    %516 = vector.extract_strided_slice %515 {offsets = [0, 0], sizes = [8, 128], strides = [1, 1]} : vector<8x512xf32> to vector<8x128xf32>
    %517 = arith.negf %516 : vector<8x128xf32>
    %518 = math.exp %517 : vector<8x128xf32>
    %cst_121 = arith.constant 1.000000e+00 : f32
    %519 = vector.broadcast %cst_121 : f32 to vector<8x128xf32>
    %520 = arith.addf %519, %518 : vector<8x128xf32>
    %521 = arith.divf %519, %520 : vector<8x128xf32>
    %522 = vector.extract_strided_slice %515 {offsets = [0, 128], sizes = [8, 128], strides = [1, 1]} : vector<8x512xf32> to vector<8x128xf32>
    %523 = arith.negf %522 : vector<8x128xf32>
    %524 = math.exp %523 : vector<8x128xf32>
    %cst_122 = arith.constant 1.000000e+00 : f32
    %525 = vector.broadcast %cst_122 : f32 to vector<8x128xf32>
    %526 = arith.addf %525, %524 : vector<8x128xf32>
    %527 = arith.divf %525, %526 : vector<8x128xf32>
    %528 = vector.extract_strided_slice %515 {offsets = [0, 256], sizes = [8, 128], strides = [1, 1]} : vector<8x512xf32> to vector<8x128xf32>
    %529 = math.tanh %528 : vector<8x128xf32>
    %530 = vector.extract_strided_slice %515 {offsets = [0, 384], sizes = [8, 128], strides = [1, 1]} : vector<8x512xf32> to vector<8x128xf32>
    %531 = arith.negf %530 : vector<8x128xf32>
    %532 = math.exp %531 : vector<8x128xf32>
    %cst_123 = arith.constant 1.000000e+00 : f32
    %533 = vector.broadcast %cst_123 : f32 to vector<8x128xf32>
    %534 = arith.addf %533, %532 : vector<8x128xf32>
    %535 = arith.divf %533, %534 : vector<8x128xf32>
    %536 = arith.mulf %527, %502 : vector<8x128xf32>
    %537 = arith.mulf %521, %529 : vector<8x128xf32>
    %538 = arith.addf %536, %537 : vector<8x128xf32>
    %539 = math.tanh %538 : vector<8x128xf32>
    %540 = arith.mulf %535, %539 : vector<8x128xf32>
    %541 = arith.truncf %540 : vector<8x128xf32> to vector<8x128xbf16>
    %542 = arith.index_cast %c14_i32 : i32 to index
    %c0_124 = arith.constant 0 : index
    %c0_125 = arith.constant 0 : index
    %543 = vector.load %arg6[%542, %c0_124, %c0_125] : memref<16x8x128xbf16, #tpu.memory_space<vmem>>, vector<1x8x128xbf16>
    %544 = vector.shape_cast %543 : vector<1x8x128xbf16> to vector<8x128xbf16>
    %545 = vector.shape_cast %541 : vector<8x128xbf16> to vector<1x8x128xbf16>
    tpu.vector_store %arg6[%542, %c0_124, %c0_125], %545 {strides = array<i32>} : memref<16x8x128xbf16, #tpu.memory_space<vmem>>, vector<1x8x128xbf16>,
    %c15_i32 = arith.constant 15 : i32
    %546 = arith.index_cast %c15_i32 : i32 to index
    %c0_126 = arith.constant 0 : index
    %c0_127 = arith.constant 0 : index
    %547 = vector.load %arg2[%546, %c0_126, %c0_127] : memref<16x8x512xf32, #tpu.memory_space<vmem>>, vector<1x8x512xf32>
    %548 = vector.shape_cast %547 : vector<1x8x512xf32> to vector<8x512xf32>
    %549 = arith.truncf %540 : vector<8x128xf32> to vector<8x128xbf16>
    %cst_128 = arith.constant dense<0.000000e+00> : vector<8x512xf32>
    %550 = tpu.matmul %549, %3, %cst_128 {dimension_numbers = #tpu.dot_dimension_numbers<[1], [0], [0], [1], [0, 0, 1, 1], [], []>} : vector<8x128xbf16>, vector<128x512xbf16>, vector<8x512xf32> -> vector<8x512xf32>
    %551 = arith.addf %548, %550 : vector<8x512xf32>
    %552 = vector.extract_strided_slice %551 {offsets = [0, 0], sizes = [8, 128], strides = [1, 1]} : vector<8x512xf32> to vector<8x128xf32>
    %553 = arith.negf %552 : vector<8x128xf32>
    %554 = math.exp %553 : vector<8x128xf32>
    %cst_129 = arith.constant 1.000000e+00 : f32
    %555 = vector.broadcast %cst_129 : f32 to vector<8x128xf32>
    %556 = arith.addf %555, %554 : vector<8x128xf32>
    %557 = arith.divf %555, %556 : vector<8x128xf32>
    %558 = vector.extract_strided_slice %551 {offsets = [0, 128], sizes = [8, 128], strides = [1, 1]} : vector<8x512xf32> to vector<8x128xf32>
    %559 = arith.negf %558 : vector<8x128xf32>
    %560 = math.exp %559 : vector<8x128xf32>
    %cst_130 = arith.constant 1.000000e+00 : f32
    %561 = vector.broadcast %cst_130 : f32 to vector<8x128xf32>
    %562 = arith.addf %561, %560 : vector<8x128xf32>
    %563 = arith.divf %561, %562 : vector<8x128xf32>
    %564 = vector.extract_strided_slice %551 {offsets = [0, 256], sizes = [8, 128], strides = [1, 1]} : vector<8x512xf32> to vector<8x128xf32>
    %565 = math.tanh %564 : vector<8x128xf32>
    %566 = vector.extract_strided_slice %551 {offsets = [0, 384], sizes = [8, 128], strides = [1, 1]} : vector<8x512xf32> to vector<8x128xf32>
    %567 = arith.negf %566 : vector<8x128xf32>
    %568 = math.exp %567 : vector<8x128xf32>
    %cst_131 = arith.constant 1.000000e+00 : f32
    %569 = vector.broadcast %cst_131 : f32 to vector<8x128xf32>
    %570 = arith.addf %569, %568 : vector<8x128xf32>
    %571 = arith.divf %569, %570 : vector<8x128xf32>
    %572 = arith.mulf %563, %538 : vector<8x128xf32>
    %573 = arith.mulf %557, %565 : vector<8x128xf32>
    %574 = arith.addf %572, %573 : vector<8x128xf32>
    %575 = math.tanh %574 : vector<8x128xf32>
    %576 = arith.mulf %571, %575 : vector<8x128xf32>
    %577 = arith.truncf %576 : vector<8x128xf32> to vector<8x128xbf16>
    %578 = arith.index_cast %c15_i32 : i32 to index
    %c0_132 = arith.constant 0 : index
    %c0_133 = arith.constant 0 : index
    %579 = vector.load %arg6[%578, %c0_132, %c0_133] : memref<16x8x128xbf16, #tpu.memory_space<vmem>>, vector<1x8x128xbf16>
    %580 = vector.shape_cast %579 : vector<1x8x128xbf16> to vector<8x128xbf16>
    %581 = vector.shape_cast %577 : vector<8x128xbf16> to vector<1x8x128xbf16>
    tpu.vector_store %arg6[%578, %c0_132, %c0_133], %581 {strides = array<i32>} : memref<16x8x128xbf16, #tpu.memory_space<vmem>>, vector<1x8x128xbf16>,
    %c16_i32 = arith.constant 16 : i32
    %c0_134 = arith.constant 0 : index
    %c0_135 = arith.constant 0 : index
    %582 = vector.load %arg9[%c0_134, %c0_135] : memref<8x128xf32, #tpu.memory_space<vmem>>, vector<8x128xf32>
    tpu.vector_store %arg9[%c0_134, %c0_135], %576 {strides = array<i32>} : memref<8x128xf32, #tpu.memory_space<vmem>>, vector<8x128xf32>,
    %c0_136 = arith.constant 0 : index
    %c0_137 = arith.constant 0 : index
    %583 = vector.load %arg10[%c0_136, %c0_137] : memref<8x128xf32, #tpu.memory_space<vmem>>, vector<8x128xf32>
    tpu.vector_store %arg10[%c0_136, %c0_137], %574 {strides = array<i32>} : memref<8x128xf32, #tpu.memory_space<vmem>>, vector<8x128xf32>,
    %c0_i32_138 = arith.constant 0 : i32
    %584 = arith.cmpi eq, %arg1, %c0_i32_138 : i32
    %585 = arith.extui %584 : i1 to i32
    %c0_i32_139 = arith.constant 0 : i32
    %586 = arith.cmpi ne, %585, %c0_i32_139 : i32
    scf.if %586 {
      %c0_140 = arith.constant 0 : index
      %c0_141 = arith.constant 0 : index
      %587 = vector.load %arg7[%c0_140, %c0_141] : memref<8x128xf32, #tpu.memory_space<vmem>>, vector<8x128xf32>
      tpu.vector_store %arg7[%c0_140, %c0_141], %576 {strides = array<i32>} : memref<8x128xf32, #tpu.memory_space<vmem>>, vector<8x128xf32>,
      %c0_142 = arith.constant 0 : index
      %c0_143 = arith.constant 0 : index
      %588 = vector.load %arg8[%c0_142, %c0_143] : memref<8x128xf32, #tpu.memory_space<vmem>>, vector<8x128xf32>
      tpu.vector_store %arg8[%c0_142, %c0_143], %574 {strides = array<i32>} : memref<8x128xf32, #tpu.memory_space<vmem>>, vector<8x128xf32>,
    } else {
    }
    return
  }
  func.func @transform_0(%arg0: i32, %arg1: i32) -> (i32, i32, i32) {
    %c0_i32 = arith.constant 0 : i32
    %c0_i32_0 = arith.constant 0 : i32
    return %arg1, %arg0, %c0_i32 : i32, i32, i32
  }
  func.func @transform_1(%arg0: i32, %arg1: i32) -> (i32, i32) {
    %c0_i32 = arith.constant 0 : i32
    %c0_i32_0 = arith.constant 0 : i32
    %c0_i32_1 = arith.constant 0 : i32
    return %c0_i32, %c0_i32_0 : i32, i32
  }
  func.func @transform_2(%arg0: i32, %arg1: i32) -> (i32, i32) {
    %c0_i32 = arith.constant 0 : i32
    %c0_i32_0 = arith.constant 0 : i32
    return %arg0, %c0_i32 : i32, i32
  }
  func.func @transform_3(%arg0: i32, %arg1: i32) -> (i32, i32) {
    %c0_i32 = arith.constant 0 : i32
    %c0_i32_0 = arith.constant 0 : i32
    return %arg0, %c0_i32 : i32, i32
  }
  func.func @transform_4(%arg0: i32, %arg1: i32) -> (i32, i32, i32) {
    %c0_i32 = arith.constant 0 : i32
    %c0_i32_0 = arith.constant 0 : i32
    return %arg1, %arg0, %c0_i32 : i32, i32, i32
  }
  func.func @transform_5(%arg0: i32, %arg1: i32) -> (i32, i32) {
    %c0_i32 = arith.constant 0 : i32
    %c0_i32_0 = arith.constant 0 : i32
    return %arg0, %c0_i32 : i32, i32
  }
  func.func @transform_6(%arg0: i32, %arg1: i32) -> (i32, i32) {
    %c0_i32 = arith.constant 0 : i32
    %c0_i32_0 = arith.constant 0 : i32
    return %arg0, %c0_i32 : i32, i32
  }
}

module attributes {stable_mosaic.version = 11 : i64} {
  func.func @_matmul_bias_kernel(%arg0: i32, %arg1: i32, %arg2: i32, %arg3: memref<128x128xbf16, #tpu.memory_space<vmem>>, %arg4: memref<128x512xbf16, #tpu.memory_space<vmem>>, %arg5: memref<1x512xf32, #tpu.memory_space<vmem>>, %arg6: memref<128x512xf32, #tpu.memory_space<vmem>>, %arg7: memref<128x512xf32, #tpu.memory_space<vmem>>) attributes {dimension_semantics = [#tpu.dimension_semantics<parallel>, #tpu.dimension_semantics<parallel>, #tpu.dimension_semantics<arbitrary>], iteration_bounds = array<i64: 1, 1, 1>, scalar_prefetch = 0 : i64, scratch_operands = 1 : i64, tpu.core_type = #tpu.core_type<tc>, window_params = [{transform_indices = @transform_0, window_bounds = array<i64: 128, 128>}, {transform_indices = @transform_1, window_bounds = array<i64: 128, 512>}, {transform_indices = @transform_2, window_bounds = array<i64: 1, 512>}, {transform_indices = @transform_3, window_bounds = array<i64: 128, 512>}]} {
    %c0_i32 = arith.constant 0 : i32
    %0 = arith.cmpi eq, %arg2, %c0_i32 : i32
    %1 = arith.extui %0 : i1 to i32
    %c0_i32_0 = arith.constant 0 : i32
    %2 = arith.cmpi ne, %1, %c0_i32_0 : i32
    scf.if %2 {
      %cst_10 = arith.constant 0.000000e+00 : f32
      %12 = vector.broadcast %cst_10 : f32 to vector<128x512xf32>
      %c0_11 = arith.constant 0 : index
      %c0_12 = arith.constant 0 : index
      %13 = vector.load %arg7[%c0_11, %c0_12] : memref<128x512xf32, #tpu.memory_space<vmem>>, vector<128x512xf32>
      tpu.vector_store %arg7[%c0_11, %c0_12], %12 {strides = array<i32>} : memref<128x512xf32, #tpu.memory_space<vmem>>, vector<128x512xf32>,
    } else {
    }
    %c0 = arith.constant 0 : index
    %c0_1 = arith.constant 0 : index
    %3 = vector.load %arg7[%c0, %c0_1] : memref<128x512xf32, #tpu.memory_space<vmem>>, vector<128x512xf32>
    %c0_2 = arith.constant 0 : index
    %c0_3 = arith.constant 0 : index
    %4 = vector.load %arg3[%c0_2, %c0_3] : memref<128x128xbf16, #tpu.memory_space<vmem>>, vector<128x128xbf16>
    %c0_4 = arith.constant 0 : index
    %c0_5 = arith.constant 0 : index
    %5 = vector.load %arg4[%c0_4, %c0_5] : memref<128x512xbf16, #tpu.memory_space<vmem>>, vector<128x512xbf16>
    %cst = arith.constant dense<0.000000e+00> : vector<128x512xf32>
    %6 = tpu.matmul %4, %5, %cst {dimension_numbers = #tpu.dot_dimension_numbers<[1], [0], [0], [1], [0, 0, 1, 1], [], []>} : vector<128x128xbf16>, vector<128x512xbf16>, vector<128x512xf32> -> vector<128x512xf32>
    %7 = arith.addf %3, %6 : vector<128x512xf32>
    %c0_6 = arith.constant 0 : index
    %c0_7 = arith.constant 0 : index
    %8 = vector.load %arg7[%c0_6, %c0_7] : memref<128x512xf32, #tpu.memory_space<vmem>>, vector<128x512xf32>
    tpu.vector_store %arg7[%c0_6, %c0_7], %7 {strides = array<i32>} : memref<128x512xf32, #tpu.memory_space<vmem>>, vector<128x512xf32>,
    %c0_i32_8 = arith.constant 0 : i32
    %9 = arith.cmpi eq, %arg2, %c0_i32_8 : i32
    %10 = arith.extui %9 : i1 to i32
    %c0_i32_9 = arith.constant 0 : i32
    %11 = arith.cmpi ne, %10, %c0_i32_9 : i32
    scf.if %11 {
      %c0_10 = arith.constant 0 : index
      %c0_11 = arith.constant 0 : index
      %12 = vector.load %arg7[%c0_10, %c0_11] : memref<128x512xf32, #tpu.memory_space<vmem>>, vector<128x512xf32>
      %c0_12 = arith.constant 0 : index
      %c0_13 = arith.constant 0 : index
      %13 = vector.load %arg5[%c0_12, %c0_13] : memref<1x512xf32, #tpu.memory_space<vmem>>, vector<1x512xf32>
      %14 = vector.broadcast %13 : vector<1x512xf32> to vector<128x512xf32>
      %15 = arith.addf %12, %14 : vector<128x512xf32>
      %c0_14 = arith.constant 0 : index
      %c0_15 = arith.constant 0 : index
      %16 = vector.load %arg6[%c0_14, %c0_15] : memref<128x512xf32, #tpu.memory_space<vmem>>, vector<128x512xf32>
      tpu.vector_store %arg6[%c0_14, %c0_15], %15 {strides = array<i32>} : memref<128x512xf32, #tpu.memory_space<vmem>>, vector<128x512xf32>,
    } else {
    }
    return
  }
  func.func @transform_0(%arg0: i32, %arg1: i32, %arg2: i32) -> (i32, i32) {
    %c0_i32 = arith.constant 0 : i32
    return %arg0, %arg2 : i32, i32
  }
  func.func @transform_1(%arg0: i32, %arg1: i32, %arg2: i32) -> (i32, i32) {
    %c0_i32 = arith.constant 0 : i32
    return %arg2, %arg1 : i32, i32
  }
  func.func @transform_2(%arg0: i32, %arg1: i32, %arg2: i32) -> (i32, i32) {
    %c0_i32 = arith.constant 0 : i32
    %c0_i32_0 = arith.constant 0 : i32
    return %c0_i32, %arg1 : i32, i32
  }
  func.func @transform_3(%arg0: i32, %arg1: i32, %arg2: i32) -> (i32, i32) {
    %c0_i32 = arith.constant 0 : i32
    return %arg0, %arg1 : i32, i32
  }
}

module attributes {stable_mosaic.version = 11 : i64} {
  func.func @_lstm_recurrent_kernel(%arg0: i32, %arg1: i32, %arg2: memref<16x8x512xf32, #tpu.memory_space<vmem>>, %arg3: memref<128x512xbf16, #tpu.memory_space<vmem>>, %arg4: memref<8x128xf32, #tpu.memory_space<vmem>>, %arg5: memref<8x128xf32, #tpu.memory_space<vmem>>, %arg6: memref<16x8x128xbf16, #tpu.memory_space<vmem>>, %arg7: memref<8x128xf32, #tpu.memory_space<vmem>>, %arg8: memref<8x128xf32, #tpu.memory_space<vmem>>, %arg9: memref<8x128xf32, #tpu.memory_space<vmem>>, %arg10: memref<8x128xf32, #tpu.memory_space<vmem>>) attributes {dimension_semantics = [#tpu.dimension_semantics<parallel>, #tpu.dimension_semantics<arbitrary>], iteration_bounds = array<i64: 1, 1>, scalar_prefetch = 0 : i64, scratch_operands = 2 : i64, tpu.core_type = #tpu.core_type<tc>, window_params = [{transform_indices = @transform_0, window_bounds = array<i64: 16, 8, 512>}, {pipeline_mode = #tpu.pipeline_mode<synchronous>, transform_indices = @transform_1, window_bounds = array<i64: 128, 512>}, {transform_indices = @transform_2, window_bounds = array<i64: 8, 128>}, {transform_indices = @transform_3, window_bounds = array<i64: 8, 128>}, {transform_indices = @transform_4, window_bounds = array<i64: 16, 8, 128>}, {transform_indices = @transform_5, window_bounds = array<i64: 8, 128>}, {transform_indices = @transform_6, window_bounds = array<i64: 8, 128>}]} {
    %c0_i32 = arith.constant 0 : i32
    %0 = arith.cmpi eq, %arg1, %c0_i32 : i32
    %1 = arith.extui %0 : i1 to i32
    %c0_i32_0 = arith.constant 0 : i32
    %2 = arith.cmpi ne, %1, %c0_i32_0 : i32
    scf.if %2 {
      %c0_140 = arith.constant 0 : index
      %c0_141 = arith.constant 0 : index
      %587 = vector.load %arg4[%c0_140, %c0_141] : memref<8x128xf32, #tpu.memory_space<vmem>>, vector<8x128xf32>
      %c0_142 = arith.constant 0 : index
      %c0_143 = arith.constant 0 : index
      %588 = vector.load %arg9[%c0_142, %c0_143] : memref<8x128xf32, #tpu.memory_space<vmem>>, vector<8x128xf32>
      tpu.vector_store %arg9[%c0_142, %c0_143], %587 {strides = array<i32>} : memref<8x128xf32, #tpu.memory_space<vmem>>, vector<8x128xf32>,
      %c0_144 = arith.constant 0 : index
      %c0_145 = arith.constant 0 : index
      %589 = vector.load %arg5[%c0_144, %c0_145] : memref<8x128xf32, #tpu.memory_space<vmem>>, vector<8x128xf32>
      %c0_146 = arith.constant 0 : index
      %c0_147 = arith.constant 0 : index
      %590 = vector.load %arg10[%c0_146, %c0_147] : memref<8x128xf32, #tpu.memory_space<vmem>>, vector<8x128xf32>
      tpu.vector_store %arg10[%c0_146, %c0_147], %589 {strides = array<i32>} : memref<8x128xf32, #tpu.memory_space<vmem>>, vector<8x128xf32>,
    } else {
    }
    %c0 = arith.constant 0 : index
    %c0_1 = arith.constant 0 : index
    %3 = vector.load %arg3[%c0, %c0_1] : memref<128x512xbf16, #tpu.memory_space<vmem>>, vector<128x512xbf16>
    %c0_2 = arith.constant 0 : index
    %c0_3 = arith.constant 0 : index
    %4 = vector.load %arg9[%c0_2, %c0_3] : memref<8x128xf32, #tpu.memory_space<vmem>>, vector<8x128xf32>
    %c0_4 = arith.constant 0 : index
    %c0_5 = arith.constant 0 : index
    %5 = vector.load %arg10[%c0_4, %c0_5] : memref<8x128xf32, #tpu.memory_space<vmem>>, vector<8x128xf32>
    %c0_i32_6 = arith.constant 0 : i32
    %6 = arith.index_cast %c0_i32_6 : i32 to index
    %c0_7 = arith.constant 0 : index
    %c0_8 = arith.constant 0 : index
    %7 = vector.load %arg2[%6, %c0_7, %c0_8] : memref<16x8x512xf32, #tpu.memory_space<vmem>>, vector<1x8x512xf32>
    %8 = vector.shape_cast %7 : vector<1x8x512xf32> to vector<8x512xf32>
    %9 = arith.truncf %4 : vector<8x128xf32> to vector<8x128xbf16>
    %cst = arith.constant dense<0.000000e+00> : vector<8x512xf32>
    %10 = tpu.matmul %9, %3, %cst {dimension_numbers = #tpu.dot_dimension_numbers<[1], [0], [0], [1], [0, 0, 1, 1], [], []>} : vector<8x128xbf16>, vector<128x512xbf16>, vector<8x512xf32> -> vector<8x512xf32>
    %11 = arith.addf %8, %10 : vector<8x512xf32>
    %12 = vector.extract_strided_slice %11 {offsets = [0, 0], sizes = [8, 128], strides = [1, 1]} : vector<8x512xf32> to vector<8x128xf32>
    %13 = arith.negf %12 : vector<8x128xf32>
    %14 = math.exp %13 : vector<8x128xf32>
    %cst_9 = arith.constant 1.000000e+00 : f32
    %15 = vector.broadcast %cst_9 : f32 to vector<8x128xf32>
    %16 = arith.addf %15, %14 : vector<8x128xf32>
    %17 = arith.divf %15, %16 : vector<8x128xf32>
    %18 = vector.extract_strided_slice %11 {offsets = [0, 128], sizes = [8, 128], strides = [1, 1]} : vector<8x512xf32> to vector<8x128xf32>
    %19 = arith.negf %18 : vector<8x128xf32>
    %20 = math.exp %19 : vector<8x128xf32>
    %cst_10 = arith.constant 1.000000e+00 : f32
    %21 = vector.broadcast %cst_10 : f32 to vector<8x128xf32>
    %22 = arith.addf %21, %20 : vector<8x128xf32>
    %23 = arith.divf %21, %22 : vector<8x128xf32>
    %24 = vector.extract_strided_slice %11 {offsets = [0, 256], sizes = [8, 128], strides = [1, 1]} : vector<8x512xf32> to vector<8x128xf32>
    %25 = math.tanh %24 : vector<8x128xf32>
    %26 = vector.extract_strided_slice %11 {offsets = [0, 384], sizes = [8, 128], strides = [1, 1]} : vector<8x512xf32> to vector<8x128xf32>
    %27 = arith.negf %26 : vector<8x128xf32>
    %28 = math.exp %27 : vector<8x128xf32>
    %cst_11 = arith.constant 1.000000e+00 : f32
    %29 = vector.broadcast %cst_11 : f32 to vector<8x128xf32>
    %30 = arith.addf %29, %28 : vector<8x128xf32>
    %31 = arith.divf %29, %30 : vector<8x128xf32>
    %32 = arith.mulf %23, %5 : vector<8x128xf32>
    %33 = arith.mulf %17, %25 : vector<8x128xf32>
    %34 = arith.addf %32, %33 : vector<8x128xf32>
    %35 = math.tanh %34 : vector<8x128xf32>
    %36 = arith.mulf %31, %35 : vector<8x128xf32>
    %37 = arith.truncf %36 : vector<8x128xf32> to vector<8x128xbf16>
    %38 = arith.index_cast %c0_i32_6 : i32 to index
    %c0_12 = arith.constant 0 : index
    %c0_13 = arith.constant 0 : index
    %39 = vector.load %arg6[%38, %c0_12, %c0_13] : memref<16x8x128xbf16, #tpu.memory_space<vmem>>, vector<1x8x128xbf16>
    %40 = vector.shape_cast %39 : vector<1x8x128xbf16> to vector<8x128xbf16>
    %41 = vector.shape_cast %37 : vector<8x128xbf16> to vector<1x8x128xbf16>
    tpu.vector_store %arg6[%38, %c0_12, %c0_13], %41 {strides = array<i32>} : memref<16x8x128xbf16, #tpu.memory_space<vmem>>, vector<1x8x128xbf16>,
    %c1_i32 = arith.constant 1 : i32
    %42 = arith.index_cast %c1_i32 : i32 to index
    %c0_14 = arith.constant 0 : index
    %c0_15 = arith.constant 0 : index
    %43 = vector.load %arg2[%42, %c0_14, %c0_15] : memref<16x8x512xf32, #tpu.memory_space<vmem>>, vector<1x8x512xf32>
    %44 = vector.shape_cast %43 : vector<1x8x512xf32> to vector<8x512xf32>
    %45 = arith.truncf %36 : vector<8x128xf32> to vector<8x128xbf16>
    %cst_16 = arith.constant dense<0.000000e+00> : vector<8x512xf32>
    %46 = tpu.matmul %45, %3, %cst_16 {dimension_numbers = #tpu.dot_dimension_numbers<[1], [0], [0], [1], [0, 0, 1, 1], [], []>} : vector<8x128xbf16>, vector<128x512xbf16>, vector<8x512xf32> -> vector<8x512xf32>
    %47 = arith.addf %44, %46 : vector<8x512xf32>
    %48 = vector.extract_strided_slice %47 {offsets = [0, 0], sizes = [8, 128], strides = [1, 1]} : vector<8x512xf32> to vector<8x128xf32>
    %49 = arith.negf %48 : vector<8x128xf32>
    %50 = math.exp %49 : vector<8x128xf32>
    %cst_17 = arith.constant 1.000000e+00 : f32
    %51 = vector.broadcast %cst_17 : f32 to vector<8x128xf32>
    %52 = arith.addf %51, %50 : vector<8x128xf32>
    %53 = arith.divf %51, %52 : vector<8x128xf32>
    %54 = vector.extract_strided_slice %47 {offsets = [0, 128], sizes = [8, 128], strides = [1, 1]} : vector<8x512xf32> to vector<8x128xf32>
    %55 = arith.negf %54 : vector<8x128xf32>
    %56 = math.exp %55 : vector<8x128xf32>
    %cst_18 = arith.constant 1.000000e+00 : f32
    %57 = vector.broadcast %cst_18 : f32 to vector<8x128xf32>
    %58 = arith.addf %57, %56 : vector<8x128xf32>
    %59 = arith.divf %57, %58 : vector<8x128xf32>
    %60 = vector.extract_strided_slice %47 {offsets = [0, 256], sizes = [8, 128], strides = [1, 1]} : vector<8x512xf32> to vector<8x128xf32>
    %61 = math.tanh %60 : vector<8x128xf32>
    %62 = vector.extract_strided_slice %47 {offsets = [0, 384], sizes = [8, 128], strides = [1, 1]} : vector<8x512xf32> to vector<8x128xf32>
    %63 = arith.negf %62 : vector<8x128xf32>
    %64 = math.exp %63 : vector<8x128xf32>
    %cst_19 = arith.constant 1.000000e+00 : f32
    %65 = vector.broadcast %cst_19 : f32 to vector<8x128xf32>
    %66 = arith.addf %65, %64 : vector<8x128xf32>
    %67 = arith.divf %65, %66 : vector<8x128xf32>
    %68 = arith.mulf %59, %34 : vector<8x128xf32>
    %69 = arith.mulf %53, %61 : vector<8x128xf32>
    %70 = arith.addf %68, %69 : vector<8x128xf32>
    %71 = math.tanh %70 : vector<8x128xf32>
    %72 = arith.mulf %67, %71 : vector<8x128xf32>
    %73 = arith.truncf %72 : vector<8x128xf32> to vector<8x128xbf16>
    %74 = arith.index_cast %c1_i32 : i32 to index
    %c0_20 = arith.constant 0 : index
    %c0_21 = arith.constant 0 : index
    %75 = vector.load %arg6[%74, %c0_20, %c0_21] : memref<16x8x128xbf16, #tpu.memory_space<vmem>>, vector<1x8x128xbf16>
    %76 = vector.shape_cast %75 : vector<1x8x128xbf16> to vector<8x128xbf16>
    %77 = vector.shape_cast %73 : vector<8x128xbf16> to vector<1x8x128xbf16>
    tpu.vector_store %arg6[%74, %c0_20, %c0_21], %77 {strides = array<i32>} : memref<16x8x128xbf16, #tpu.memory_space<vmem>>, vector<1x8x128xbf16>,
    %c2_i32 = arith.constant 2 : i32
    %78 = arith.index_cast %c2_i32 : i32 to index
    %c0_22 = arith.constant 0 : index
    %c0_23 = arith.constant 0 : index
    %79 = vector.load %arg2[%78, %c0_22, %c0_23] : memref<16x8x512xf32, #tpu.memory_space<vmem>>, vector<1x8x512xf32>
    %80 = vector.shape_cast %79 : vector<1x8x512xf32> to vector<8x512xf32>
    %81 = arith.truncf %72 : vector<8x128xf32> to vector<8x128xbf16>
    %cst_24 = arith.constant dense<0.000000e+00> : vector<8x512xf32>
    %82 = tpu.matmul %81, %3, %cst_24 {dimension_numbers = #tpu.dot_dimension_numbers<[1], [0], [0], [1], [0, 0, 1, 1], [], []>} : vector<8x128xbf16>, vector<128x512xbf16>, vector<8x512xf32> -> vector<8x512xf32>
    %83 = arith.addf %80, %82 : vector<8x512xf32>
    %84 = vector.extract_strided_slice %83 {offsets = [0, 0], sizes = [8, 128], strides = [1, 1]} : vector<8x512xf32> to vector<8x128xf32>
    %85 = arith.negf %84 : vector<8x128xf32>
    %86 = math.exp %85 : vector<8x128xf32>
    %cst_25 = arith.constant 1.000000e+00 : f32
    %87 = vector.broadcast %cst_25 : f32 to vector<8x128xf32>
    %88 = arith.addf %87, %86 : vector<8x128xf32>
    %89 = arith.divf %87, %88 : vector<8x128xf32>
    %90 = vector.extract_strided_slice %83 {offsets = [0, 128], sizes = [8, 128], strides = [1, 1]} : vector<8x512xf32> to vector<8x128xf32>
    %91 = arith.negf %90 : vector<8x128xf32>
    %92 = math.exp %91 : vector<8x128xf32>
    %cst_26 = arith.constant 1.000000e+00 : f32
    %93 = vector.broadcast %cst_26 : f32 to vector<8x128xf32>
    %94 = arith.addf %93, %92 : vector<8x128xf32>
    %95 = arith.divf %93, %94 : vector<8x128xf32>
    %96 = vector.extract_strided_slice %83 {offsets = [0, 256], sizes = [8, 128], strides = [1, 1]} : vector<8x512xf32> to vector<8x128xf32>
    %97 = math.tanh %96 : vector<8x128xf32>
    %98 = vector.extract_strided_slice %83 {offsets = [0, 384], sizes = [8, 128], strides = [1, 1]} : vector<8x512xf32> to vector<8x128xf32>
    %99 = arith.negf %98 : vector<8x128xf32>
    %100 = math.exp %99 : vector<8x128xf32>
    %cst_27 = arith.constant 1.000000e+00 : f32
    %101 = vector.broadcast %cst_27 : f32 to vector<8x128xf32>
    %102 = arith.addf %101, %100 : vector<8x128xf32>
    %103 = arith.divf %101, %102 : vector<8x128xf32>
    %104 = arith.mulf %95, %70 : vector<8x128xf32>
    %105 = arith.mulf %89, %97 : vector<8x128xf32>
    %106 = arith.addf %104, %105 : vector<8x128xf32>
    %107 = math.tanh %106 : vector<8x128xf32>
    %108 = arith.mulf %103, %107 : vector<8x128xf32>
    %109 = arith.truncf %108 : vector<8x128xf32> to vector<8x128xbf16>
    %110 = arith.index_cast %c2_i32 : i32 to index
    %c0_28 = arith.constant 0 : index
    %c0_29 = arith.constant 0 : index
    %111 = vector.load %arg6[%110, %c0_28, %c0_29] : memref<16x8x128xbf16, #tpu.memory_space<vmem>>, vector<1x8x128xbf16>
    %112 = vector.shape_cast %111 : vector<1x8x128xbf16> to vector<8x128xbf16>
    %113 = vector.shape_cast %109 : vector<8x128xbf16> to vector<1x8x128xbf16>
    tpu.vector_store %arg6[%110, %c0_28, %c0_29], %113 {strides = array<i32>} : memref<16x8x128xbf16, #tpu.memory_space<vmem>>, vector<1x8x128xbf16>,
    %c3_i32 = arith.constant 3 : i32
    %114 = arith.index_cast %c3_i32 : i32 to index
    %c0_30 = arith.constant 0 : index
    %c0_31 = arith.constant 0 : index
    %115 = vector.load %arg2[%114, %c0_30, %c0_31] : memref<16x8x512xf32, #tpu.memory_space<vmem>>, vector<1x8x512xf32>
    %116 = vector.shape_cast %115 : vector<1x8x512xf32> to vector<8x512xf32>
    %117 = arith.truncf %108 : vector<8x128xf32> to vector<8x128xbf16>
    %cst_32 = arith.constant dense<0.000000e+00> : vector<8x512xf32>
    %118 = tpu.matmul %117, %3, %cst_32 {dimension_numbers = #tpu.dot_dimension_numbers<[1], [0], [0], [1], [0, 0, 1, 1], [], []>} : vector<8x128xbf16>, vector<128x512xbf16>, vector<8x512xf32> -> vector<8x512xf32>
    %119 = arith.addf %116, %118 : vector<8x512xf32>
    %120 = vector.extract_strided_slice %119 {offsets = [0, 0], sizes = [8, 128], strides = [1, 1]} : vector<8x512xf32> to vector<8x128xf32>
    %121 = arith.negf %120 : vector<8x128xf32>
    %122 = math.exp %121 : vector<8x128xf32>
    %cst_33 = arith.constant 1.000000e+00 : f32
    %123 = vector.broadcast %cst_33 : f32 to vector<8x128xf32>
    %124 = arith.addf %123, %122 : vector<8x128xf32>
    %125 = arith.divf %123, %124 : vector<8x128xf32>
    %126 = vector.extract_strided_slice %119 {offsets = [0, 128], sizes = [8, 128], strides = [1, 1]} : vector<8x512xf32> to vector<8x128xf32>
    %127 = arith.negf %126 : vector<8x128xf32>
    %128 = math.exp %127 : vector<8x128xf32>
    %cst_34 = arith.constant 1.000000e+00 : f32
    %129 = vector.broadcast %cst_34 : f32 to vector<8x128xf32>
    %130 = arith.addf %129, %128 : vector<8x128xf32>
    %131 = arith.divf %129, %130 : vector<8x128xf32>
    %132 = vector.extract_strided_slice %119 {offsets = [0, 256], sizes = [8, 128], strides = [1, 1]} : vector<8x512xf32> to vector<8x128xf32>
    %133 = math.tanh %132 : vector<8x128xf32>
    %134 = vector.extract_strided_slice %119 {offsets = [0, 384], sizes = [8, 128], strides = [1, 1]} : vector<8x512xf32> to vector<8x128xf32>
    %135 = arith.negf %134 : vector<8x128xf32>
    %136 = math.exp %135 : vector<8x128xf32>
    %cst_35 = arith.constant 1.000000e+00 : f32
    %137 = vector.broadcast %cst_35 : f32 to vector<8x128xf32>
    %138 = arith.addf %137, %136 : vector<8x128xf32>
    %139 = arith.divf %137, %138 : vector<8x128xf32>
    %140 = arith.mulf %131, %106 : vector<8x128xf32>
    %141 = arith.mulf %125, %133 : vector<8x128xf32>
    %142 = arith.addf %140, %141 : vector<8x128xf32>
    %143 = math.tanh %142 : vector<8x128xf32>
    %144 = arith.mulf %139, %143 : vector<8x128xf32>
    %145 = arith.truncf %144 : vector<8x128xf32> to vector<8x128xbf16>
    %146 = arith.index_cast %c3_i32 : i32 to index
    %c0_36 = arith.constant 0 : index
    %c0_37 = arith.constant 0 : index
    %147 = vector.load %arg6[%146, %c0_36, %c0_37] : memref<16x8x128xbf16, #tpu.memory_space<vmem>>, vector<1x8x128xbf16>
    %148 = vector.shape_cast %147 : vector<1x8x128xbf16> to vector<8x128xbf16>
    %149 = vector.shape_cast %145 : vector<8x128xbf16> to vector<1x8x128xbf16>
    tpu.vector_store %arg6[%146, %c0_36, %c0_37], %149 {strides = array<i32>} : memref<16x8x128xbf16, #tpu.memory_space<vmem>>, vector<1x8x128xbf16>,
    %c4_i32 = arith.constant 4 : i32
    %150 = arith.index_cast %c4_i32 : i32 to index
    %c0_38 = arith.constant 0 : index
    %c0_39 = arith.constant 0 : index
    %151 = vector.load %arg2[%150, %c0_38, %c0_39] : memref<16x8x512xf32, #tpu.memory_space<vmem>>, vector<1x8x512xf32>
    %152 = vector.shape_cast %151 : vector<1x8x512xf32> to vector<8x512xf32>
    %153 = arith.truncf %144 : vector<8x128xf32> to vector<8x128xbf16>
    %cst_40 = arith.constant dense<0.000000e+00> : vector<8x512xf32>
    %154 = tpu.matmul %153, %3, %cst_40 {dimension_numbers = #tpu.dot_dimension_numbers<[1], [0], [0], [1], [0, 0, 1, 1], [], []>} : vector<8x128xbf16>, vector<128x512xbf16>, vector<8x512xf32> -> vector<8x512xf32>
    %155 = arith.addf %152, %154 : vector<8x512xf32>
    %156 = vector.extract_strided_slice %155 {offsets = [0, 0], sizes = [8, 128], strides = [1, 1]} : vector<8x512xf32> to vector<8x128xf32>
    %157 = arith.negf %156 : vector<8x128xf32>
    %158 = math.exp %157 : vector<8x128xf32>
    %cst_41 = arith.constant 1.000000e+00 : f32
    %159 = vector.broadcast %cst_41 : f32 to vector<8x128xf32>
    %160 = arith.addf %159, %158 : vector<8x128xf32>
    %161 = arith.divf %159, %160 : vector<8x128xf32>
    %162 = vector.extract_strided_slice %155 {offsets = [0, 128], sizes = [8, 128], strides = [1, 1]} : vector<8x512xf32> to vector<8x128xf32>
    %163 = arith.negf %162 : vector<8x128xf32>
    %164 = math.exp %163 : vector<8x128xf32>
    %cst_42 = arith.constant 1.000000e+00 : f32
    %165 = vector.broadcast %cst_42 : f32 to vector<8x128xf32>
    %166 = arith.addf %165, %164 : vector<8x128xf32>
    %167 = arith.divf %165, %166 : vector<8x128xf32>
    %168 = vector.extract_strided_slice %155 {offsets = [0, 256], sizes = [8, 128], strides = [1, 1]} : vector<8x512xf32> to vector<8x128xf32>
    %169 = math.tanh %168 : vector<8x128xf32>
    %170 = vector.extract_strided_slice %155 {offsets = [0, 384], sizes = [8, 128], strides = [1, 1]} : vector<8x512xf32> to vector<8x128xf32>
    %171 = arith.negf %170 : vector<8x128xf32>
    %172 = math.exp %171 : vector<8x128xf32>
    %cst_43 = arith.constant 1.000000e+00 : f32
    %173 = vector.broadcast %cst_43 : f32 to vector<8x128xf32>
    %174 = arith.addf %173, %172 : vector<8x128xf32>
    %175 = arith.divf %173, %174 : vector<8x128xf32>
    %176 = arith.mulf %167, %142 : vector<8x128xf32>
    %177 = arith.mulf %161, %169 : vector<8x128xf32>
    %178 = arith.addf %176, %177 : vector<8x128xf32>
    %179 = math.tanh %178 : vector<8x128xf32>
    %180 = arith.mulf %175, %179 : vector<8x128xf32>
    %181 = arith.truncf %180 : vector<8x128xf32> to vector<8x128xbf16>
    %182 = arith.index_cast %c4_i32 : i32 to index
    %c0_44 = arith.constant 0 : index
    %c0_45 = arith.constant 0 : index
    %183 = vector.load %arg6[%182, %c0_44, %c0_45] : memref<16x8x128xbf16, #tpu.memory_space<vmem>>, vector<1x8x128xbf16>
    %184 = vector.shape_cast %183 : vector<1x8x128xbf16> to vector<8x128xbf16>
    %185 = vector.shape_cast %181 : vector<8x128xbf16> to vector<1x8x128xbf16>
    tpu.vector_store %arg6[%182, %c0_44, %c0_45], %185 {strides = array<i32>} : memref<16x8x128xbf16, #tpu.memory_space<vmem>>, vector<1x8x128xbf16>,
    %c5_i32 = arith.constant 5 : i32
    %186 = arith.index_cast %c5_i32 : i32 to index
    %c0_46 = arith.constant 0 : index
    %c0_47 = arith.constant 0 : index
    %187 = vector.load %arg2[%186, %c0_46, %c0_47] : memref<16x8x512xf32, #tpu.memory_space<vmem>>, vector<1x8x512xf32>
    %188 = vector.shape_cast %187 : vector<1x8x512xf32> to vector<8x512xf32>
    %189 = arith.truncf %180 : vector<8x128xf32> to vector<8x128xbf16>
    %cst_48 = arith.constant dense<0.000000e+00> : vector<8x512xf32>
    %190 = tpu.matmul %189, %3, %cst_48 {dimension_numbers = #tpu.dot_dimension_numbers<[1], [0], [0], [1], [0, 0, 1, 1], [], []>} : vector<8x128xbf16>, vector<128x512xbf16>, vector<8x512xf32> -> vector<8x512xf32>
    %191 = arith.addf %188, %190 : vector<8x512xf32>
    %192 = vector.extract_strided_slice %191 {offsets = [0, 0], sizes = [8, 128], strides = [1, 1]} : vector<8x512xf32> to vector<8x128xf32>
    %193 = arith.negf %192 : vector<8x128xf32>
    %194 = math.exp %193 : vector<8x128xf32>
    %cst_49 = arith.constant 1.000000e+00 : f32
    %195 = vector.broadcast %cst_49 : f32 to vector<8x128xf32>
    %196 = arith.addf %195, %194 : vector<8x128xf32>
    %197 = arith.divf %195, %196 : vector<8x128xf32>
    %198 = vector.extract_strided_slice %191 {offsets = [0, 128], sizes = [8, 128], strides = [1, 1]} : vector<8x512xf32> to vector<8x128xf32>
    %199 = arith.negf %198 : vector<8x128xf32>
    %200 = math.exp %199 : vector<8x128xf32>
    %cst_50 = arith.constant 1.000000e+00 : f32
    %201 = vector.broadcast %cst_50 : f32 to vector<8x128xf32>
    %202 = arith.addf %201, %200 : vector<8x128xf32>
    %203 = arith.divf %201, %202 : vector<8x128xf32>
    %204 = vector.extract_strided_slice %191 {offsets = [0, 256], sizes = [8, 128], strides = [1, 1]} : vector<8x512xf32> to vector<8x128xf32>
    %205 = math.tanh %204 : vector<8x128xf32>
    %206 = vector.extract_strided_slice %191 {offsets = [0, 384], sizes = [8, 128], strides = [1, 1]} : vector<8x512xf32> to vector<8x128xf32>
    %207 = arith.negf %206 : vector<8x128xf32>
    %208 = math.exp %207 : vector<8x128xf32>
    %cst_51 = arith.constant 1.000000e+00 : f32
    %209 = vector.broadcast %cst_51 : f32 to vector<8x128xf32>
    %210 = arith.addf %209, %208 : vector<8x128xf32>
    %211 = arith.divf %209, %210 : vector<8x128xf32>
    %212 = arith.mulf %203, %178 : vector<8x128xf32>
    %213 = arith.mulf %197, %205 : vector<8x128xf32>
    %214 = arith.addf %212, %213 : vector<8x128xf32>
    %215 = math.tanh %214 : vector<8x128xf32>
    %216 = arith.mulf %211, %215 : vector<8x128xf32>
    %217 = arith.truncf %216 : vector<8x128xf32> to vector<8x128xbf16>
    %218 = arith.index_cast %c5_i32 : i32 to index
    %c0_52 = arith.constant 0 : index
    %c0_53 = arith.constant 0 : index
    %219 = vector.load %arg6[%218, %c0_52, %c0_53] : memref<16x8x128xbf16, #tpu.memory_space<vmem>>, vector<1x8x128xbf16>
    %220 = vector.shape_cast %219 : vector<1x8x128xbf16> to vector<8x128xbf16>
    %221 = vector.shape_cast %217 : vector<8x128xbf16> to vector<1x8x128xbf16>
    tpu.vector_store %arg6[%218, %c0_52, %c0_53], %221 {strides = array<i32>} : memref<16x8x128xbf16, #tpu.memory_space<vmem>>, vector<1x8x128xbf16>,
    %c6_i32 = arith.constant 6 : i32
    %222 = arith.index_cast %c6_i32 : i32 to index
    %c0_54 = arith.constant 0 : index
    %c0_55 = arith.constant 0 : index
    %223 = vector.load %arg2[%222, %c0_54, %c0_55] : memref<16x8x512xf32, #tpu.memory_space<vmem>>, vector<1x8x512xf32>
    %224 = vector.shape_cast %223 : vector<1x8x512xf32> to vector<8x512xf32>
    %225 = arith.truncf %216 : vector<8x128xf32> to vector<8x128xbf16>
    %cst_56 = arith.constant dense<0.000000e+00> : vector<8x512xf32>
    %226 = tpu.matmul %225, %3, %cst_56 {dimension_numbers = #tpu.dot_dimension_numbers<[1], [0], [0], [1], [0, 0, 1, 1], [], []>} : vector<8x128xbf16>, vector<128x512xbf16>, vector<8x512xf32> -> vector<8x512xf32>
    %227 = arith.addf %224, %226 : vector<8x512xf32>
    %228 = vector.extract_strided_slice %227 {offsets = [0, 0], sizes = [8, 128], strides = [1, 1]} : vector<8x512xf32> to vector<8x128xf32>
    %229 = arith.negf %228 : vector<8x128xf32>
    %230 = math.exp %229 : vector<8x128xf32>
    %cst_57 = arith.constant 1.000000e+00 : f32
    %231 = vector.broadcast %cst_57 : f32 to vector<8x128xf32>
    %232 = arith.addf %231, %230 : vector<8x128xf32>
    %233 = arith.divf %231, %232 : vector<8x128xf32>
    %234 = vector.extract_strided_slice %227 {offsets = [0, 128], sizes = [8, 128], strides = [1, 1]} : vector<8x512xf32> to vector<8x128xf32>
    %235 = arith.negf %234 : vector<8x128xf32>
    %236 = math.exp %235 : vector<8x128xf32>
    %cst_58 = arith.constant 1.000000e+00 : f32
    %237 = vector.broadcast %cst_58 : f32 to vector<8x128xf32>
    %238 = arith.addf %237, %236 : vector<8x128xf32>
    %239 = arith.divf %237, %238 : vector<8x128xf32>
    %240 = vector.extract_strided_slice %227 {offsets = [0, 256], sizes = [8, 128], strides = [1, 1]} : vector<8x512xf32> to vector<8x128xf32>
    %241 = math.tanh %240 : vector<8x128xf32>
    %242 = vector.extract_strided_slice %227 {offsets = [0, 384], sizes = [8, 128], strides = [1, 1]} : vector<8x512xf32> to vector<8x128xf32>
    %243 = arith.negf %242 : vector<8x128xf32>
    %244 = math.exp %243 : vector<8x128xf32>
    %cst_59 = arith.constant 1.000000e+00 : f32
    %245 = vector.broadcast %cst_59 : f32 to vector<8x128xf32>
    %246 = arith.addf %245, %244 : vector<8x128xf32>
    %247 = arith.divf %245, %246 : vector<8x128xf32>
    %248 = arith.mulf %239, %214 : vector<8x128xf32>
    %249 = arith.mulf %233, %241 : vector<8x128xf32>
    %250 = arith.addf %248, %249 : vector<8x128xf32>
    %251 = math.tanh %250 : vector<8x128xf32>
    %252 = arith.mulf %247, %251 : vector<8x128xf32>
    %253 = arith.truncf %252 : vector<8x128xf32> to vector<8x128xbf16>
    %254 = arith.index_cast %c6_i32 : i32 to index
    %c0_60 = arith.constant 0 : index
    %c0_61 = arith.constant 0 : index
    %255 = vector.load %arg6[%254, %c0_60, %c0_61] : memref<16x8x128xbf16, #tpu.memory_space<vmem>>, vector<1x8x128xbf16>
    %256 = vector.shape_cast %255 : vector<1x8x128xbf16> to vector<8x128xbf16>
    %257 = vector.shape_cast %253 : vector<8x128xbf16> to vector<1x8x128xbf16>
    tpu.vector_store %arg6[%254, %c0_60, %c0_61], %257 {strides = array<i32>} : memref<16x8x128xbf16, #tpu.memory_space<vmem>>, vector<1x8x128xbf16>,
    %c7_i32 = arith.constant 7 : i32
    %258 = arith.index_cast %c7_i32 : i32 to index
    %c0_62 = arith.constant 0 : index
    %c0_63 = arith.constant 0 : index
    %259 = vector.load %arg2[%258, %c0_62, %c0_63] : memref<16x8x512xf32, #tpu.memory_space<vmem>>, vector<1x8x512xf32>
    %260 = vector.shape_cast %259 : vector<1x8x512xf32> to vector<8x512xf32>
    %261 = arith.truncf %252 : vector<8x128xf32> to vector<8x128xbf16>
    %cst_64 = arith.constant dense<0.000000e+00> : vector<8x512xf32>
    %262 = tpu.matmul %261, %3, %cst_64 {dimension_numbers = #tpu.dot_dimension_numbers<[1], [0], [0], [1], [0, 0, 1, 1], [], []>} : vector<8x128xbf16>, vector<128x512xbf16>, vector<8x512xf32> -> vector<8x512xf32>
    %263 = arith.addf %260, %262 : vector<8x512xf32>
    %264 = vector.extract_strided_slice %263 {offsets = [0, 0], sizes = [8, 128], strides = [1, 1]} : vector<8x512xf32> to vector<8x128xf32>
    %265 = arith.negf %264 : vector<8x128xf32>
    %266 = math.exp %265 : vector<8x128xf32>
    %cst_65 = arith.constant 1.000000e+00 : f32
    %267 = vector.broadcast %cst_65 : f32 to vector<8x128xf32>
    %268 = arith.addf %267, %266 : vector<8x128xf32>
    %269 = arith.divf %267, %268 : vector<8x128xf32>
    %270 = vector.extract_strided_slice %263 {offsets = [0, 128], sizes = [8, 128], strides = [1, 1]} : vector<8x512xf32> to vector<8x128xf32>
    %271 = arith.negf %270 : vector<8x128xf32>
    %272 = math.exp %271 : vector<8x128xf32>
    %cst_66 = arith.constant 1.000000e+00 : f32
    %273 = vector.broadcast %cst_66 : f32 to vector<8x128xf32>
    %274 = arith.addf %273, %272 : vector<8x128xf32>
    %275 = arith.divf %273, %274 : vector<8x128xf32>
    %276 = vector.extract_strided_slice %263 {offsets = [0, 256], sizes = [8, 128], strides = [1, 1]} : vector<8x512xf32> to vector<8x128xf32>
    %277 = math.tanh %276 : vector<8x128xf32>
    %278 = vector.extract_strided_slice %263 {offsets = [0, 384], sizes = [8, 128], strides = [1, 1]} : vector<8x512xf32> to vector<8x128xf32>
    %279 = arith.negf %278 : vector<8x128xf32>
    %280 = math.exp %279 : vector<8x128xf32>
    %cst_67 = arith.constant 1.000000e+00 : f32
    %281 = vector.broadcast %cst_67 : f32 to vector<8x128xf32>
    %282 = arith.addf %281, %280 : vector<8x128xf32>
    %283 = arith.divf %281, %282 : vector<8x128xf32>
    %284 = arith.mulf %275, %250 : vector<8x128xf32>
    %285 = arith.mulf %269, %277 : vector<8x128xf32>
    %286 = arith.addf %284, %285 : vector<8x128xf32>
    %287 = math.tanh %286 : vector<8x128xf32>
    %288 = arith.mulf %283, %287 : vector<8x128xf32>
    %289 = arith.truncf %288 : vector<8x128xf32> to vector<8x128xbf16>
    %290 = arith.index_cast %c7_i32 : i32 to index
    %c0_68 = arith.constant 0 : index
    %c0_69 = arith.constant 0 : index
    %291 = vector.load %arg6[%290, %c0_68, %c0_69] : memref<16x8x128xbf16, #tpu.memory_space<vmem>>, vector<1x8x128xbf16>
    %292 = vector.shape_cast %291 : vector<1x8x128xbf16> to vector<8x128xbf16>
    %293 = vector.shape_cast %289 : vector<8x128xbf16> to vector<1x8x128xbf16>
    tpu.vector_store %arg6[%290, %c0_68, %c0_69], %293 {strides = array<i32>} : memref<16x8x128xbf16, #tpu.memory_space<vmem>>, vector<1x8x128xbf16>,
    %c8_i32 = arith.constant 8 : i32
    %294 = arith.index_cast %c8_i32 : i32 to index
    %c0_70 = arith.constant 0 : index
    %c0_71 = arith.constant 0 : index
    %295 = vector.load %arg2[%294, %c0_70, %c0_71] : memref<16x8x512xf32, #tpu.memory_space<vmem>>, vector<1x8x512xf32>
    %296 = vector.shape_cast %295 : vector<1x8x512xf32> to vector<8x512xf32>
    %297 = arith.truncf %288 : vector<8x128xf32> to vector<8x128xbf16>
    %cst_72 = arith.constant dense<0.000000e+00> : vector<8x512xf32>
    %298 = tpu.matmul %297, %3, %cst_72 {dimension_numbers = #tpu.dot_dimension_numbers<[1], [0], [0], [1], [0, 0, 1, 1], [], []>} : vector<8x128xbf16>, vector<128x512xbf16>, vector<8x512xf32> -> vector<8x512xf32>
    %299 = arith.addf %296, %298 : vector<8x512xf32>
    %300 = vector.extract_strided_slice %299 {offsets = [0, 0], sizes = [8, 128], strides = [1, 1]} : vector<8x512xf32> to vector<8x128xf32>
    %301 = arith.negf %300 : vector<8x128xf32>
    %302 = math.exp %301 : vector<8x128xf32>
    %cst_73 = arith.constant 1.000000e+00 : f32
    %303 = vector.broadcast %cst_73 : f32 to vector<8x128xf32>
    %304 = arith.addf %303, %302 : vector<8x128xf32>
    %305 = arith.divf %303, %304 : vector<8x128xf32>
    %306 = vector.extract_strided_slice %299 {offsets = [0, 128], sizes = [8, 128], strides = [1, 1]} : vector<8x512xf32> to vector<8x128xf32>
    %307 = arith.negf %306 : vector<8x128xf32>
    %308 = math.exp %307 : vector<8x128xf32>
    %cst_74 = arith.constant 1.000000e+00 : f32
    %309 = vector.broadcast %cst_74 : f32 to vector<8x128xf32>
    %310 = arith.addf %309, %308 : vector<8x128xf32>
    %311 = arith.divf %309, %310 : vector<8x128xf32>
    %312 = vector.extract_strided_slice %299 {offsets = [0, 256], sizes = [8, 128], strides = [1, 1]} : vector<8x512xf32> to vector<8x128xf32>
    %313 = math.tanh %312 : vector<8x128xf32>
    %314 = vector.extract_strided_slice %299 {offsets = [0, 384], sizes = [8, 128], strides = [1, 1]} : vector<8x512xf32> to vector<8x128xf32>
    %315 = arith.negf %314 : vector<8x128xf32>
    %316 = math.exp %315 : vector<8x128xf32>
    %cst_75 = arith.constant 1.000000e+00 : f32
    %317 = vector.broadcast %cst_75 : f32 to vector<8x128xf32>
    %318 = arith.addf %317, %316 : vector<8x128xf32>
    %319 = arith.divf %317, %318 : vector<8x128xf32>
    %320 = arith.mulf %311, %286 : vector<8x128xf32>
    %321 = arith.mulf %305, %313 : vector<8x128xf32>
    %322 = arith.addf %320, %321 : vector<8x128xf32>
    %323 = math.tanh %322 : vector<8x128xf32>
    %324 = arith.mulf %319, %323 : vector<8x128xf32>
    %325 = arith.truncf %324 : vector<8x128xf32> to vector<8x128xbf16>
    %326 = arith.index_cast %c8_i32 : i32 to index
    %c0_76 = arith.constant 0 : index
    %c0_77 = arith.constant 0 : index
    %327 = vector.load %arg6[%326, %c0_76, %c0_77] : memref<16x8x128xbf16, #tpu.memory_space<vmem>>, vector<1x8x128xbf16>
    %328 = vector.shape_cast %327 : vector<1x8x128xbf16> to vector<8x128xbf16>
    %329 = vector.shape_cast %325 : vector<8x128xbf16> to vector<1x8x128xbf16>
    tpu.vector_store %arg6[%326, %c0_76, %c0_77], %329 {strides = array<i32>} : memref<16x8x128xbf16, #tpu.memory_space<vmem>>, vector<1x8x128xbf16>,
    %c9_i32 = arith.constant 9 : i32
    %330 = arith.index_cast %c9_i32 : i32 to index
    %c0_78 = arith.constant 0 : index
    %c0_79 = arith.constant 0 : index
    %331 = vector.load %arg2[%330, %c0_78, %c0_79] : memref<16x8x512xf32, #tpu.memory_space<vmem>>, vector<1x8x512xf32>
    %332 = vector.shape_cast %331 : vector<1x8x512xf32> to vector<8x512xf32>
    %333 = arith.truncf %324 : vector<8x128xf32> to vector<8x128xbf16>
    %cst_80 = arith.constant dense<0.000000e+00> : vector<8x512xf32>
    %334 = tpu.matmul %333, %3, %cst_80 {dimension_numbers = #tpu.dot_dimension_numbers<[1], [0], [0], [1], [0, 0, 1, 1], [], []>} : vector<8x128xbf16>, vector<128x512xbf16>, vector<8x512xf32> -> vector<8x512xf32>
    %335 = arith.addf %332, %334 : vector<8x512xf32>
    %336 = vector.extract_strided_slice %335 {offsets = [0, 0], sizes = [8, 128], strides = [1, 1]} : vector<8x512xf32> to vector<8x128xf32>
    %337 = arith.negf %336 : vector<8x128xf32>
    %338 = math.exp %337 : vector<8x128xf32>
    %cst_81 = arith.constant 1.000000e+00 : f32
    %339 = vector.broadcast %cst_81 : f32 to vector<8x128xf32>
    %340 = arith.addf %339, %338 : vector<8x128xf32>
    %341 = arith.divf %339, %340 : vector<8x128xf32>
    %342 = vector.extract_strided_slice %335 {offsets = [0, 128], sizes = [8, 128], strides = [1, 1]} : vector<8x512xf32> to vector<8x128xf32>
    %343 = arith.negf %342 : vector<8x128xf32>
    %344 = math.exp %343 : vector<8x128xf32>
    %cst_82 = arith.constant 1.000000e+00 : f32
    %345 = vector.broadcast %cst_82 : f32 to vector<8x128xf32>
    %346 = arith.addf %345, %344 : vector<8x128xf32>
    %347 = arith.divf %345, %346 : vector<8x128xf32>
    %348 = vector.extract_strided_slice %335 {offsets = [0, 256], sizes = [8, 128], strides = [1, 1]} : vector<8x512xf32> to vector<8x128xf32>
    %349 = math.tanh %348 : vector<8x128xf32>
    %350 = vector.extract_strided_slice %335 {offsets = [0, 384], sizes = [8, 128], strides = [1, 1]} : vector<8x512xf32> to vector<8x128xf32>
    %351 = arith.negf %350 : vector<8x128xf32>
    %352 = math.exp %351 : vector<8x128xf32>
    %cst_83 = arith.constant 1.000000e+00 : f32
    %353 = vector.broadcast %cst_83 : f32 to vector<8x128xf32>
    %354 = arith.addf %353, %352 : vector<8x128xf32>
    %355 = arith.divf %353, %354 : vector<8x128xf32>
    %356 = arith.mulf %347, %322 : vector<8x128xf32>
    %357 = arith.mulf %341, %349 : vector<8x128xf32>
    %358 = arith.addf %356, %357 : vector<8x128xf32>
    %359 = math.tanh %358 : vector<8x128xf32>
    %360 = arith.mulf %355, %359 : vector<8x128xf32>
    %361 = arith.truncf %360 : vector<8x128xf32> to vector<8x128xbf16>
    %362 = arith.index_cast %c9_i32 : i32 to index
    %c0_84 = arith.constant 0 : index
    %c0_85 = arith.constant 0 : index
    %363 = vector.load %arg6[%362, %c0_84, %c0_85] : memref<16x8x128xbf16, #tpu.memory_space<vmem>>, vector<1x8x128xbf16>
    %364 = vector.shape_cast %363 : vector<1x8x128xbf16> to vector<8x128xbf16>
    %365 = vector.shape_cast %361 : vector<8x128xbf16> to vector<1x8x128xbf16>
    tpu.vector_store %arg6[%362, %c0_84, %c0_85], %365 {strides = array<i32>} : memref<16x8x128xbf16, #tpu.memory_space<vmem>>, vector<1x8x128xbf16>,
    %c10_i32 = arith.constant 10 : i32
    %366 = arith.index_cast %c10_i32 : i32 to index
    %c0_86 = arith.constant 0 : index
    %c0_87 = arith.constant 0 : index
    %367 = vector.load %arg2[%366, %c0_86, %c0_87] : memref<16x8x512xf32, #tpu.memory_space<vmem>>, vector<1x8x512xf32>
    %368 = vector.shape_cast %367 : vector<1x8x512xf32> to vector<8x512xf32>
    %369 = arith.truncf %360 : vector<8x128xf32> to vector<8x128xbf16>
    %cst_88 = arith.constant dense<0.000000e+00> : vector<8x512xf32>
    %370 = tpu.matmul %369, %3, %cst_88 {dimension_numbers = #tpu.dot_dimension_numbers<[1], [0], [0], [1], [0, 0, 1, 1], [], []>} : vector<8x128xbf16>, vector<128x512xbf16>, vector<8x512xf32> -> vector<8x512xf32>
    %371 = arith.addf %368, %370 : vector<8x512xf32>
    %372 = vector.extract_strided_slice %371 {offsets = [0, 0], sizes = [8, 128], strides = [1, 1]} : vector<8x512xf32> to vector<8x128xf32>
    %373 = arith.negf %372 : vector<8x128xf32>
    %374 = math.exp %373 : vector<8x128xf32>
    %cst_89 = arith.constant 1.000000e+00 : f32
    %375 = vector.broadcast %cst_89 : f32 to vector<8x128xf32>
    %376 = arith.addf %375, %374 : vector<8x128xf32>
    %377 = arith.divf %375, %376 : vector<8x128xf32>
    %378 = vector.extract_strided_slice %371 {offsets = [0, 128], sizes = [8, 128], strides = [1, 1]} : vector<8x512xf32> to vector<8x128xf32>
    %379 = arith.negf %378 : vector<8x128xf32>
    %380 = math.exp %379 : vector<8x128xf32>
    %cst_90 = arith.constant 1.000000e+00 : f32
    %381 = vector.broadcast %cst_90 : f32 to vector<8x128xf32>
    %382 = arith.addf %381, %380 : vector<8x128xf32>
    %383 = arith.divf %381, %382 : vector<8x128xf32>
    %384 = vector.extract_strided_slice %371 {offsets = [0, 256], sizes = [8, 128], strides = [1, 1]} : vector<8x512xf32> to vector<8x128xf32>
    %385 = math.tanh %384 : vector<8x128xf32>
    %386 = vector.extract_strided_slice %371 {offsets = [0, 384], sizes = [8, 128], strides = [1, 1]} : vector<8x512xf32> to vector<8x128xf32>
    %387 = arith.negf %386 : vector<8x128xf32>
    %388 = math.exp %387 : vector<8x128xf32>
    %cst_91 = arith.constant 1.000000e+00 : f32
    %389 = vector.broadcast %cst_91 : f32 to vector<8x128xf32>
    %390 = arith.addf %389, %388 : vector<8x128xf32>
    %391 = arith.divf %389, %390 : vector<8x128xf32>
    %392 = arith.mulf %383, %358 : vector<8x128xf32>
    %393 = arith.mulf %377, %385 : vector<8x128xf32>
    %394 = arith.addf %392, %393 : vector<8x128xf32>
    %395 = math.tanh %394 : vector<8x128xf32>
    %396 = arith.mulf %391, %395 : vector<8x128xf32>
    %397 = arith.truncf %396 : vector<8x128xf32> to vector<8x128xbf16>
    %398 = arith.index_cast %c10_i32 : i32 to index
    %c0_92 = arith.constant 0 : index
    %c0_93 = arith.constant 0 : index
    %399 = vector.load %arg6[%398, %c0_92, %c0_93] : memref<16x8x128xbf16, #tpu.memory_space<vmem>>, vector<1x8x128xbf16>
    %400 = vector.shape_cast %399 : vector<1x8x128xbf16> to vector<8x128xbf16>
    %401 = vector.shape_cast %397 : vector<8x128xbf16> to vector<1x8x128xbf16>
    tpu.vector_store %arg6[%398, %c0_92, %c0_93], %401 {strides = array<i32>} : memref<16x8x128xbf16, #tpu.memory_space<vmem>>, vector<1x8x128xbf16>,
    %c11_i32 = arith.constant 11 : i32
    %402 = arith.index_cast %c11_i32 : i32 to index
    %c0_94 = arith.constant 0 : index
    %c0_95 = arith.constant 0 : index
    %403 = vector.load %arg2[%402, %c0_94, %c0_95] : memref<16x8x512xf32, #tpu.memory_space<vmem>>, vector<1x8x512xf32>
    %404 = vector.shape_cast %403 : vector<1x8x512xf32> to vector<8x512xf32>
    %405 = arith.truncf %396 : vector<8x128xf32> to vector<8x128xbf16>
    %cst_96 = arith.constant dense<0.000000e+00> : vector<8x512xf32>
    %406 = tpu.matmul %405, %3, %cst_96 {dimension_numbers = #tpu.dot_dimension_numbers<[1], [0], [0], [1], [0, 0, 1, 1], [], []>} : vector<8x128xbf16>, vector<128x512xbf16>, vector<8x512xf32> -> vector<8x512xf32>
    %407 = arith.addf %404, %406 : vector<8x512xf32>
    %408 = vector.extract_strided_slice %407 {offsets = [0, 0], sizes = [8, 128], strides = [1, 1]} : vector<8x512xf32> to vector<8x128xf32>
    %409 = arith.negf %408 : vector<8x128xf32>
    %410 = math.exp %409 : vector<8x128xf32>
    %cst_97 = arith.constant 1.000000e+00 : f32
    %411 = vector.broadcast %cst_97 : f32 to vector<8x128xf32>
    %412 = arith.addf %411, %410 : vector<8x128xf32>
    %413 = arith.divf %411, %412 : vector<8x128xf32>
    %414 = vector.extract_strided_slice %407 {offsets = [0, 128], sizes = [8, 128], strides = [1, 1]} : vector<8x512xf32> to vector<8x128xf32>
    %415 = arith.negf %414 : vector<8x128xf32>
    %416 = math.exp %415 : vector<8x128xf32>
    %cst_98 = arith.constant 1.000000e+00 : f32
    %417 = vector.broadcast %cst_98 : f32 to vector<8x128xf32>
    %418 = arith.addf %417, %416 : vector<8x128xf32>
    %419 = arith.divf %417, %418 : vector<8x128xf32>
    %420 = vector.extract_strided_slice %407 {offsets = [0, 256], sizes = [8, 128], strides = [1, 1]} : vector<8x512xf32> to vector<8x128xf32>
    %421 = math.tanh %420 : vector<8x128xf32>
    %422 = vector.extract_strided_slice %407 {offsets = [0, 384], sizes = [8, 128], strides = [1, 1]} : vector<8x512xf32> to vector<8x128xf32>
    %423 = arith.negf %422 : vector<8x128xf32>
    %424 = math.exp %423 : vector<8x128xf32>
    %cst_99 = arith.constant 1.000000e+00 : f32
    %425 = vector.broadcast %cst_99 : f32 to vector<8x128xf32>
    %426 = arith.addf %425, %424 : vector<8x128xf32>
    %427 = arith.divf %425, %426 : vector<8x128xf32>
    %428 = arith.mulf %419, %394 : vector<8x128xf32>
    %429 = arith.mulf %413, %421 : vector<8x128xf32>
    %430 = arith.addf %428, %429 : vector<8x128xf32>
    %431 = math.tanh %430 : vector<8x128xf32>
    %432 = arith.mulf %427, %431 : vector<8x128xf32>
    %433 = arith.truncf %432 : vector<8x128xf32> to vector<8x128xbf16>
    %434 = arith.index_cast %c11_i32 : i32 to index
    %c0_100 = arith.constant 0 : index
    %c0_101 = arith.constant 0 : index
    %435 = vector.load %arg6[%434, %c0_100, %c0_101] : memref<16x8x128xbf16, #tpu.memory_space<vmem>>, vector<1x8x128xbf16>
    %436 = vector.shape_cast %435 : vector<1x8x128xbf16> to vector<8x128xbf16>
    %437 = vector.shape_cast %433 : vector<8x128xbf16> to vector<1x8x128xbf16>
    tpu.vector_store %arg6[%434, %c0_100, %c0_101], %437 {strides = array<i32>} : memref<16x8x128xbf16, #tpu.memory_space<vmem>>, vector<1x8x128xbf16>,
    %c12_i32 = arith.constant 12 : i32
    %438 = arith.index_cast %c12_i32 : i32 to index
    %c0_102 = arith.constant 0 : index
    %c0_103 = arith.constant 0 : index
    %439 = vector.load %arg2[%438, %c0_102, %c0_103] : memref<16x8x512xf32, #tpu.memory_space<vmem>>, vector<1x8x512xf32>
    %440 = vector.shape_cast %439 : vector<1x8x512xf32> to vector<8x512xf32>
    %441 = arith.truncf %432 : vector<8x128xf32> to vector<8x128xbf16>
    %cst_104 = arith.constant dense<0.000000e+00> : vector<8x512xf32>
    %442 = tpu.matmul %441, %3, %cst_104 {dimension_numbers = #tpu.dot_dimension_numbers<[1], [0], [0], [1], [0, 0, 1, 1], [], []>} : vector<8x128xbf16>, vector<128x512xbf16>, vector<8x512xf32> -> vector<8x512xf32>
    %443 = arith.addf %440, %442 : vector<8x512xf32>
    %444 = vector.extract_strided_slice %443 {offsets = [0, 0], sizes = [8, 128], strides = [1, 1]} : vector<8x512xf32> to vector<8x128xf32>
    %445 = arith.negf %444 : vector<8x128xf32>
    %446 = math.exp %445 : vector<8x128xf32>
    %cst_105 = arith.constant 1.000000e+00 : f32
    %447 = vector.broadcast %cst_105 : f32 to vector<8x128xf32>
    %448 = arith.addf %447, %446 : vector<8x128xf32>
    %449 = arith.divf %447, %448 : vector<8x128xf32>
    %450 = vector.extract_strided_slice %443 {offsets = [0, 128], sizes = [8, 128], strides = [1, 1]} : vector<8x512xf32> to vector<8x128xf32>
    %451 = arith.negf %450 : vector<8x128xf32>
    %452 = math.exp %451 : vector<8x128xf32>
    %cst_106 = arith.constant 1.000000e+00 : f32
    %453 = vector.broadcast %cst_106 : f32 to vector<8x128xf32>
    %454 = arith.addf %453, %452 : vector<8x128xf32>
    %455 = arith.divf %453, %454 : vector<8x128xf32>
    %456 = vector.extract_strided_slice %443 {offsets = [0, 256], sizes = [8, 128], strides = [1, 1]} : vector<8x512xf32> to vector<8x128xf32>
    %457 = math.tanh %456 : vector<8x128xf32>
    %458 = vector.extract_strided_slice %443 {offsets = [0, 384], sizes = [8, 128], strides = [1, 1]} : vector<8x512xf32> to vector<8x128xf32>
    %459 = arith.negf %458 : vector<8x128xf32>
    %460 = math.exp %459 : vector<8x128xf32>
    %cst_107 = arith.constant 1.000000e+00 : f32
    %461 = vector.broadcast %cst_107 : f32 to vector<8x128xf32>
    %462 = arith.addf %461, %460 : vector<8x128xf32>
    %463 = arith.divf %461, %462 : vector<8x128xf32>
    %464 = arith.mulf %455, %430 : vector<8x128xf32>
    %465 = arith.mulf %449, %457 : vector<8x128xf32>
    %466 = arith.addf %464, %465 : vector<8x128xf32>
    %467 = math.tanh %466 : vector<8x128xf32>
    %468 = arith.mulf %463, %467 : vector<8x128xf32>
    %469 = arith.truncf %468 : vector<8x128xf32> to vector<8x128xbf16>
    %470 = arith.index_cast %c12_i32 : i32 to index
    %c0_108 = arith.constant 0 : index
    %c0_109 = arith.constant 0 : index
    %471 = vector.load %arg6[%470, %c0_108, %c0_109] : memref<16x8x128xbf16, #tpu.memory_space<vmem>>, vector<1x8x128xbf16>
    %472 = vector.shape_cast %471 : vector<1x8x128xbf16> to vector<8x128xbf16>
    %473 = vector.shape_cast %469 : vector<8x128xbf16> to vector<1x8x128xbf16>
    tpu.vector_store %arg6[%470, %c0_108, %c0_109], %473 {strides = array<i32>} : memref<16x8x128xbf16, #tpu.memory_space<vmem>>, vector<1x8x128xbf16>,
    %c13_i32 = arith.constant 13 : i32
    %474 = arith.index_cast %c13_i32 : i32 to index
    %c0_110 = arith.constant 0 : index
    %c0_111 = arith.constant 0 : index
    %475 = vector.load %arg2[%474, %c0_110, %c0_111] : memref<16x8x512xf32, #tpu.memory_space<vmem>>, vector<1x8x512xf32>
    %476 = vector.shape_cast %475 : vector<1x8x512xf32> to vector<8x512xf32>
    %477 = arith.truncf %468 : vector<8x128xf32> to vector<8x128xbf16>
    %cst_112 = arith.constant dense<0.000000e+00> : vector<8x512xf32>
    %478 = tpu.matmul %477, %3, %cst_112 {dimension_numbers = #tpu.dot_dimension_numbers<[1], [0], [0], [1], [0, 0, 1, 1], [], []>} : vector<8x128xbf16>, vector<128x512xbf16>, vector<8x512xf32> -> vector<8x512xf32>
    %479 = arith.addf %476, %478 : vector<8x512xf32>
    %480 = vector.extract_strided_slice %479 {offsets = [0, 0], sizes = [8, 128], strides = [1, 1]} : vector<8x512xf32> to vector<8x128xf32>
    %481 = arith.negf %480 : vector<8x128xf32>
    %482 = math.exp %481 : vector<8x128xf32>
    %cst_113 = arith.constant 1.000000e+00 : f32
    %483 = vector.broadcast %cst_113 : f32 to vector<8x128xf32>
    %484 = arith.addf %483, %482 : vector<8x128xf32>
    %485 = arith.divf %483, %484 : vector<8x128xf32>
    %486 = vector.extract_strided_slice %479 {offsets = [0, 128], sizes = [8, 128], strides = [1, 1]} : vector<8x512xf32> to vector<8x128xf32>
    %487 = arith.negf %486 : vector<8x128xf32>
    %488 = math.exp %487 : vector<8x128xf32>
    %cst_114 = arith.constant 1.000000e+00 : f32
    %489 = vector.broadcast %cst_114 : f32 to vector<8x128xf32>
    %490 = arith.addf %489, %488 : vector<8x128xf32>
    %491 = arith.divf %489, %490 : vector<8x128xf32>
    %492 = vector.extract_strided_slice %479 {offsets = [0, 256], sizes = [8, 128], strides = [1, 1]} : vector<8x512xf32> to vector<8x128xf32>
    %493 = math.tanh %492 : vector<8x128xf32>
    %494 = vector.extract_strided_slice %479 {offsets = [0, 384], sizes = [8, 128], strides = [1, 1]} : vector<8x512xf32> to vector<8x128xf32>
    %495 = arith.negf %494 : vector<8x128xf32>
    %496 = math.exp %495 : vector<8x128xf32>
    %cst_115 = arith.constant 1.000000e+00 : f32
    %497 = vector.broadcast %cst_115 : f32 to vector<8x128xf32>
    %498 = arith.addf %497, %496 : vector<8x128xf32>
    %499 = arith.divf %497, %498 : vector<8x128xf32>
    %500 = arith.mulf %491, %466 : vector<8x128xf32>
    %501 = arith.mulf %485, %493 : vector<8x128xf32>
    %502 = arith.addf %500, %501 : vector<8x128xf32>
    %503 = math.tanh %502 : vector<8x128xf32>
    %504 = arith.mulf %499, %503 : vector<8x128xf32>
    %505 = arith.truncf %504 : vector<8x128xf32> to vector<8x128xbf16>
    %506 = arith.index_cast %c13_i32 : i32 to index
    %c0_116 = arith.constant 0 : index
    %c0_117 = arith.constant 0 : index
    %507 = vector.load %arg6[%506, %c0_116, %c0_117] : memref<16x8x128xbf16, #tpu.memory_space<vmem>>, vector<1x8x128xbf16>
    %508 = vector.shape_cast %507 : vector<1x8x128xbf16> to vector<8x128xbf16>
    %509 = vector.shape_cast %505 : vector<8x128xbf16> to vector<1x8x128xbf16>
    tpu.vector_store %arg6[%506, %c0_116, %c0_117], %509 {strides = array<i32>} : memref<16x8x128xbf16, #tpu.memory_space<vmem>>, vector<1x8x128xbf16>,
    %c14_i32 = arith.constant 14 : i32
    %510 = arith.index_cast %c14_i32 : i32 to index
    %c0_118 = arith.constant 0 : index
    %c0_119 = arith.constant 0 : index
    %511 = vector.load %arg2[%510, %c0_118, %c0_119] : memref<16x8x512xf32, #tpu.memory_space<vmem>>, vector<1x8x512xf32>
    %512 = vector.shape_cast %511 : vector<1x8x512xf32> to vector<8x512xf32>
    %513 = arith.truncf %504 : vector<8x128xf32> to vector<8x128xbf16>
    %cst_120 = arith.constant dense<0.000000e+00> : vector<8x512xf32>
    %514 = tpu.matmul %513, %3, %cst_120 {dimension_numbers = #tpu.dot_dimension_numbers<[1], [0], [0], [1], [0, 0, 1, 1], [], []>} : vector<8x128xbf16>, vector<128x512xbf16>, vector<8x512xf32> -> vector<8x512xf32>
    %515 = arith.addf %512, %514 : vector<8x512xf32>
    %516 = vector.extract_strided_slice %515 {offsets = [0, 0], sizes = [8, 128], strides = [1, 1]} : vector<8x512xf32> to vector<8x128xf32>
    %517 = arith.negf %516 : vector<8x128xf32>
    %518 = math.exp %517 : vector<8x128xf32>
    %cst_121 = arith.constant 1.000000e+00 : f32
    %519 = vector.broadcast %cst_121 : f32 to vector<8x128xf32>
    %520 = arith.addf %519, %518 : vector<8x128xf32>
    %521 = arith.divf %519, %520 : vector<8x128xf32>
    %522 = vector.extract_strided_slice %515 {offsets = [0, 128], sizes = [8, 128], strides = [1, 1]} : vector<8x512xf32> to vector<8x128xf32>
    %523 = arith.negf %522 : vector<8x128xf32>
    %524 = math.exp %523 : vector<8x128xf32>
    %cst_122 = arith.constant 1.000000e+00 : f32
    %525 = vector.broadcast %cst_122 : f32 to vector<8x128xf32>
    %526 = arith.addf %525, %524 : vector<8x128xf32>
    %527 = arith.divf %525, %526 : vector<8x128xf32>
    %528 = vector.extract_strided_slice %515 {offsets = [0, 256], sizes = [8, 128], strides = [1, 1]} : vector<8x512xf32> to vector<8x128xf32>
    %529 = math.tanh %528 : vector<8x128xf32>
    %530 = vector.extract_strided_slice %515 {offsets = [0, 384], sizes = [8, 128], strides = [1, 1]} : vector<8x512xf32> to vector<8x128xf32>
    %531 = arith.negf %530 : vector<8x128xf32>
    %532 = math.exp %531 : vector<8x128xf32>
    %cst_123 = arith.constant 1.000000e+00 : f32
    %533 = vector.broadcast %cst_123 : f32 to vector<8x128xf32>
    %534 = arith.addf %533, %532 : vector<8x128xf32>
    %535 = arith.divf %533, %534 : vector<8x128xf32>
    %536 = arith.mulf %527, %502 : vector<8x128xf32>
    %537 = arith.mulf %521, %529 : vector<8x128xf32>
    %538 = arith.addf %536, %537 : vector<8x128xf32>
    %539 = math.tanh %538 : vector<8x128xf32>
    %540 = arith.mulf %535, %539 : vector<8x128xf32>
    %541 = arith.truncf %540 : vector<8x128xf32> to vector<8x128xbf16>
    %542 = arith.index_cast %c14_i32 : i32 to index
    %c0_124 = arith.constant 0 : index
    %c0_125 = arith.constant 0 : index
    %543 = vector.load %arg6[%542, %c0_124, %c0_125] : memref<16x8x128xbf16, #tpu.memory_space<vmem>>, vector<1x8x128xbf16>
    %544 = vector.shape_cast %543 : vector<1x8x128xbf16> to vector<8x128xbf16>
    %545 = vector.shape_cast %541 : vector<8x128xbf16> to vector<1x8x128xbf16>
    tpu.vector_store %arg6[%542, %c0_124, %c0_125], %545 {strides = array<i32>} : memref<16x8x128xbf16, #tpu.memory_space<vmem>>, vector<1x8x128xbf16>,
    %c15_i32 = arith.constant 15 : i32
    %546 = arith.index_cast %c15_i32 : i32 to index
    %c0_126 = arith.constant 0 : index
    %c0_127 = arith.constant 0 : index
    %547 = vector.load %arg2[%546, %c0_126, %c0_127] : memref<16x8x512xf32, #tpu.memory_space<vmem>>, vector<1x8x512xf32>
    %548 = vector.shape_cast %547 : vector<1x8x512xf32> to vector<8x512xf32>
    %549 = arith.truncf %540 : vector<8x128xf32> to vector<8x128xbf16>
    %cst_128 = arith.constant dense<0.000000e+00> : vector<8x512xf32>
    %550 = tpu.matmul %549, %3, %cst_128 {dimension_numbers = #tpu.dot_dimension_numbers<[1], [0], [0], [1], [0, 0, 1, 1], [], []>} : vector<8x128xbf16>, vector<128x512xbf16>, vector<8x512xf32> -> vector<8x512xf32>
    %551 = arith.addf %548, %550 : vector<8x512xf32>
    %552 = vector.extract_strided_slice %551 {offsets = [0, 0], sizes = [8, 128], strides = [1, 1]} : vector<8x512xf32> to vector<8x128xf32>
    %553 = arith.negf %552 : vector<8x128xf32>
    %554 = math.exp %553 : vector<8x128xf32>
    %cst_129 = arith.constant 1.000000e+00 : f32
    %555 = vector.broadcast %cst_129 : f32 to vector<8x128xf32>
    %556 = arith.addf %555, %554 : vector<8x128xf32>
    %557 = arith.divf %555, %556 : vector<8x128xf32>
    %558 = vector.extract_strided_slice %551 {offsets = [0, 128], sizes = [8, 128], strides = [1, 1]} : vector<8x512xf32> to vector<8x128xf32>
    %559 = arith.negf %558 : vector<8x128xf32>
    %560 = math.exp %559 : vector<8x128xf32>
    %cst_130 = arith.constant 1.000000e+00 : f32
    %561 = vector.broadcast %cst_130 : f32 to vector<8x128xf32>
    %562 = arith.addf %561, %560 : vector<8x128xf32>
    %563 = arith.divf %561, %562 : vector<8x128xf32>
    %564 = vector.extract_strided_slice %551 {offsets = [0, 256], sizes = [8, 128], strides = [1, 1]} : vector<8x512xf32> to vector<8x128xf32>
    %565 = math.tanh %564 : vector<8x128xf32>
    %566 = vector.extract_strided_slice %551 {offsets = [0, 384], sizes = [8, 128], strides = [1, 1]} : vector<8x512xf32> to vector<8x128xf32>
    %567 = arith.negf %566 : vector<8x128xf32>
    %568 = math.exp %567 : vector<8x128xf32>
    %cst_131 = arith.constant 1.000000e+00 : f32
    %569 = vector.broadcast %cst_131 : f32 to vector<8x128xf32>
    %570 = arith.addf %569, %568 : vector<8x128xf32>
    %571 = arith.divf %569, %570 : vector<8x128xf32>
    %572 = arith.mulf %563, %538 : vector<8x128xf32>
    %573 = arith.mulf %557, %565 : vector<8x128xf32>
    %574 = arith.addf %572, %573 : vector<8x128xf32>
    %575 = math.tanh %574 : vector<8x128xf32>
    %576 = arith.mulf %571, %575 : vector<8x128xf32>
    %577 = arith.truncf %576 : vector<8x128xf32> to vector<8x128xbf16>
    %578 = arith.index_cast %c15_i32 : i32 to index
    %c0_132 = arith.constant 0 : index
    %c0_133 = arith.constant 0 : index
    %579 = vector.load %arg6[%578, %c0_132, %c0_133] : memref<16x8x128xbf16, #tpu.memory_space<vmem>>, vector<1x8x128xbf16>
    %580 = vector.shape_cast %579 : vector<1x8x128xbf16> to vector<8x128xbf16>
    %581 = vector.shape_cast %577 : vector<8x128xbf16> to vector<1x8x128xbf16>
    tpu.vector_store %arg6[%578, %c0_132, %c0_133], %581 {strides = array<i32>} : memref<16x8x128xbf16, #tpu.memory_space<vmem>>, vector<1x8x128xbf16>,
    %c16_i32 = arith.constant 16 : i32
    %c0_134 = arith.constant 0 : index
    %c0_135 = arith.constant 0 : index
    %582 = vector.load %arg9[%c0_134, %c0_135] : memref<8x128xf32, #tpu.memory_space<vmem>>, vector<8x128xf32>
    tpu.vector_store %arg9[%c0_134, %c0_135], %576 {strides = array<i32>} : memref<8x128xf32, #tpu.memory_space<vmem>>, vector<8x128xf32>,
    %c0_136 = arith.constant 0 : index
    %c0_137 = arith.constant 0 : index
    %583 = vector.load %arg10[%c0_136, %c0_137] : memref<8x128xf32, #tpu.memory_space<vmem>>, vector<8x128xf32>
    tpu.vector_store %arg10[%c0_136, %c0_137], %574 {strides = array<i32>} : memref<8x128xf32, #tpu.memory_space<vmem>>, vector<8x128xf32>,
    %c0_i32_138 = arith.constant 0 : i32
    %584 = arith.cmpi eq, %arg1, %c0_i32_138 : i32
    %585 = arith.extui %584 : i1 to i32
    %c0_i32_139 = arith.constant 0 : i32
    %586 = arith.cmpi ne, %585, %c0_i32_139 : i32
    scf.if %586 {
      %c0_140 = arith.constant 0 : index
      %c0_141 = arith.constant 0 : index
      %587 = vector.load %arg7[%c0_140, %c0_141] : memref<8x128xf32, #tpu.memory_space<vmem>>, vector<8x128xf32>
      tpu.vector_store %arg7[%c0_140, %c0_141], %576 {strides = array<i32>} : memref<8x128xf32, #tpu.memory_space<vmem>>, vector<8x128xf32>,
      %c0_142 = arith.constant 0 : index
      %c0_143 = arith.constant 0 : index
      %588 = vector.load %arg8[%c0_142, %c0_143] : memref<8x128xf32, #tpu.memory_space<vmem>>, vector<8x128xf32>
      tpu.vector_store %arg8[%c0_142, %c0_143], %574 {strides = array<i32>} : memref<8x128xf32, #tpu.memory_space<vmem>>, vector<8x128xf32>,
    } else {
    }
    return
  }
  func.func @transform_0(%arg0: i32, %arg1: i32) -> (i32, i32, i32) {
    %c0_i32 = arith.constant 0 : i32
    %c0_i32_0 = arith.constant 0 : i32
    return %arg1, %arg0, %c0_i32 : i32, i32, i32
  }
  func.func @transform_1(%arg0: i32, %arg1: i32) -> (i32, i32) {
    %c0_i32 = arith.constant 0 : i32
    %c0_i32_0 = arith.constant 0 : i32
    %c0_i32_1 = arith.constant 0 : i32
    return %c0_i32, %c0_i32_0 : i32, i32
  }
  func.func @transform_2(%arg0: i32, %arg1: i32) -> (i32, i32) {
    %c0_i32 = arith.constant 0 : i32
    %c0_i32_0 = arith.constant 0 : i32
    return %arg0, %c0_i32 : i32, i32
  }
  func.func @transform_3(%arg0: i32, %arg1: i32) -> (i32, i32) {
    %c0_i32 = arith.constant 0 : i32
    %c0_i32_0 = arith.constant 0 : i32
    return %arg0, %c0_i32 : i32, i32
  }
  func.func @transform_4(%arg0: i32, %arg1: i32) -> (i32, i32, i32) {
    %c0_i32 = arith.constant 0 : i32
    %c0_i32_0 = arith.constant 0 : i32
    return %arg1, %arg0, %c0_i32 : i32, i32, i32
  }
  func.func @transform_5(%arg0: i32, %arg1: i32) -> (i32, i32) {
    %c0_i32 = arith.constant 0 : i32
    %c0_i32_0 = arith.constant 0 : i32
    return %arg0, %c0_i32 : i32, i32
  }
  func.func @transform_6(%arg0: i32, %arg1: i32) -> (i32, i32) {
    %c0_i32 = arith.constant 0 : i32
    %c0_i32_0 = arith.constant 0 : i32
    return %arg0, %c0_i32 : i32, i32
  }
}

module attributes {stable_mosaic.version = 11 : i64} {
  func.func @_matmul_bias_kernel(%arg0: i32, %arg1: i32, %arg2: i32, %arg3: memref<128x128xbf16, #tpu.memory_space<vmem>>, %arg4: memref<128x256xbf16, #tpu.memory_space<vmem>>, %arg5: memref<1x256xf32, #tpu.memory_space<vmem>>, %arg6: memref<128x256xf32, #tpu.memory_space<vmem>>, %arg7: memref<128x256xf32, #tpu.memory_space<vmem>>) attributes {dimension_semantics = [#tpu.dimension_semantics<parallel>, #tpu.dimension_semantics<parallel>, #tpu.dimension_semantics<arbitrary>], iteration_bounds = array<i64: 1, 1, 1>, scalar_prefetch = 0 : i64, scratch_operands = 1 : i64, tpu.core_type = #tpu.core_type<tc>, window_params = [{transform_indices = @transform_0, window_bounds = array<i64: 128, 128>}, {transform_indices = @transform_1, window_bounds = array<i64: 128, 256>}, {transform_indices = @transform_2, window_bounds = array<i64: 1, 256>}, {transform_indices = @transform_3, window_bounds = array<i64: 128, 256>}]} {
    %c0_i32 = arith.constant 0 : i32
    %0 = arith.cmpi eq, %arg2, %c0_i32 : i32
    %1 = arith.extui %0 : i1 to i32
    %c0_i32_0 = arith.constant 0 : i32
    %2 = arith.cmpi ne, %1, %c0_i32_0 : i32
    scf.if %2 {
      %cst_10 = arith.constant 0.000000e+00 : f32
      %12 = vector.broadcast %cst_10 : f32 to vector<128x256xf32>
      %c0_11 = arith.constant 0 : index
      %c0_12 = arith.constant 0 : index
      %13 = vector.load %arg7[%c0_11, %c0_12] : memref<128x256xf32, #tpu.memory_space<vmem>>, vector<128x256xf32>
      tpu.vector_store %arg7[%c0_11, %c0_12], %12 {strides = array<i32>} : memref<128x256xf32, #tpu.memory_space<vmem>>, vector<128x256xf32>,
    } else {
    }
    %c0 = arith.constant 0 : index
    %c0_1 = arith.constant 0 : index
    %3 = vector.load %arg7[%c0, %c0_1] : memref<128x256xf32, #tpu.memory_space<vmem>>, vector<128x256xf32>
    %c0_2 = arith.constant 0 : index
    %c0_3 = arith.constant 0 : index
    %4 = vector.load %arg3[%c0_2, %c0_3] : memref<128x128xbf16, #tpu.memory_space<vmem>>, vector<128x128xbf16>
    %c0_4 = arith.constant 0 : index
    %c0_5 = arith.constant 0 : index
    %5 = vector.load %arg4[%c0_4, %c0_5] : memref<128x256xbf16, #tpu.memory_space<vmem>>, vector<128x256xbf16>
    %cst = arith.constant dense<0.000000e+00> : vector<128x256xf32>
    %6 = tpu.matmul %4, %5, %cst {dimension_numbers = #tpu.dot_dimension_numbers<[1], [0], [0], [1], [0, 0, 1, 1], [], []>} : vector<128x128xbf16>, vector<128x256xbf16>, vector<128x256xf32> -> vector<128x256xf32>
    %7 = arith.addf %3, %6 : vector<128x256xf32>
    %c0_6 = arith.constant 0 : index
    %c0_7 = arith.constant 0 : index
    %8 = vector.load %arg7[%c0_6, %c0_7] : memref<128x256xf32, #tpu.memory_space<vmem>>, vector<128x256xf32>
    tpu.vector_store %arg7[%c0_6, %c0_7], %7 {strides = array<i32>} : memref<128x256xf32, #tpu.memory_space<vmem>>, vector<128x256xf32>,
    %c0_i32_8 = arith.constant 0 : i32
    %9 = arith.cmpi eq, %arg2, %c0_i32_8 : i32
    %10 = arith.extui %9 : i1 to i32
    %c0_i32_9 = arith.constant 0 : i32
    %11 = arith.cmpi ne, %10, %c0_i32_9 : i32
    scf.if %11 {
      %c0_10 = arith.constant 0 : index
      %c0_11 = arith.constant 0 : index
      %12 = vector.load %arg7[%c0_10, %c0_11] : memref<128x256xf32, #tpu.memory_space<vmem>>, vector<128x256xf32>
      %c0_12 = arith.constant 0 : index
      %c0_13 = arith.constant 0 : index
      %13 = vector.load %arg5[%c0_12, %c0_13] : memref<1x256xf32, #tpu.memory_space<vmem>>, vector<1x256xf32>
      %14 = vector.broadcast %13 : vector<1x256xf32> to vector<128x256xf32>
      %15 = arith.addf %12, %14 : vector<128x256xf32>
      %c0_14 = arith.constant 0 : index
      %c0_15 = arith.constant 0 : index
      %16 = vector.load %arg6[%c0_14, %c0_15] : memref<128x256xf32, #tpu.memory_space<vmem>>, vector<128x256xf32>
      tpu.vector_store %arg6[%c0_14, %c0_15], %15 {strides = array<i32>} : memref<128x256xf32, #tpu.memory_space<vmem>>, vector<128x256xf32>,
    } else {
    }
    return
  }
  func.func @transform_0(%arg0: i32, %arg1: i32, %arg2: i32) -> (i32, i32) {
    %c0_i32 = arith.constant 0 : i32
    return %arg0, %arg2 : i32, i32
  }
  func.func @transform_1(%arg0: i32, %arg1: i32, %arg2: i32) -> (i32, i32) {
    %c0_i32 = arith.constant 0 : i32
    return %arg2, %arg1 : i32, i32
  }
  func.func @transform_2(%arg0: i32, %arg1: i32, %arg2: i32) -> (i32, i32) {
    %c0_i32 = arith.constant 0 : i32
    %c0_i32_0 = arith.constant 0 : i32
    return %c0_i32, %arg1 : i32, i32
  }
  func.func @transform_3(%arg0: i32, %arg1: i32, %arg2: i32) -> (i32, i32) {
    %c0_i32 = arith.constant 0 : i32
    return %arg0, %arg1 : i32, i32
  }
}

</mosaic_0001>

<bundles_post_ra>
// kernel: rnn_model_forward.9
= control target key start
LH: loop header
LB: loop body
LE: loop exit
PB: predicated region body
PF: predicated region fallthrough
CT: control target
= control target key end

     0   :  { %8 = vsyncpa [#allocation4], 0  ;;  %s834_s0 = inlined_call_operand.vmem [shape: bf16[128,128], index: 0, kind: input, shape index: {}]   ;;  %s835_s1 = inlined_call_operand.hbm [shape: bf16[128,256], index: 1, kind: input, shape index: {}]   ;;  %s836_s2 = inlined_call_operand.vmem [shape: f32[1,256], index: 2, kind: input, shape index: {}]   ;;  %s837_s3 = inlined_call_operand.hbm [shape: f32[128,256], index: 3, kind: output, shape index: {}]  }
   0x1   :  { %9 = vsyncpa [#allocation5], 0  ;;  %s16_s14 = sshll.u32 %s835_s1, 4  ;;  %s739_s15 = smov [#allocation3]   ;;  %s17_s14 = int_to_ptr.hbm [resolvable:$true] %s16_s14 }
   0x2   :  { %s18_s16 = sshll.u32 %s739_s15, 4  ;;  %s740_s17 = smov 128   ;;  %s19_s16 = int_to_ptr.vmem [resolvable:$true] %s18_s16 }
   0x3   :  { %s741_s18 = smov 8  }
   0x4   :  { %24 = dma.hbm_to_vmem [thread:$0]  %s17_s14, 2048, %s19_s16, [#allocation4], %s740_s17, %s740_s17, %s741_s18  }
   0x5   :  { %735 = dma.done.wait [#allocation4], 2048  }
   0x6   :  { %736 = vsyncadd [#allocation4], 4294965248  ;;  %v635_v0 = vld [vmem:[#allocation3 + $0x70] sm:$0xf]  ;;  %v664_v1 = vld [vmem:[#allocation3 + $0x74] sm:$0xf0] }
   0x7   :  { %v663_v2 = vld [vmem:[#allocation3 + $0x74] sm:$0xf]  ;;  %v636_v3 = vor.u32 %v664_v1, %v635_v0  ;;  %v637_v4 = vld [vmem:[#allocation3 + $0x78] sm:$0xf0]  ;;  %v627_v5 = vld [vmem:[#allocation3 + $0x60] sm:$0xf] }
   0x8   :  { %v662_v6 = vld [vmem:[#allocation3 + $0x64] sm:$0xf0]  ;;  %v640_v7 = vor.u32 %v663_v2, %v637_v4  ;;  %v661_v8 = vld [vmem:[#allocation3 + $0x64] sm:$0xf]  ;;  %v629_v9 = vld [vmem:[#allocation3 + $0x68] sm:$0xf0] }
   0x9   :  { %259 = vmatpush.bf16.msra.mxu0 %v636_v3  ;;  %665 = vmatpush.bf16.msra.mxu2 %v636_v3  ;;  %v628_v10 = vor.u32 %v662_v6, %v627_v5  ;;  %v632_v11 = vor.u32 %v661_v8, %v629_v9  ;;  %v619_v12 = vld [vmem:[#allocation3 + $0x50] sm:$0xf]  ;;  %v660_v13 = vld [vmem:[#allocation3 + $0x54] sm:$0xf0]  ;;  %v659_v14 = vld [vmem:[#allocation3 + $0x54] sm:$0xf] }
   0xa   :  { %308 = vmatpush.bf16.msra.mxu1 %v640_v7  ;;  %673 = vmatpush.bf16.msra.mxu3 %v640_v7  ;;  %v621_v15 = vld [vmem:[#allocation3 + $0x58] sm:$0xf0]  ;;  %v620_v16 = vor.u32 %v660_v13, %v619_v12  ;;  %v611_v18 = vld [vmem:[#allocation3 + $0x40] sm:$0xf]  ;;  %v658_v19 = vld [vmem:[#allocation3 + $0x44] sm:$0xf0] }
   0xb   :  { %v624_v17 = vor.u32 %v659_v14, %v621_v15  ;;  %v657_v20 = vld [vmem:[#allocation3 + $0x44] sm:$0xf]  ;;  %v613_v21 = vld [vmem:[#allocation3 + $0x48] sm:$0xf0]  ;;  %v612_v22 = vor.u32 %v658_v19, %v611_v18  ;;  %v603_v24 = vld [vmem:[#allocation3 + $0x30] sm:$0xf] }
   0xc   :  { %v616_v23 = vor.u32 %v657_v20, %v613_v21  ;;  %v656_v25 = vld [vmem:[#allocation3 + $0x34] sm:$0xf0]  ;;  %v655_v26 = vld [vmem:[#allocation3 + $0x34] sm:$0xf]  ;;  %v605_v27 = vld [vmem:[#allocation3 + $0x38] sm:$0xf0] }
   0xd   :  { %260 = vmatpush.bf16.msra.mxu0 %v628_v10  ;;  %666 = vmatpush.bf16.msra.mxu2 %v628_v10  ;;  %v604_v28 = vor.u32 %v656_v25, %v603_v24  ;;  %v608_v29 = vor.u32 %v655_v26, %v605_v27  ;;  %v595_v30 = vld [vmem:[#allocation3 + $0x20] sm:$0xf]  ;;  %v654_v31 = vld [vmem:[#allocation3 + $0x24] sm:$0xf0]  ;;  %v653_v32 = vld [vmem:[#allocation3 + $0x24] sm:$0xf] }
   0xe   :  { %309 = vmatpush.bf16.msra.mxu1 %v632_v11  ;;  %674 = vmatpush.bf16.msra.mxu3 %v632_v11  ;;  %v597_v33 = vld [vmem:[#allocation3 + $0x28] sm:$0xf0]  ;;  %v596_v34 = vor.u32 %v654_v31, %v595_v30  ;;  %v587_v36 = vld [vmem:[#allocation3 + $0x10] sm:$0xf]  ;;  %v652_v37 = vld [vmem:[#allocation3 + $0x14] sm:$0xf0] }
   0xf   :  { %v600_v35 = vor.u32 %v653_v32, %v597_v33  ;;  %v651_v38 = vld [vmem:[#allocation3 + $0x14] sm:$0xf]  ;;  %v589_v39 = vld [vmem:[#allocation3 + $0x18] sm:$0xf0]  ;;  %v588_v40 = vor.u32 %v652_v37, %v587_v36  ;;  %v579_v42 = vld [vmem:[#allocation3] sm:$0xf] }
  0x10   :  { %v592_v41 = vor.u32 %v651_v38, %v589_v39  ;;  %v650_v43 = vld [vmem:[#allocation3 + $0x4] sm:$0xf0]  ;;  %v649_v44 = vld [vmem:[#allocation3 + $0x4] sm:$0xf]  ;;  %v581_v45 = vld [vmem:[#allocation3 + $0x8] sm:$0xf0] }
  0x11   :  { %261 = vmatpush.bf16.msra.mxu0 %v620_v16  ;;  %667 = vmatpush.bf16.msra.mxu2 %v620_v16  ;;  %v580_v46 = vor.u32 %v650_v43, %v579_v42  ;;  %v584_v47 = vor.u32 %v649_v44, %v581_v45  ;;  %v641_v48 = vld [vmem:[%s834_s0] sm:$0xff]  ;;  %v642_v50 = vld [vmem:[%s834_s0 + $0x8] sm:$0xff]  ;;  %v643_v52 = vld [vmem:[%s834_s0 + $0x10] sm:$0xff]  ;;  %s532_s11 = sshll.u32 %s837_s3, 4  ;;  %s743_s12 = smov 256   ;;  %s533_s11 = int_to_ptr.hbm [resolvable:$true] %s532_s11 }
  0x12   :  { %310 = vmatpush.bf16.msra.mxu1 %v624_v17  ;;  %675 = vmatpush.bf16.msra.mxu3 %v624_v17  ;;  %v645_v49 = vld [vmem:[%s834_s0 + $0x20] sm:$0xff]  ;;  %v646_v51 = vld [vmem:[%s834_s0 + $0x28] sm:$0xff]  ;;  %v647_v53 = vld [vmem:[%s834_s0 + $0x30] sm:$0xff]  ;;  %s744_s13 = smov 16  }
  0x13   :  { %v644_v54 = vld [vmem:[%s834_s0 + $0x18] sm:$0xff]  ;;  %v456_v56 = vld [vmem:[%s836_s2] sm:$0x3] }
  0x14   :  { %v648_v55 = vld [vmem:[%s834_s0 + $0x38] sm:$0xff]  ;;  %v795_v57 = vperm.slane %v456_v56, 0  ;;  %v797_v58 = vperm.slane %v456_v56, 1  ;;  %s742_s0 = smov [#allocation6]  }
  0x15   :  { %262 = vmatpush.bf16.msra.mxu0 %v612_v22  ;;  %668 = vmatpush.bf16.msra.mxu2 %v612_v22  ;;  %s530_s2 = sshll.u32 %s742_s0, 4  ;;  %s531_s2 = int_to_ptr.vmem [resolvable:$true] %s530_s2 }
  0x16   :  { %311 = vmatpush.bf16.msra.mxu1 %v616_v23  ;;  %676 = vmatpush.bf16.msra.mxu3 %v616_v23 }
  0x19   :  { %263 = vmatpush.bf16.msra.mxu0 %v604_v28  ;;  %669 = vmatpush.bf16.msra.mxu2 %v604_v28 }
  0x1a   :  { %312 = vmatpush.bf16.msra.mxu1 %v608_v29  ;;  %677 = vmatpush.bf16.msra.mxu3 %v608_v29 }
  0x1d   :  { %264 = vmatpush.bf16.msra.mxu0 %v596_v34  ;;  %670 = vmatpush.bf16.msra.mxu2 %v596_v34 }
  0x1e   :  { %313 = vmatpush.bf16.msra.mxu1 %v600_v35  ;;  %678 = vmatpush.bf16.msra.mxu3 %v600_v35 }
  0x21   :  { %265 = vmatpush.bf16.msra.mxu0 %v588_v40  ;;  %671 = vmatpush.bf16.msra.mxu2 %v588_v40 }
  0x22   :  { %314 = vmatpush.bf16.msra.mxu1 %v592_v41  ;;  %679 = vmatpush.bf16.msra.mxu3 %v592_v41 }
  0x25   :  { %266 = vmatpush.bf16.msra.mxu0 %v580_v46  ;;  %672 = vmatpush.bf16.msra.mxu2 %v580_v46 }
  0x26   :  { %315 = vmatpush.bf16.msra.mxu1 %v584_v47  ;;  %680 = vmatpush.bf16.msra.mxu3 %v584_v47 }
  0x28   :  { %267 = vmatmul.bf16.vlgmr.msra.gmra.mxu0 %v641_v48  ;;  %287 = vmatmul.bf16.vlgmr.msra.gmra.mxu2 %v645_v49 }
  0x29   :  { %316 = vmatmul.bf16.vlgmr.msra.gmra.mxu1 %v641_v48  ;;  %336 = vmatmul.bf16.vlgmr.msra.gmra.mxu3 %v645_v49 }
  0x38   :  { %272 = vmatmul.bf16.gmra.mxu0 %v642_v50  ;;  %292 = vmatmul.bf16.gmra.mxu2 %v646_v51 }
  0x39   :  { %321 = vmatmul.bf16.gmra.mxu1 %v642_v50  ;;  %341 = vmatmul.bf16.gmra.mxu3 %v646_v51 }
  0x48   :  { %277 = vmatmul.bf16.gmra.mxu0 %v643_v52  ;;  %297 = vmatmul.bf16.gmra.mxu2 %v647_v53 }
  0x49   :  { %326 = vmatmul.bf16.gmra.mxu1 %v643_v52  ;;  %346 = vmatmul.bf16.gmra.mxu3 %v647_v53 }
  0x58   :  { %282 = vmatmul.bf16.gmra.mxu0 %v644_v54  ;;  %302 = vmatmul.bf16.gmra.mxu2 %v648_v55 }
  0x59   :  { %331 = vmatmul.bf16.gmra.mxu1 %v644_v54  ;;  %351 = vmatmul.bf16.gmra.mxu3 %v648_v55 }
  0xa5   :  { %v268_v59 = vpop.f32.mrf.mxu0 }
  0xa6   :  { %v462_v60 = vadd.f32 %v795_v57, %v268_v59  ;;  %v317_v61 = vpop.f32.mrf.mxu1 }
  0xa7   :  { %v463_v62 = vadd.f32 %v797_v58, %v317_v61 }
  0xa8   :  { %494 = vst [vmem:[#allocation6] sm:$0xff] %v462_v60 }
  0xa9   :  { %495 = vst [vmem:[#allocation6 + $0x8] sm:$0xff] %v463_v62 }
  0xab   :  { %v288_v63 = vpop.f32.mrf.mxu2 }
  0xac   :  { %v478_v0 = vadd.f32 %v795_v57, %v288_v63  ;;  %v337_v1 = vpop.f32.mrf.mxu3 }
  0xad   :  { %v479_v2 = vadd.f32 %v797_v58, %v337_v1  ;;  %v270_v3 = vpop.f32.mrf.mxu0 }
  0xae   :  { %510 = vst [vmem:[#allocation6 + $0x80] sm:$0xff] %v478_v0  ;;  %v464_v4 = vadd.f32 %v795_v57, %v270_v3  ;;  %v319_v5 = vpop.f32.mrf.mxu1 }
  0xaf   :  { %511 = vst [vmem:[#allocation6 + $0x88] sm:$0xff] %v479_v2  ;;  %v465_v6 = vadd.f32 %v797_v58, %v319_v5 }
  0xb0   :  { %496 = vst [vmem:[#allocation6 + $0x10] sm:$0xff] %v464_v4 }
  0xb1   :  { %497 = vst [vmem:[#allocation6 + $0x18] sm:$0xff] %v465_v6 }
  0xb3   :  { %v290_v7 = vpop.f32.mrf.mxu2 }
  0xb4   :  { %v480_v8 = vadd.f32 %v795_v57, %v290_v7  ;;  %v339_v9 = vpop.f32.mrf.mxu3 }
  0xb5   :  { %v481_v10 = vadd.f32 %v797_v58, %v339_v9  ;;  %v273_v11 = vpop.f32.mrf.mxu0 }
  0xb6   :  { %512 = vst [vmem:[#allocation6 + $0x90] sm:$0xff] %v480_v8  ;;  %v466_v12 = vadd.f32 %v795_v57, %v273_v11  ;;  %v322_v13 = vpop.f32.mrf.mxu1 }
  0xb7   :  { %513 = vst [vmem:[#allocation6 + $0x98] sm:$0xff] %v481_v10  ;;  %v467_v14 = vadd.f32 %v797_v58, %v322_v13 }
  0xb8   :  { %498 = vst [vmem:[#allocation6 + $0x20] sm:$0xff] %v466_v12 }
  0xb9   :  { %499 = vst [vmem:[#allocation6 + $0x28] sm:$0xff] %v467_v14 }
  0xbb   :  { %v293_v15 = vpop.f32.mrf.mxu2 }
  0xbc   :  { %v482_v16 = vadd.f32 %v795_v57, %v293_v15  ;;  %v342_v17 = vpop.f32.mrf.mxu3 }
  0xbd   :  { %v483_v18 = vadd.f32 %v797_v58, %v342_v17  ;;  %v275_v19 = vpop.f32.mrf.mxu0 }
  0xbe   :  { %514 = vst [vmem:[#allocation6 + $0xa0] sm:$0xff] %v482_v16  ;;  %v468_v20 = vadd.f32 %v795_v57, %v275_v19  ;;  %v324_v21 = vpop.f32.mrf.mxu1 }
  0xbf   :  { %515 = vst [vmem:[#allocation6 + $0xa8] sm:$0xff] %v483_v18  ;;  %v469_v22 = vadd.f32 %v797_v58, %v324_v21 }
  0xc0   :  { %500 = vst [vmem:[#allocation6 + $0x30] sm:$0xff] %v468_v20 }
  0xc1   :  { %501 = vst [vmem:[#allocation6 + $0x38] sm:$0xff] %v469_v22 }
  0xc3   :  { %v295_v23 = vpop.f32.mrf.mxu2 }
  0xc4   :  { %v484_v24 = vadd.f32 %v795_v57, %v295_v23  ;;  %v344_v25 = vpop.f32.mrf.mxu3 }
  0xc5   :  { %v485_v26 = vadd.f32 %v797_v58, %v344_v25  ;;  %v278_v27 = vpop.f32.mrf.mxu0 }
  0xc6   :  { %516 = vst [vmem:[#allocation6 + $0xb0] sm:$0xff] %v484_v24  ;;  %v470_v28 = vadd.f32 %v795_v57, %v278_v27  ;;  %v327_v29 = vpop.f32.mrf.mxu1 }
  0xc7   :  { %517 = vst [vmem:[#allocation6 + $0xb8] sm:$0xff] %v485_v26  ;;  %v471_v30 = vadd.f32 %v797_v58, %v327_v29 }
  0xc8   :  { %502 = vst [vmem:[#allocation6 + $0x40] sm:$0xff] %v470_v28 }
  0xc9   :  { %503 = vst [vmem:[#allocation6 + $0x48] sm:$0xff] %v471_v30 }
  0xcb   :  { %v298_v31 = vpop.f32.mrf.mxu2 }
  0xcc   :  { %v486_v32 = vadd.f32 %v795_v57, %v298_v31  ;;  %v347_v33 = vpop.f32.mrf.mxu3 }
  0xcd   :  { %v487_v34 = vadd.f32 %v797_v58, %v347_v33  ;;  %v280_v35 = vpop.f32.mrf.mxu0 }
  0xce   :  { %518 = vst [vmem:[#allocation6 + $0xc0] sm:$0xff] %v486_v32  ;;  %v472_v36 = vadd.f32 %v795_v57, %v280_v35  ;;  %v329_v37 = vpop.f32.mrf.mxu1 }
  0xcf   :  { %519 = vst [vmem:[#allocation6 + $0xc8] sm:$0xff] %v487_v34  ;;  %v473_v38 = vadd.f32 %v797_v58, %v329_v37 }
  0xd0   :  { %504 = vst [vmem:[#allocation6 + $0x50] sm:$0xff] %v472_v36 }
  0xd1   :  { %505 = vst [vmem:[#allocation6 + $0x58] sm:$0xff] %v473_v38 }
  0xd3   :  { %v300_v39 = vpop.f32.mrf.mxu2 }
  0xd4   :  { %v488_v40 = vadd.f32 %v795_v57, %v300_v39  ;;  %v349_v41 = vpop.f32.mrf.mxu3 }
  0xd5   :  { %v489_v42 = vadd.f32 %v797_v58, %v349_v41  ;;  %v283_v43 = vpop.f32.mrf.mxu0 }
  0xd6   :  { %520 = vst [vmem:[#allocation6 + $0xd0] sm:$0xff] %v488_v40  ;;  %v474_v44 = vadd.f32 %v795_v57, %v283_v43  ;;  %v332_v45 = vpop.f32.mrf.mxu1 }
  0xd7   :  { %521 = vst [vmem:[#allocation6 + $0xd8] sm:$0xff] %v489_v42  ;;  %v475_v46 = vadd.f32 %v797_v58, %v332_v45 }
  0xd8   :  { %506 = vst [vmem:[#allocation6 + $0x60] sm:$0xff] %v474_v44 }
  0xd9   :  { %507 = vst [vmem:[#allocation6 + $0x68] sm:$0xff] %v475_v46 }
  0xdb   :  { %v303_v47 = vpop.f32.mrf.mxu2 }
  0xdc   :  { %v490_v48 = vadd.f32 %v795_v57, %v303_v47  ;;  %v352_v49 = vpop.f32.mrf.mxu3 }
  0xdd   :  { %v491_v50 = vadd.f32 %v797_v58, %v352_v49  ;;  %v285_v51 = vpop.f32.mrf.mxu0 }
  0xde   :  { %522 = vst [vmem:[#allocation6 + $0xe0] sm:$0xff] %v490_v48  ;;  %v476_v52 = vadd.f32 %v795_v57, %v285_v51  ;;  %v334_v53 = vpop.f32.mrf.mxu1 }
  0xdf   :  { %523 = vst [vmem:[#allocation6 + $0xe8] sm:$0xff] %v491_v50  ;;  %v477_v54 = vadd.f32 %v797_v58, %v334_v53 }
  0xe0   :  { %508 = vst [vmem:[#allocation6 + $0x70] sm:$0xff] %v476_v52 }
  0xe1   :  { %509 = vst [vmem:[#allocation6 + $0x78] sm:$0xff] %v477_v54 }
  0xe3   :  { %v305_v55 = vpop.f32.mrf.mxu2 }
  0xe4   :  { %v492_v56 = vadd.f32 %v795_v57, %v305_v55  ;;  %v354_v59 = vpop.f32.mrf.mxu3 }
  0xe5   :  { %v493_v60 = vadd.f32 %v797_v58, %v354_v59 }
  0xe6   :  { %524 = vst [vmem:[#allocation6 + $0xf0] sm:$0xff] %v492_v56 }
  0xe7   :  { %525 = vst [vmem:[#allocation6 + $0xf8] sm:$0xff] %v493_v60 }
  0xe8   :  { %538 = dma.vmem_to_hbm [thread:$0]  %s531_s2, 4096, %s533_s11, [#allocation5], %s743_s12, %s743_s12, %s744_s13  }
  0xe9   :  { %737 = dma.done.wait [#allocation5], 4096  }
  0xea   :  { %738 = vsyncadd [#allocation5], 4294963200 }
  0xeb   :  { %543 = vsyncpa [#allocation4], 1 }
  0xec   :  { %544 = vsyncpa [#allocation5], 1 }

// kernel: rnn_model_forward.5
= control target key start
LH: loop header
LB: loop body
LE: loop exit
PB: predicated region body
PF: predicated region fallthrough
CT: control target
= control target key end

     0   :  { %s1638_s1 = inlined_call_operand.vmem [shape: bf16[128,512], index: 1, kind: input, shape index: {}]   ;;  %s1639_s0 = inlined_call_operand.vmem [shape: bf16[128,128], index: 0, kind: input, shape index: {}]   ;;  %s1640_s2 = inlined_call_operand.vmem [shape: f32[1,512], index: 2, kind: input, shape index: {}]   ;;  %s1641_s3 = inlined_call_operand.vmem [shape: f32[128,512], index: 3, kind: output, shape index: {}]  }
   0x1   :  { %v1081_v0 = vld [vmem:[%s1638_s1 + $0xe0] sm:$0xf]  ;;  %v1133_v1 = vld [vmem:[%s1638_s1 + $0xec] sm:$0xf0]  ;;  %v1131_v2 = vld [vmem:[%s1638_s1 + $0xe4] sm:$0xf] }
   0x2   :  { %v1082_v3 = vor.u32 %v1133_v1, %v1081_v0  ;;  %v1083_v4 = vld [vmem:[%s1638_s1 + $0xf0] sm:$0xf0]  ;;  %v1089_v5 = vld [vmem:[%s1638_s1 + $0xe8] sm:$0xf]  ;;  %v1134_v6 = vld [vmem:[%s1638_s1 + $0xf4] sm:$0xf0] }
   0x3   :  { %v1086_v7 = vor.u32 %v1131_v2, %v1083_v4  ;;  %v1090_v8 = vor.u32 %v1134_v6, %v1089_v5  ;;  %v1132_v9 = vld [vmem:[%s1638_s1 + $0xec] sm:$0xf]  ;;  %v1091_v10 = vld [vmem:[%s1638_s1 + $0xf8] sm:$0xf0]  ;;  %v1065_v11 = vld [vmem:[%s1638_s1 + $0xc0] sm:$0xf] }
   0x4   :  { %402 = vmatpush.bf16.msra.mxu0 %v1082_v3  ;;  %v1094_v12 = vor.u32 %v1132_v9, %v1091_v10  ;;  %v1129_v13 = vld [vmem:[%s1638_s1 + $0xcc] sm:$0xf0]  ;;  %v1127_v14 = vld [vmem:[%s1638_s1 + $0xc4] sm:$0xf]  ;;  %v1067_v15 = vld [vmem:[%s1638_s1 + $0xd0] sm:$0xf0] }
   0x5   :  { %451 = vmatpush.bf16.msra.mxu1 %v1086_v7  ;;  %500 = vmatpush.bf16.msra.mxu2 %v1090_v8  ;;  %v1066_v16 = vor.u32 %v1129_v13, %v1065_v11  ;;  %v1070_v17 = vor.u32 %v1127_v14, %v1067_v15  ;;  %v1073_v18 = vld [vmem:[%s1638_s1 + $0xc8] sm:$0xf]  ;;  %v1130_v19 = vld [vmem:[%s1638_s1 + $0xd4] sm:$0xf0]  ;;  %v1128_v20 = vld [vmem:[%s1638_s1 + $0xcc] sm:$0xf] }
   0x6   :  { %549 = vmatpush.bf16.msra.mxu3 %v1094_v12  ;;  %v1074_v21 = vor.u32 %v1130_v19, %v1073_v18  ;;  %v1075_v22 = vld [vmem:[%s1638_s1 + $0xd8] sm:$0xf0]  ;;  %v1049_v23 = vld [vmem:[%s1638_s1 + $0xa0] sm:$0xf]  ;;  %v1125_v24 = vld [vmem:[%s1638_s1 + $0xac] sm:$0xf0] }
   0x7   :  { %v1078_v25 = vor.u32 %v1128_v20, %v1075_v22  ;;  %v1123_v26 = vld [vmem:[%s1638_s1 + $0xa4] sm:$0xf]  ;;  %v1051_v27 = vld [vmem:[%s1638_s1 + $0xb0] sm:$0xf0]  ;;  %v1057_v28 = vld [vmem:[%s1638_s1 + $0xa8] sm:$0xf]  ;;  %v1050_v29 = vor.u32 %v1125_v24, %v1049_v23 }
   0x8   :  { %403 = vmatpush.bf16.msra.mxu0 %v1066_v16  ;;  %v1126_v30 = vld [vmem:[%s1638_s1 + $0xb4] sm:$0xf0]  ;;  %v1124_v31 = vld [vmem:[%s1638_s1 + $0xac] sm:$0xf]  ;;  %v1059_v32 = vld [vmem:[%s1638_s1 + $0xb8] sm:$0xf0]  ;;  %v1054_v33 = vor.u32 %v1123_v26, %v1051_v27 }
   0x9   :  { %452 = vmatpush.bf16.msra.mxu1 %v1070_v17  ;;  %501 = vmatpush.bf16.msra.mxu2 %v1074_v21  ;;  %v1058_v34 = vor.u32 %v1126_v30, %v1057_v28  ;;  %v1033_v35 = vld [vmem:[%s1638_s1 + $0x80] sm:$0xf]  ;;  %v1121_v36 = vld [vmem:[%s1638_s1 + $0x8c] sm:$0xf0]  ;;  %v1119_v37 = vld [vmem:[%s1638_s1 + $0x84] sm:$0xf]  ;;  %v1062_v38 = vor.u32 %v1124_v31, %v1059_v32 }
   0xa   :  { %550 = vmatpush.bf16.msra.mxu3 %v1078_v25  ;;  %v1035_v39 = vld [vmem:[%s1638_s1 + $0x90] sm:$0xf0]  ;;  %v1041_v40 = vld [vmem:[%s1638_s1 + $0x88] sm:$0xf]  ;;  %v1122_v41 = vld [vmem:[%s1638_s1 + $0x94] sm:$0xf0]  ;;  %v1034_v44 = vor.u32 %v1121_v36, %v1033_v35 }
   0xb   :  { %v1120_v42 = vld [vmem:[%s1638_s1 + $0x8c] sm:$0xf]  ;;  %v1043_v43 = vld [vmem:[%s1638_s1 + $0x98] sm:$0xf0]  ;;  %v1038_v45 = vor.u32 %v1119_v37, %v1035_v39  ;;  %v1042_v46 = vor.u32 %v1122_v41, %v1041_v40  ;;  %v1017_v47 = vld [vmem:[%s1638_s1 + $0x60] sm:$0xf] }
   0xc   :  { %404 = vmatpush.bf16.msra.mxu0 %v1050_v29  ;;  %v1117_v48 = vld [vmem:[%s1638_s1 + $0x6c] sm:$0xf0]  ;;  %v1115_v49 = vld [vmem:[%s1638_s1 + $0x64] sm:$0xf]  ;;  %v1046_v50 = vor.u32 %v1120_v42, %v1043_v43  ;;  %v1019_v51 = vld [vmem:[%s1638_s1 + $0x70] sm:$0xf0] }
   0xd   :  { %453 = vmatpush.bf16.msra.mxu1 %v1054_v33  ;;  %502 = vmatpush.bf16.msra.mxu2 %v1058_v34  ;;  %v1025_v52 = vld [vmem:[%s1638_s1 + $0x68] sm:$0xf]  ;;  %v1118_v53 = vld [vmem:[%s1638_s1 + $0x74] sm:$0xf0]  ;;  %v1116_v54 = vld [vmem:[%s1638_s1 + $0x6c] sm:$0xf]  ;;  %v1018_v56 = vor.u32 %v1117_v48, %v1017_v47  ;;  %v1022_v57 = vor.u32 %v1115_v49, %v1019_v51 }
   0xe   :  { %551 = vmatpush.bf16.msra.mxu3 %v1062_v38  ;;  %v1027_v55 = vld [vmem:[%s1638_s1 + $0x78] sm:$0xf0]  ;;  %v1026_v58 = vor.u32 %v1118_v53, %v1025_v52  ;;  %v1001_v59 = vld [vmem:[%s1638_s1 + $0x40] sm:$0xf]  ;;  %v1113_v60 = vld [vmem:[%s1638_s1 + $0x4c] sm:$0xf0] }
   0xf   :  { %v1111_v61 = vld [vmem:[%s1638_s1 + $0x44] sm:$0xf]  ;;  %v1030_v62 = vor.u32 %v1116_v54, %v1027_v55  ;;  %v1003_v63 = vld [vmem:[%s1638_s1 + $0x50] sm:$0xf0]  ;;  %v1009_v0 = vld [vmem:[%s1638_s1 + $0x48] sm:$0xf]  ;;  %v1002_v4 = vor.u32 %v1113_v60, %v1001_v59 }
  0x10   :  { %405 = vmatpush.bf16.msra.mxu0 %v1034_v44  ;;  %v1114_v1 = vld [vmem:[%s1638_s1 + $0x54] sm:$0xf0]  ;;  %v1112_v2 = vld [vmem:[%s1638_s1 + $0x4c] sm:$0xf]  ;;  %v1011_v3 = vld [vmem:[%s1638_s1 + $0x58] sm:$0xf0]  ;;  %v1006_v5 = vor.u32 %v1111_v61, %v1003_v63 }
  0x11   :  { %454 = vmatpush.bf16.msra.mxu1 %v1038_v45  ;;  %503 = vmatpush.bf16.msra.mxu2 %v1042_v46  ;;  %v1010_v6 = vor.u32 %v1114_v1, %v1009_v0  ;;  %v985_v7 = vld [vmem:[%s1638_s1 + $0x20] sm:$0xf]  ;;  %v1109_v8 = vld [vmem:[%s1638_s1 + $0x2c] sm:$0xf0]  ;;  %v1107_v9 = vld [vmem:[%s1638_s1 + $0x24] sm:$0xf]  ;;  %v1014_v10 = vor.u32 %v1112_v2, %v1011_v3 }
  0x12   :  { %552 = vmatpush.bf16.msra.mxu3 %v1046_v50  ;;  %v987_v11 = vld [vmem:[%s1638_s1 + $0x30] sm:$0xf0]  ;;  %v993_v12 = vld [vmem:[%s1638_s1 + $0x28] sm:$0xf]  ;;  %v1110_v13 = vld [vmem:[%s1638_s1 + $0x34] sm:$0xf0]  ;;  %v986_v16 = vor.u32 %v1109_v8, %v985_v7 }
  0x13   :  { %v1108_v14 = vld [vmem:[%s1638_s1 + $0x2c] sm:$0xf]  ;;  %v995_v15 = vld [vmem:[%s1638_s1 + $0x38] sm:$0xf0]  ;;  %v990_v17 = vor.u32 %v1107_v9, %v987_v11  ;;  %v994_v18 = vor.u32 %v1110_v13, %v993_v12  ;;  %v969_v19 = vld [vmem:[%s1638_s1] sm:$0xf] }
  0x14   :  { %406 = vmatpush.bf16.msra.mxu0 %v1018_v56  ;;  %v1105_v20 = vld [vmem:[%s1638_s1 + $0xc] sm:$0xf0]  ;;  %v1103_v21 = vld [vmem:[%s1638_s1 + $0x4] sm:$0xf]  ;;  %v998_v22 = vor.u32 %v1108_v14, %v995_v15  ;;  %v971_v23 = vld [vmem:[%s1638_s1 + $0x10] sm:$0xf0] }
  0x15   :  { %455 = vmatpush.bf16.msra.mxu1 %v1022_v57  ;;  %504 = vmatpush.bf16.msra.mxu2 %v1026_v58  ;;  %v977_v24 = vld [vmem:[%s1638_s1 + $0x8] sm:$0xf]  ;;  %v1106_v25 = vld [vmem:[%s1638_s1 + $0x14] sm:$0xf0]  ;;  %v1104_v26 = vld [vmem:[%s1638_s1 + $0xc] sm:$0xf]  ;;  %v970_v28 = vor.u32 %v1105_v20, %v969_v19  ;;  %v974_v29 = vor.u32 %v1103_v21, %v971_v23 }
  0x16   :  { %553 = vmatpush.bf16.msra.mxu3 %v1030_v62  ;;  %v979_v27 = vld [vmem:[%s1638_s1 + $0x18] sm:$0xf0]  ;;  %v978_v30 = vor.u32 %v1106_v25, %v977_v24  ;;  %v1095_v32 = vld [vmem:[%s1639_s0] sm:$0xff]  ;;  %v1096_v33 = vld [vmem:[%s1639_s0 + $0x8] sm:$0xff] }
  0x17   :  { %v982_v31 = vor.u32 %v1104_v26, %v979_v27  ;;  %v1097_v34 = vld [vmem:[%s1639_s0 + $0x10] sm:$0xff]  ;;  %v1098_v35 = vld [vmem:[%s1639_s0 + $0x18] sm:$0xff]  ;;  %v1099_v36 = vld [vmem:[%s1639_s0 + $0x20] sm:$0xff] }
  0x18   :  { %407 = vmatpush.bf16.msra.mxu0 %v1002_v4  ;;  %v1100_v37 = vld [vmem:[%s1639_s0 + $0x28] sm:$0xff]  ;;  %v1101_v38 = vld [vmem:[%s1639_s0 + $0x30] sm:$0xff]  ;;  %v1102_v39 = vld [vmem:[%s1639_s0 + $0x38] sm:$0xff] }
  0x19   :  { %456 = vmatpush.bf16.msra.mxu1 %v1006_v5  ;;  %505 = vmatpush.bf16.msra.mxu2 %v1010_v6  ;;  %v793_v40 = vld [vmem:[%s1640_s2] sm:$0xf] }
  0x1a   :  { %554 = vmatpush.bf16.msra.mxu3 %v1014_v10  ;;  %v1374_v41 = vperm.slane %v793_v40, 0  ;;  %v1376_v42 = vperm.slane %v793_v40, 1  ;;  %v1386_v47 = vperm.slane %v793_v40, 2  ;;  %v1388_v48 = vperm.slane %v793_v40, 3 }
  0x1c   :  { %408 = vmatpush.bf16.msra.mxu0 %v986_v16 }
  0x1d   :  { %457 = vmatpush.bf16.msra.mxu1 %v990_v17  ;;  %506 = vmatpush.bf16.msra.mxu2 %v994_v18 }
  0x1e   :  { %555 = vmatpush.bf16.msra.mxu3 %v998_v22 }
  0x20   :  { %409 = vmatpush.bf16.msra.mxu0 %v970_v28 }
  0x21   :  { %458 = vmatpush.bf16.msra.mxu1 %v974_v29  ;;  %507 = vmatpush.bf16.msra.mxu2 %v978_v30 }
  0x22   :  { %556 = vmatpush.bf16.msra.mxu3 %v982_v31 }
  0x23   :  { %410 = vmatmul.bf16.vlgmr.msra.gmra.mxu0 %v1095_v32 }
  0x24   :  { %459 = vmatmul.bf16.vlgmr.msra.gmra.mxu1 %v1095_v32  ;;  %508 = vmatmul.bf16.vlgmr.msra.gmra.mxu2 %v1095_v32 }
  0x25   :  { %557 = vmatmul.bf16.vlgmr.msra.gmra.mxu3 %v1095_v32 }
  0x33   :  { %415 = vmatmul.bf16.gmra.mxu0 %v1096_v33 }
  0x34   :  { %464 = vmatmul.bf16.gmra.mxu1 %v1096_v33  ;;  %513 = vmatmul.bf16.gmra.mxu2 %v1096_v33 }
  0x35   :  { %562 = vmatmul.bf16.gmra.mxu3 %v1096_v33 }
  0x43   :  { %420 = vmatmul.bf16.gmra.mxu0 %v1097_v34 }
  0x44   :  { %469 = vmatmul.bf16.gmra.mxu1 %v1097_v34  ;;  %518 = vmatmul.bf16.gmra.mxu2 %v1097_v34 }
  0x45   :  { %567 = vmatmul.bf16.gmra.mxu3 %v1097_v34 }
  0x53   :  { %425 = vmatmul.bf16.gmra.mxu0 %v1098_v35 }
  0x54   :  { %474 = vmatmul.bf16.gmra.mxu1 %v1098_v35  ;;  %523 = vmatmul.bf16.gmra.mxu2 %v1098_v35 }
  0x55   :  { %572 = vmatmul.bf16.gmra.mxu3 %v1098_v35 }
  0x63   :  { %430 = vmatmul.bf16.gmra.mxu0 %v1099_v36 }
  0x64   :  { %479 = vmatmul.bf16.gmra.mxu1 %v1099_v36  ;;  %528 = vmatmul.bf16.gmra.mxu2 %v1099_v36 }
  0x65   :  { %577 = vmatmul.bf16.gmra.mxu3 %v1099_v36 }
  0x73   :  { %435 = vmatmul.bf16.gmra.mxu0 %v1100_v37 }
  0x74   :  { %484 = vmatmul.bf16.gmra.mxu1 %v1100_v37  ;;  %533 = vmatmul.bf16.gmra.mxu2 %v1100_v37 }
  0x75   :  { %582 = vmatmul.bf16.gmra.mxu3 %v1100_v37 }
  0x83   :  { %440 = vmatmul.bf16.gmra.mxu0 %v1101_v38 }
  0x84   :  { %489 = vmatmul.bf16.gmra.mxu1 %v1101_v38  ;;  %538 = vmatmul.bf16.gmra.mxu2 %v1101_v38 }
  0x85   :  { %587 = vmatmul.bf16.gmra.mxu3 %v1101_v38 }
  0x93   :  { %445 = vmatmul.bf16.gmra.mxu0 %v1102_v39 }
  0x94   :  { %494 = vmatmul.bf16.gmra.mxu1 %v1102_v39  ;;  %543 = vmatmul.bf16.gmra.mxu2 %v1102_v39 }
  0x95   :  { %592 = vmatmul.bf16.gmra.mxu3 %v1102_v39 }
  0xa0   :  { %v411_v43 = vpop.f32.mrf.mxu0 }
  0xa1   :  { %v803_v44 = vadd.f32 %v1374_v41, %v411_v43  ;;  %v460_v45 = vpop.f32.mrf.mxu1 }
  0xa2   :  { %v804_v46 = vadd.f32 %v1376_v42, %v460_v45 }
  0xa3   :  { %867 = vst [vmem:[%s1641_s3] sm:$0xff] %v803_v44 }
  0xa4   :  { %868 = vst [vmem:[%s1641_s3 + $0x8] sm:$0xff] %v804_v46 }
  0xa7   :  { %v509_v49 = vpop.f32.mrf.mxu2 }
  0xa8   :  { %v805_v50 = vadd.f32 %v1386_v47, %v509_v49  ;;  %v558_v51 = vpop.f32.mrf.mxu3  ;;  %v413_v52 = vpop.f32.mrf.mxu0 }
  0xa9   :  { %v806_v53 = vadd.f32 %v1388_v48, %v558_v51  ;;  %v807_v54 = vadd.f32 %v1374_v41, %v413_v52  ;;  %v462_v55 = vpop.f32.mrf.mxu1 }
  0xaa   :  { %869 = vst [vmem:[%s1641_s3 + $0x10] sm:$0xff] %v805_v50  ;;  %v808_v56 = vadd.f32 %v1376_v42, %v462_v55 }
  0xab   :  { %870 = vst [vmem:[%s1641_s3 + $0x18] sm:$0xff] %v806_v53 }
  0xac   :  { %871 = vst [vmem:[%s1641_s3 + $0x20] sm:$0xff] %v807_v54 }
  0xad   :  { %872 = vst [vmem:[%s1641_s3 + $0x28] sm:$0xff] %v808_v56 }
  0xaf   :  { %v511_v57 = vpop.f32.mrf.mxu2 }
  0xb0   :  { %v809_v58 = vadd.f32 %v1386_v47, %v511_v57  ;;  %v560_v59 = vpop.f32.mrf.mxu3  ;;  %v416_v60 = vpop.f32.mrf.mxu0 }
  0xb1   :  { %v810_v61 = vadd.f32 %v1388_v48, %v560_v59  ;;  %v811_v62 = vadd.f32 %v1374_v41, %v416_v60  ;;  %v465_v63 = vpop.f32.mrf.mxu1 }
  0xb2   :  { %873 = vst [vmem:[%s1641_s3 + $0x30] sm:$0xff] %v809_v58  ;;  %v812_v0 = vadd.f32 %v1376_v42, %v465_v63 }
  0xb3   :  { %874 = vst [vmem:[%s1641_s3 + $0x38] sm:$0xff] %v810_v61 }
  0xb4   :  { %875 = vst [vmem:[%s1641_s3 + $0x40] sm:$0xff] %v811_v62 }
  0xb5   :  { %876 = vst [vmem:[%s1641_s3 + $0x48] sm:$0xff] %v812_v0 }
  0xb7   :  { %v514_v1 = vpop.f32.mrf.mxu2 }
  0xb8   :  { %v813_v2 = vadd.f32 %v1386_v47, %v514_v1  ;;  %v563_v3 = vpop.f32.mrf.mxu3  ;;  %v418_v4 = vpop.f32.mrf.mxu0 }
  0xb9   :  { %v814_v5 = vadd.f32 %v1388_v48, %v563_v3  ;;  %v815_v6 = vadd.f32 %v1374_v41, %v418_v4  ;;  %v467_v7 = vpop.f32.mrf.mxu1 }
  0xba   :  { %877 = vst [vmem:[%s1641_s3 + $0x50] sm:$0xff] %v813_v2  ;;  %v816_v8 = vadd.f32 %v1376_v42, %v467_v7 }
  0xbb   :  { %878 = vst [vmem:[%s1641_s3 + $0x58] sm:$0xff] %v814_v5 }
  0xbc   :  { %879 = vst [vmem:[%s1641_s3 + $0x60] sm:$0xff] %v815_v6 }
  0xbd   :  { %880 = vst [vmem:[%s1641_s3 + $0x68] sm:$0xff] %v816_v8 }
  0xbf   :  { %v516_v9 = vpop.f32.mrf.mxu2 }
  0xc0   :  { %v817_v10 = vadd.f32 %v1386_v47, %v516_v9  ;;  %v565_v11 = vpop.f32.mrf.mxu3  ;;  %v421_v12 = vpop.f32.mrf.mxu0 }
  0xc1   :  { %v818_v13 = vadd.f32 %v1388_v48, %v565_v11  ;;  %v819_v14 = vadd.f32 %v1374_v41, %v421_v12  ;;  %v470_v15 = vpop.f32.mrf.mxu1 }
  0xc2   :  { %881 = vst [vmem:[%s1641_s3 + $0x70] sm:$0xff] %v817_v10  ;;  %v820_v16 = vadd.f32 %v1376_v42, %v470_v15 }
  0xc3   :  { %882 = vst [vmem:[%s1641_s3 + $0x78] sm:$0xff] %v818_v13 }
  0xc4   :  { %883 = vst [vmem:[%s1641_s3 + $0x80] sm:$0xff] %v819_v14 }
  0xc5   :  { %884 = vst [vmem:[%s1641_s3 + $0x88] sm:$0xff] %v820_v16 }
  0xc7   :  { %v519_v17 = vpop.f32.mrf.mxu2 }
  0xc8   :  { %v821_v18 = vadd.f32 %v1386_v47, %v519_v17  ;;  %v568_v19 = vpop.f32.mrf.mxu3  ;;  %v423_v20 = vpop.f32.mrf.mxu0 }
  0xc9   :  { %v822_v21 = vadd.f32 %v1388_v48, %v568_v19  ;;  %v823_v22 = vadd.f32 %v1374_v41, %v423_v20  ;;  %v472_v23 = vpop.f32.mrf.mxu1 }
  0xca   :  { %885 = vst [vmem:[%s1641_s3 + $0x90] sm:$0xff] %v821_v18  ;;  %v824_v24 = vadd.f32 %v1376_v42, %v472_v23 }
  0xcb   :  { %886 = vst [vmem:[%s1641_s3 + $0x98] sm:$0xff] %v822_v21 }
  0xcc   :  { %887 = vst [vmem:[%s1641_s3 + $0xa0] sm:$0xff] %v823_v22 }
  0xcd   :  { %888 = vst [vmem:[%s1641_s3 + $0xa8] sm:$0xff] %v824_v24 }
  0xcf   :  { %v521_v25 = vpop.f32.mrf.mxu2 }
  0xd0   :  { %v825_v26 = vadd.f32 %v1386_v47, %v521_v25  ;;  %v570_v27 = vpop.f32.mrf.mxu3  ;;  %v426_v28 = vpop.f32.mrf.mxu0 }
  0xd1   :  { %v826_v29 = vadd.f32 %v1388_v48, %v570_v27  ;;  %v827_v30 = vadd.f32 %v1374_v41, %v426_v28  ;;  %v475_v31 = vpop.f32.mrf.mxu1 }
  0xd2   :  { %889 = vst [vmem:[%s1641_s3 + $0xb0] sm:$0xff] %v825_v26  ;;  %v828_v32 = vadd.f32 %v1376_v42, %v475_v31 }
  0xd3   :  { %890 = vst [vmem:[%s1641_s3 + $0xb8] sm:$0xff] %v826_v29 }
  0xd4   :  { %891 = vst [vmem:[%s1641_s3 + $0xc0] sm:$0xff] %v827_v30 }
  0xd5   :  { %892 = vst [vmem:[%s1641_s3 + $0xc8] sm:$0xff] %v828_v32 }
  0xd7   :  { %v524_v33 = vpop.f32.mrf.mxu2 }
  0xd8   :  { %v829_v34 = vadd.f32 %v1386_v47, %v524_v33  ;;  %v573_v35 = vpop.f32.mrf.mxu3  ;;  %v428_v36 = vpop.f32.mrf.mxu0 }
  0xd9   :  { %v830_v37 = vadd.f32 %v1388_v48, %v573_v35  ;;  %v831_v38 = vadd.f32 %v1374_v41, %v428_v36  ;;  %v477_v39 = vpop.f32.mrf.mxu1 }
  0xda   :  { %893 = vst [vmem:[%s1641_s3 + $0xd0] sm:$0xff] %v829_v34  ;;  %v832_v40 = vadd.f32 %v1376_v42, %v477_v39 }
  0xdb   :  { %894 = vst [vmem:[%s1641_s3 + $0xd8] sm:$0xff] %v830_v37 }
  0xdc   :  { %895 = vst [vmem:[%s1641_s3 + $0xe0] sm:$0xff] %v831_v38 }
  0xdd   :  { %896 = vst [vmem:[%s1641_s3 + $0xe8] sm:$0xff] %v832_v40 }
  0xdf   :  { %v526_v43 = vpop.f32.mrf.mxu2 }
  0xe0   :  { %v833_v44 = vadd.f32 %v1386_v47, %v526_v43  ;;  %v575_v45 = vpop.f32.mrf.mxu3  ;;  %v431_v46 = vpop.f32.mrf.mxu0 }
  0xe1   :  { %v834_v49 = vadd.f32 %v1388_v48, %v575_v45  ;;  %v835_v50 = vadd.f32 %v1374_v41, %v431_v46  ;;  %v480_v51 = vpop.f32.mrf.mxu1 }
  0xe2   :  { %897 = vst [vmem:[%s1641_s3 + $0xf0] sm:$0xff] %v833_v44  ;;  %v836_v52 = vadd.f32 %v1376_v42, %v480_v51 }
  0xe3   :  { %898 = vst [vmem:[%s1641_s3 + $0xf8] sm:$0xff] %v834_v49 }
  0xe4   :  { %899 = vst [vmem:[%s1641_s3 + $0x100] sm:$0xff] %v835_v50 }
  0xe5   :  { %900 = vst [vmem:[%s1641_s3 + $0x108] sm:$0xff] %v836_v52 }
  0xe7   :  { %v529_v53 = vpop.f32.mrf.mxu2 }
  0xe8   :  { %v837_v54 = vadd.f32 %v1386_v47, %v529_v53  ;;  %v578_v55 = vpop.f32.mrf.mxu3  ;;  %v433_v56 = vpop.f32.mrf.mxu0 }
  0xe9   :  { %v838_v57 = vadd.f32 %v1388_v48, %v578_v55  ;;  %v839_v58 = vadd.f32 %v1374_v41, %v433_v56  ;;  %v482_v59 = vpop.f32.mrf.mxu1 }
  0xea   :  { %901 = vst [vmem:[%s1641_s3 + $0x110] sm:$0xff] %v837_v54  ;;  %v840_v60 = vadd.f32 %v1376_v42, %v482_v59 }
  0xeb   :  { %902 = vst [vmem:[%s1641_s3 + $0x118] sm:$0xff] %v838_v57 }
  0xec   :  { %903 = vst [vmem:[%s1641_s3 + $0x120] sm:$0xff] %v839_v58 }
  0xed   :  { %904 = vst [vmem:[%s1641_s3 + $0x128] sm:$0xff] %v840_v60 }
  0xef   :  { %v531_v61 = vpop.f32.mrf.mxu2 }
  0xf0   :  { %v841_v62 = vadd.f32 %v1386_v47, %v531_v61  ;;  %v580_v63 = vpop.f32.mrf.mxu3  ;;  %v436_v0 = vpop.f32.mrf.mxu0 }
  0xf1   :  { %v842_v1 = vadd.f32 %v1388_v48, %v580_v63  ;;  %v843_v2 = vadd.f32 %v1374_v41, %v436_v0  ;;  %v485_v3 = vpop.f32.mrf.mxu1 }
  0xf2   :  { %905 = vst [vmem:[%s1641_s3 + $0x130] sm:$0xff] %v841_v62  ;;  %v844_v4 = vadd.f32 %v1376_v42, %v485_v3 }
  0xf3   :  { %906 = vst [vmem:[%s1641_s3 + $0x138] sm:$0xff] %v842_v1 }
  0xf4   :  { %907 = vst [vmem:[%s1641_s3 + $0x140] sm:$0xff] %v843_v2 }
  0xf5   :  { %908 = vst [vmem:[%s1641_s3 + $0x148] sm:$0xff] %v844_v4 }
  0xf7   :  { %v534_v5 = vpop.f32.mrf.mxu2 }
  0xf8   :  { %v845_v6 = vadd.f32 %v1386_v47, %v534_v5  ;;  %v583_v7 = vpop.f32.mrf.mxu3  ;;  %v438_v8 = vpop.f32.mrf.mxu0 }
  0xf9   :  { %v846_v9 = vadd.f32 %v1388_v48, %v583_v7  ;;  %v847_v10 = vadd.f32 %v1374_v41, %v438_v8  ;;  %v487_v11 = vpop.f32.mrf.mxu1 }
  0xfa   :  { %909 = vst [vmem:[%s1641_s3 + $0x150] sm:$0xff] %v845_v6  ;;  %v848_v12 = vadd.f32 %v1376_v42, %v487_v11 }
  0xfb   :  { %910 = vst [vmem:[%s1641_s3 + $0x158] sm:$0xff] %v846_v9 }
  0xfc   :  { %911 = vst [vmem:[%s1641_s3 + $0x160] sm:$0xff] %v847_v10 }
  0xfd   :  { %912 = vst [vmem:[%s1641_s3 + $0x168] sm:$0xff] %v848_v12 }
  0xff   :  { %v536_v13 = vpop.f32.mrf.mxu2 }
 0x100   :  { %v849_v14 = vadd.f32 %v1386_v47, %v536_v13  ;;  %v585_v15 = vpop.f32.mrf.mxu3  ;;  %v441_v16 = vpop.f32.mrf.mxu0 }
 0x101   :  { %v850_v17 = vadd.f32 %v1388_v48, %v585_v15  ;;  %v851_v18 = vadd.f32 %v1374_v41, %v441_v16  ;;  %v490_v19 = vpop.f32.mrf.mxu1 }
 0x102   :  { %913 = vst [vmem:[%s1641_s3 + $0x170] sm:$0xff] %v849_v14  ;;  %v852_v20 = vadd.f32 %v1376_v42, %v490_v19 }
 0x103   :  { %914 = vst [vmem:[%s1641_s3 + $0x178] sm:$0xff] %v850_v17 }
 0x104   :  { %915 = vst [vmem:[%s1641_s3 + $0x180] sm:$0xff] %v851_v18 }
 0x105   :  { %916 = vst [vmem:[%s1641_s3 + $0x188] sm:$0xff] %v852_v20 }
 0x107   :  { %v539_v21 = vpop.f32.mrf.mxu2 }
 0x108   :  { %v853_v22 = vadd.f32 %v1386_v47, %v539_v21  ;;  %v588_v23 = vpop.f32.mrf.mxu3  ;;  %v443_v24 = vpop.f32.mrf.mxu0 }
 0x109   :  { %v854_v25 = vadd.f32 %v1388_v48, %v588_v23  ;;  %v855_v26 = vadd.f32 %v1374_v41, %v443_v24  ;;  %v492_v27 = vpop.f32.mrf.mxu1 }
 0x10a   :  { %917 = vst [vmem:[%s1641_s3 + $0x190] sm:$0xff] %v853_v22  ;;  %v856_v28 = vadd.f32 %v1376_v42, %v492_v27 }
 0x10b   :  { %918 = vst [vmem:[%s1641_s3 + $0x198] sm:$0xff] %v854_v25 }
 0x10c   :  { %919 = vst [vmem:[%s1641_s3 + $0x1a0] sm:$0xff] %v855_v26 }
 0x10d   :  { %920 = vst [vmem:[%s1641_s3 + $0x1a8] sm:$0xff] %v856_v28 }
 0x10f   :  { %v541_v29 = vpop.f32.mrf.mxu2 }
 0x110   :  { %v857_v30 = vadd.f32 %v1386_v47, %v541_v29  ;;  %v590_v31 = vpop.f32.mrf.mxu3  ;;  %v446_v32 = vpop.f32.mrf.mxu0 }
 0x111   :  { %v858_v33 = vadd.f32 %v1388_v48, %v590_v31  ;;  %v859_v34 = vadd.f32 %v1374_v41, %v446_v32  ;;  %v495_v35 = vpop.f32.mrf.mxu1 }
 0x112   :  { %921 = vst [vmem:[%s1641_s3 + $0x1b0] sm:$0xff] %v857_v30  ;;  %v860_v36 = vadd.f32 %v1376_v42, %v495_v35 }
 0x113   :  { %922 = vst [vmem:[%s1641_s3 + $0x1b8] sm:$0xff] %v858_v33 }
 0x114   :  { %923 = vst [vmem:[%s1641_s3 + $0x1c0] sm:$0xff] %v859_v34 }
 0x115   :  { %924 = vst [vmem:[%s1641_s3 + $0x1c8] sm:$0xff] %v860_v36 }
 0x117   :  { %v544_v37 = vpop.f32.mrf.mxu2 }
 0x118   :  { %v861_v38 = vadd.f32 %v1386_v47, %v544_v37  ;;  %v593_v39 = vpop.f32.mrf.mxu3  ;;  %v448_v40 = vpop.f32.mrf.mxu0 }
 0x119   :  { %v862_v43 = vadd.f32 %v1388_v48, %v593_v39  ;;  %v863_v44 = vadd.f32 %v1374_v41, %v448_v40  ;;  %v497_v45 = vpop.f32.mrf.mxu1 }
 0x11a   :  { %925 = vst [vmem:[%s1641_s3 + $0x1d0] sm:$0xff] %v861_v38  ;;  %v864_v46 = vadd.f32 %v1376_v42, %v497_v45 }
 0x11b   :  { %926 = vst [vmem:[%s1641_s3 + $0x1d8] sm:$0xff] %v862_v43 }
 0x11c   :  { %927 = vst [vmem:[%s1641_s3 + $0x1e0] sm:$0xff] %v863_v44 }
 0x11d   :  { %928 = vst [vmem:[%s1641_s3 + $0x1e8] sm:$0xff] %v864_v46 }
 0x11f   :  { %v546_v41 = vpop.f32.mrf.mxu2 }
 0x120   :  { %v865_v49 = vadd.f32 %v1386_v47, %v546_v41  ;;  %v595_v50 = vpop.f32.mrf.mxu3 }
 0x121   :  { %v866_v51 = vadd.f32 %v1388_v48, %v595_v50 }
 0x122   :  { %929 = vst [vmem:[%s1641_s3 + $0x1f0] sm:$0xff] %v865_v49 }
 0x123   :  { %930 = vst [vmem:[%s1641_s3 + $0x1f8] sm:$0xff] %v866_v51 }

// kernel: rnn_model_forward.6
= control target key start
LH: loop header
LB: loop body
LE: loop exit
PB: predicated region body
PF: predicated region fallthrough
CT: control target
= control target key end

     0   :  { %s3926_s1 = inlined_call_operand.vmem [shape: bf16[128,512], index: 1, kind: input, shape index: {}]   ;;  %s3927_s2 = inlined_call_operand.vmem [shape: f32[8,128], index: 2, kind: input, shape index: {}, may-alias: {2,3}]   ;;  %s3928_s0 = inlined_call_operand.vmem [shape: f32[16,8,512], index: 0, kind: input, shape index: {}]   ;;  %s3929_s3 = inlined_call_operand.vmem [shape: f32[8,128], index: 3, kind: input, shape index: {}, may-alias: {2,3}]   ;;  %s3930_s4 = inlined_call_operand.vmem [shape: bf16[16,8,128], index: 4, kind: output, shape index: {0}]   ;;  %s3931_s6 = inlined_call_operand.vmem [shape: f32[8,128], index: 6, kind: output, shape index: {2}]   ;;  %s3932_s5 = inlined_call_operand.vmem [shape: f32[8,128], index: 5, kind: output, shape index: {1}]  }
   0x1   :  { %v2386_v0 = vld [vmem:[%s3926_s1 + $0xe0] sm:$0xf]  ;;  %v2553_v1 = vld [vmem:[%s3926_s1 + $0xec] sm:$0xf0]  ;;  %v2551_v2 = vld [vmem:[%s3926_s1 + $0xe4] sm:$0xf] }
   0x2   :  { %v2855_v3 = vor.u32 %v2553_v1, %v2386_v0  ;;  %v2388_v4 = vld [vmem:[%s3926_s1 + $0xf0] sm:$0xf0]  ;;  %v2552_v5 = vld [vmem:[%s3926_s1 + $0xec] sm:$0xf]  ;;  %v2396_v6 = vld [vmem:[%s3926_s1 + $0xf8] sm:$0xf0] }
   0x3   :  { %v2866_v7 = vor.u32 %v2551_v2, %v2388_v4  ;;  %v2868_v8 = vor.u32 %v2552_v5, %v2396_v6  ;;  %v2370_v9 = vld [vmem:[%s3926_s1 + $0xc0] sm:$0xf]  ;;  %v2549_v10 = vld [vmem:[%s3926_s1 + $0xcc] sm:$0xf0]  ;;  %v2547_v11 = vld [vmem:[%s3926_s1 + $0xc4] sm:$0xf] }
   0x4   :  { %227 = vmatpush.bf16.msra.mxu0 %v2855_v3  ;;  %v2880_v12 = vor.u32 %v2549_v10, %v2370_v9  ;;  %v2372_v13 = vld [vmem:[%s3926_s1 + $0xd0] sm:$0xf0]  ;;  %v2548_v14 = vld [vmem:[%s3926_s1 + $0xcc] sm:$0xf]  ;;  %v2380_v15 = vld [vmem:[%s3926_s1 + $0xd8] sm:$0xf0] }
   0x5   :  { %240 = vmatpush.bf16.msra.mxu1 %v2866_v7  ;;  %266 = vmatpush.bf16.msra.mxu3 %v2868_v8  ;;  %v2893_v16 = vor.u32 %v2547_v11, %v2372_v13  ;;  %v2895_v17 = vor.u32 %v2548_v14, %v2380_v15  ;;  %v2394_v18 = vld [vmem:[%s3926_s1 + $0xe8] sm:$0xf]  ;;  %v2554_v19 = vld [vmem:[%s3926_s1 + $0xf4] sm:$0xf0]  ;;  %v2354_v20 = vld [vmem:[%s3926_s1 + $0xa0] sm:$0xf] }
   0x6   :  { %v2906_v21 = vor.u32 %v2554_v19, %v2394_v18  ;;  %v2545_v22 = vld [vmem:[%s3926_s1 + $0xac] sm:$0xf0]  ;;  %v2543_v23 = vld [vmem:[%s3926_s1 + $0xa4] sm:$0xf]  ;;  %v2356_v24 = vld [vmem:[%s3926_s1 + $0xb0] sm:$0xf0] }
   0x7   :  { %v2544_v25 = vld [vmem:[%s3926_s1 + $0xac] sm:$0xf]  ;;  %v2364_v26 = vld [vmem:[%s3926_s1 + $0xb8] sm:$0xf0]  ;;  %v2378_v27 = vld [vmem:[%s3926_s1 + $0xc8] sm:$0xf]  ;;  %v2928_v28 = vor.u32 %v2545_v22, %v2354_v20  ;;  %v2941_v32 = vor.u32 %v2543_v23, %v2356_v24 }
   0x8   :  { %228 = vmatpush.bf16.msra.mxu0 %v2880_v12  ;;  %253 = vmatpush.bf16.msra.mxu2 %v2906_v21  ;;  %v2550_v29 = vld [vmem:[%s3926_s1 + $0xd4] sm:$0xf0]  ;;  %v2338_v30 = vld [vmem:[%s3926_s1 + $0x80] sm:$0xf]  ;;  %v2541_v31 = vld [vmem:[%s3926_s1 + $0x8c] sm:$0xf0]  ;;  %v2943_v33 = vor.u32 %v2544_v25, %v2364_v26 }
   0x9   :  { %241 = vmatpush.bf16.msra.mxu1 %v2893_v16  ;;  %267 = vmatpush.bf16.msra.mxu3 %v2895_v17  ;;  %v2945_v34 = vor.u32 %v2550_v29, %v2378_v27  ;;  %v2539_v35 = vld [vmem:[%s3926_s1 + $0x84] sm:$0xf]  ;;  %v2340_v36 = vld [vmem:[%s3926_s1 + $0x90] sm:$0xf0]  ;;  %v2540_v37 = vld [vmem:[%s3926_s1 + $0x8c] sm:$0xf]  ;;  %v2967_v41 = vor.u32 %v2541_v31, %v2338_v30 }
   0xa   :  { %v2348_v38 = vld [vmem:[%s3926_s1 + $0x98] sm:$0xf0]  ;;  %v2362_v39 = vld [vmem:[%s3926_s1 + $0xa8] sm:$0xf]  ;;  %v2546_v40 = vld [vmem:[%s3926_s1 + $0xb4] sm:$0xf0]  ;;  %v2979_v45 = vor.u32 %v2539_v35, %v2340_v36 }
   0xb   :  { %v2969_v42 = vor.u32 %v2546_v40, %v2362_v39  ;;  %v2322_v43 = vld [vmem:[%s3926_s1 + $0x60] sm:$0xf]  ;;  %v2537_v44 = vld [vmem:[%s3926_s1 + $0x6c] sm:$0xf0]  ;;  %v2981_v46 = vor.u32 %v2540_v37, %v2348_v38  ;;  %v2535_v47 = vld [vmem:[%s3926_s1 + $0x64] sm:$0xf] }
   0xc   :  { %229 = vmatpush.bf16.msra.mxu0 %v2928_v28  ;;  %254 = vmatpush.bf16.msra.mxu2 %v2945_v34  ;;  %v2346_v48 = vld [vmem:[%s3926_s1 + $0x88] sm:$0xf]  ;;  %v2542_v49 = vld [vmem:[%s3926_s1 + $0x94] sm:$0xf0]  ;;  %v2324_v50 = vld [vmem:[%s3926_s1 + $0x70] sm:$0xf0]  ;;  %v3003_v53 = vor.u32 %v2537_v44, %v2322_v43 }
   0xd   :  { %242 = vmatpush.bf16.msra.mxu1 %v2941_v32  ;;  %268 = vmatpush.bf16.msra.mxu3 %v2943_v33  ;;  %v2536_v51 = vld [vmem:[%s3926_s1 + $0x6c] sm:$0xf]  ;;  %v2332_v52 = vld [vmem:[%s3926_s1 + $0x78] sm:$0xf0]  ;;  %v3005_v54 = vor.u32 %v2542_v49, %v2346_v48  ;;  %v2306_v55 = vld [vmem:[%s3926_s1 + $0x40] sm:$0xf]  ;;  %v3015_v57 = vor.u32 %v2535_v47, %v2324_v50 }
   0xe   :  { %v2533_v56 = vld [vmem:[%s3926_s1 + $0x4c] sm:$0xf0]  ;;  %v3017_v58 = vor.u32 %v2536_v51, %v2332_v52  ;;  %v2531_v59 = vld [vmem:[%s3926_s1 + $0x44] sm:$0xf]  ;;  %v2330_v60 = vld [vmem:[%s3926_s1 + $0x68] sm:$0xf] }
   0xf   :  { %v2538_v61 = vld [vmem:[%s3926_s1 + $0x74] sm:$0xf0]  ;;  %v2308_v62 = vld [vmem:[%s3926_s1 + $0x50] sm:$0xf0]  ;;  %v2532_v63 = vld [vmem:[%s3926_s1 + $0x4c] sm:$0xf]  ;;  %v3039_v1 = vor.u32 %v2533_v56, %v2306_v55 }
  0x10   :  { %230 = vmatpush.bf16.msra.mxu0 %v2967_v41  ;;  %255 = vmatpush.bf16.msra.mxu2 %v2969_v42  ;;  %v2316_v0 = vld [vmem:[%s3926_s1 + $0x58] sm:$0xf0]  ;;  %v3041_v2 = vor.u32 %v2538_v61, %v2330_v60  ;;  %v2290_v4 = vld [vmem:[%s3926_s1 + $0x20] sm:$0xf]  ;;  %v2529_v5 = vld [vmem:[%s3926_s1 + $0x2c] sm:$0xf0]  ;;  %v3051_v6 = vor.u32 %v2531_v59, %v2308_v62 }
  0x11   :  { %243 = vmatpush.bf16.msra.mxu1 %v2979_v45  ;;  %269 = vmatpush.bf16.msra.mxu3 %v2981_v46  ;;  %v3053_v9 = vor.u32 %v2532_v63, %v2316_v0  ;;  %v2527_v10 = vld [vmem:[%s3926_s1 + $0x24] sm:$0xf]  ;;  %v2314_v11 = vld [vmem:[%s3926_s1 + $0x48] sm:$0xf]  ;;  %v2534_v13 = vld [vmem:[%s3926_s1 + $0x54] sm:$0xf0]  ;;  %v3075_v19 = vor.u32 %v2529_v5, %v2290_v4 }
  0x12   :  { %v2292_v14 = vld [vmem:[%s3926_s1 + $0x30] sm:$0xf0]  ;;  %v2528_v15 = vld [vmem:[%s3926_s1 + $0x2c] sm:$0xf]  ;;  %v2300_v18 = vld [vmem:[%s3926_s1 + $0x38] sm:$0xf0]  ;;  %v3077_v20 = vor.u32 %v2534_v13, %v2314_v11 }
  0x13   :  { %v2274_v22 = vld [vmem:[%s3926_s1] sm:$0xf]  ;;  %v2525_v23 = vld [vmem:[%s3926_s1 + $0xc] sm:$0xf0]  ;;  %v3087_v24 = vor.u32 %v2527_v10, %v2292_v14  ;;  %v3089_v25 = vor.u32 %v2528_v15, %v2300_v18  ;;  %v2523_v26 = vld [vmem:[%s3926_s1 + $0x4] sm:$0xf] }
  0x14   :  { %231 = vmatpush.bf16.msra.mxu0 %v3003_v53  ;;  %256 = vmatpush.bf16.msra.mxu2 %v3005_v54  ;;  %v2298_v27 = vld [vmem:[%s3926_s1 + $0x28] sm:$0xf]  ;;  %v2530_v29 = vld [vmem:[%s3926_s1 + $0x34] sm:$0xf0]  ;;  %v2276_v30 = vld [vmem:[%s3926_s1 + $0x10] sm:$0xf0]  ;;  %v3111_v36 = vor.u32 %v2525_v23, %v2274_v22 }
  0x15   :  { %244 = vmatpush.bf16.msra.mxu1 %v3015_v57  ;;  %270 = vmatpush.bf16.msra.mxu3 %v3017_v58  ;;  %v2524_v31 = vld [vmem:[%s3926_s1 + $0xc] sm:$0xf]  ;;  %v2284_v35 = vld [vmem:[%s3926_s1 + $0x18] sm:$0xf0]  ;;  %v24_v37 = vld [vmem:[%s3927_s2] sm:$0xff]  ;;  %v3116_v38 = vor.u32 %v2530_v29, %v2298_v27  ;;  %v3120_v39 = vor.u32 %v2523_v26, %v2276_v30 }
  0x16   :  { %v3122_v40 = vor.u32 %v2524_v31, %v2284_v35  ;;  %v2282_v43 = vld [vmem:[%s3926_s1 + $0x8] sm:$0xf]  ;;  %v2526_v44 = vld [vmem:[%s3926_s1 + $0x14] sm:$0xf0]  ;;  %v66_v47 = vpack.c.bf16 %v24_v37, %v24_v37  ;;  %v62_v49 = vld [vmem:[%s3928_s0] sm:$0xff] }
  0x17   :  { %v3134_v48 = vor.u32 %v2526_v44, %v2282_v43  ;;  %v63_v50 = vld [vmem:[%s3928_s0 + $0x8] sm:$0xff]  ;;  %v65_v61 = vld [vmem:[%s3928_s0 + $0x18] sm:$0xff]  ;;  %v64_v18 = vld [vmem:[%s3928_s0 + $0x10] sm:$0xff] }
  0x18   :  { %232 = vmatpush.bf16.msra.mxu0 %v3039_v1  ;;  %257 = vmatpush.bf16.msra.mxu2 %v3041_v2 }
  0x19   :  { %245 = vmatpush.bf16.msra.mxu1 %v3051_v6  ;;  %271 = vmatpush.bf16.msra.mxu3 %v3053_v9 }
  0x1c   :  { %233 = vmatpush.bf16.msra.mxu0 %v3075_v19  ;;  %258 = vmatpush.bf16.msra.mxu2 %v3077_v20 }
  0x1d   :  { %246 = vmatpush.bf16.msra.mxu1 %v3087_v24  ;;  %272 = vmatpush.bf16.msra.mxu3 %v3089_v25 }
  0x20   :  { %234 = vmatpush.bf16.msra.mxu0 %v3111_v36  ;;  %259 = vmatpush.bf16.msra.mxu2 %v3116_v38 }
  0x21   :  { %247 = vmatpush.bf16.msra.mxu1 %v3120_v39  ;;  %273 = vmatpush.bf16.msra.mxu3 %v3122_v40 }
  0x23   :  { %235 = vmatmul.bf16.vlgmr.msra.gmra.mxu0 %v66_v47 }
  0x24   :  { %353 = vmatpush.bf16.msrb.mxu0 %v2855_v3  ;;  %248 = vmatmul.bf16.vlgmr.msra.gmra.mxu1 %v66_v47 }
  0x25   :  { %366 = vmatpush.bf16.msrb.mxu1 %v2866_v7  ;;  %392 = vmatpush.bf16.msrb.mxu3 %v2868_v8 }
  0x26   :  { %274 = vmatmul.bf16.vlgmr.msra.gmra.mxu3 %v66_v47  ;;  %260 = vmatpush.bf16.msra.mxu2 %v3134_v48 }
  0x28   :  { %354 = vmatpush.bf16.msrb.mxu0 %v2880_v12 }
  0x29   :  { %367 = vmatpush.bf16.msrb.mxu1 %v2893_v16  ;;  %393 = vmatpush.bf16.msrb.mxu3 %v2895_v17 }
  0x2a   :  { %379 = vmatpush.bf16.msrb.mxu2 %v2906_v21 }
  0x2b   :  { %261 = vmatmul.bf16.vlgmr.msra.gmra.mxu2 %v66_v47 }
  0x2c   :  { %355 = vmatpush.bf16.msrb.mxu0 %v2928_v28 }
  0x2d   :  { %368 = vmatpush.bf16.msrb.mxu1 %v2941_v32  ;;  %394 = vmatpush.bf16.msrb.mxu3 %v2943_v33 }
  0x2e   :  { %380 = vmatpush.bf16.msrb.mxu2 %v2945_v34 }
  0x30   :  { %356 = vmatpush.bf16.msrb.mxu0 %v2967_v41 }
  0x31   :  { %369 = vmatpush.bf16.msrb.mxu1 %v2979_v45  ;;  %395 = vmatpush.bf16.msrb.mxu3 %v2981_v46 }
  0x32   :  { %381 = vmatpush.bf16.msrb.mxu2 %v2969_v42 }
  0x34   :  { %357 = vmatpush.bf16.msrb.mxu0 %v3003_v53 }
  0x35   :  { %370 = vmatpush.bf16.msrb.mxu1 %v3015_v57  ;;  %396 = vmatpush.bf16.msrb.mxu3 %v3017_v58 }
  0x36   :  { %382 = vmatpush.bf16.msrb.mxu2 %v3005_v54 }
  0x38   :  { %358 = vmatpush.bf16.msrb.mxu0 %v3039_v1 }
  0x39   :  { %371 = vmatpush.bf16.msrb.mxu1 %v3051_v6  ;;  %397 = vmatpush.bf16.msrb.mxu3 %v3053_v9 }
  0x3a   :  { %383 = vmatpush.bf16.msrb.mxu2 %v3041_v2 }
  0x3c   :  { %359 = vmatpush.bf16.msrb.mxu0 %v3075_v19 }
  0x3d   :  { %372 = vmatpush.bf16.msrb.mxu1 %v3087_v24  ;;  %398 = vmatpush.bf16.msrb.mxu3 %v3089_v25 }
  0x3e   :  { %384 = vmatpush.bf16.msrb.mxu2 %v3077_v20 }
  0x40   :  { %360 = vmatpush.bf16.msrb.mxu0 %v3111_v36 }
  0x41   :  { %373 = vmatpush.bf16.msrb.mxu1 %v3120_v39  ;;  %399 = vmatpush.bf16.msrb.mxu3 %v3122_v40 }
  0x42   :  { %385 = vmatpush.bf16.msrb.mxu2 %v3116_v38 }
  0x44   :  { %480 = vmatpush.bf16.msra.mxu0 %v2855_v3 }
  0x45   :  { %493 = vmatpush.bf16.msra.mxu1 %v2866_v7  ;;  %519 = vmatpush.bf16.msra.mxu3 %v2868_v8 }
  0x46   :  { %386 = vmatpush.bf16.msrb.mxu2 %v3134_v48 }
  0x48   :  { %481 = vmatpush.bf16.msra.mxu0 %v2880_v12 }
  0x49   :  { %494 = vmatpush.bf16.msra.mxu1 %v2893_v16  ;;  %520 = vmatpush.bf16.msra.mxu3 %v2895_v17 }
  0x4a   :  { %506 = vmatpush.bf16.msra.mxu2 %v2906_v21 }
  0x4c   :  { %482 = vmatpush.bf16.msra.mxu0 %v2928_v28 }
  0x4d   :  { %495 = vmatpush.bf16.msra.mxu1 %v2941_v32  ;;  %521 = vmatpush.bf16.msra.mxu3 %v2943_v33 }
  0x4e   :  { %507 = vmatpush.bf16.msra.mxu2 %v2945_v34 }
  0x50   :  { %483 = vmatpush.bf16.msra.mxu0 %v2967_v41 }
  0x51   :  { %496 = vmatpush.bf16.msra.mxu1 %v2979_v45  ;;  %522 = vmatpush.bf16.msra.mxu3 %v2981_v46 }
  0x52   :  { %508 = vmatpush.bf16.msra.mxu2 %v2969_v42 }
  0x54   :  { %484 = vmatpush.bf16.msra.mxu0 %v3003_v53 }
  0x55   :  { %497 = vmatpush.bf16.msra.mxu1 %v3015_v57  ;;  %523 = vmatpush.bf16.msra.mxu3 %v3017_v58 }
  0x56   :  { %509 = vmatpush.bf16.msra.mxu2 %v3005_v54 }
  0x58   :  { %485 = vmatpush.bf16.msra.mxu0 %v3039_v1 }
  0x59   :  { %498 = vmatpush.bf16.msra.mxu1 %v3051_v6  ;;  %524 = vmatpush.bf16.msra.mxu3 %v3053_v9 }
  0x5a   :  { %510 = vmatpush.bf16.msra.mxu2 %v3041_v2 }
  0x5c   :  { %486 = vmatpush.bf16.msra.mxu0 %v3075_v19 }
  0x5d   :  { %499 = vmatpush.bf16.msra.mxu1 %v3087_v24  ;;  %525 = vmatpush.bf16.msra.mxu3 %v3089_v25 }
  0x5e   :  { %511 = vmatpush.bf16.msra.mxu2 %v3077_v20 }
  0x60   :  { %487 = vmatpush.bf16.msra.mxu0 %v3111_v36 }
  0x61   :  { %500 = vmatpush.bf16.msra.mxu1 %v3120_v39  ;;  %526 = vmatpush.bf16.msra.mxu3 %v3122_v40 }
  0x62   :  { %512 = vmatpush.bf16.msra.mxu2 %v3116_v38 }
  0x66   :  { %513 = vmatpush.bf16.msra.mxu2 %v3134_v48 }
  0xa0   :  { %v236_v51 = vpop.f32.mrf.mxu0 }
  0xa1   :  { %v279_v52 = vadd.f32 %v236_v51, %v62_v49  ;;  %v249_v55 = vpop.f32.mrf.mxu1 }
  0xa2   :  { %v280_v56 = vadd.f32 %v249_v55, %v63_v50 }
  0xa3   :  { %v2400_v59 = vmul.f32 -1.442695, %v279_v52 }
  0xa4   :  { %v2401_v60 = vmul.f32 -1.442695, %v280_v56 }
  0xa5   :  { %2555 = vpow2.f32 %v2400_v59 }
  0xa6   :  { %2557 = vpow2.f32 %v2401_v60 }
  0xa8   :  { %v238_v0 = vpop.f32.mrf.mxu0 }
  0xa9   :  { %v275_v62 = vpop.f32.mrf.mxu3  ;;  %v251_v4 = vpop.f32.mrf.mxu1 }
  0xaa   :  { %v282_v63 = vadd.f32 %v275_v62, %v65_v61  ;;  %v26_v4 = vld [vmem:[%s3929_s3] sm:$0xff] }
  0xab   :  { %v2556_v10 = vpop.eup %2555 }
  0xac   :  { %v2402_v5 = vmul.f32 -1.442695, %v282_v63  ;;  %v2558_v13 = vpop.eup %2557  ;;  %v286_v14 = vadd.f32 1.0, %v2556_v10 }
  0xad   :  { %v305_v15 = vadd.f32 1.0, %v2558_v13 }
  0xae   :  { %v262_v11 = vpop.f32.mrf.mxu2  ;;  %2559 = vpow2.f32 %v2402_v5  ;;  %v298_v47 = vand.u32 2147483648, %v286_v14  ;;  %v296_v51 = vand.u32 2147483647, %v286_v14  ;;  %vm292_vm2 = vweird.f32 %v286_v14 }
  0xaf   :  { %2561 = vrcp.f32 %v286_v14  ;;  %v281_v26 = vadd.f32 %v262_v11, %v64_v18  ;;  %v317_v49 = vand.u32 2147483648, %v305_v15  ;;  %v315_v55 = vand.u32 2147483647, %v305_v15 }
  0xb0   :  { %2563 = vrcp.f32 %v305_v15  ;;  %vm311_vm3 = vweird.f32 %v305_v15  ;;  %v299_v62 = vor.u32 1.1754944e-38, %v298_v47  ;;  %vm297_vm6 = vcmp.eq.f32.partialorder %v296_v51, 8.507059e+37 }
  0xb1   :  { %v277_v22 = vpop.f32.mrf.mxu3  ;;  %v318_v0 = vor.u32 1.1754944e-38, %v317_v49  ;;  %vm316_vm7 = vcmp.eq.f32.partialorder %v315_v55, 8.507059e+37  ;;  %v2404_v49 = vld [vmem:[%s3928_s0 + $0x28] sm:$0xff] }
  0xb4   :  { %v2560_v23 = vpop.eup %2559 }
  0xb5   :  { %v325_v27 = vadd.f32 1.0, %v2560_v23  ;;  %v2562_v30 = vpop.eup %2561 }
  0xb6   :  { %v264_v29 = vpop.f32.mrf.mxu2  ;;  %v2564_v31 = vpop.eup %2563  ;;  %v288_v35 = vmul.f32 %v2562_v30, %v286_v14  ;;  %vm293_vm0 = vweird.f32 %v2562_v30 }
  0xb7   :  { %2565 = vrcp.f32 %v325_v27  ;;  %v307_v37 = vmul.f32 %v2564_v31, %v305_v15  ;;  %vm312_vm1 = vweird.f32 %v2564_v31  ;;  %vm294_vm4 = vmor %vm292_vm2, %vm293_vm0  ;;  %v337_v29 = vand.u32 2147483648, %v325_v27 }
  0xb8   :  { %2567 = vtanh.f32 %v281_v26  ;;  %v289_v43 = vsub.f32 1.0, %v288_v35  ;;  %vm313_vm5 = vmor %vm311_vm3, %vm312_vm1  ;;  %vm331_vm9 = vweird.f32 %v325_v27  ;;  %v335_v35 = vand.u32 2147483647, %v325_v27 }
  0xb9   :  { %v308_v44 = vsub.f32 1.0, %v307_v37  ;;  %v338_v37 = vor.u32 1.1754944e-38, %v337_v29 }
  0xba   :  { %v290_v50 = vmul.f32 %v2562_v30, %v289_v43  ;;  %vm336_vm11 = vcmp.eq.f32.partialorder %v335_v35, 8.507059e+37 }
  0xbb   :  { %v309_v52 = vmul.f32 %v2564_v31, %v308_v44 }
  0xbc   :  { %v291_v59 = vadd.f32 %v2562_v30, %v290_v50 }
  0xbd   :  { %v2566_v56 = vpop.eup %2565  ;;  %v310_v63 = vadd.f32 %v2564_v31, %v309_v52 }
  0xbe   :  { %v2568_v60 = vpop.eup %2567  ;;  %v327_v61 = vmul.f32 %v2566_v56, %v325_v27  ;;  %v295_v5 = vsel %vm294_vm4, %v2562_v30, %v291_v59  ;;  %vm332_vm8 = vweird.f32 %v2566_v56  ;;  %v2403_v27 = vld [vmem:[%s3928_s0 + $0x20] sm:$0xff] }
  0xbf   :  { %v300_v11 = vsel %vm297_vm6, %v299_v62, %v295_v5  ;;  %v314_v13 = vsel %vm313_vm5, %v2564_v31, %v310_v63  ;;  %vm333_vm10 = vmor %vm331_vm9, %vm332_vm8 }
  0xc0   :  { %v328_v10 = vsub.f32 1.0, %v327_v61  ;;  %v319_v18 = vsel %vm316_vm7, %v318_v0, %v314_v13  ;;  %v342_v14 = vmul.f32 %v2568_v60, %v300_v11  ;;  %v2406_v60 = vld [vmem:[%s3928_s0 + $0x38] sm:$0xff] }
  0xc1   :  { %v341_v15 = vmul.f32 %v319_v18, %v26_v4 }
  0xc2   :  { %v329_v22 = vmul.f32 %v2566_v56, %v328_v10 }
  0xc3   :  { %v3216_v23 = vadd.f32 %v342_v14, %v341_v15  ;;  %v2405_v15 = vld [vmem:[%s3928_s0 + $0x30] sm:$0xff] }
  0xc4   :  { %v330_v26 = vadd.f32 %v2566_v56, %v329_v22 }
  0xc5   :  { %2569 = vtanh.f32 %v3216_v23 }
  0xc6   :  { %v334_v30 = vsel %vm333_vm10, %v2566_v56, %v330_v26 }
  0xc7   :  { %v339_v31 = vsel %vm336_vm11, %v338_v37, %v334_v30 }
  0xcb   :  { %v2570_v43 = vpop.eup %2569 }
  0xcc   :  { %v345_v44 = vmul.f32 %v2570_v43, %v339_v31 }
  0xce   :  { %v346_v47 = vpack.c.bf16 %v345_v44, %v345_v44 }
  0xd0   :  { %347 = vst [vmem:[%s3930_s4] sm:$0xf] %v346_v47  ;;  %361 = vmatmul.bf16.vlgmr.msrb.gmra.mxu0 %v346_v47  ;;  %374 = vmatmul.bf16.vlgmr.msrb.gmra.mxu1 %v346_v47 }
  0xd1   :  { %387 = vmatmul.bf16.vlgmr.msrb.gmra.mxu2 %v346_v47  ;;  %400 = vmatmul.bf16.vlgmr.msrb.gmra.mxu3 %v346_v47 }
  0xd2   :  { %607 = vmatpush.bf16.msrb.mxu0 %v2855_v3  ;;  %620 = vmatpush.bf16.msrb.mxu1 %v2866_v7 }
  0xd3   :  { %633 = vmatpush.bf16.msrb.mxu2 %v2906_v21  ;;  %646 = vmatpush.bf16.msrb.mxu3 %v2868_v8 }
  0xd6   :  { %608 = vmatpush.bf16.msrb.mxu0 %v2880_v12  ;;  %621 = vmatpush.bf16.msrb.mxu1 %v2893_v16 }
  0xd7   :  { %634 = vmatpush.bf16.msrb.mxu2 %v2945_v34  ;;  %647 = vmatpush.bf16.msrb.mxu3 %v2895_v17 }
  0xda   :  { %609 = vmatpush.bf16.msrb.mxu0 %v2928_v28  ;;  %622 = vmatpush.bf16.msrb.mxu1 %v2941_v32 }
  0xdb   :  { %635 = vmatpush.bf16.msrb.mxu2 %v2969_v42  ;;  %648 = vmatpush.bf16.msrb.mxu3 %v2943_v33 }
  0xde   :  { %610 = vmatpush.bf16.msrb.mxu0 %v2967_v41  ;;  %623 = vmatpush.bf16.msrb.mxu1 %v2979_v45 }
  0xdf   :  { %636 = vmatpush.bf16.msrb.mxu2 %v3005_v54  ;;  %649 = vmatpush.bf16.msrb.mxu3 %v2981_v46 }
  0xe2   :  { %611 = vmatpush.bf16.msrb.mxu0 %v3003_v53  ;;  %624 = vmatpush.bf16.msrb.mxu1 %v3015_v57 }
  0xe3   :  { %637 = vmatpush.bf16.msrb.mxu2 %v3041_v2  ;;  %650 = vmatpush.bf16.msrb.mxu3 %v3017_v58 }
  0xe6   :  { %612 = vmatpush.bf16.msrb.mxu0 %v3039_v1  ;;  %625 = vmatpush.bf16.msrb.mxu1 %v3051_v6 }
  0xe7   :  { %638 = vmatpush.bf16.msrb.mxu2 %v3077_v20  ;;  %651 = vmatpush.bf16.msrb.mxu3 %v3053_v9 }
  0xea   :  { %613 = vmatpush.bf16.msrb.mxu0 %v3075_v19  ;;  %626 = vmatpush.bf16.msrb.mxu1 %v3087_v24 }
  0xeb   :  { %639 = vmatpush.bf16.msrb.mxu2 %v3116_v38  ;;  %652 = vmatpush.bf16.msrb.mxu3 %v3089_v25 }
  0xee   :  { %614 = vmatpush.bf16.msrb.mxu0 %v3111_v36  ;;  %627 = vmatpush.bf16.msrb.mxu1 %v3120_v39 }
  0xef   :  { %640 = vmatpush.bf16.msrb.mxu2 %v3134_v48  ;;  %653 = vmatpush.bf16.msrb.mxu3 %v3122_v40 }
 0x14d   :  { %v362_v50 = vpop.f32.mrf.mxu0  ;;  %v375_v51 = vpop.f32.mrf.mxu1 }
 0x14e   :  { %v405_v52 = vadd.f32 %v2403_v27, %v362_v50  ;;  %v406_v55 = vadd.f32 %v2404_v49, %v375_v51 }
 0x150   :  { %v2407_v56 = vmul.f32 -1.442695, %v405_v52  ;;  %v2408_v59 = vmul.f32 -1.442695, %v406_v55 }
 0x152   :  { %2571 = vpow2.f32 %v2407_v56 }
 0x153   :  { %2573 = vpow2.f32 %v2408_v59 }
 0x154   :  { %v388_v61 = vpop.f32.mrf.mxu2  ;;  %v401_v62 = vpop.f32.mrf.mxu3 }
 0x155   :  { %v408_v63 = vadd.f32 %v2406_v60, %v401_v62  ;;  %v364_v0 = vpop.f32.mrf.mxu0  ;;  %v377_v4 = vpop.f32.mrf.mxu1  ;;  %v407_v30 = vadd.f32 %v2405_v15, %v388_v61 }
 0x157   :  { %v2409_v5 = vmul.f32 -1.442695, %v408_v63 }
 0x158   :  { %v2572_v10 = vpop.eup %2571 }
 0x159   :  { %v2574_v11 = vpop.eup %2573  ;;  %v412_v13 = vadd.f32 1.0, %v2572_v10  ;;  %2575 = vpow2.f32 %v2409_v5 }
 0x15a   :  { %v431_v18 = vadd.f32 1.0, %v2574_v11 }
 0x15b   :  { %2577 = vrcp.f32 %v412_v13  ;;  %v424_v27 = vand.u32 2147483648, %v412_v13  ;;  %v422_v51 = vand.u32 2147483647, %v412_v13  ;;  %vm418_vm14 = vweird.f32 %v412_v13 }
 0x15c   :  { %2579 = vrcp.f32 %v431_v18  ;;  %v390_v14 = vpop.f32.mrf.mxu2  ;;  %v403_v22 = vpop.f32.mrf.mxu3  ;;  %v443_v49 = vand.u32 2147483648, %v431_v18  ;;  %v441_v55 = vand.u32 2147483647, %v431_v18  ;;  %vm437_vm15 = vweird.f32 %v431_v18 }
 0x15d   :  { %v425_v60 = vor.u32 1.1754944e-38, %v424_v27  ;;  %vm423_vm2 = vcmp.eq.f32.partialorder %v422_v51, 8.507059e+37 }
 0x15e   :  { %v444_v63 = vor.u32 1.1754944e-38, %v443_v49  ;;  %vm442_vm3 = vcmp.eq.f32.partialorder %v441_v55, 8.507059e+37 }
 0x15f   :  { %v2576_v26 = vpop.eup %2575 }
 0x160   :  { %v451_v29 = vadd.f32 1.0, %v2576_v26 }
 0x161   :  { %v2578_v35 = vpop.eup %2577 }
 0x162   :  { %v2580_v37 = vpop.eup %2579  ;;  %v414_v43 = vmul.f32 %v2578_v35, %v412_v13  ;;  %2581 = vrcp.f32 %v451_v29  ;;  %vm419_vm12 = vweird.f32 %v2578_v35  ;;  %vm457_vm5 = vweird.f32 %v451_v29 }
 0x163   :  { %v433_v31 = vmul.f32 %v2580_v37, %v431_v18  ;;  %2583 = vtanh.f32 %v407_v30  ;;  %vm438_vm13 = vweird.f32 %v2580_v37  ;;  %vm420_vm0 = vmor %vm418_vm14, %vm419_vm12  ;;  %v463_v30 = vand.u32 2147483648, %v451_v29 }
 0x164   :  { %v415_v44 = vsub.f32 1.0, %v414_v43  ;;  %vm439_vm1 = vmor %vm437_vm15, %vm438_vm13 }
 0x165   :  { %v434_v47 = vsub.f32 1.0, %v433_v31  ;;  %v464_v31 = vor.u32 1.1754944e-38, %v463_v30 }
 0x166   :  { %v416_v50 = vmul.f32 %v2578_v35, %v415_v44 }
 0x167   :  { %v435_v52 = vmul.f32 %v2580_v37, %v434_v47 }
 0x168   :  { %v2582_v56 = vpop.eup %2581  ;;  %v417_v59 = vadd.f32 %v2578_v35, %v416_v50 }
 0x169   :  { %v436_v61 = vadd.f32 %v2580_v37, %v435_v52  ;;  %v453_v62 = vmul.f32 %v2582_v56, %v451_v29  ;;  %v2584_v4 = vpop.eup %2583  ;;  %vm458_vm4 = vweird.f32 %v2582_v56 }
 0x16a   :  { %v421_v0 = vsel %vm420_vm0, %v2578_v35, %v417_v59  ;;  %v461_v35 = vand.u32 2147483647, %v451_v29  ;;  %vm459_vm6 = vmor %vm457_vm5, %vm458_vm4  ;;  %v2412_v29 = vld [vmem:[%s3928_s0 + $0x48] sm:$0xff]  ;;  %v2414_v59 = vld [vmem:[%s3928_s0 + $0x58] sm:$0xff] }
 0x16b   :  { %v426_v5 = vsel %vm423_vm2, %v425_v60, %v421_v0  ;;  %v440_v10 = vsel %vm439_vm1, %v2580_v37, %v436_v61  ;;  %v454_v11 = vsub.f32 1.0, %v453_v62 }
 0x16c   :  { %v445_v14 = vsel %vm442_vm3, %v444_v63, %v440_v10  ;;  %v468_v22 = vmul.f32 %v2584_v4, %v426_v5  ;;  %vm462_vm7 = vcmp.eq.f32.partialorder %v461_v35, 8.507059e+37 }
 0x16d   :  { %v467_v15 = vmul.f32 %v445_v14, %v3216_v23  ;;  %v455_v26 = vmul.f32 %v2582_v56, %v454_v11  ;;  %v2411_v23 = vld [vmem:[%s3928_s0 + $0x40] sm:$0xff] }
 0x16f   :  { %v3267_v13 = vadd.f32 %v468_v22, %v467_v15  ;;  %v456_v18 = vadd.f32 %v2582_v56, %v455_v26  ;;  %v2413_v26 = vld [vmem:[%s3928_s0 + $0x50] sm:$0xff] }
 0x171   :  { %2585 = vtanh.f32 %v3267_v13  ;;  %v460_v43 = vsel %vm459_vm6, %v2582_v56, %v456_v18 }
 0x172   :  { %v465_v44 = vsel %vm462_vm7, %v464_v31, %v460_v43 }
 0x177   :  { %v2586_v37 = vpop.eup %2585 }
 0x178   :  { %v471_v47 = vmul.f32 %v2586_v37, %v465_v44 }
 0x17a   :  { %v472_v27 = vpack.c.bf16 %v471_v47, %v471_v47 }
 0x17c   :  { %2410 = vst [vmem:[%s3930_s4 + $0x4] sm:$0xf] %v472_v27  ;;  %488 = vmatmul.bf16.vlgmr.msra.gmra.mxu0 %v472_v27  ;;  %501 = vmatmul.bf16.vlgmr.msra.gmra.mxu1 %v472_v27 }
 0x17d   :  { %514 = vmatmul.bf16.vlgmr.msra.gmra.mxu2 %v472_v27  ;;  %527 = vmatmul.bf16.vlgmr.msra.gmra.mxu3 %v472_v27 }
 0x17e   :  { %734 = vmatpush.bf16.msra.mxu0 %v2855_v3  ;;  %747 = vmatpush.bf16.msra.mxu1 %v2866_v7 }
 0x17f   :  { %760 = vmatpush.bf16.msra.mxu2 %v2906_v21  ;;  %773 = vmatpush.bf16.msra.mxu3 %v2868_v8 }
 0x182   :  { %735 = vmatpush.bf16.msra.mxu0 %v2880_v12  ;;  %748 = vmatpush.bf16.msra.mxu1 %v2893_v16 }
 0x183   :  { %761 = vmatpush.bf16.msra.mxu2 %v2945_v34  ;;  %774 = vmatpush.bf16.msra.mxu3 %v2895_v17 }
 0x186   :  { %736 = vmatpush.bf16.msra.mxu0 %v2928_v28  ;;  %749 = vmatpush.bf16.msra.mxu1 %v2941_v32 }
 0x187   :  { %762 = vmatpush.bf16.msra.mxu2 %v2969_v42  ;;  %775 = vmatpush.bf16.msra.mxu3 %v2943_v33 }
 0x18a   :  { %737 = vmatpush.bf16.msra.mxu0 %v2967_v41  ;;  %750 = vmatpush.bf16.msra.mxu1 %v2979_v45 }
 0x18b   :  { %763 = vmatpush.bf16.msra.mxu2 %v3005_v54  ;;  %776 = vmatpush.bf16.msra.mxu3 %v2981_v46 }
 0x18e   :  { %738 = vmatpush.bf16.msra.mxu0 %v3003_v53  ;;  %751 = vmatpush.bf16.msra.mxu1 %v3015_v57 }
 0x18f   :  { %764 = vmatpush.bf16.msra.mxu2 %v3041_v2  ;;  %777 = vmatpush.bf16.msra.mxu3 %v3017_v58 }
 0x192   :  { %739 = vmatpush.bf16.msra.mxu0 %v3039_v1  ;;  %752 = vmatpush.bf16.msra.mxu1 %v3051_v6 }
 0x193   :  { %765 = vmatpush.bf16.msra.mxu2 %v3077_v20  ;;  %778 = vmatpush.bf16.msra.mxu3 %v3053_v9 }
 0x196   :  { %740 = vmatpush.bf16.msra.mxu0 %v3075_v19  ;;  %753 = vmatpush.bf16.msra.mxu1 %v3087_v24 }
 0x197   :  { %766 = vmatpush.bf16.msra.mxu2 %v3116_v38  ;;  %779 = vmatpush.bf16.msra.mxu3 %v3089_v25 }
 0x19a   :  { %741 = vmatpush.bf16.msra.mxu0 %v3111_v36  ;;  %754 = vmatpush.bf16.msra.mxu1 %v3120_v39 }
 0x19b   :  { %767 = vmatpush.bf16.msra.mxu2 %v3134_v48  ;;  %780 = vmatpush.bf16.msra.mxu3 %v3122_v40 }
 0x1f9   :  { %v489_v49 = vpop.f32.mrf.mxu0  ;;  %v502_v50 = vpop.f32.mrf.mxu1 }
 0x1fa   :  { %v532_v51 = vadd.f32 %v2411_v23, %v489_v49  ;;  %v533_v52 = vadd.f32 %v2412_v29, %v502_v50 }
 0x1fc   :  { %v2415_v55 = vmul.f32 -1.442695, %v532_v51  ;;  %v2416_v56 = vmul.f32 -1.442695, %v533_v52 }
 0x1fe   :  { %2587 = vpow2.f32 %v2415_v55 }
 0x1ff   :  { %2589 = vpow2.f32 %v2416_v56 }
 0x200   :  { %v515_v60 = vpop.f32.mrf.mxu2  ;;  %v528_v61 = vpop.f32.mrf.mxu3 }
 0x201   :  { %v535_v62 = vadd.f32 %v2414_v59, %v528_v61  ;;  %v491_v63 = vpop.f32.mrf.mxu0  ;;  %v504_v0 = vpop.f32.mrf.mxu1  ;;  %v534_v43 = vadd.f32 %v2413_v26, %v515_v60 }
 0x203   :  { %v2417_v4 = vmul.f32 -1.442695, %v535_v62 }
 0x204   :  { %v2588_v5 = vpop.eup %2587 }
 0x205   :  { %v2590_v10 = vpop.eup %2589  ;;  %v539_v11 = vadd.f32 1.0, %v2588_v5  ;;  %2591 = vpow2.f32 %v2417_v4 }
 0x206   :  { %v558_v14 = vadd.f32 1.0, %v2590_v10 }
 0x207   :  { %2593 = vrcp.f32 %v539_v11  ;;  %v551_v23 = vand.u32 2147483648, %v539_v11  ;;  %v549_v50 = vand.u32 2147483647, %v539_v11  ;;  %vm545_vm10 = vweird.f32 %v539_v11 }
 0x208   :  { %2595 = vrcp.f32 %v558_v14  ;;  %v517_v22 = vpop.f32.mrf.mxu2  ;;  %v530_v15 = vpop.f32.mrf.mxu3  ;;  %v570_v29 = vand.u32 2147483648, %v558_v14  ;;  %v568_v52 = vand.u32 2147483647, %v558_v14  ;;  %vm564_vm11 = vweird.f32 %v558_v14 }
 0x209   :  { %v552_v59 = vor.u32 1.1754944e-38, %v551_v23  ;;  %vm550_vm14 = vcmp.eq.f32.partialorder %v549_v50, 8.507059e+37 }
 0x20a   :  { %v571_v62 = vor.u32 1.1754944e-38, %v570_v29  ;;  %vm569_vm15 = vcmp.eq.f32.partialorder %v568_v52, 8.507059e+37 }
 0x20b   :  { %v2592_v18 = vpop.eup %2591 }
 0x20c   :  { %v578_v30 = vadd.f32 1.0, %v2592_v18 }
 0x20d   :  { %v2594_v35 = vpop.eup %2593 }
 0x20e   :  { %v2596_v31 = vpop.eup %2595  ;;  %v541_v37 = vmul.f32 %v2594_v35, %v539_v11  ;;  %2597 = vrcp.f32 %v578_v30  ;;  %vm546_vm8 = vweird.f32 %v2594_v35  ;;  %vm584_vm1 = vweird.f32 %v578_v30 }
 0x20f   :  { %v560_v44 = vmul.f32 %v2596_v31, %v558_v14  ;;  %2599 = vtanh.f32 %v534_v43  ;;  %vm565_vm9 = vweird.f32 %v2596_v31  ;;  %vm547_vm12 = vmor %vm545_vm10, %vm546_vm8  ;;  %v590_v43 = vand.u32 2147483648, %v578_v30 }
 0x210   :  { %v542_v47 = vsub.f32 1.0, %v541_v37  ;;  %vm566_vm13 = vmor %vm564_vm11, %vm565_vm9 }
 0x211   :  { %v561_v27 = vsub.f32 1.0, %v560_v44  ;;  %v591_v44 = vor.u32 1.1754944e-38, %v590_v43 }
 0x212   :  { %v543_v49 = vmul.f32 %v2594_v35, %v542_v47 }
 0x213   :  { %v562_v51 = vmul.f32 %v2596_v31, %v561_v27 }
 0x214   :  { %v2598_v55 = vpop.eup %2597  ;;  %v544_v56 = vadd.f32 %v2594_v35, %v543_v49 }
 0x215   :  { %v563_v60 = vadd.f32 %v2596_v31, %v562_v51  ;;  %v580_v61 = vmul.f32 %v2598_v55, %v578_v30  ;;  %v2600_v0 = vpop.eup %2599  ;;  %vm585_vm0 = vweird.f32 %v2598_v55 }
 0x216   :  { %v548_v63 = vsel %vm547_vm12, %v2594_v35, %v544_v56  ;;  %v588_v35 = vand.u32 2147483647, %v578_v30  ;;  %vm586_vm2 = vmor %vm584_vm1, %vm585_vm0  ;;  %v2420_v30 = vld [vmem:[%s3928_s0 + $0x68] sm:$0xff]  ;;  %v2422_v56 = vld [vmem:[%s3928_s0 + $0x78] sm:$0xff] }
 0x217   :  { %v553_v4 = vsel %vm550_vm14, %v552_v59, %v548_v63  ;;  %v567_v5 = vsel %vm566_vm13, %v2596_v31, %v563_v60  ;;  %v581_v10 = vsub.f32 1.0, %v580_v61 }
 0x218   :  { %v572_v22 = vsel %vm569_vm15, %v571_v62, %v567_v5  ;;  %v595_v15 = vmul.f32 %v2600_v0, %v553_v4  ;;  %vm589_vm3 = vcmp.eq.f32.partialorder %v588_v35, 8.507059e+37 }
 0x219   :  { %v594_v26 = vmul.f32 %v572_v22, %v3267_v13  ;;  %v582_v18 = vmul.f32 %v2598_v55, %v581_v10  ;;  %v2419_v13 = vld [vmem:[%s3928_s0 + $0x60] sm:$0xff] }
 0x21b   :  { %v3318_v11 = vadd.f32 %v595_v15, %v594_v26  ;;  %v583_v14 = vadd.f32 %v2598_v55, %v582_v18  ;;  %v2421_v18 = vld [vmem:[%s3928_s0 + $0x70] sm:$0xff] }
 0x21d   :  { %2601 = vtanh.f32 %v3318_v11  ;;  %v587_v37 = vsel %vm586_vm2, %v2598_v55, %v583_v14 }
 0x21e   :  { %v592_v47 = vsel %vm589_vm3, %v591_v44, %v587_v37 }
 0x223   :  { %v2602_v31 = vpop.eup %2601 }
 0x224   :  { %v598_v27 = vmul.f32 %v2602_v31, %v592_v47 }
 0x226   :  { %v599_v23 = vpack.c.bf16 %v598_v27, %v598_v27 }
 0x228   :  { %2418 = vst [vmem:[%s3930_s4 + $0x8] sm:$0xf] %v599_v23  ;;  %615 = vmatmul.bf16.vlgmr.msrb.gmra.mxu0 %v599_v23  ;;  %628 = vmatmul.bf16.vlgmr.msrb.gmra.mxu1 %v599_v23 }
 0x229   :  { %641 = vmatmul.bf16.vlgmr.msrb.gmra.mxu2 %v599_v23  ;;  %654 = vmatmul.bf16.vlgmr.msrb.gmra.mxu3 %v599_v23 }
 0x22a   :  { %861 = vmatpush.bf16.msrb.mxu0 %v2855_v3  ;;  %874 = vmatpush.bf16.msrb.mxu1 %v2866_v7 }
 0x22b   :  { %887 = vmatpush.bf16.msrb.mxu2 %v2906_v21  ;;  %900 = vmatpush.bf16.msrb.mxu3 %v2868_v8 }
 0x22e   :  { %862 = vmatpush.bf16.msrb.mxu0 %v2880_v12  ;;  %875 = vmatpush.bf16.msrb.mxu1 %v2893_v16 }
 0x22f   :  { %888 = vmatpush.bf16.msrb.mxu2 %v2945_v34  ;;  %901 = vmatpush.bf16.msrb.mxu3 %v2895_v17 }
 0x232   :  { %863 = vmatpush.bf16.msrb.mxu0 %v2928_v28  ;;  %876 = vmatpush.bf16.msrb.mxu1 %v2941_v32 }
 0x233   :  { %889 = vmatpush.bf16.msrb.mxu2 %v2969_v42  ;;  %902 = vmatpush.bf16.msrb.mxu3 %v2943_v33 }
 0x236   :  { %864 = vmatpush.bf16.msrb.mxu0 %v2967_v41  ;;  %877 = vmatpush.bf16.msrb.mxu1 %v2979_v45 }
 0x237   :  { %890 = vmatpush.bf16.msrb.mxu2 %v3005_v54  ;;  %903 = vmatpush.bf16.msrb.mxu3 %v2981_v46 }
 0x23a   :  { %865 = vmatpush.bf16.msrb.mxu0 %v3003_v53  ;;  %878 = vmatpush.bf16.msrb.mxu1 %v3015_v57 }
 0x23b   :  { %891 = vmatpush.bf16.msrb.mxu2 %v3041_v2  ;;  %904 = vmatpush.bf16.msrb.mxu3 %v3017_v58 }
 0x23e   :  { %866 = vmatpush.bf16.msrb.mxu0 %v3039_v1  ;;  %879 = vmatpush.bf16.msrb.mxu1 %v3051_v6 }
 0x23f   :  { %892 = vmatpush.bf16.msrb.mxu2 %v3077_v20  ;;  %905 = vmatpush.bf16.msrb.mxu3 %v3053_v9 }
 0x242   :  { %867 = vmatpush.bf16.msrb.mxu0 %v3075_v19  ;;  %880 = vmatpush.bf16.msrb.mxu1 %v3087_v24 }
 0x243   :  { %893 = vmatpush.bf16.msrb.mxu2 %v3116_v38  ;;  %906 = vmatpush.bf16.msrb.mxu3 %v3089_v25 }
 0x246   :  { %868 = vmatpush.bf16.msrb.mxu0 %v3111_v36  ;;  %881 = vmatpush.bf16.msrb.mxu1 %v3120_v39 }
 0x247   :  { %894 = vmatpush.bf16.msrb.mxu2 %v3134_v48  ;;  %907 = vmatpush.bf16.msrb.mxu3 %v3122_v40 }
 0x2a5   :  { %v616_v29 = vpop.f32.mrf.mxu0  ;;  %v629_v49 = vpop.f32.mrf.mxu1 }
 0x2a6   :  { %v659_v50 = vadd.f32 %v2419_v13, %v616_v29  ;;  %v660_v51 = vadd.f32 %v2420_v30, %v629_v49 }
 0x2a8   :  { %v2423_v52 = vmul.f32 -1.442695, %v659_v50  ;;  %v2424_v55 = vmul.f32 -1.442695, %v660_v51 }
 0x2aa   :  { %2603 = vpow2.f32 %v2423_v52 }
 0x2ab   :  { %2605 = vpow2.f32 %v2424_v55 }
 0x2ac   :  { %v642_v59 = vpop.f32.mrf.mxu2  ;;  %v655_v60 = vpop.f32.mrf.mxu3 }
 0x2ad   :  { %v662_v61 = vadd.f32 %v2422_v56, %v655_v60  ;;  %v618_v62 = vpop.f32.mrf.mxu0  ;;  %v631_v63 = vpop.f32.mrf.mxu1  ;;  %v661_v37 = vadd.f32 %v2421_v18, %v642_v59 }
 0x2af   :  { %v2425_v0 = vmul.f32 -1.442695, %v662_v61 }
 0x2b0   :  { %v2604_v4 = vpop.eup %2603 }
 0x2b1   :  { %v2606_v5 = vpop.eup %2605  ;;  %v666_v10 = vadd.f32 1.0, %v2604_v4  ;;  %2607 = vpow2.f32 %v2425_v0 }
 0x2b2   :  { %v685_v22 = vadd.f32 1.0, %v2606_v5 }
 0x2b3   :  { %2609 = vrcp.f32 %v666_v10  ;;  %v678_v13 = vand.u32 2147483648, %v666_v10  ;;  %v676_v49 = vand.u32 2147483647, %v666_v10  ;;  %vm672_vm6 = vweird.f32 %v666_v10 }
 0x2b4   :  { %2611 = vrcp.f32 %v685_v22  ;;  %v644_v15 = vpop.f32.mrf.mxu2  ;;  %v657_v26 = vpop.f32.mrf.mxu3  ;;  %v697_v30 = vand.u32 2147483648, %v685_v22  ;;  %v695_v51 = vand.u32 2147483647, %v685_v22  ;;  %vm691_vm7 = vweird.f32 %v685_v22 }
 0x2b5   :  { %v679_v56 = vor.u32 1.1754944e-38, %v678_v13  ;;  %vm677_vm10 = vcmp.eq.f32.partialorder %v676_v49, 8.507059e+37 }
 0x2b6   :  { %v698_v61 = vor.u32 1.1754944e-38, %v697_v30  ;;  %vm696_vm11 = vcmp.eq.f32.partialorder %v695_v51, 8.507059e+37 }
 0x2b7   :  { %v2608_v14 = vpop.eup %2607 }
 0x2b8   :  { %v705_v43 = vadd.f32 1.0, %v2608_v14 }
 0x2b9   :  { %v2610_v35 = vpop.eup %2609 }
 0x2ba   :  { %v2612_v44 = vpop.eup %2611  ;;  %v668_v31 = vmul.f32 %v2610_v35, %v666_v10  ;;  %2613 = vrcp.f32 %v705_v43  ;;  %vm673_vm4 = vweird.f32 %v2610_v35  ;;  %vm711_vm13 = vweird.f32 %v705_v43 }
 0x2bb   :  { %v687_v47 = vmul.f32 %v2612_v44, %v685_v22  ;;  %2615 = vtanh.f32 %v661_v37  ;;  %vm692_vm5 = vweird.f32 %v2612_v44  ;;  %vm674_vm8 = vmor %vm672_vm6, %vm673_vm4  ;;  %v717_v37 = vand.u32 2147483648, %v705_v43 }
 0x2bc   :  { %v669_v27 = vsub.f32 1.0, %v668_v31  ;;  %vm693_vm9 = vmor %vm691_vm7, %vm692_vm5 }
 0x2bd   :  { %v688_v23 = vsub.f32 1.0, %v687_v47  ;;  %v718_v47 = vor.u32 1.1754944e-38, %v717_v37 }
 0x2be   :  { %v670_v29 = vmul.f32 %v2610_v35, %v669_v27 }
 0x2bf   :  { %v689_v50 = vmul.f32 %v2612_v44, %v688_v23 }
 0x2c0   :  { %v2614_v52 = vpop.eup %2613  ;;  %v671_v55 = vadd.f32 %v2610_v35, %v670_v29 }
 0x2c1   :  { %v690_v59 = vadd.f32 %v2612_v44, %v689_v50  ;;  %v707_v60 = vmul.f32 %v2614_v52, %v705_v43  ;;  %v2616_v63 = vpop.eup %2615  ;;  %vm712_vm12 = vweird.f32 %v2614_v52 }
 0x2c2   :  { %v675_v62 = vsel %vm674_vm8, %v2610_v35, %v671_v55  ;;  %v715_v35 = vand.u32 2147483647, %v705_v43  ;;  %vm713_vm14 = vmor %vm711_vm13, %vm712_vm12  ;;  %v2428_v43 = vld [vmem:[%s3928_s0 + $0x88] sm:$0xff]  ;;  %v2430_v55 = vld [vmem:[%s3928_s0 + $0x98] sm:$0xff] }
 0x2c3   :  { %v680_v0 = vsel %vm677_vm10, %v679_v56, %v675_v62  ;;  %v694_v4 = vsel %vm693_vm9, %v2612_v44, %v690_v59  ;;  %v708_v5 = vsub.f32 1.0, %v707_v60 }
 0x2c4   :  { %v699_v15 = vsel %vm696_vm11, %v698_v61, %v694_v4  ;;  %v722_v26 = vmul.f32 %v2616_v63, %v680_v0  ;;  %vm716_vm15 = vcmp.eq.f32.partialorder %v715_v35, 8.507059e+37 }
 0x2c5   :  { %v721_v18 = vmul.f32 %v699_v15, %v3318_v11  ;;  %v709_v14 = vmul.f32 %v2614_v52, %v708_v5  ;;  %v2427_v11 = vld [vmem:[%s3928_s0 + $0x80] sm:$0xff] }
 0x2c7   :  { %v3369_v10 = vadd.f32 %v722_v26, %v721_v18  ;;  %v710_v22 = vadd.f32 %v2614_v52, %v709_v14  ;;  %v2429_v14 = vld [vmem:[%s3928_s0 + $0x90] sm:$0xff] }
 0x2c9   :  { %2617 = vtanh.f32 %v3369_v10  ;;  %v714_v31 = vsel %vm713_vm14, %v2614_v52, %v710_v22 }
 0x2ca   :  { %v719_v27 = vsel %vm716_vm15, %v718_v47, %v714_v31 }
 0x2cf   :  { %v2618_v44 = vpop.eup %2617 }
 0x2d0   :  { %v725_v23 = vmul.f32 %v2618_v44, %v719_v27 }
 0x2d2   :  { %v726_v13 = vpack.c.bf16 %v725_v23, %v725_v23 }
 0x2d4   :  { %2426 = vst [vmem:[%s3930_s4 + $0xc] sm:$0xf] %v726_v13  ;;  %742 = vmatmul.bf16.vlgmr.msra.gmra.mxu0 %v726_v13  ;;  %755 = vmatmul.bf16.vlgmr.msra.gmra.mxu1 %v726_v13 }
 0x2d5   :  { %768 = vmatmul.bf16.vlgmr.msra.gmra.mxu2 %v726_v13  ;;  %781 = vmatmul.bf16.vlgmr.msra.gmra.mxu3 %v726_v13 }
 0x2d6   :  { %988 = vmatpush.bf16.msra.mxu0 %v2855_v3  ;;  %1001 = vmatpush.bf16.msra.mxu1 %v2866_v7 }
 0x2d7   :  { %1014 = vmatpush.bf16.msra.mxu2 %v2906_v21  ;;  %1027 = vmatpush.bf16.msra.mxu3 %v2868_v8 }
 0x2da   :  { %989 = vmatpush.bf16.msra.mxu0 %v2880_v12  ;;  %1002 = vmatpush.bf16.msra.mxu1 %v2893_v16 }
 0x2db   :  { %1015 = vmatpush.bf16.msra.mxu2 %v2945_v34  ;;  %1028 = vmatpush.bf16.msra.mxu3 %v2895_v17 }
 0x2de   :  { %990 = vmatpush.bf16.msra.mxu0 %v2928_v28  ;;  %1003 = vmatpush.bf16.msra.mxu1 %v2941_v32 }
 0x2df   :  { %1016 = vmatpush.bf16.msra.mxu2 %v2969_v42  ;;  %1029 = vmatpush.bf16.msra.mxu3 %v2943_v33 }
 0x2e2   :  { %991 = vmatpush.bf16.msra.mxu0 %v2967_v41  ;;  %1004 = vmatpush.bf16.msra.mxu1 %v2979_v45 }
 0x2e3   :  { %1017 = vmatpush.bf16.msra.mxu2 %v3005_v54  ;;  %1030 = vmatpush.bf16.msra.mxu3 %v2981_v46 }
 0x2e6   :  { %992 = vmatpush.bf16.msra.mxu0 %v3003_v53  ;;  %1005 = vmatpush.bf16.msra.mxu1 %v3015_v57 }
 0x2e7   :  { %1018 = vmatpush.bf16.msra.mxu2 %v3041_v2  ;;  %1031 = vmatpush.bf16.msra.mxu3 %v3017_v58 }
 0x2ea   :  { %993 = vmatpush.bf16.msra.mxu0 %v3039_v1  ;;  %1006 = vmatpush.bf16.msra.mxu1 %v3051_v6 }
 0x2eb   :  { %1019 = vmatpush.bf16.msra.mxu2 %v3077_v20  ;;  %1032 = vmatpush.bf16.msra.mxu3 %v3053_v9 }
 0x2ee   :  { %994 = vmatpush.bf16.msra.mxu0 %v3075_v19  ;;  %1007 = vmatpush.bf16.msra.mxu1 %v3087_v24 }
 0x2ef   :  { %1020 = vmatpush.bf16.msra.mxu2 %v3116_v38  ;;  %1033 = vmatpush.bf16.msra.mxu3 %v3089_v25 }
 0x2f2   :  { %995 = vmatpush.bf16.msra.mxu0 %v3111_v36  ;;  %1008 = vmatpush.bf16.msra.mxu1 %v3120_v39 }
 0x2f3   :  { %1021 = vmatpush.bf16.msra.mxu2 %v3134_v48  ;;  %1034 = vmatpush.bf16.msra.mxu3 %v3122_v40 }
 0x351   :  { %v743_v30 = vpop.f32.mrf.mxu0  ;;  %v756_v29 = vpop.f32.mrf.mxu1 }
 0x352   :  { %v786_v49 = vadd.f32 %v2427_v11, %v743_v30  ;;  %v787_v50 = vadd.f32 %v2428_v43, %v756_v29 }
 0x354   :  { %v2431_v51 = vmul.f32 -1.442695, %v786_v49  ;;  %v2432_v52 = vmul.f32 -1.442695, %v787_v50 }
 0x356   :  { %2619 = vpow2.f32 %v2431_v51 }
 0x357   :  { %2621 = vpow2.f32 %v2432_v52 }
 0x358   :  { %v769_v56 = vpop.f32.mrf.mxu2  ;;  %v782_v59 = vpop.f32.mrf.mxu3 }
 0x359   :  { %v789_v60 = vadd.f32 %v2430_v55, %v782_v59  ;;  %v745_v61 = vpop.f32.mrf.mxu0  ;;  %v758_v62 = vpop.f32.mrf.mxu1  ;;  %v788_v31 = vadd.f32 %v2429_v14, %v769_v56 }
 0x35b   :  { %v2433_v63 = vmul.f32 -1.442695, %v789_v60 }
 0x35c   :  { %v2620_v0 = vpop.eup %2619 }
 0x35d   :  { %v2622_v4 = vpop.eup %2621  ;;  %v793_v5 = vadd.f32 1.0, %v2620_v0  ;;  %2623 = vpow2.f32 %v2433_v63 }
 0x35e   :  { %v812_v15 = vadd.f32 1.0, %v2622_v4 }
 0x35f   :  { %2625 = vrcp.f32 %v793_v5  ;;  %v805_v11 = vand.u32 2147483648, %v793_v5  ;;  %v803_v29 = vand.u32 2147483647, %v793_v5  ;;  %vm799_vm2 = vweird.f32 %v793_v5 }
 0x360   :  { %2627 = vrcp.f32 %v812_v15  ;;  %v771_v26 = vpop.f32.mrf.mxu2  ;;  %v784_v18 = vpop.f32.mrf.mxu3  ;;  %v824_v43 = vand.u32 2147483648, %v812_v15  ;;  %v822_v50 = vand.u32 2147483647, %v812_v15  ;;  %vm818_vm3 = vweird.f32 %v812_v15 }
 0x361   :  { %v806_v55 = vor.u32 1.1754944e-38, %v805_v11  ;;  %vm804_vm6 = vcmp.eq.f32.partialorder %v803_v29, 8.507059e+37 }
 0x362   :  { %v825_v60 = vor.u32 1.1754944e-38, %v824_v43  ;;  %vm823_vm7 = vcmp.eq.f32.partialorder %v822_v50, 8.507059e+37 }
 0x363   :  { %v2624_v22 = vpop.eup %2623 }
 0x364   :  { %v832_v37 = vadd.f32 1.0, %v2624_v22 }
 0x365   :  { %v2626_v35 = vpop.eup %2625 }
 0x366   :  { %v2628_v47 = vpop.eup %2627  ;;  %v795_v44 = vmul.f32 %v2626_v35, %v793_v5  ;;  %2629 = vrcp.f32 %v832_v37  ;;  %vm800_vm0 = vweird.f32 %v2626_v35  ;;  %vm838_vm9 = vweird.f32 %v832_v37 }
 0x367   :  { %v814_v27 = vmul.f32 %v2628_v47, %v812_v15  ;;  %2631 = vtanh.f32 %v788_v31  ;;  %vm819_vm1 = vweird.f32 %v2628_v47  ;;  %vm801_vm4 = vmor %vm799_vm2, %vm800_vm0  ;;  %v844_v31 = vand.u32 2147483648, %v832_v37 }
 0x368   :  { %v796_v23 = vsub.f32 1.0, %v795_v44  ;;  %vm820_vm5 = vmor %vm818_vm3, %vm819_vm1 }
 0x369   :  { %v815_v13 = vsub.f32 1.0, %v814_v27  ;;  %v845_v27 = vor.u32 1.1754944e-38, %v844_v31 }
 0x36a   :  { %v797_v30 = vmul.f32 %v2626_v35, %v796_v23 }
 0x36b   :  { %v816_v49 = vmul.f32 %v2628_v47, %v815_v13 }
 0x36c   :  { %v2630_v51 = vpop.eup %2629  ;;  %v798_v52 = vadd.f32 %v2626_v35, %v797_v30 }
 0x36d   :  { %v817_v56 = vadd.f32 %v2628_v47, %v816_v49  ;;  %v834_v59 = vmul.f32 %v2630_v51, %v832_v37  ;;  %v2632_v62 = vpop.eup %2631  ;;  %vm839_vm8 = vweird.f32 %v2630_v51 }
 0x36e   :  { %v802_v61 = vsel %vm801_vm4, %v2626_v35, %v798_v52  ;;  %v842_v35 = vand.u32 2147483647, %v832_v37  ;;  %vm840_vm10 = vmor %vm838_vm9, %vm839_vm8  ;;  %v2436_v37 = vld [vmem:[%s3928_s0 + $0xa8] sm:$0xff]  ;;  %v2438_v52 = vld [vmem:[%s3928_s0 + $0xb8] sm:$0xff] }
 0x36f   :  { %v807_v63 = vsel %vm804_vm6, %v806_v55, %v802_v61  ;;  %v821_v0 = vsel %vm820_vm5, %v2628_v47, %v817_v56  ;;  %v835_v4 = vsub.f32 1.0, %v834_v59 }
 0x370   :  { %v826_v26 = vsel %vm823_vm7, %v825_v60, %v821_v0  ;;  %v849_v18 = vmul.f32 %v2632_v62, %v807_v63  ;;  %vm843_vm11 = vcmp.eq.f32.partialorder %v842_v35, 8.507059e+37 }
 0x371   :  { %v848_v14 = vmul.f32 %v826_v26, %v3369_v10  ;;  %v836_v22 = vmul.f32 %v2630_v51, %v835_v4  ;;  %v2435_v10 = vld [vmem:[%s3928_s0 + $0xa0] sm:$0xff] }
 0x373   :  { %v3420_v5 = vadd.f32 %v849_v18, %v848_v14  ;;  %v837_v15 = vadd.f32 %v2630_v51, %v836_v22  ;;  %v2437_v22 = vld [vmem:[%s3928_s0 + $0xb0] sm:$0xff] }
 0x375   :  { %2633 = vtanh.f32 %v3420_v5  ;;  %v841_v44 = vsel %vm840_vm10, %v2630_v51, %v837_v15 }
 0x376   :  { %v846_v23 = vsel %vm843_vm11, %v845_v27, %v841_v44 }
 0x37b   :  { %v2634_v47 = vpop.eup %2633 }
 0x37c   :  { %v852_v13 = vmul.f32 %v2634_v47, %v846_v23 }
 0x37e   :  { %v853_v11 = vpack.c.bf16 %v852_v13, %v852_v13 }
 0x380   :  { %2434 = vst [vmem:[%s3930_s4 + $0x10] sm:$0xf] %v853_v11  ;;  %869 = vmatmul.bf16.vlgmr.msrb.gmra.mxu0 %v853_v11  ;;  %882 = vmatmul.bf16.vlgmr.msrb.gmra.mxu1 %v853_v11 }
 0x381   :  { %895 = vmatmul.bf16.vlgmr.msrb.gmra.mxu2 %v853_v11  ;;  %908 = vmatmul.bf16.vlgmr.msrb.gmra.mxu3 %v853_v11 }
 0x382   :  { %1115 = vmatpush.bf16.msrb.mxu0 %v2855_v3  ;;  %1128 = vmatpush.bf16.msrb.mxu1 %v2866_v7 }
 0x383   :  { %1141 = vmatpush.bf16.msrb.mxu2 %v2906_v21  ;;  %1154 = vmatpush.bf16.msrb.mxu3 %v2868_v8 }
 0x386   :  { %1116 = vmatpush.bf16.msrb.mxu0 %v2880_v12  ;;  %1129 = vmatpush.bf16.msrb.mxu1 %v2893_v16 }
 0x387   :  { %1142 = vmatpush.bf16.msrb.mxu2 %v2945_v34  ;;  %1155 = vmatpush.bf16.msrb.mxu3 %v2895_v17 }
 0x38a   :  { %1117 = vmatpush.bf16.msrb.mxu0 %v2928_v28  ;;  %1130 = vmatpush.bf16.msrb.mxu1 %v2941_v32 }
 0x38b   :  { %1143 = vmatpush.bf16.msrb.mxu2 %v2969_v42  ;;  %1156 = vmatpush.bf16.msrb.mxu3 %v2943_v33 }
 0x38e   :  { %1118 = vmatpush.bf16.msrb.mxu0 %v2967_v41  ;;  %1131 = vmatpush.bf16.msrb.mxu1 %v2979_v45 }
 0x38f   :  { %1144 = vmatpush.bf16.msrb.mxu2 %v3005_v54  ;;  %1157 = vmatpush.bf16.msrb.mxu3 %v2981_v46 }
 0x392   :  { %1119 = vmatpush.bf16.msrb.mxu0 %v3003_v53  ;;  %1132 = vmatpush.bf16.msrb.mxu1 %v3015_v57 }
 0x393   :  { %1145 = vmatpush.bf16.msrb.mxu2 %v3041_v2  ;;  %1158 = vmatpush.bf16.msrb.mxu3 %v3017_v58 }
 0x396   :  { %1120 = vmatpush.bf16.msrb.mxu0 %v3039_v1  ;;  %1133 = vmatpush.bf16.msrb.mxu1 %v3051_v6 }
 0x397   :  { %1146 = vmatpush.bf16.msrb.mxu2 %v3077_v20  ;;  %1159 = vmatpush.bf16.msrb.mxu3 %v3053_v9 }
 0x39a   :  { %1121 = vmatpush.bf16.msrb.mxu0 %v3075_v19  ;;  %1134 = vmatpush.bf16.msrb.mxu1 %v3087_v24 }
 0x39b   :  { %1147 = vmatpush.bf16.msrb.mxu2 %v3116_v38  ;;  %1160 = vmatpush.bf16.msrb.mxu3 %v3089_v25 }
 0x39e   :  { %1122 = vmatpush.bf16.msrb.mxu0 %v3111_v36  ;;  %1135 = vmatpush.bf16.msrb.mxu1 %v3120_v39 }
 0x39f   :  { %1148 = vmatpush.bf16.msrb.mxu2 %v3134_v48  ;;  %1161 = vmatpush.bf16.msrb.mxu3 %v3122_v40 }
 0x3fd   :  { %v870_v43 = vpop.f32.mrf.mxu0  ;;  %v883_v30 = vpop.f32.mrf.mxu1 }
 0x3fe   :  { %v913_v29 = vadd.f32 %v2435_v10, %v870_v43  ;;  %v914_v49 = vadd.f32 %v2436_v37, %v883_v30 }
 0x400   :  { %v2439_v50 = vmul.f32 -1.442695, %v913_v29  ;;  %v2440_v51 = vmul.f32 -1.442695, %v914_v49 }
 0x402   :  { %2635 = vpow2.f32 %v2439_v50 }
 0x403   :  { %2637 = vpow2.f32 %v2440_v51 }
 0x404   :  { %v896_v55 = vpop.f32.mrf.mxu2  ;;  %v909_v56 = vpop.f32.mrf.mxu3 }
 0x405   :  { %v916_v59 = vadd.f32 %v2438_v52, %v909_v56  ;;  %v872_v60 = vpop.f32.mrf.mxu0  ;;  %v885_v61 = vpop.f32.mrf.mxu1  ;;  %v915_v44 = vadd.f32 %v2437_v22, %v896_v55 }
 0x407   :  { %v2441_v62 = vmul.f32 -1.442695, %v916_v59 }
 0x408   :  { %v2636_v63 = vpop.eup %2635 }
 0x409   :  { %v2638_v0 = vpop.eup %2637  ;;  %v920_v4 = vadd.f32 1.0, %v2636_v63  ;;  %2639 = vpow2.f32 %v2441_v62 }
 0x40a   :  { %v939_v26 = vadd.f32 1.0, %v2638_v0 }
 0x40b   :  { %2641 = vrcp.f32 %v920_v4  ;;  %v932_v10 = vand.u32 2147483648, %v920_v4  ;;  %v930_v30 = vand.u32 2147483647, %v920_v4  ;;  %vm926_vm14 = vweird.f32 %v920_v4 }
 0x40c   :  { %2643 = vrcp.f32 %v939_v26  ;;  %v898_v18 = vpop.f32.mrf.mxu2  ;;  %v911_v14 = vpop.f32.mrf.mxu3  ;;  %v951_v37 = vand.u32 2147483648, %v939_v26  ;;  %v949_v49 = vand.u32 2147483647, %v939_v26  ;;  %vm945_vm15 = vweird.f32 %v939_v26 }
 0x40d   :  { %v933_v52 = vor.u32 1.1754944e-38, %v932_v10  ;;  %vm931_vm2 = vcmp.eq.f32.partialorder %v930_v30, 8.507059e+37 }
 0x40e   :  { %v952_v59 = vor.u32 1.1754944e-38, %v951_v37  ;;  %vm950_vm3 = vcmp.eq.f32.partialorder %v949_v49, 8.507059e+37 }
 0x40f   :  { %v2640_v15 = vpop.eup %2639 }
 0x410   :  { %v959_v31 = vadd.f32 1.0, %v2640_v15 }
 0x411   :  { %v2642_v35 = vpop.eup %2641 }
 0x412   :  { %v2644_v27 = vpop.eup %2643  ;;  %v922_v47 = vmul.f32 %v2642_v35, %v920_v4  ;;  %2645 = vrcp.f32 %v959_v31  ;;  %vm927_vm12 = vweird.f32 %v2642_v35  ;;  %vm965_vm5 = vweird.f32 %v959_v31 }
 0x413   :  { %v941_v23 = vmul.f32 %v2644_v27, %v939_v26  ;;  %2647 = vtanh.f32 %v915_v44  ;;  %vm946_vm13 = vweird.f32 %v2644_v27  ;;  %vm928_vm0 = vmor %vm926_vm14, %vm927_vm12  ;;  %v971_v44 = vand.u32 2147483648, %v959_v31 }
 0x414   :  { %v923_v13 = vsub.f32 1.0, %v922_v47  ;;  %vm947_vm1 = vmor %vm945_vm15, %vm946_vm13 }
 0x415   :  { %v942_v11 = vsub.f32 1.0, %v941_v23  ;;  %v972_v23 = vor.u32 1.1754944e-38, %v971_v44 }
 0x416   :  { %v924_v43 = vmul.f32 %v2642_v35, %v923_v13 }
 0x417   :  { %v943_v29 = vmul.f32 %v2644_v27, %v942_v11 }
 0x418   :  { %v2646_v50 = vpop.eup %2645  ;;  %v925_v51 = vadd.f32 %v2642_v35, %v924_v43 }
 0x419   :  { %v944_v55 = vadd.f32 %v2644_v27, %v943_v29  ;;  %v961_v56 = vmul.f32 %v2646_v50, %v959_v31  ;;  %v2648_v61 = vpop.eup %2647  ;;  %vm966_vm4 = vweird.f32 %v2646_v50 }
 0x41a   :  { %v929_v60 = vsel %vm928_vm0, %v2642_v35, %v925_v51  ;;  %v969_v35 = vand.u32 2147483647, %v959_v31  ;;  %vm967_vm6 = vmor %vm965_vm5, %vm966_vm4  ;;  %v2444_v31 = vld [vmem:[%s3928_s0 + $0xc8] sm:$0xff]  ;;  %v2446_v51 = vld [vmem:[%s3928_s0 + $0xd8] sm:$0xff] }
 0x41b   :  { %v934_v62 = vsel %vm931_vm2, %v933_v52, %v929_v60  ;;  %v948_v63 = vsel %vm947_vm1, %v2644_v27, %v944_v55  ;;  %v962_v0 = vsub.f32 1.0, %v961_v56 }
 0x41c   :  { %v953_v18 = vsel %vm950_vm3, %v952_v59, %v948_v63  ;;  %v976_v14 = vmul.f32 %v2648_v61, %v934_v62  ;;  %vm970_vm7 = vcmp.eq.f32.partialorder %v969_v35, 8.507059e+37 }
 0x41d   :  { %v975_v22 = vmul.f32 %v953_v18, %v3420_v5  ;;  %v963_v15 = vmul.f32 %v2646_v50, %v962_v0  ;;  %v2443_v5 = vld [vmem:[%s3928_s0 + $0xc0] sm:$0xff] }
 0x41f   :  { %v3471_v4 = vadd.f32 %v976_v14, %v975_v22  ;;  %v964_v26 = vadd.f32 %v2646_v50, %v963_v15  ;;  %v2445_v15 = vld [vmem:[%s3928_s0 + $0xd0] sm:$0xff] }
 0x421   :  { %2649 = vtanh.f32 %v3471_v4  ;;  %v968_v47 = vsel %vm967_vm6, %v2646_v50, %v964_v26 }
 0x422   :  { %v973_v13 = vsel %vm970_vm7, %v972_v23, %v968_v47 }
 0x427   :  { %v2650_v27 = vpop.eup %2649 }
 0x428   :  { %v979_v11 = vmul.f32 %v2650_v27, %v973_v13 }
 0x42a   :  { %v980_v10 = vpack.c.bf16 %v979_v11, %v979_v11 }
 0x42c   :  { %2442 = vst [vmem:[%s3930_s4 + $0x14] sm:$0xf] %v980_v10  ;;  %996 = vmatmul.bf16.vlgmr.msra.gmra.mxu0 %v980_v10  ;;  %1009 = vmatmul.bf16.vlgmr.msra.gmra.mxu1 %v980_v10 }
 0x42d   :  { %1022 = vmatmul.bf16.vlgmr.msra.gmra.mxu2 %v980_v10  ;;  %1035 = vmatmul.bf16.vlgmr.msra.gmra.mxu3 %v980_v10 }
 0x42e   :  { %1242 = vmatpush.bf16.msra.mxu0 %v2855_v3  ;;  %1255 = vmatpush.bf16.msra.mxu1 %v2866_v7 }
 0x42f   :  { %1268 = vmatpush.bf16.msra.mxu2 %v2906_v21  ;;  %1281 = vmatpush.bf16.msra.mxu3 %v2868_v8 }
 0x432   :  { %1243 = vmatpush.bf16.msra.mxu0 %v2880_v12  ;;  %1256 = vmatpush.bf16.msra.mxu1 %v2893_v16 }
 0x433   :  { %1269 = vmatpush.bf16.msra.mxu2 %v2945_v34  ;;  %1282 = vmatpush.bf16.msra.mxu3 %v2895_v17 }
 0x436   :  { %1244 = vmatpush.bf16.msra.mxu0 %v2928_v28  ;;  %1257 = vmatpush.bf16.msra.mxu1 %v2941_v32 }
 0x437   :  { %1270 = vmatpush.bf16.msra.mxu2 %v2969_v42  ;;  %1283 = vmatpush.bf16.msra.mxu3 %v2943_v33 }
 0x43a   :  { %1245 = vmatpush.bf16.msra.mxu0 %v2967_v41  ;;  %1258 = vmatpush.bf16.msra.mxu1 %v2979_v45 }
 0x43b   :  { %1271 = vmatpush.bf16.msra.mxu2 %v3005_v54  ;;  %1284 = vmatpush.bf16.msra.mxu3 %v2981_v46 }
 0x43e   :  { %1246 = vmatpush.bf16.msra.mxu0 %v3003_v53  ;;  %1259 = vmatpush.bf16.msra.mxu1 %v3015_v57 }
 0x43f   :  { %1272 = vmatpush.bf16.msra.mxu2 %v3041_v2  ;;  %1285 = vmatpush.bf16.msra.mxu3 %v3017_v58 }
 0x442   :  { %1247 = vmatpush.bf16.msra.mxu0 %v3039_v1  ;;  %1260 = vmatpush.bf16.msra.mxu1 %v3051_v6 }
 0x443   :  { %1273 = vmatpush.bf16.msra.mxu2 %v3077_v20  ;;  %1286 = vmatpush.bf16.msra.mxu3 %v3053_v9 }
 0x446   :  { %1248 = vmatpush.bf16.msra.mxu0 %v3075_v19  ;;  %1261 = vmatpush.bf16.msra.mxu1 %v3087_v24 }
 0x447   :  { %1274 = vmatpush.bf16.msra.mxu2 %v3116_v38  ;;  %1287 = vmatpush.bf16.msra.mxu3 %v3089_v25 }
 0x44a   :  { %1249 = vmatpush.bf16.msra.mxu0 %v3111_v36  ;;  %1262 = vmatpush.bf16.msra.mxu1 %v3120_v39 }
 0x44b   :  { %1275 = vmatpush.bf16.msra.mxu2 %v3134_v48  ;;  %1288 = vmatpush.bf16.msra.mxu3 %v3122_v40 }
 0x4a9   :  { %v997_v37 = vpop.f32.mrf.mxu0  ;;  %v1010_v43 = vpop.f32.mrf.mxu1 }
 0x4aa   :  { %v1040_v30 = vadd.f32 %v2443_v5, %v997_v37  ;;  %v1041_v29 = vadd.f32 %v2444_v31, %v1010_v43 }
 0x4ac   :  { %v2447_v49 = vmul.f32 -1.442695, %v1040_v30  ;;  %v2448_v50 = vmul.f32 -1.442695, %v1041_v29 }
 0x4ae   :  { %2651 = vpow2.f32 %v2447_v49 }
 0x4af   :  { %2653 = vpow2.f32 %v2448_v50 }
 0x4b0   :  { %v1023_v52 = vpop.f32.mrf.mxu2  ;;  %v1036_v55 = vpop.f32.mrf.mxu3 }
 0x4b1   :  { %v1043_v56 = vadd.f32 %v2446_v51, %v1036_v55  ;;  %v999_v59 = vpop.f32.mrf.mxu0  ;;  %v1012_v60 = vpop.f32.mrf.mxu1  ;;  %v1042_v47 = vadd.f32 %v2445_v15, %v1023_v52 }
 0x4b3   :  { %v2449_v61 = vmul.f32 -1.442695, %v1043_v56 }
 0x4b4   :  { %v2652_v62 = vpop.eup %2651 }
 0x4b5   :  { %v2654_v63 = vpop.eup %2653  ;;  %v1047_v0 = vadd.f32 1.0, %v2652_v62  ;;  %2655 = vpow2.f32 %v2449_v61 }
 0x4b6   :  { %v1066_v18 = vadd.f32 1.0, %v2654_v63 }
 0x4b7   :  { %2657 = vrcp.f32 %v1047_v0  ;;  %v1059_v5 = vand.u32 2147483648, %v1047_v0  ;;  %v1057_v43 = vand.u32 2147483647, %v1047_v0  ;;  %vm1053_vm10 = vweird.f32 %v1047_v0 }
 0x4b8   :  { %2659 = vrcp.f32 %v1066_v18  ;;  %v1025_v14 = vpop.f32.mrf.mxu2  ;;  %v1038_v22 = vpop.f32.mrf.mxu3  ;;  %v1078_v31 = vand.u32 2147483648, %v1066_v18  ;;  %v1076_v29 = vand.u32 2147483647, %v1066_v18  ;;  %vm1072_vm11 = vweird.f32 %v1066_v18 }
 0x4b9   :  { %v1060_v51 = vor.u32 1.1754944e-38, %v1059_v5  ;;  %vm1058_vm14 = vcmp.eq.f32.partialorder %v1057_v43, 8.507059e+37 }
 0x4ba   :  { %v1079_v56 = vor.u32 1.1754944e-38, %v1078_v31  ;;  %vm1077_vm15 = vcmp.eq.f32.partialorder %v1076_v29, 8.507059e+37 }
 0x4bb   :  { %v2656_v26 = vpop.eup %2655 }
 0x4bc   :  { %v1086_v44 = vadd.f32 1.0, %v2656_v26 }
 0x4bd   :  { %v2658_v35 = vpop.eup %2657 }
 0x4be   :  { %v2660_v23 = vpop.eup %2659  ;;  %v1049_v27 = vmul.f32 %v2658_v35, %v1047_v0  ;;  %2661 = vrcp.f32 %v1086_v44  ;;  %vm1054_vm8 = vweird.f32 %v2658_v35  ;;  %vm1092_vm1 = vweird.f32 %v1086_v44 }
 0x4bf   :  { %v1068_v13 = vmul.f32 %v2660_v23, %v1066_v18  ;;  %2663 = vtanh.f32 %v1042_v47  ;;  %vm1073_vm9 = vweird.f32 %v2660_v23  ;;  %vm1055_vm12 = vmor %vm1053_vm10, %vm1054_vm8  ;;  %v1098_v47 = vand.u32 2147483648, %v1086_v44 }
 0x4c0   :  { %v1050_v11 = vsub.f32 1.0, %v1049_v27  ;;  %vm1074_vm13 = vmor %vm1072_vm11, %vm1073_vm9 }
 0x4c1   :  { %v1069_v10 = vsub.f32 1.0, %v1068_v13  ;;  %v1099_v13 = vor.u32 1.1754944e-38, %v1098_v47 }
 0x4c2   :  { %v1051_v37 = vmul.f32 %v2658_v35, %v1050_v11 }
 0x4c3   :  { %v1070_v30 = vmul.f32 %v2660_v23, %v1069_v10 }
 0x4c4   :  { %v2662_v49 = vpop.eup %2661  ;;  %v1052_v50 = vadd.f32 %v2658_v35, %v1051_v37 }
 0x4c5   :  { %v1071_v52 = vadd.f32 %v2660_v23, %v1070_v30  ;;  %v1088_v55 = vmul.f32 %v2662_v49, %v1086_v44  ;;  %v2664_v60 = vpop.eup %2663  ;;  %vm1093_vm0 = vweird.f32 %v2662_v49 }
 0x4c6   :  { %v1056_v59 = vsel %vm1055_vm12, %v2658_v35, %v1052_v50  ;;  %v1096_v35 = vand.u32 2147483647, %v1086_v44  ;;  %vm1094_vm2 = vmor %vm1092_vm1, %vm1093_vm0  ;;  %v2452_v44 = vld [vmem:[%s3928_s0 + $0xe8] sm:$0xff]  ;;  %v2454_v50 = vld [vmem:[%s3928_s0 + $0xf8] sm:$0xff] }
 0x4c7   :  { %v1061_v61 = vsel %vm1058_vm14, %v1060_v51, %v1056_v59  ;;  %v1075_v62 = vsel %vm1074_vm13, %v2660_v23, %v1071_v52  ;;  %v1089_v63 = vsub.f32 1.0, %v1088_v55 }
 0x4c8   :  { %v1080_v14 = vsel %vm1077_vm15, %v1079_v56, %v1075_v62  ;;  %v1103_v22 = vmul.f32 %v2664_v60, %v1061_v61  ;;  %vm1097_vm3 = vcmp.eq.f32.partialorder %v1096_v35, 8.507059e+37 }
 0x4c9   :  { %v1102_v15 = vmul.f32 %v1080_v14, %v3471_v4  ;;  %v1090_v26 = vmul.f32 %v2662_v49, %v1089_v63  ;;  %v2451_v4 = vld [vmem:[%s3928_s0 + $0xe0] sm:$0xff] }
 0x4cb   :  { %v3522_v0 = vadd.f32 %v1103_v22, %v1102_v15  ;;  %v1091_v18 = vadd.f32 %v2662_v49, %v1090_v26  ;;  %v2453_v26 = vld [vmem:[%s3928_s0 + $0xf0] sm:$0xff] }
 0x4cd   :  { %2665 = vtanh.f32 %v3522_v0  ;;  %v1095_v27 = vsel %vm1094_vm2, %v2662_v49, %v1091_v18 }
 0x4ce   :  { %v1100_v11 = vsel %vm1097_vm3, %v1099_v13, %v1095_v27 }
 0x4d3   :  { %v2666_v23 = vpop.eup %2665 }
 0x4d4   :  { %v1106_v10 = vmul.f32 %v2666_v23, %v1100_v11 }
 0x4d6   :  { %v1107_v5 = vpack.c.bf16 %v1106_v10, %v1106_v10 }
 0x4d8   :  { %2450 = vst [vmem:[%s3930_s4 + $0x18] sm:$0xf] %v1107_v5  ;;  %1123 = vmatmul.bf16.vlgmr.msrb.gmra.mxu0 %v1107_v5  ;;  %1136 = vmatmul.bf16.vlgmr.msrb.gmra.mxu1 %v1107_v5 }
 0x4d9   :  { %1149 = vmatmul.bf16.vlgmr.msrb.gmra.mxu2 %v1107_v5  ;;  %1162 = vmatmul.bf16.vlgmr.msrb.gmra.mxu3 %v1107_v5 }
 0x4da   :  { %1369 = vmatpush.bf16.msrb.mxu0 %v2855_v3  ;;  %1382 = vmatpush.bf16.msrb.mxu1 %v2866_v7 }
 0x4db   :  { %1395 = vmatpush.bf16.msrb.mxu2 %v2906_v21  ;;  %1408 = vmatpush.bf16.msrb.mxu3 %v2868_v8 }
 0x4de   :  { %1370 = vmatpush.bf16.msrb.mxu0 %v2880_v12  ;;  %1383 = vmatpush.bf16.msrb.mxu1 %v2893_v16 }
 0x4df   :  { %1396 = vmatpush.bf16.msrb.mxu2 %v2945_v34  ;;  %1409 = vmatpush.bf16.msrb.mxu3 %v2895_v17 }
 0x4e2   :  { %1371 = vmatpush.bf16.msrb.mxu0 %v2928_v28  ;;  %1384 = vmatpush.bf16.msrb.mxu1 %v2941_v32 }
 0x4e3   :  { %1397 = vmatpush.bf16.msrb.mxu2 %v2969_v42  ;;  %1410 = vmatpush.bf16.msrb.mxu3 %v2943_v33 }
 0x4e6   :  { %1372 = vmatpush.bf16.msrb.mxu0 %v2967_v41  ;;  %1385 = vmatpush.bf16.msrb.mxu1 %v2979_v45 }
 0x4e7   :  { %1398 = vmatpush.bf16.msrb.mxu2 %v3005_v54  ;;  %1411 = vmatpush.bf16.msrb.mxu3 %v2981_v46 }
 0x4ea   :  { %1373 = vmatpush.bf16.msrb.mxu0 %v3003_v53  ;;  %1386 = vmatpush.bf16.msrb.mxu1 %v3015_v57 }
 0x4eb   :  { %1399 = vmatpush.bf16.msrb.mxu2 %v3041_v2  ;;  %1412 = vmatpush.bf16.msrb.mxu3 %v3017_v58 }
 0x4ee   :  { %1374 = vmatpush.bf16.msrb.mxu0 %v3039_v1  ;;  %1387 = vmatpush.bf16.msrb.mxu1 %v3051_v6 }
 0x4ef   :  { %1400 = vmatpush.bf16.msrb.mxu2 %v3077_v20  ;;  %1413 = vmatpush.bf16.msrb.mxu3 %v3053_v9 }
 0x4f2   :  { %1375 = vmatpush.bf16.msrb.mxu0 %v3075_v19  ;;  %1388 = vmatpush.bf16.msrb.mxu1 %v3087_v24 }
 0x4f3   :  { %1401 = vmatpush.bf16.msrb.mxu2 %v3116_v38  ;;  %1414 = vmatpush.bf16.msrb.mxu3 %v3089_v25 }
 0x4f6   :  { %1376 = vmatpush.bf16.msrb.mxu0 %v3111_v36  ;;  %1389 = vmatpush.bf16.msrb.mxu1 %v3120_v39 }
 0x4f7   :  { %1402 = vmatpush.bf16.msrb.mxu2 %v3134_v48  ;;  %1415 = vmatpush.bf16.msrb.mxu3 %v3122_v40 }
 0x555   :  { %v1124_v31 = vpop.f32.mrf.mxu0  ;;  %v1137_v37 = vpop.f32.mrf.mxu1 }
 0x556   :  { %v1167_v43 = vadd.f32 %v2451_v4, %v1124_v31  ;;  %v1168_v30 = vadd.f32 %v2452_v44, %v1137_v37 }
 0x558   :  { %v2455_v29 = vmul.f32 -1.442695, %v1167_v43  ;;  %v2456_v49 = vmul.f32 -1.442695, %v1168_v30 }
 0x55a   :  { %2667 = vpow2.f32 %v2455_v29 }
 0x55b   :  { %2669 = vpow2.f32 %v2456_v49 }
 0x55c   :  { %v1150_v51 = vpop.f32.mrf.mxu2  ;;  %v1163_v52 = vpop.f32.mrf.mxu3 }
 0x55d   :  { %v1170_v55 = vadd.f32 %v2454_v50, %v1163_v52  ;;  %v1126_v56 = vpop.f32.mrf.mxu0  ;;  %v1139_v59 = vpop.f32.mrf.mxu1  ;;  %v1169_v27 = vadd.f32 %v2453_v26, %v1150_v51 }
 0x55f   :  { %v2457_v60 = vmul.f32 -1.442695, %v1170_v55 }
 0x560   :  { %v2668_v61 = vpop.eup %2667 }
 0x561   :  { %v2670_v62 = vpop.eup %2669  ;;  %v1174_v63 = vadd.f32 1.0, %v2668_v61  ;;  %2671 = vpow2.f32 %v2457_v60 }
 0x562   :  { %v1193_v14 = vadd.f32 1.0, %v2670_v62 }
 0x563   :  { %2673 = vrcp.f32 %v1174_v63  ;;  %v1186_v4 = vand.u32 2147483648, %v1174_v63  ;;  %v1184_v37 = vand.u32 2147483647, %v1174_v63  ;;  %vm1180_vm6 = vweird.f32 %v1174_v63 }
 0x564   :  { %2675 = vrcp.f32 %v1193_v14  ;;  %v1152_v22 = vpop.f32.mrf.mxu2  ;;  %v1165_v15 = vpop.f32.mrf.mxu3  ;;  %v1205_v44 = vand.u32 2147483648, %v1193_v14  ;;  %v1203_v30 = vand.u32 2147483647, %v1193_v14  ;;  %vm1199_vm7 = vweird.f32 %v1193_v14 }
 0x565   :  { %v1187_v50 = vor.u32 1.1754944e-38, %v1186_v4  ;;  %vm1185_vm10 = vcmp.eq.f32.partialorder %v1184_v37, 8.507059e+37 }
 0x566   :  { %v1206_v55 = vor.u32 1.1754944e-38, %v1205_v44  ;;  %vm1204_vm11 = vcmp.eq.f32.partialorder %v1203_v30, 8.507059e+37 }
 0x567   :  { %v2672_v18 = vpop.eup %2671 }
 0x568   :  { %v1213_v47 = vadd.f32 1.0, %v2672_v18 }
 0x569   :  { %v2674_v35 = vpop.eup %2673 }
 0x56a   :  { %v2676_v13 = vpop.eup %2675  ;;  %v1176_v23 = vmul.f32 %v2674_v35, %v1174_v63  ;;  %2677 = vrcp.f32 %v1213_v47  ;;  %vm1181_vm4 = vweird.f32 %v2674_v35  ;;  %vm1219_vm13 = vweird.f32 %v1213_v47 }
 0x56b   :  { %v1195_v11 = vmul.f32 %v2676_v13, %v1193_v14  ;;  %2679 = vtanh.f32 %v1169_v27  ;;  %vm1200_vm5 = vweird.f32 %v2676_v13  ;;  %vm1182_vm8 = vmor %vm1180_vm6, %vm1181_vm4  ;;  %v1225_v27 = vand.u32 2147483648, %v1213_v47 }
 0x56c   :  { %v1177_v10 = vsub.f32 1.0, %v1176_v23  ;;  %vm1201_vm9 = vmor %vm1199_vm7, %vm1200_vm5 }
 0x56d   :  { %v1196_v5 = vsub.f32 1.0, %v1195_v11  ;;  %v1226_v11 = vor.u32 1.1754944e-38, %v1225_v27 }
 0x56e   :  { %v1178_v31 = vmul.f32 %v2674_v35, %v1177_v10 }
 0x56f   :  { %v1197_v43 = vmul.f32 %v2676_v13, %v1196_v5 }
 0x570   :  { %v2678_v29 = vpop.eup %2677  ;;  %v1179_v49 = vadd.f32 %v2674_v35, %v1178_v31 }
 0x571   :  { %v1198_v51 = vadd.f32 %v2676_v13, %v1197_v43  ;;  %v1215_v52 = vmul.f32 %v2678_v29, %v1213_v47  ;;  %v2680_v59 = vpop.eup %2679  ;;  %vm1220_vm12 = vweird.f32 %v2678_v29 }
 0x572   :  { %v1183_v56 = vsel %vm1182_vm8, %v2674_v35, %v1179_v49  ;;  %v1223_v35 = vand.u32 2147483647, %v1213_v47  ;;  %vm1221_vm14 = vmor %vm1219_vm13, %vm1220_vm12  ;;  %v2460_v47 = vld [vmem:[%s3928_s0 + $0x108] sm:$0xff]  ;;  %v2462_v49 = vld [vmem:[%s3928_s0 + $0x118] sm:$0xff] }
 0x573   :  { %v1188_v60 = vsel %vm1185_vm10, %v1187_v50, %v1183_v56  ;;  %v1202_v61 = vsel %vm1201_vm9, %v2676_v13, %v1198_v51  ;;  %v1216_v62 = vsub.f32 1.0, %v1215_v52 }
 0x574   :  { %v1207_v22 = vsel %vm1204_vm11, %v1206_v55, %v1202_v61  ;;  %v1230_v15 = vmul.f32 %v2680_v59, %v1188_v60  ;;  %vm1224_vm15 = vcmp.eq.f32.partialorder %v1223_v35, 8.507059e+37 }
 0x575   :  { %v1229_v26 = vmul.f32 %v1207_v22, %v3522_v0  ;;  %v1217_v18 = vmul.f32 %v2678_v29, %v1216_v62  ;;  %v2459_v0 = vld [vmem:[%s3928_s0 + $0x100] sm:$0xff] }
 0x577   :  { %v3573_v63 = vadd.f32 %v1230_v15, %v1229_v26  ;;  %v1218_v14 = vadd.f32 %v2678_v29, %v1217_v18  ;;  %v2461_v18 = vld [vmem:[%s3928_s0 + $0x110] sm:$0xff] }
 0x579   :  { %2681 = vtanh.f32 %v3573_v63  ;;  %v1222_v23 = vsel %vm1221_vm14, %v2678_v29, %v1218_v14 }
 0x57a   :  { %v1227_v10 = vsel %vm1224_vm15, %v1226_v11, %v1222_v23 }
 0x57f   :  { %v2682_v13 = vpop.eup %2681 }
 0x580   :  { %v1233_v5 = vmul.f32 %v2682_v13, %v1227_v10 }
 0x582   :  { %v1234_v4 = vpack.c.bf16 %v1233_v5, %v1233_v5 }
 0x584   :  { %2458 = vst [vmem:[%s3930_s4 + $0x1c] sm:$0xf] %v1234_v4  ;;  %1250 = vmatmul.bf16.vlgmr.msra.gmra.mxu0 %v1234_v4  ;;  %1263 = vmatmul.bf16.vlgmr.msra.gmra.mxu1 %v1234_v4 }
 0x585   :  { %1276 = vmatmul.bf16.vlgmr.msra.gmra.mxu2 %v1234_v4  ;;  %1289 = vmatmul.bf16.vlgmr.msra.gmra.mxu3 %v1234_v4 }
 0x586   :  { %1496 = vmatpush.bf16.msra.mxu0 %v2855_v3  ;;  %1509 = vmatpush.bf16.msra.mxu1 %v2866_v7 }
 0x587   :  { %1522 = vmatpush.bf16.msra.mxu2 %v2906_v21  ;;  %1535 = vmatpush.bf16.msra.mxu3 %v2868_v8 }
 0x58a   :  { %1497 = vmatpush.bf16.msra.mxu0 %v2880_v12  ;;  %1510 = vmatpush.bf16.msra.mxu1 %v2893_v16 }
 0x58b   :  { %1523 = vmatpush.bf16.msra.mxu2 %v2945_v34  ;;  %1536 = vmatpush.bf16.msra.mxu3 %v2895_v17 }
 0x58e   :  { %1498 = vmatpush.bf16.msra.mxu0 %v2928_v28  ;;  %1511 = vmatpush.bf16.msra.mxu1 %v2941_v32 }
 0x58f   :  { %1524 = vmatpush.bf16.msra.mxu2 %v2969_v42  ;;  %1537 = vmatpush.bf16.msra.mxu3 %v2943_v33 }
 0x592   :  { %1499 = vmatpush.bf16.msra.mxu0 %v2967_v41  ;;  %1512 = vmatpush.bf16.msra.mxu1 %v2979_v45 }
 0x593   :  { %1525 = vmatpush.bf16.msra.mxu2 %v3005_v54  ;;  %1538 = vmatpush.bf16.msra.mxu3 %v2981_v46 }
 0x596   :  { %1500 = vmatpush.bf16.msra.mxu0 %v3003_v53  ;;  %1513 = vmatpush.bf16.msra.mxu1 %v3015_v57 }
 0x597   :  { %1526 = vmatpush.bf16.msra.mxu2 %v3041_v2  ;;  %1539 = vmatpush.bf16.msra.mxu3 %v3017_v58 }
 0x59a   :  { %1501 = vmatpush.bf16.msra.mxu0 %v3039_v1  ;;  %1514 = vmatpush.bf16.msra.mxu1 %v3051_v6 }
 0x59b   :  { %1527 = vmatpush.bf16.msra.mxu2 %v3077_v20  ;;  %1540 = vmatpush.bf16.msra.mxu3 %v3053_v9 }
 0x59e   :  { %1502 = vmatpush.bf16.msra.mxu0 %v3075_v19  ;;  %1515 = vmatpush.bf16.msra.mxu1 %v3087_v24 }
 0x59f   :  { %1528 = vmatpush.bf16.msra.mxu2 %v3116_v38  ;;  %1541 = vmatpush.bf16.msra.mxu3 %v3089_v25 }
 0x5a2   :  { %1503 = vmatpush.bf16.msra.mxu0 %v3111_v36  ;;  %1516 = vmatpush.bf16.msra.mxu1 %v3120_v39 }
 0x5a3   :  { %1529 = vmatpush.bf16.msra.mxu2 %v3134_v48  ;;  %1542 = vmatpush.bf16.msra.mxu3 %v3122_v40 }
 0x601   :  { %v1251_v44 = vpop.f32.mrf.mxu0  ;;  %v1264_v31 = vpop.f32.mrf.mxu1 }
 0x602   :  { %v1294_v37 = vadd.f32 %v2459_v0, %v1251_v44  ;;  %v1295_v43 = vadd.f32 %v2460_v47, %v1264_v31 }
 0x604   :  { %v2463_v30 = vmul.f32 -1.442695, %v1294_v37  ;;  %v2464_v29 = vmul.f32 -1.442695, %v1295_v43 }
 0x606   :  { %2683 = vpow2.f32 %v2463_v30 }
 0x607   :  { %2685 = vpow2.f32 %v2464_v29 }
 0x608   :  { %v1277_v50 = vpop.f32.mrf.mxu2  ;;  %v1290_v51 = vpop.f32.mrf.mxu3 }
 0x609   :  { %v1297_v52 = vadd.f32 %v2462_v49, %v1290_v51  ;;  %v1253_v55 = vpop.f32.mrf.mxu0  ;;  %v1266_v56 = vpop.f32.mrf.mxu1  ;;  %v1296_v23 = vadd.f32 %v2461_v18, %v1277_v50 }
 0x60b   :  { %v2465_v59 = vmul.f32 -1.442695, %v1297_v52 }
 0x60c   :  { %v2684_v60 = vpop.eup %2683 }
 0x60d   :  { %v2686_v61 = vpop.eup %2685  ;;  %v1301_v62 = vadd.f32 1.0, %v2684_v60  ;;  %2687 = vpow2.f32 %v2465_v59 }
 0x60e   :  { %v1320_v22 = vadd.f32 1.0, %v2686_v61 }
 0x60f   :  { %2689 = vrcp.f32 %v1301_v62  ;;  %v1313_v0 = vand.u32 2147483648, %v1301_v62  ;;  %v1311_v31 = vand.u32 2147483647, %v1301_v62  ;;  %vm1307_vm2 = vweird.f32 %v1301_v62 }
 0x610   :  { %2691 = vrcp.f32 %v1320_v22  ;;  %v1279_v15 = vpop.f32.mrf.mxu2  ;;  %v1292_v26 = vpop.f32.mrf.mxu3  ;;  %v1332_v47 = vand.u32 2147483648, %v1320_v22  ;;  %v1330_v43 = vand.u32 2147483647, %v1320_v22  ;;  %vm1326_vm3 = vweird.f32 %v1320_v22 }
 0x611   :  { %v1314_v49 = vor.u32 1.1754944e-38, %v1313_v0  ;;  %vm1312_vm6 = vcmp.eq.f32.partialorder %v1311_v31, 8.507059e+37 }
 0x612   :  { %v1333_v52 = vor.u32 1.1754944e-38, %v1332_v47  ;;  %vm1331_vm7 = vcmp.eq.f32.partialorder %v1330_v43, 8.507059e+37 }
 0x613   :  { %v2688_v14 = vpop.eup %2687 }
 0x614   :  { %v1340_v27 = vadd.f32 1.0, %v2688_v14 }
 0x615   :  { %v2690_v35 = vpop.eup %2689 }
 0x616   :  { %v2692_v11 = vpop.eup %2691  ;;  %v1303_v13 = vmul.f32 %v2690_v35, %v1301_v62  ;;  %2693 = vrcp.f32 %v1340_v27  ;;  %vm1308_vm0 = vweird.f32 %v2690_v35  ;;  %vm1346_vm9 = vweird.f32 %v1340_v27 }
 0x617   :  { %v1322_v10 = vmul.f32 %v2692_v11, %v1320_v22  ;;  %2695 = vtanh.f32 %v1296_v23  ;;  %vm1327_vm1 = vweird.f32 %v2692_v11  ;;  %vm1309_vm4 = vmor %vm1307_vm2, %vm1308_vm0  ;;  %v1352_v23 = vand.u32 2147483648, %v1340_v27 }
 0x618   :  { %v1304_v5 = vsub.f32 1.0, %v1303_v13  ;;  %vm1328_vm5 = vmor %vm1326_vm3, %vm1327_vm1 }
 0x619   :  { %v1323_v4 = vsub.f32 1.0, %v1322_v10  ;;  %v1353_v10 = vor.u32 1.1754944e-38, %v1352_v23 }
 0x61a   :  { %v1305_v44 = vmul.f32 %v2690_v35, %v1304_v5 }
 0x61b   :  { %v1324_v37 = vmul.f32 %v2692_v11, %v1323_v4 }
 0x61c   :  { %v2694_v30 = vpop.eup %2693  ;;  %v1306_v29 = vadd.f32 %v2690_v35, %v1305_v44 }
 0x61d   :  { %v1325_v50 = vadd.f32 %v2692_v11, %v1324_v37  ;;  %v1342_v51 = vmul.f32 %v2694_v30, %v1340_v27  ;;  %v2696_v56 = vpop.eup %2695  ;;  %vm1347_vm8 = vweird.f32 %v2694_v30 }
 0x61e   :  { %v1310_v55 = vsel %vm1309_vm4, %v2690_v35, %v1306_v29  ;;  %v1350_v35 = vand.u32 2147483647, %v1340_v27  ;;  %vm1348_vm10 = vmor %vm1346_vm9, %vm1347_vm8  ;;  %v2468_v27 = vld [vmem:[%s3928_s0 + $0x128] sm:$0xff]  ;;  %v2470_v29 = vld [vmem:[%s3928_s0 + $0x138] sm:$0xff] }
 0x61f   :  { %v1315_v59 = vsel %vm1312_vm6, %v1314_v49, %v1310_v55  ;;  %v1329_v60 = vsel %vm1328_vm5, %v2692_v11, %v1325_v50  ;;  %v1343_v61 = vsub.f32 1.0, %v1342_v51 }
 0x620   :  { %v1334_v15 = vsel %vm1331_vm7, %v1333_v52, %v1329_v60  ;;  %v1357_v26 = vmul.f32 %v2696_v56, %v1315_v59  ;;  %vm1351_vm11 = vcmp.eq.f32.partialorder %v1350_v35, 8.507059e+37 }
 0x621   :  { %v1356_v18 = vmul.f32 %v1334_v15, %v3573_v63  ;;  %v1344_v14 = vmul.f32 %v2694_v30, %v1343_v61  ;;  %v2467_v63 = vld [vmem:[%s3928_s0 + $0x120] sm:$0xff] }
 0x623   :  { %v3624_v62 = vadd.f32 %v1357_v26, %v1356_v18  ;;  %v1345_v22 = vadd.f32 %v2694_v30, %v1344_v14  ;;  %v2469_v14 = vld [vmem:[%s3928_s0 + $0x130] sm:$0xff] }
 0x625   :  { %2697 = vtanh.f32 %v3624_v62  ;;  %v1349_v13 = vsel %vm1348_vm10, %v2694_v30, %v1345_v22 }
 0x626   :  { %v1354_v5 = vsel %vm1351_vm11, %v1353_v10, %v1349_v13 }
 0x62b   :  { %v2698_v11 = vpop.eup %2697 }
 0x62c   :  { %v1360_v4 = vmul.f32 %v2698_v11, %v1354_v5 }
 0x62e   :  { %v1361_v0 = vpack.c.bf16 %v1360_v4, %v1360_v4 }
 0x630   :  { %2466 = vst [vmem:[%s3930_s4 + $0x20] sm:$0xf] %v1361_v0  ;;  %1377 = vmatmul.bf16.vlgmr.msrb.gmra.mxu0 %v1361_v0  ;;  %1390 = vmatmul.bf16.vlgmr.msrb.gmra.mxu1 %v1361_v0 }
 0x631   :  { %1403 = vmatmul.bf16.vlgmr.msrb.gmra.mxu2 %v1361_v0  ;;  %1416 = vmatmul.bf16.vlgmr.msrb.gmra.mxu3 %v1361_v0 }
 0x632   :  { %1623 = vmatpush.bf16.msrb.mxu0 %v2855_v3  ;;  %1636 = vmatpush.bf16.msrb.mxu1 %v2866_v7 }
 0x633   :  { %1649 = vmatpush.bf16.msrb.mxu2 %v2906_v21  ;;  %1662 = vmatpush.bf16.msrb.mxu3 %v2868_v8 }
 0x636   :  { %1624 = vmatpush.bf16.msrb.mxu0 %v2880_v12  ;;  %1637 = vmatpush.bf16.msrb.mxu1 %v2893_v16 }
 0x637   :  { %1650 = vmatpush.bf16.msrb.mxu2 %v2945_v34  ;;  %1663 = vmatpush.bf16.msrb.mxu3 %v2895_v17 }
 0x63a   :  { %1625 = vmatpush.bf16.msrb.mxu0 %v2928_v28  ;;  %1638 = vmatpush.bf16.msrb.mxu1 %v2941_v32 }
 0x63b   :  { %1651 = vmatpush.bf16.msrb.mxu2 %v2969_v42  ;;  %1664 = vmatpush.bf16.msrb.mxu3 %v2943_v33 }
 0x63e   :  { %1626 = vmatpush.bf16.msrb.mxu0 %v2967_v41  ;;  %1639 = vmatpush.bf16.msrb.mxu1 %v2979_v45 }
 0x63f   :  { %1652 = vmatpush.bf16.msrb.mxu2 %v3005_v54  ;;  %1665 = vmatpush.bf16.msrb.mxu3 %v2981_v46 }
 0x642   :  { %1627 = vmatpush.bf16.msrb.mxu0 %v3003_v53  ;;  %1640 = vmatpush.bf16.msrb.mxu1 %v3015_v57 }
 0x643   :  { %1653 = vmatpush.bf16.msrb.mxu2 %v3041_v2  ;;  %1666 = vmatpush.bf16.msrb.mxu3 %v3017_v58 }
 0x646   :  { %1628 = vmatpush.bf16.msrb.mxu0 %v3039_v1  ;;  %1641 = vmatpush.bf16.msrb.mxu1 %v3051_v6 }
 0x647   :  { %1654 = vmatpush.bf16.msrb.mxu2 %v3077_v20  ;;  %1667 = vmatpush.bf16.msrb.mxu3 %v3053_v9 }
 0x64a   :  { %1629 = vmatpush.bf16.msrb.mxu0 %v3075_v19  ;;  %1642 = vmatpush.bf16.msrb.mxu1 %v3087_v24 }
 0x64b   :  { %1655 = vmatpush.bf16.msrb.mxu2 %v3116_v38  ;;  %1668 = vmatpush.bf16.msrb.mxu3 %v3089_v25 }
 0x64e   :  { %1630 = vmatpush.bf16.msrb.mxu0 %v3111_v36  ;;  %1643 = vmatpush.bf16.msrb.mxu1 %v3120_v39 }
 0x64f   :  { %1656 = vmatpush.bf16.msrb.mxu2 %v3134_v48  ;;  %1669 = vmatpush.bf16.msrb.mxu3 %v3122_v40 }
 0x6ad   :  { %v1378_v47 = vpop.f32.mrf.mxu0  ;;  %v1391_v44 = vpop.f32.mrf.mxu1 }
 0x6ae   :  { %v1421_v31 = vadd.f32 %v2467_v63, %v1378_v47  ;;  %v1422_v37 = vadd.f32 %v2468_v27, %v1391_v44 }
 0x6b0   :  { %v2471_v43 = vmul.f32 -1.442695, %v1421_v31  ;;  %v2472_v30 = vmul.f32 -1.442695, %v1422_v37 }
 0x6b2   :  { %2699 = vpow2.f32 %v2471_v43 }
 0x6b3   :  { %2701 = vpow2.f32 %v2472_v30 }
 0x6b4   :  { %v1404_v49 = vpop.f32.mrf.mxu2  ;;  %v1417_v50 = vpop.f32.mrf.mxu3 }
 0x6b5   :  { %v1424_v51 = vadd.f32 %v2470_v29, %v1417_v50  ;;  %v1380_v52 = vpop.f32.mrf.mxu0  ;;  %v1393_v55 = vpop.f32.mrf.mxu1  ;;  %v1423_v13 = vadd.f32 %v2469_v14, %v1404_v49 }
 0x6b7   :  { %v2473_v56 = vmul.f32 -1.442695, %v1424_v51 }
 0x6b8   :  { %v2700_v59 = vpop.eup %2699 }
 0x6b9   :  { %v2702_v60 = vpop.eup %2701  ;;  %v1428_v61 = vadd.f32 1.0, %v2700_v59  ;;  %2703 = vpow2.f32 %v2473_v56 }
 0x6ba   :  { %v1447_v15 = vadd.f32 1.0, %v2702_v60 }
 0x6bb   :  { %2705 = vrcp.f32 %v1428_v61  ;;  %v1440_v63 = vand.u32 2147483648, %v1428_v61  ;;  %v1438_v44 = vand.u32 2147483647, %v1428_v61  ;;  %vm1434_vm14 = vweird.f32 %v1428_v61 }
 0x6bc   :  { %2707 = vrcp.f32 %v1447_v15  ;;  %v1406_v26 = vpop.f32.mrf.mxu2  ;;  %v1419_v18 = vpop.f32.mrf.mxu3  ;;  %v1459_v27 = vand.u32 2147483648, %v1447_v15  ;;  %v1457_v37 = vand.u32 2147483647, %v1447_v15  ;;  %vm1453_vm15 = vweird.f32 %v1447_v15 }
 0x6bd   :  { %v1441_v29 = vor.u32 1.1754944e-38, %v1440_v63  ;;  %vm1439_vm2 = vcmp.eq.f32.partialorder %v1438_v44, 8.507059e+37 }
 0x6be   :  { %v1460_v51 = vor.u32 1.1754944e-38, %v1459_v27  ;;  %vm1458_vm3 = vcmp.eq.f32.partialorder %v1457_v37, 8.507059e+37 }
 0x6bf   :  { %v2704_v22 = vpop.eup %2703 }
 0x6c0   :  { %v1467_v23 = vadd.f32 1.0, %v2704_v22 }
 0x6c1   :  { %v2706_v35 = vpop.eup %2705 }
 0x6c2   :  { %v2708_v10 = vpop.eup %2707  ;;  %v1430_v11 = vmul.f32 %v2706_v35, %v1428_v61  ;;  %2709 = vrcp.f32 %v1467_v23  ;;  %vm1435_vm12 = vweird.f32 %v2706_v35  ;;  %vm1473_vm5 = vweird.f32 %v1467_v23 }
 0x6c3   :  { %v1449_v5 = vmul.f32 %v2708_v10, %v1447_v15  ;;  %2711 = vtanh.f32 %v1423_v13  ;;  %vm1454_vm13 = vweird.f32 %v2708_v10  ;;  %vm1436_vm0 = vmor %vm1434_vm14, %vm1435_vm12  ;;  %v1479_v13 = vand.u32 2147483648, %v1467_v23 }
 0x6c4   :  { %v1431_v4 = vsub.f32 1.0, %v1430_v11  ;;  %vm1455_vm1 = vmor %vm1453_vm15, %vm1454_vm13 }
 0x6c5   :  { %v1450_v0 = vsub.f32 1.0, %v1449_v5  ;;  %v1480_v5 = vor.u32 1.1754944e-38, %v1479_v13 }
 0x6c6   :  { %v1432_v47 = vmul.f32 %v2706_v35, %v1431_v4 }
 0x6c7   :  { %v1451_v31 = vmul.f32 %v2708_v10, %v1450_v0 }
 0x6c8   :  { %v2710_v43 = vpop.eup %2709  ;;  %v1433_v30 = vadd.f32 %v2706_v35, %v1432_v47 }
 0x6c9   :  { %v1452_v49 = vadd.f32 %v2708_v10, %v1451_v31  ;;  %v1469_v50 = vmul.f32 %v2710_v43, %v1467_v23  ;;  %v2712_v55 = vpop.eup %2711  ;;  %vm1474_vm4 = vweird.f32 %v2710_v43 }
 0x6ca   :  { %v1437_v52 = vsel %vm1436_vm0, %v2706_v35, %v1433_v30  ;;  %v1477_v35 = vand.u32 2147483647, %v1467_v23  ;;  %vm1475_vm6 = vmor %vm1473_vm5, %vm1474_vm4  ;;  %v2476_v23 = vld [vmem:[%s3928_s0 + $0x148] sm:$0xff]  ;;  %v2478_v30 = vld [vmem:[%s3928_s0 + $0x158] sm:$0xff] }
 0x6cb   :  { %v1442_v56 = vsel %vm1439_vm2, %v1441_v29, %v1437_v52  ;;  %v1456_v59 = vsel %vm1455_vm1, %v2708_v10, %v1452_v49  ;;  %v1470_v60 = vsub.f32 1.0, %v1469_v50 }
 0x6cc   :  { %v1461_v26 = vsel %vm1458_vm3, %v1460_v51, %v1456_v59  ;;  %v1484_v18 = vmul.f32 %v2712_v55, %v1442_v56  ;;  %vm1478_vm7 = vcmp.eq.f32.partialorder %v1477_v35, 8.507059e+37 }
 0x6cd   :  { %v1483_v14 = vmul.f32 %v1461_v26, %v3624_v62  ;;  %v1471_v22 = vmul.f32 %v2710_v43, %v1470_v60  ;;  %v2475_v62 = vld [vmem:[%s3928_s0 + $0x140] sm:$0xff] }
 0x6cf   :  { %v3675_v61 = vadd.f32 %v1484_v18, %v1483_v14  ;;  %v1472_v15 = vadd.f32 %v2710_v43, %v1471_v22  ;;  %v2477_v22 = vld [vmem:[%s3928_s0 + $0x150] sm:$0xff] }
 0x6d1   :  { %2713 = vtanh.f32 %v3675_v61  ;;  %v1476_v11 = vsel %vm1475_vm6, %v2710_v43, %v1472_v15 }
 0x6d2   :  { %v1481_v4 = vsel %vm1478_vm7, %v1480_v5, %v1476_v11 }
 0x6d7   :  { %v2714_v10 = vpop.eup %2713 }
 0x6d8   :  { %v1487_v0 = vmul.f32 %v2714_v10, %v1481_v4 }
 0x6da   :  { %v1488_v63 = vpack.c.bf16 %v1487_v0, %v1487_v0 }
 0x6dc   :  { %2474 = vst [vmem:[%s3930_s4 + $0x24] sm:$0xf] %v1488_v63  ;;  %1504 = vmatmul.bf16.vlgmr.msra.gmra.mxu0 %v1488_v63  ;;  %1517 = vmatmul.bf16.vlgmr.msra.gmra.mxu1 %v1488_v63 }
 0x6dd   :  { %1530 = vmatmul.bf16.vlgmr.msra.gmra.mxu2 %v1488_v63  ;;  %1543 = vmatmul.bf16.vlgmr.msra.gmra.mxu3 %v1488_v63 }
 0x6de   :  { %1750 = vmatpush.bf16.msra.mxu0 %v2855_v3  ;;  %1763 = vmatpush.bf16.msra.mxu1 %v2866_v7 }
 0x6df   :  { %1776 = vmatpush.bf16.msra.mxu2 %v2906_v21  ;;  %1789 = vmatpush.bf16.msra.mxu3 %v2868_v8 }
 0x6e2   :  { %1751 = vmatpush.bf16.msra.mxu0 %v2880_v12  ;;  %1764 = vmatpush.bf16.msra.mxu1 %v2893_v16 }
 0x6e3   :  { %1777 = vmatpush.bf16.msra.mxu2 %v2945_v34  ;;  %1790 = vmatpush.bf16.msra.mxu3 %v2895_v17 }
 0x6e6   :  { %1752 = vmatpush.bf16.msra.mxu0 %v2928_v28  ;;  %1765 = vmatpush.bf16.msra.mxu1 %v2941_v32 }
 0x6e7   :  { %1778 = vmatpush.bf16.msra.mxu2 %v2969_v42  ;;  %1791 = vmatpush.bf16.msra.mxu3 %v2943_v33 }
 0x6ea   :  { %1753 = vmatpush.bf16.msra.mxu0 %v2967_v41  ;;  %1766 = vmatpush.bf16.msra.mxu1 %v2979_v45 }
 0x6eb   :  { %1779 = vmatpush.bf16.msra.mxu2 %v3005_v54  ;;  %1792 = vmatpush.bf16.msra.mxu3 %v2981_v46 }
 0x6ee   :  { %1754 = vmatpush.bf16.msra.mxu0 %v3003_v53  ;;  %1767 = vmatpush.bf16.msra.mxu1 %v3015_v57 }
 0x6ef   :  { %1780 = vmatpush.bf16.msra.mxu2 %v3041_v2  ;;  %1793 = vmatpush.bf16.msra.mxu3 %v3017_v58 }
 0x6f2   :  { %1755 = vmatpush.bf16.msra.mxu0 %v3039_v1  ;;  %1768 = vmatpush.bf16.msra.mxu1 %v3051_v6 }
 0x6f3   :  { %1781 = vmatpush.bf16.msra.mxu2 %v3077_v20  ;;  %1794 = vmatpush.bf16.msra.mxu3 %v3053_v9 }
 0x6f6   :  { %1756 = vmatpush.bf16.msra.mxu0 %v3075_v19  ;;  %1769 = vmatpush.bf16.msra.mxu1 %v3087_v24 }
 0x6f7   :  { %1782 = vmatpush.bf16.msra.mxu2 %v3116_v38  ;;  %1795 = vmatpush.bf16.msra.mxu3 %v3089_v25 }
 0x6fa   :  { %1757 = vmatpush.bf16.msra.mxu0 %v3111_v36  ;;  %1770 = vmatpush.bf16.msra.mxu1 %v3120_v39 }
 0x6fb   :  { %1783 = vmatpush.bf16.msra.mxu2 %v3134_v48  ;;  %1796 = vmatpush.bf16.msra.mxu3 %v3122_v40 }
 0x759   :  { %v1505_v27 = vpop.f32.mrf.mxu0  ;;  %v1518_v47 = vpop.f32.mrf.mxu1 }
 0x75a   :  { %v1548_v44 = vadd.f32 %v2475_v62, %v1505_v27  ;;  %v1549_v31 = vadd.f32 %v2476_v23, %v1518_v47 }
 0x75c   :  { %v2479_v37 = vmul.f32 -1.442695, %v1548_v44  ;;  %v2480_v43 = vmul.f32 -1.442695, %v1549_v31 }
 0x75e   :  { %2715 = vpow2.f32 %v2479_v37 }
 0x75f   :  { %2717 = vpow2.f32 %v2480_v43 }
 0x760   :  { %v1531_v29 = vpop.f32.mrf.mxu2  ;;  %v1544_v49 = vpop.f32.mrf.mxu3 }
 0x761   :  { %v1551_v50 = vadd.f32 %v2478_v30, %v1544_v49  ;;  %v1507_v51 = vpop.f32.mrf.mxu0  ;;  %v1520_v52 = vpop.f32.mrf.mxu1  ;;  %v1550_v11 = vadd.f32 %v2477_v22, %v1531_v29 }
 0x763   :  { %v2481_v55 = vmul.f32 -1.442695, %v1551_v50 }
 0x764   :  { %v2716_v56 = vpop.eup %2715 }
 0x765   :  { %v2718_v59 = vpop.eup %2717  ;;  %v1555_v60 = vadd.f32 1.0, %v2716_v56  ;;  %2719 = vpow2.f32 %v2481_v55 }
 0x766   :  { %v1574_v26 = vadd.f32 1.0, %v2718_v59 }
 0x767   :  { %2721 = vrcp.f32 %v1555_v60  ;;  %v1567_v62 = vand.u32 2147483648, %v1555_v60  ;;  %v1565_v47 = vand.u32 2147483647, %v1555_v60  ;;  %vm1561_vm10 = vweird.f32 %v1555_v60 }
 0x768   :  { %2723 = vrcp.f32 %v1574_v26  ;;  %v1533_v18 = vpop.f32.mrf.mxu2  ;;  %v1546_v14 = vpop.f32.mrf.mxu3  ;;  %v1586_v23 = vand.u32 2147483648, %v1574_v26  ;;  %v1584_v31 = vand.u32 2147483647, %v1574_v26  ;;  %vm1580_vm11 = vweird.f32 %v1574_v26 }
 0x769   :  { %v1568_v30 = vor.u32 1.1754944e-38, %v1567_v62  ;;  %vm1566_vm14 = vcmp.eq.f32.partialorder %v1565_v47, 8.507059e+37 }
 0x76a   :  { %v1587_v50 = vor.u32 1.1754944e-38, %v1586_v23  ;;  %vm1585_vm15 = vcmp.eq.f32.partialorder %v1584_v31, 8.507059e+37 }
 0x76b   :  { %v2720_v15 = vpop.eup %2719 }
 0x76c   :  { %v1594_v13 = vadd.f32 1.0, %v2720_v15 }
 0x76d   :  { %v2722_v35 = vpop.eup %2721 }
 0x76e   :  { %v2724_v5 = vpop.eup %2723  ;;  %v1557_v10 = vmul.f32 %v2722_v35, %v1555_v60  ;;  %2725 = vrcp.f32 %v1594_v13  ;;  %vm1562_vm8 = vweird.f32 %v2722_v35  ;;  %vm1600_vm1 = vweird.f32 %v1594_v13 }
 0x76f   :  { %v1576_v4 = vmul.f32 %v2724_v5, %v1574_v26  ;;  %2727 = vtanh.f32 %v1550_v11  ;;  %vm1581_vm9 = vweird.f32 %v2724_v5  ;;  %vm1563_vm12 = vmor %vm1561_vm10, %vm1562_vm8  ;;  %v1606_v11 = vand.u32 2147483648, %v1594_v13 }
 0x770   :  { %v1558_v0 = vsub.f32 1.0, %v1557_v10  ;;  %vm1582_vm13 = vmor %vm1580_vm11, %vm1581_vm9 }
 0x771   :  { %v1577_v63 = vsub.f32 1.0, %v1576_v4  ;;  %v1607_v4 = vor.u32 1.1754944e-38, %v1606_v11 }
 0x772   :  { %v1559_v27 = vmul.f32 %v2722_v35, %v1558_v0 }
 0x773   :  { %v1578_v44 = vmul.f32 %v2724_v5, %v1577_v63 }
 0x774   :  { %v2726_v37 = vpop.eup %2725  ;;  %v1560_v43 = vadd.f32 %v2722_v35, %v1559_v27 }
 0x775   :  { %v1579_v29 = vadd.f32 %v2724_v5, %v1578_v44  ;;  %v1596_v49 = vmul.f32 %v2726_v37, %v1594_v13  ;;  %v2728_v52 = vpop.eup %2727  ;;  %vm1601_vm0 = vweird.f32 %v2726_v37 }
 0x776   :  { %v1564_v51 = vsel %vm1563_vm12, %v2722_v35, %v1560_v43  ;;  %v1604_v35 = vand.u32 2147483647, %v1594_v13  ;;  %vm1602_vm2 = vmor %vm1600_vm1, %vm1601_vm0  ;;  %v2484_v13 = vld [vmem:[%s3928_s0 + $0x168] sm:$0xff]  ;;  %v2486_v43 = vld [vmem:[%s3928_s0 + $0x178] sm:$0xff] }
 0x777   :  { %v1569_v55 = vsel %vm1566_vm14, %v1568_v30, %v1564_v51  ;;  %v1583_v56 = vsel %vm1582_vm13, %v2724_v5, %v1579_v29  ;;  %v1597_v59 = vsub.f32 1.0, %v1596_v49 }
 0x778   :  { %v1588_v18 = vsel %vm1585_vm15, %v1587_v50, %v1583_v56  ;;  %v1611_v14 = vmul.f32 %v2728_v52, %v1569_v55  ;;  %vm1605_vm3 = vcmp.eq.f32.partialorder %v1604_v35, 8.507059e+37 }
 0x779   :  { %v1610_v22 = vmul.f32 %v1588_v18, %v3675_v61  ;;  %v1598_v15 = vmul.f32 %v2726_v37, %v1597_v59  ;;  %v2483_v61 = vld [vmem:[%s3928_s0 + $0x160] sm:$0xff] }
 0x77b   :  { %v3726_v60 = vadd.f32 %v1611_v14, %v1610_v22  ;;  %v1599_v26 = vadd.f32 %v2726_v37, %v1598_v15  ;;  %v2485_v15 = vld [vmem:[%s3928_s0 + $0x170] sm:$0xff] }
 0x77d   :  { %2729 = vtanh.f32 %v3726_v60  ;;  %v1603_v10 = vsel %vm1602_vm2, %v2726_v37, %v1599_v26 }
 0x77e   :  { %v1608_v0 = vsel %vm1605_vm3, %v1607_v4, %v1603_v10 }
 0x783   :  { %v2730_v5 = vpop.eup %2729 }
 0x784   :  { %v1614_v63 = vmul.f32 %v2730_v5, %v1608_v0 }
 0x786   :  { %v1615_v62 = vpack.c.bf16 %v1614_v63, %v1614_v63 }
 0x788   :  { %2482 = vst [vmem:[%s3930_s4 + $0x28] sm:$0xf] %v1615_v62  ;;  %1631 = vmatmul.bf16.vlgmr.msrb.gmra.mxu0 %v1615_v62  ;;  %1644 = vmatmul.bf16.vlgmr.msrb.gmra.mxu1 %v1615_v62 }
 0x789   :  { %1657 = vmatmul.bf16.vlgmr.msrb.gmra.mxu2 %v1615_v62  ;;  %1670 = vmatmul.bf16.vlgmr.msrb.gmra.mxu3 %v1615_v62 }
 0x78a   :  { %1877 = vmatpush.bf16.msrb.mxu0 %v2855_v3  ;;  %1890 = vmatpush.bf16.msrb.mxu1 %v2866_v7 }
 0x78b   :  { %1903 = vmatpush.bf16.msrb.mxu2 %v2906_v21  ;;  %1916 = vmatpush.bf16.msrb.mxu3 %v2868_v8 }
 0x78e   :  { %1878 = vmatpush.bf16.msrb.mxu0 %v2880_v12  ;;  %1891 = vmatpush.bf16.msrb.mxu1 %v2893_v16 }
 0x78f   :  { %1904 = vmatpush.bf16.msrb.mxu2 %v2945_v34  ;;  %1917 = vmatpush.bf16.msrb.mxu3 %v2895_v17 }
 0x792   :  { %1879 = vmatpush.bf16.msrb.mxu0 %v2928_v28  ;;  %1892 = vmatpush.bf16.msrb.mxu1 %v2941_v32 }
 0x793   :  { %1905 = vmatpush.bf16.msrb.mxu2 %v2969_v42  ;;  %1918 = vmatpush.bf16.msrb.mxu3 %v2943_v33 }
 0x796   :  { %1880 = vmatpush.bf16.msrb.mxu0 %v2967_v41  ;;  %1893 = vmatpush.bf16.msrb.mxu1 %v2979_v45 }
 0x797   :  { %1906 = vmatpush.bf16.msrb.mxu2 %v3005_v54  ;;  %1919 = vmatpush.bf16.msrb.mxu3 %v2981_v46 }
 0x79a   :  { %1881 = vmatpush.bf16.msrb.mxu0 %v3003_v53  ;;  %1894 = vmatpush.bf16.msrb.mxu1 %v3015_v57 }
 0x79b   :  { %1907 = vmatpush.bf16.msrb.mxu2 %v3041_v2  ;;  %1920 = vmatpush.bf16.msrb.mxu3 %v3017_v58 }
 0x79e   :  { %1882 = vmatpush.bf16.msrb.mxu0 %v3039_v1  ;;  %1895 = vmatpush.bf16.msrb.mxu1 %v3051_v6 }
 0x79f   :  { %1908 = vmatpush.bf16.msrb.mxu2 %v3077_v20  ;;  %1921 = vmatpush.bf16.msrb.mxu3 %v3053_v9 }
 0x7a2   :  { %1883 = vmatpush.bf16.msrb.mxu0 %v3075_v19  ;;  %1896 = vmatpush.bf16.msrb.mxu1 %v3087_v24 }
 0x7a3   :  { %1909 = vmatpush.bf16.msrb.mxu2 %v3116_v38  ;;  %1922 = vmatpush.bf16.msrb.mxu3 %v3089_v25 }
 0x7a6   :  { %1884 = vmatpush.bf16.msrb.mxu0 %v3111_v36  ;;  %1897 = vmatpush.bf16.msrb.mxu1 %v3120_v39 }
 0x7a7   :  { %1910 = vmatpush.bf16.msrb.mxu2 %v3134_v48  ;;  %1923 = vmatpush.bf16.msrb.mxu3 %v3122_v40 }
 0x805   :  { %v1632_v23 = vpop.f32.mrf.mxu0  ;;  %v1645_v27 = vpop.f32.mrf.mxu1 }
 0x806   :  { %v1675_v47 = vadd.f32 %v2483_v61, %v1632_v23  ;;  %v1676_v44 = vadd.f32 %v2484_v13, %v1645_v27 }
 0x808   :  { %v2487_v31 = vmul.f32 -1.442695, %v1675_v47  ;;  %v2488_v37 = vmul.f32 -1.442695, %v1676_v44 }
 0x80a   :  { %2731 = vpow2.f32 %v2487_v31 }
 0x80b   :  { %2733 = vpow2.f32 %v2488_v37 }
 0x80c   :  { %v1658_v30 = vpop.f32.mrf.mxu2  ;;  %v1671_v29 = vpop.f32.mrf.mxu3 }
 0x80d   :  { %v1678_v49 = vadd.f32 %v2486_v43, %v1671_v29  ;;  %v1634_v50 = vpop.f32.mrf.mxu0  ;;  %v1647_v51 = vpop.f32.mrf.mxu1  ;;  %v1677_v10 = vadd.f32 %v2485_v15, %v1658_v30 }
 0x80f   :  { %v2489_v52 = vmul.f32 -1.442695, %v1678_v49 }
 0x810   :  { %v2732_v55 = vpop.eup %2731 }
 0x811   :  { %v2734_v56 = vpop.eup %2733  ;;  %v1682_v59 = vadd.f32 1.0, %v2732_v55  ;;  %2735 = vpow2.f32 %v2489_v52 }
 0x812   :  { %v1701_v18 = vadd.f32 1.0, %v2734_v56 }
 0x813   :  { %2737 = vrcp.f32 %v1682_v59  ;;  %v1694_v61 = vand.u32 2147483648, %v1682_v59  ;;  %v1692_v27 = vand.u32 2147483647, %v1682_v59  ;;  %vm1688_vm6 = vweird.f32 %v1682_v59 }
 0x814   :  { %2739 = vrcp.f32 %v1701_v18  ;;  %v1660_v14 = vpop.f32.mrf.mxu2  ;;  %v1673_v22 = vpop.f32.mrf.mxu3  ;;  %v1713_v13 = vand.u32 2147483648, %v1701_v18  ;;  %v1711_v44 = vand.u32 2147483647, %v1701_v18  ;;  %vm1707_vm7 = vweird.f32 %v1701_v18 }
 0x815   :  { %v1695_v43 = vor.u32 1.1754944e-38, %v1694_v61  ;;  %vm1693_vm10 = vcmp.eq.f32.partialorder %v1692_v27, 8.507059e+37 }
 0x816   :  { %v1714_v49 = vor.u32 1.1754944e-38, %v1713_v13  ;;  %vm1712_vm11 = vcmp.eq.f32.partialorder %v1711_v44, 8.507059e+37 }
 0x817   :  { %v2736_v26 = vpop.eup %2735 }
 0x818   :  { %v1721_v11 = vadd.f32 1.0, %v2736_v26 }
 0x819   :  { %v2738_v35 = vpop.eup %2737 }
 0x81a   :  { %v2740_v4 = vpop.eup %2739  ;;  %v1684_v5 = vmul.f32 %v2738_v35, %v1682_v59  ;;  %2741 = vrcp.f32 %v1721_v11  ;;  %vm1689_vm4 = vweird.f32 %v2738_v35  ;;  %vm1727_vm13 = vweird.f32 %v1721_v11 }
 0x81b   :  { %v1703_v0 = vmul.f32 %v2740_v4, %v1701_v18  ;;  %2743 = vtanh.f32 %v1677_v10  ;;  %vm1708_vm5 = vweird.f32 %v2740_v4  ;;  %vm1690_vm8 = vmor %vm1688_vm6, %vm1689_vm4  ;;  %v1733_v10 = vand.u32 2147483648, %v1721_v11 }
 0x81c   :  { %v1685_v63 = vsub.f32 1.0, %v1684_v5  ;;  %vm1709_vm9 = vmor %vm1707_vm7, %vm1708_vm5 }
 0x81d   :  { %v1704_v62 = vsub.f32 1.0, %v1703_v0  ;;  %v1734_v0 = vor.u32 1.1754944e-38, %v1733_v10 }
 0x81e   :  { %v1686_v23 = vmul.f32 %v2738_v35, %v1685_v63 }
 0x81f   :  { %v1705_v47 = vmul.f32 %v2740_v4, %v1704_v62 }
 0x820   :  { %v2742_v31 = vpop.eup %2741  ;;  %v1687_v37 = vadd.f32 %v2738_v35, %v1686_v23 }
 0x821   :  { %v1706_v30 = vadd.f32 %v2740_v4, %v1705_v47  ;;  %v1723_v29 = vmul.f32 %v2742_v31, %v1721_v11  ;;  %v2744_v51 = vpop.eup %2743  ;;  %vm1728_vm12 = vweird.f32 %v2742_v31 }
 0x822   :  { %v1691_v50 = vsel %vm1690_vm8, %v2738_v35, %v1687_v37  ;;  %v1731_v35 = vand.u32 2147483647, %v1721_v11  ;;  %vm1729_vm14 = vmor %vm1727_vm13, %vm1728_vm12  ;;  %v2492_v11 = vld [vmem:[%s3928_s0 + $0x188] sm:$0xff]  ;;  %v2494_v37 = vld [vmem:[%s3928_s0 + $0x198] sm:$0xff] }
 0x823   :  { %v1696_v52 = vsel %vm1693_vm10, %v1695_v43, %v1691_v50  ;;  %v1710_v55 = vsel %vm1709_vm9, %v2740_v4, %v1706_v30  ;;  %v1724_v56 = vsub.f32 1.0, %v1723_v29 }
 0x824   :  { %v1715_v14 = vsel %vm1712_vm11, %v1714_v49, %v1710_v55  ;;  %v1738_v22 = vmul.f32 %v2744_v51, %v1696_v52  ;;  %vm1732_vm15 = vcmp.eq.f32.partialorder %v1731_v35, 8.507059e+37 }
 0x825   :  { %v1737_v15 = vmul.f32 %v1715_v14, %v3726_v60  ;;  %v1725_v26 = vmul.f32 %v2742_v31, %v1724_v56  ;;  %v2491_v60 = vld [vmem:[%s3928_s0 + $0x180] sm:$0xff] }
 0x827   :  { %v3777_v59 = vadd.f32 %v1738_v22, %v1737_v15  ;;  %v1726_v18 = vadd.f32 %v2742_v31, %v1725_v26  ;;  %v2493_v26 = vld [vmem:[%s3928_s0 + $0x190] sm:$0xff] }
 0x829   :  { %2745 = vtanh.f32 %v3777_v59  ;;  %v1730_v5 = vsel %vm1729_vm14, %v2742_v31, %v1726_v18 }
 0x82a   :  { %v1735_v63 = vsel %vm1732_vm15, %v1734_v0, %v1730_v5 }
 0x82f   :  { %v2746_v4 = vpop.eup %2745 }
 0x830   :  { %v1741_v62 = vmul.f32 %v2746_v4, %v1735_v63 }
 0x832   :  { %v1742_v61 = vpack.c.bf16 %v1741_v62, %v1741_v62 }
 0x834   :  { %2490 = vst [vmem:[%s3930_s4 + $0x2c] sm:$0xf] %v1742_v61  ;;  %1758 = vmatmul.bf16.vlgmr.msra.gmra.mxu0 %v1742_v61  ;;  %1771 = vmatmul.bf16.vlgmr.msra.gmra.mxu1 %v1742_v61 }
 0x835   :  { %1784 = vmatmul.bf16.vlgmr.msra.gmra.mxu2 %v1742_v61  ;;  %1797 = vmatmul.bf16.vlgmr.msra.gmra.mxu3 %v1742_v61 }
 0x836   :  { %2004 = vmatpush.bf16.msra.mxu0 %v2855_v3  ;;  %2017 = vmatpush.bf16.msra.mxu1 %v2866_v7 }
 0x837   :  { %2030 = vmatpush.bf16.msra.mxu2 %v2906_v21  ;;  %2043 = vmatpush.bf16.msra.mxu3 %v2868_v8 }
 0x83a   :  { %2005 = vmatpush.bf16.msra.mxu0 %v2880_v12  ;;  %2018 = vmatpush.bf16.msra.mxu1 %v2893_v16 }
 0x83b   :  { %2031 = vmatpush.bf16.msra.mxu2 %v2945_v34  ;;  %2044 = vmatpush.bf16.msra.mxu3 %v2895_v17 }
 0x83e   :  { %2006 = vmatpush.bf16.msra.mxu0 %v2928_v28  ;;  %2019 = vmatpush.bf16.msra.mxu1 %v2941_v32 }
 0x83f   :  { %2032 = vmatpush.bf16.msra.mxu2 %v2969_v42  ;;  %2045 = vmatpush.bf16.msra.mxu3 %v2943_v33 }
 0x842   :  { %2007 = vmatpush.bf16.msra.mxu0 %v2967_v41  ;;  %2020 = vmatpush.bf16.msra.mxu1 %v2979_v45 }
 0x843   :  { %2033 = vmatpush.bf16.msra.mxu2 %v3005_v54  ;;  %2046 = vmatpush.bf16.msra.mxu3 %v2981_v46 }
 0x846   :  { %2008 = vmatpush.bf16.msra.mxu0 %v3003_v53  ;;  %2021 = vmatpush.bf16.msra.mxu1 %v3015_v57 }
 0x847   :  { %2034 = vmatpush.bf16.msra.mxu2 %v3041_v2  ;;  %2047 = vmatpush.bf16.msra.mxu3 %v3017_v58 }
 0x84a   :  { %2009 = vmatpush.bf16.msra.mxu0 %v3039_v1  ;;  %2022 = vmatpush.bf16.msra.mxu1 %v3051_v6 }
 0x84b   :  { %2035 = vmatpush.bf16.msra.mxu2 %v3077_v20  ;;  %2048 = vmatpush.bf16.msra.mxu3 %v3053_v9 }
 0x84e   :  { %2010 = vmatpush.bf16.msra.mxu0 %v3075_v19  ;;  %2023 = vmatpush.bf16.msra.mxu1 %v3087_v24 }
 0x84f   :  { %2036 = vmatpush.bf16.msra.mxu2 %v3116_v38  ;;  %2049 = vmatpush.bf16.msra.mxu3 %v3089_v25 }
 0x852   :  { %2011 = vmatpush.bf16.msra.mxu0 %v3111_v36  ;;  %2024 = vmatpush.bf16.msra.mxu1 %v3120_v39 }
 0x853   :  { %2037 = vmatpush.bf16.msra.mxu2 %v3134_v48  ;;  %2050 = vmatpush.bf16.msra.mxu3 %v3122_v40 }
 0x8b1   :  { %v1759_v13 = vpop.f32.mrf.mxu0  ;;  %v1772_v23 = vpop.f32.mrf.mxu1 }
 0x8b2   :  { %v1802_v27 = vadd.f32 %v2491_v60, %v1759_v13  ;;  %v1803_v47 = vadd.f32 %v2492_v11, %v1772_v23 }
 0x8b4   :  { %v2495_v44 = vmul.f32 -1.442695, %v1802_v27  ;;  %v2496_v31 = vmul.f32 -1.442695, %v1803_v47 }
 0x8b6   :  { %2747 = vpow2.f32 %v2495_v44 }
 0x8b7   :  { %2749 = vpow2.f32 %v2496_v31 }
 0x8b8   :  { %v1785_v43 = vpop.f32.mrf.mxu2  ;;  %v1798_v30 = vpop.f32.mrf.mxu3 }
 0x8b9   :  { %v1805_v29 = vadd.f32 %v2494_v37, %v1798_v30  ;;  %v1761_v49 = vpop.f32.mrf.mxu0  ;;  %v1774_v50 = vpop.f32.mrf.mxu1  ;;  %v1804_v5 = vadd.f32 %v2493_v26, %v1785_v43 }
 0x8bb   :  { %v2497_v51 = vmul.f32 -1.442695, %v1805_v29 }
 0x8bc   :  { %v2748_v52 = vpop.eup %2747 }
 0x8bd   :  { %v2750_v55 = vpop.eup %2749  ;;  %v1809_v56 = vadd.f32 1.0, %v2748_v52  ;;  %2751 = vpow2.f32 %v2497_v51 }
 0x8be   :  { %v1828_v14 = vadd.f32 1.0, %v2750_v55 }
 0x8bf   :  { %2753 = vrcp.f32 %v1809_v56  ;;  %v1821_v60 = vand.u32 2147483648, %v1809_v56  ;;  %v1819_v23 = vand.u32 2147483647, %v1809_v56  ;;  %vm1815_vm2 = vweird.f32 %v1809_v56 }
 0x8c0   :  { %2755 = vrcp.f32 %v1828_v14  ;;  %v1787_v22 = vpop.f32.mrf.mxu2  ;;  %v1800_v15 = vpop.f32.mrf.mxu3  ;;  %v1840_v11 = vand.u32 2147483648, %v1828_v14  ;;  %v1838_v47 = vand.u32 2147483647, %v1828_v14  ;;  %vm1834_vm3 = vweird.f32 %v1828_v14 }
 0x8c1   :  { %v1822_v37 = vor.u32 1.1754944e-38, %v1821_v60  ;;  %vm1820_vm6 = vcmp.eq.f32.partialorder %v1819_v23, 8.507059e+37 }
 0x8c2   :  { %v1841_v29 = vor.u32 1.1754944e-38, %v1840_v11  ;;  %vm1839_vm7 = vcmp.eq.f32.partialorder %v1838_v47, 8.507059e+37 }
 0x8c3   :  { %v2752_v18 = vpop.eup %2751 }
 0x8c4   :  { %v1848_v10 = vadd.f32 1.0, %v2752_v18 }
 0x8c5   :  { %v2754_v35 = vpop.eup %2753 }
 0x8c6   :  { %v2756_v0 = vpop.eup %2755  ;;  %v1811_v4 = vmul.f32 %v2754_v35, %v1809_v56  ;;  %2757 = vrcp.f32 %v1848_v10  ;;  %vm1816_vm0 = vweird.f32 %v2754_v35  ;;  %vm1854_vm9 = vweird.f32 %v1848_v10 }
 0x8c7   :  { %v1830_v63 = vmul.f32 %v2756_v0, %v1828_v14  ;;  %2759 = vtanh.f32 %v1804_v5  ;;  %vm1835_vm1 = vweird.f32 %v2756_v0  ;;  %vm1817_vm4 = vmor %vm1815_vm2, %vm1816_vm0  ;;  %v1860_v5 = vand.u32 2147483648, %v1848_v10 }
 0x8c8   :  { %v1812_v62 = vsub.f32 1.0, %v1811_v4  ;;  %vm1836_vm5 = vmor %vm1834_vm3, %vm1835_vm1 }
 0x8c9   :  { %v1831_v61 = vsub.f32 1.0, %v1830_v63  ;;  %v1861_v63 = vor.u32 1.1754944e-38, %v1860_v5 }
 0x8ca   :  { %v1813_v13 = vmul.f32 %v2754_v35, %v1812_v62 }
 0x8cb   :  { %v1832_v27 = vmul.f32 %v2756_v0, %v1831_v61 }
 0x8cc   :  { %v2758_v44 = vpop.eup %2757  ;;  %v1814_v31 = vadd.f32 %v2754_v35, %v1813_v13 }
 0x8cd   :  { %v1833_v43 = vadd.f32 %v2756_v0, %v1832_v27  ;;  %v1850_v30 = vmul.f32 %v2758_v44, %v1848_v10  ;;  %v2760_v50 = vpop.eup %2759  ;;  %vm1855_vm8 = vweird.f32 %v2758_v44 }
 0x8ce   :  { %v1818_v49 = vsel %vm1817_vm4, %v2754_v35, %v1814_v31  ;;  %v1858_v35 = vand.u32 2147483647, %v1848_v10  ;;  %vm1856_vm10 = vmor %vm1854_vm9, %vm1855_vm8 }
 0x8cf   :  { %v1823_v51 = vsel %vm1820_vm6, %v1822_v37, %v1818_v49  ;;  %v1837_v52 = vsel %vm1836_vm5, %v2756_v0, %v1833_v43  ;;  %v1851_v55 = vsub.f32 1.0, %v1850_v30 }
 0x8d0   :  { %v1842_v22 = vsel %vm1839_vm7, %v1841_v29, %v1837_v52  ;;  %v1865_v15 = vmul.f32 %v2760_v50, %v1823_v51  ;;  %vm1859_vm11 = vcmp.eq.f32.partialorder %v1858_v35, 8.507059e+37 }
 0x8d1   :  { %v1864_v26 = vmul.f32 %v1842_v22, %v3777_v59  ;;  %v1852_v18 = vmul.f32 %v2758_v44, %v1851_v55 }
 0x8d3   :  { %v3828_v56 = vadd.f32 %v1865_v15, %v1864_v26  ;;  %v1853_v14 = vadd.f32 %v2758_v44, %v1852_v18 }
 0x8d5   :  { %2761 = vtanh.f32 %v3828_v56  ;;  %v1857_v4 = vsel %vm1856_vm10, %v2758_v44, %v1853_v14 }
 0x8d6   :  { %v1862_v62 = vsel %vm1859_vm11, %v1861_v63, %v1857_v4 }
 0x8db   :  { %v2762_v0 = vpop.eup %2761 }
 0x8dc   :  { %v1868_v61 = vmul.f32 %v2762_v0, %v1862_v62 }
 0x8de   :  { %v1869_v60 = vpack.c.bf16 %v1868_v61, %v1868_v61 }
 0x8e0   :  { %2498 = vst [vmem:[%s3930_s4 + $0x30] sm:$0xf] %v1869_v60  ;;  %1885 = vmatmul.bf16.vlgmr.msrb.gmra.mxu0 %v1869_v60  ;;  %1898 = vmatmul.bf16.vlgmr.msrb.gmra.mxu1 %v1869_v60 }
 0x8e1   :  { %1911 = vmatmul.bf16.vlgmr.msrb.gmra.mxu2 %v1869_v60  ;;  %1924 = vmatmul.bf16.vlgmr.msrb.gmra.mxu3 %v1869_v60  ;;  %v2508_v60 = vld [vmem:[%s3928_s0 + $0x1c8] sm:$0xff] }
 0x8e2   :  { %2131 = vmatpush.bf16.msrb.mxu0 %v2855_v3  ;;  %2144 = vmatpush.bf16.msrb.mxu1 %v2866_v7  ;;  %v2499_v3 = vld [vmem:[%s3928_s0 + $0x1a0] sm:$0xff]  ;;  %v2500_v7 = vld [vmem:[%s3928_s0 + $0x1a8] sm:$0xff] }
 0x8e3   :  { %2157 = vmatpush.bf16.msrb.mxu2 %v2906_v21  ;;  %2170 = vmatpush.bf16.msrb.mxu3 %v2868_v8 }
 0x8e6   :  { %2132 = vmatpush.bf16.msrb.mxu0 %v2880_v12  ;;  %2145 = vmatpush.bf16.msrb.mxu1 %v2893_v16 }
 0x8e7   :  { %2158 = vmatpush.bf16.msrb.mxu2 %v2945_v34  ;;  %2171 = vmatpush.bf16.msrb.mxu3 %v2895_v17 }
 0x8ea   :  { %2133 = vmatpush.bf16.msrb.mxu0 %v2928_v28  ;;  %2146 = vmatpush.bf16.msrb.mxu1 %v2941_v32  ;;  %v2502_v32 = vld [vmem:[%s3928_s0 + $0x1b8] sm:$0xff] }
 0x8eb   :  { %2159 = vmatpush.bf16.msrb.mxu2 %v2969_v42  ;;  %2172 = vmatpush.bf16.msrb.mxu3 %v2943_v33 }
 0x8ee   :  { %2134 = vmatpush.bf16.msrb.mxu0 %v2967_v41  ;;  %2147 = vmatpush.bf16.msrb.mxu1 %v2979_v45 }
 0x8ef   :  { %2160 = vmatpush.bf16.msrb.mxu2 %v3005_v54  ;;  %2173 = vmatpush.bf16.msrb.mxu3 %v2981_v46 }
 0x8f2   :  { %2135 = vmatpush.bf16.msrb.mxu0 %v3003_v53  ;;  %2148 = vmatpush.bf16.msrb.mxu1 %v3015_v57 }
 0x8f3   :  { %2161 = vmatpush.bf16.msrb.mxu2 %v3041_v2  ;;  %2174 = vmatpush.bf16.msrb.mxu3 %v3017_v58 }
 0x8f6   :  { %2136 = vmatpush.bf16.msrb.mxu0 %v3039_v1  ;;  %2149 = vmatpush.bf16.msrb.mxu1 %v3051_v6  ;;  %v2501_v6 = vld [vmem:[%s3928_s0 + $0x1b0] sm:$0xff] }
 0x8f7   :  { %2162 = vmatpush.bf16.msrb.mxu2 %v3077_v20  ;;  %2175 = vmatpush.bf16.msrb.mxu3 %v3053_v9 }
 0x8fa   :  { %2137 = vmatpush.bf16.msrb.mxu0 %v3075_v19  ;;  %2150 = vmatpush.bf16.msrb.mxu1 %v3087_v24 }
 0x8fb   :  { %2163 = vmatpush.bf16.msrb.mxu2 %v3116_v38  ;;  %2176 = vmatpush.bf16.msrb.mxu3 %v3089_v25 }
 0x8fe   :  { %2138 = vmatpush.bf16.msrb.mxu0 %v3111_v36  ;;  %2151 = vmatpush.bf16.msrb.mxu1 %v3120_v39 }
 0x8ff   :  { %2164 = vmatpush.bf16.msrb.mxu2 %v3134_v48  ;;  %2177 = vmatpush.bf16.msrb.mxu3 %v3122_v40 }
 0x95d   :  { %v1886_v8 = vpop.f32.mrf.mxu0  ;;  %v1899_v12 = vpop.f32.mrf.mxu1 }
 0x95e   :  { %v1929_v16 = vadd.f32 %v2499_v3, %v1886_v8  ;;  %v1930_v17 = vadd.f32 %v2500_v7, %v1899_v12 }
 0x960   :  { %v2503_v21 = vmul.f32 -1.442695, %v1929_v16  ;;  %v2504_v28 = vmul.f32 -1.442695, %v1930_v17 }
 0x962   :  { %2763 = vpow2.f32 %v2503_v21  ;;  %v2510_v21 = vld [vmem:[%s3928_s0 + $0x1d8] sm:$0xff] }
 0x963   :  { %2765 = vpow2.f32 %v2504_v28 }
 0x964   :  { %v1912_v33 = vpop.f32.mrf.mxu2  ;;  %v1925_v34 = vpop.f32.mrf.mxu3 }
 0x965   :  { %v1932_v41 = vadd.f32 %v2502_v32, %v1925_v34  ;;  %v1888_v42 = vpop.f32.mrf.mxu0  ;;  %v1901_v45 = vpop.f32.mrf.mxu1  ;;  %v1931_v24 = vadd.f32 %v2501_v6, %v1912_v33 }
 0x967   :  { %v2505_v46 = vmul.f32 -1.442695, %v1932_v41 }
 0x968   :  { %v2764_v53 = vpop.eup %2763 }
 0x969   :  { %v2766_v54 = vpop.eup %2765  ;;  %v1936_v57 = vadd.f32 1.0, %v2764_v53  ;;  %2767 = vpow2.f32 %v2505_v46 }
 0x96a   :  { %v1955_v58 = vadd.f32 1.0, %v2766_v54 }
 0x96b   :  { %2769 = vrcp.f32 %v1936_v57  ;;  %v1948_v48 = vand.u32 2147483648, %v1936_v57  ;;  %v1946_v11 = vand.u32 2147483647, %v1936_v57  ;;  %vm1942_vm14 = vweird.f32 %v1936_v57 }
 0x96c   :  { %2771 = vrcp.f32 %v1955_v58  ;;  %v1914_v1 = vpop.f32.mrf.mxu2  ;;  %v1927_v2 = vpop.f32.mrf.mxu3  ;;  %v1967_v59 = vand.u32 2147483648, %v1955_v58  ;;  %v1965_v23 = vand.u32 2147483647, %v1955_v58  ;;  %vm1961_vm15 = vweird.f32 %v1955_v58 }
 0x96d   :  { %v1949_v44 = vor.u32 1.1754944e-38, %v1948_v48  ;;  %vm1947_vm2 = vcmp.eq.f32.partialorder %v1946_v11, 8.507059e+37  ;;  %v2509_v1 = vld [vmem:[%s3928_s0 + $0x1d0] sm:$0xff] }
 0x96e   :  { %v1968_v43 = vor.u32 1.1754944e-38, %v1967_v59  ;;  %vm1966_vm3 = vcmp.eq.f32.partialorder %v1965_v23, 8.507059e+37 }
 0x96f   :  { %v2768_v9 = vpop.eup %2767 }
 0x970   :  { %v1975_v19 = vadd.f32 1.0, %v2768_v9 }
 0x971   :  { %v2770_v20 = vpop.eup %2769 }
 0x972   :  { %v2772_v25 = vpop.eup %2771  ;;  %v1938_v36 = vmul.f32 %v2770_v20, %v1936_v57  ;;  %2773 = vrcp.f32 %v1975_v19  ;;  %vm1943_vm12 = vweird.f32 %v2770_v20  ;;  %v1987_v14 = vand.u32 2147483648, %v1975_v19 }
 0x973   :  { %v1957_v38 = vmul.f32 %v2772_v25, %v1955_v58  ;;  %2775 = vtanh.f32 %v1931_v24  ;;  %vm1962_vm13 = vweird.f32 %v2772_v25  ;;  %vm1944_vm0 = vmor %vm1942_vm14, %vm1943_vm12  ;;  %vm1981_vm5 = vweird.f32 %v1975_v19 }
 0x974   :  { %v1939_v39 = vsub.f32 1.0, %v1938_v36  ;;  %vm1963_vm1 = vmor %vm1961_vm15, %vm1962_vm13  ;;  %v1985_v5 = vand.u32 2147483647, %v1975_v19  ;;  %v1988_v4 = vor.u32 1.1754944e-38, %v1987_v14 }
 0x975   :  { %v1958_v40 = vsub.f32 1.0, %v1957_v38 }
 0x976   :  { %v1940_v10 = vmul.f32 %v2770_v20, %v1939_v39  ;;  %vm1986_vm7 = vcmp.eq.f32.partialorder %v1985_v5, 8.507059e+37 }
 0x977   :  { %v1959_v13 = vmul.f32 %v2772_v25, %v1958_v40 }
 0x978   :  { %v2774_v27 = vpop.eup %2773  ;;  %v1941_v47 = vadd.f32 %v2770_v20, %v1940_v10 }
 0x979   :  { %v1960_v31 = vadd.f32 %v2772_v25, %v1959_v13  ;;  %v1977_v37 = vmul.f32 %v2774_v27, %v1975_v19  ;;  %v2776_v29 = vpop.eup %2775  ;;  %vm1982_vm4 = vweird.f32 %v2774_v27 }
 0x97a   :  { %v1945_v30 = vsel %vm1944_vm0, %v2770_v20, %v1941_v47  ;;  %vm1983_vm6 = vmor %vm1981_vm5, %vm1982_vm4 }
 0x97b   :  { %v1950_v49 = vsel %vm1947_vm2, %v1949_v44, %v1945_v30  ;;  %v1964_v50 = vsel %vm1963_vm1, %v2772_v25, %v1960_v31  ;;  %v1978_v51 = vsub.f32 1.0, %v1977_v37 }
 0x97c   :  { %v1969_v52 = vsel %vm1966_vm3, %v1968_v43, %v1964_v50  ;;  %v1992_v55 = vmul.f32 %v2776_v29, %v1950_v49 }
 0x97d   :  { %v1991_v22 = vmul.f32 %v1969_v52, %v3828_v56  ;;  %v1979_v15 = vmul.f32 %v2774_v27, %v1978_v51  ;;  %v2507_v56 = vld [vmem:[%s3928_s0 + $0x1c0] sm:$0xff] }
 0x97f   :  { %v3879_v26 = vadd.f32 %v1992_v55, %v1991_v22  ;;  %v1980_v18 = vadd.f32 %v2774_v27, %v1979_v15 }
 0x981   :  { %2777 = vtanh.f32 %v3879_v26  ;;  %v1984_v35 = vsel %vm1983_vm6, %v2774_v27, %v1980_v18 }
 0x982   :  { %v1989_v0 = vsel %vm1986_vm7, %v1988_v4, %v1984_v35 }
 0x987   :  { %v2778_v63 = vpop.eup %2777 }
 0x988   :  { %v1995_v62 = vmul.f32 %v2778_v63, %v1989_v0 }
 0x98a   :  { %v1996_v61 = vpack.c.bf16 %v1995_v62, %v1995_v62 }
 0x98c   :  { %2506 = vst [vmem:[%s3930_s4 + $0x34] sm:$0xf] %v1996_v61  ;;  %2012 = vmatmul.bf16.vlgmr.msra.gmra.mxu0 %v1996_v61  ;;  %2025 = vmatmul.bf16.vlgmr.msra.gmra.mxu1 %v1996_v61 }
 0x98d   :  { %2038 = vmatmul.bf16.vlgmr.msra.gmra.mxu2 %v1996_v61  ;;  %2051 = vmatmul.bf16.vlgmr.msra.gmra.mxu3 %v1996_v61  ;;  %v2516_v61 = vld [vmem:[%s3928_s0 + $0x1e8] sm:$0xff] }
 0xa09   :  { %v2013_v3 = vpop.f32.mrf.mxu0  ;;  %v2026_v7 = vpop.f32.mrf.mxu1 }
 0xa0a   :  { %v2056_v8 = vadd.f32 %v2507_v56, %v2013_v3  ;;  %v2057_v12 = vadd.f32 %v2508_v60, %v2026_v7 }
 0xa0c   :  { %v2511_v16 = vmul.f32 -1.442695, %v2056_v8  ;;  %v2512_v17 = vmul.f32 -1.442695, %v2057_v12 }
 0xa0e   :  { %2779 = vpow2.f32 %v2511_v16  ;;  %v2518_v16 = vld [vmem:[%s3928_s0 + $0x1f8] sm:$0xff] }
 0xa0f   :  { %2781 = vpow2.f32 %v2512_v17 }
 0xa10   :  { %v2039_v28 = vpop.f32.mrf.mxu2  ;;  %v2052_v32 = vpop.f32.mrf.mxu3 }
 0xa11   :  { %v2059_v33 = vadd.f32 %v2510_v21, %v2052_v32  ;;  %v2015_v34 = vpop.f32.mrf.mxu0  ;;  %v2028_v41 = vpop.f32.mrf.mxu1  ;;  %v2058_v19 = vadd.f32 %v2509_v1, %v2039_v28 }
 0xa13   :  { %v2513_v42 = vmul.f32 -1.442695, %v2059_v33 }
 0xa14   :  { %v2780_v45 = vpop.eup %2779 }
 0xa15   :  { %v2782_v46 = vpop.eup %2781  ;;  %v2063_v53 = vadd.f32 1.0, %v2780_v45  ;;  %2783 = vpow2.f32 %v2513_v42 }
 0xa16   :  { %v2082_v54 = vadd.f32 1.0, %v2782_v46 }
 0xa17   :  { %2785 = vrcp.f32 %v2063_v53  ;;  %v2075_v39 = vand.u32 2147483648, %v2063_v53  ;;  %v2073_v59 = vand.u32 2147483647, %v2063_v53  ;;  %vm2069_vm10 = vweird.f32 %v2063_v53 }
 0xa18   :  { %2787 = vrcp.f32 %v2082_v54  ;;  %v2041_v57 = vpop.f32.mrf.mxu2  ;;  %v2054_v58 = vpop.f32.mrf.mxu3  ;;  %v2094_v40 = vand.u32 2147483648, %v2082_v54  ;;  %v2092_v11 = vand.u32 2147483647, %v2082_v54  ;;  %vm2088_vm11 = vweird.f32 %v2082_v54 }
 0xa19   :  { %v2076_v27 = vor.u32 1.1754944e-38, %v2075_v39  ;;  %vm2074_vm14 = vcmp.eq.f32.partialorder %v2073_v59, 8.507059e+37  ;;  %v2517_v57 = vld [vmem:[%s3928_s0 + $0x1f0] sm:$0xff] }
 0xa1a   :  { %v2095_v31 = vor.u32 1.1754944e-38, %v2094_v40  ;;  %vm2093_vm15 = vcmp.eq.f32.partialorder %v2092_v11, 8.507059e+37 }
 0xa1b   :  { %v2784_v2 = vpop.eup %2783 }
 0xa1c   :  { %v2102_v6 = vadd.f32 1.0, %v2784_v2 }
 0xa1d   :  { %v2786_v9 = vpop.eup %2785 }
 0xa1e   :  { %v2788_v20 = vpop.eup %2787  ;;  %v2065_v24 = vmul.f32 %v2786_v9, %v2063_v53  ;;  %2789 = vrcp.f32 %v2102_v6  ;;  %vm2070_vm8 = vweird.f32 %v2786_v9  ;;  %v2114_v18 = vand.u32 2147483648, %v2102_v6 }
 0xa1f   :  { %v2084_v25 = vmul.f32 %v2788_v20, %v2082_v54  ;;  %2791 = vtanh.f32 %v2058_v19  ;;  %vm2089_vm9 = vweird.f32 %v2788_v20  ;;  %vm2071_vm12 = vmor %vm2069_vm10, %vm2070_vm8  ;;  %vm2108_vm1 = vweird.f32 %v2102_v6 }
 0xa20   :  { %v2066_v36 = vsub.f32 1.0, %v2065_v24  ;;  %vm2090_vm13 = vmor %vm2088_vm11, %vm2089_vm9  ;;  %v2112_v14 = vand.u32 2147483647, %v2102_v6  ;;  %v2115_v35 = vor.u32 1.1754944e-38, %v2114_v18 }
 0xa21   :  { %v2085_v38 = vsub.f32 1.0, %v2084_v25 }
 0xa22   :  { %v2067_v48 = vmul.f32 %v2786_v9, %v2066_v36  ;;  %vm2113_vm3 = vcmp.eq.f32.partialorder %v2112_v14, 8.507059e+37 }
 0xa23   :  { %v2086_v10 = vmul.f32 %v2788_v20, %v2085_v38 }
 0xa24   :  { %v2790_v13 = vpop.eup %2789  ;;  %v2068_v23 = vadd.f32 %v2786_v9, %v2067_v48 }
 0xa25   :  { %v2087_v47 = vadd.f32 %v2788_v20, %v2086_v10  ;;  %v2104_v44 = vmul.f32 %v2790_v13, %v2102_v6  ;;  %v2792_v43 = vpop.eup %2791  ;;  %vm2109_vm0 = vweird.f32 %v2790_v13 }
 0xa26   :  { %v2072_v37 = vsel %vm2071_vm12, %v2786_v9, %v2068_v23  ;;  %vm2110_vm2 = vmor %vm2108_vm1, %vm2109_vm0 }
 0xa27   :  { %v2077_v30 = vsel %vm2074_vm14, %v2076_v27, %v2072_v37  ;;  %v2091_v29 = vsel %vm2090_vm13, %v2788_v20, %v2087_v47  ;;  %v2105_v49 = vsub.f32 1.0, %v2104_v44 }
 0xa28   :  { %v2096_v50 = vsel %vm2093_vm15, %v2095_v31, %v2091_v29  ;;  %v2119_v51 = vmul.f32 %v2792_v43, %v2077_v30 }
 0xa29   :  { %v2118_v52 = vmul.f32 %v2096_v50, %v3879_v26  ;;  %v2106_v55 = vmul.f32 %v2790_v13, %v2105_v49  ;;  %v2515_v26 = vld [vmem:[%s3928_s0 + $0x1e0] sm:$0xff] }
 0xa2b   :  { %v3898_v22 = vadd.f32 %v2119_v51, %v2118_v52  ;;  %v2107_v15 = vadd.f32 %v2790_v13, %v2106_v55 }
 0xa2d   :  { %2793 = vtanh.f32 %v3898_v22  ;;  %v2111_v5 = vsel %vm2110_vm2, %v2790_v13, %v2107_v15 }
 0xa2e   :  { %v2116_v63 = vsel %vm2113_vm3, %v2115_v35, %v2111_v5 }
 0xa33   :  { %v2794_v4 = vpop.eup %2793 }
 0xa34   :  { %v2122_v0 = vmul.f32 %v2794_v4, %v2116_v63 }
 0xa36   :  { %v2123_v62 = vpack.c.bf16 %v2122_v0, %v2122_v0 }
 0xa38   :  { %2514 = vst [vmem:[%s3930_s4 + $0x38] sm:$0xf] %v2123_v62  ;;  %2139 = vmatmul.bf16.vlgmr.msrb.gmra.mxu0 %v2123_v62  ;;  %2152 = vmatmul.bf16.vlgmr.msrb.gmra.mxu1 %v2123_v62 }
 0xa39   :  { %2165 = vmatmul.bf16.vlgmr.msrb.gmra.mxu2 %v2123_v62  ;;  %2178 = vmatmul.bf16.vlgmr.msrb.gmra.mxu3 %v2123_v62 }
 0xab5   :  { %v2140_v56 = vpop.f32.mrf.mxu0  ;;  %v2153_v60 = vpop.f32.mrf.mxu1 }
 0xab6   :  { %v2183_v3 = vadd.f32 %v2515_v26, %v2140_v56  ;;  %v2184_v7 = vadd.f32 %v2516_v61, %v2153_v60 }
 0xab8   :  { %v2519_v8 = vmul.f32 -1.442695, %v2183_v3  ;;  %v2520_v12 = vmul.f32 -1.442695, %v2184_v7 }
 0xaba   :  { %2795 = vpow2.f32 %v2519_v8 }
 0xabb   :  { %2797 = vpow2.f32 %v2520_v12 }
 0xabc   :  { %v2166_v17 = vpop.f32.mrf.mxu2  ;;  %v2179_v21 = vpop.f32.mrf.mxu3 }
 0xabd   :  { %v2186_v28 = vadd.f32 %v2518_v16, %v2179_v21  ;;  %v2142_v32 = vpop.f32.mrf.mxu0  ;;  %v2155_v33 = vpop.f32.mrf.mxu1  ;;  %v2185_v6 = vadd.f32 %v2517_v57, %v2166_v17 }
 0xabf   :  { %v2521_v34 = vmul.f32 -1.442695, %v2186_v28 }
 0xac0   :  { %v2796_v41 = vpop.eup %2795 }
 0xac1   :  { %v2798_v42 = vpop.eup %2797  ;;  %v2190_v45 = vadd.f32 1.0, %v2796_v41  ;;  %2799 = vpow2.f32 %v2521_v34 }
 0xac2   :  { %v2209_v46 = vadd.f32 1.0, %v2798_v42 }
 0xac3   :  { %2801 = vrcp.f32 %v2190_v45  ;;  %v2202_v36 = vand.u32 2147483648, %v2190_v45  ;;  %v2200_v40 = vand.u32 2147483647, %v2190_v45  ;;  %vm2196_vm6 = vweird.f32 %v2190_v45 }
 0xac4   :  { %2803 = vrcp.f32 %v2209_v46  ;;  %v2168_v53 = vpop.f32.mrf.mxu2  ;;  %v2181_v54 = vpop.f32.mrf.mxu3  ;;  %v2221_v38 = vand.u32 2147483648, %v2209_v46  ;;  %v2219_v59 = vand.u32 2147483647, %v2209_v46  ;;  %vm2215_vm7 = vweird.f32 %v2209_v46 }
 0xac5   :  { %v2203_v13 = vor.u32 1.1754944e-38, %v2202_v36  ;;  %vm2201_vm10 = vcmp.eq.f32.partialorder %v2200_v40, 8.507059e+37 }
 0xac6   :  { %v2222_v47 = vor.u32 1.1754944e-38, %v2221_v38  ;;  %vm2220_vm11 = vcmp.eq.f32.partialorder %v2219_v59, 8.507059e+37 }
 0xac7   :  { %v2800_v58 = vpop.eup %2799 }
 0xac8   :  { %v2229_v1 = vadd.f32 1.0, %v2800_v58 }
 0xac9   :  { %v2802_v2 = vpop.eup %2801 }
 0xaca   :  { %v2804_v9 = vpop.eup %2803  ;;  %v2192_v19 = vmul.f32 %v2802_v2, %v2190_v45  ;;  %2805 = vrcp.f32 %v2229_v1  ;;  %vm2197_vm4 = vweird.f32 %v2802_v2  ;;  %v2241_v15 = vand.u32 2147483648, %v2229_v1 }
 0xacb   :  { %v2211_v20 = vmul.f32 %v2804_v9, %v2209_v46  ;;  %2807 = vtanh.f32 %v2185_v6  ;;  %vm2216_vm5 = vweird.f32 %v2804_v9  ;;  %vm2198_vm8 = vmor %vm2196_vm6, %vm2197_vm4  ;;  %vm2235_vm13 = vweird.f32 %v2229_v1 }
 0xacc   :  { %v2193_v24 = vsub.f32 1.0, %v2192_v19  ;;  %vm2217_vm9 = vmor %vm2215_vm7, %vm2216_vm5  ;;  %v2239_v18 = vand.u32 2147483647, %v2229_v1  ;;  %v2242_v5 = vor.u32 1.1754944e-38, %v2241_v15 }
 0xacd   :  { %v2212_v25 = vsub.f32 1.0, %v2211_v20 }
 0xace   :  { %v2194_v39 = vmul.f32 %v2802_v2, %v2193_v24  ;;  %vm2240_vm15 = vcmp.eq.f32.partialorder %v2239_v18, 8.507059e+37 }
 0xacf   :  { %v2213_v48 = vmul.f32 %v2804_v9, %v2212_v25 }
 0xad0   :  { %v2806_v10 = vpop.eup %2805  ;;  %v2195_v11 = vadd.f32 %v2802_v2, %v2194_v39 }
 0xad1   :  { %v2214_v23 = vadd.f32 %v2804_v9, %v2213_v48  ;;  %v2231_v27 = vmul.f32 %v2806_v10, %v2229_v1  ;;  %v2808_v31 = vpop.eup %2807  ;;  %vm2236_vm12 = vweird.f32 %v2806_v10 }
 0xad2   :  { %v2199_v44 = vsel %vm2198_vm8, %v2802_v2, %v2195_v11  ;;  %vm2237_vm14 = vmor %vm2235_vm13, %vm2236_vm12 }
 0xad3   :  { %v2204_v37 = vsel %vm2201_vm10, %v2203_v13, %v2199_v44  ;;  %v2218_v43 = vsel %vm2217_vm9, %v2804_v9, %v2214_v23  ;;  %v2232_v30 = vsub.f32 1.0, %v2231_v27 }
 0xad4   :  { %v2223_v29 = vsel %vm2220_vm11, %v2222_v47, %v2218_v43  ;;  %v2246_v49 = vmul.f32 %v2808_v31, %v2204_v37 }
 0xad5   :  { %v2245_v50 = vmul.f32 %v2223_v29, %v3898_v22  ;;  %v2233_v51 = vmul.f32 %v2806_v10, %v2232_v30 }
 0xad7   :  { %v2247_v52 = vadd.f32 %v2246_v49, %v2245_v50  ;;  %v2234_v55 = vadd.f32 %v2806_v10, %v2233_v51 }
 0xad9   :  { %2809 = vtanh.f32 %v2247_v52  ;;  %2259 = vst [vmem:[%s3931_s6] sm:$0xff] %v2247_v52  ;;  %v2238_v14 = vsel %vm2237_vm14, %v2806_v10, %v2234_v55 }
 0xada   :  { %v2243_v4 = vsel %vm2240_vm15, %v2242_v5, %v2238_v14 }
 0xadf   :  { %v2810_v35 = vpop.eup %2809 }
 0xae0   :  { %v2249_v63 = vmul.f32 %v2810_v35, %v2243_v4 }
 0xae2   :  { %v2250_v22 = vpack.c.bf16 %v2249_v63, %v2249_v63  ;;  %2258 = vst [vmem:[%s3932_s5] sm:$0xff] %v2249_v63 }
 0xae4   :  { %2522 = vst [vmem:[%s3930_s4 + $0x3c] sm:$0xf] %v2250_v22 }

// kernel: rnn_model_forward.8
= control target key start
LH: loop header
LB: loop body
LE: loop exit
PB: predicated region body
PF: predicated region fallthrough
CT: control target
= control target key end

     0   :  { %12 = vsyncpa [#allocation5], 0  ;;  %s2857_s24 = smov [#allocation4]   ;;  %s2858_s26 = smov 256   ;;  %s3786_s0 = inlined_call_operand.vmem [shape: f32[16,8,512], index: 0, kind: input, shape index: {}]   ;;  %s3787_s1 = inlined_call_operand.hbm [shape: bf16[128,512], index: 1, kind: input, shape index: {}]   ;;  %s3788_s2 = inlined_call_operand.vmem [shape: f32[8,128], index: 2, kind: input, shape index: {}, may-alias: {2,3}]   ;;  %s3789_s3 = inlined_call_operand.vmem [shape: f32[8,128], index: 3, kind: input, shape index: {}, may-alias: {2,3}]   ;;  %s3790_s4 = inlined_call_operand.vmem [shape: bf16[16,8,128], index: 4, kind: output, shape index: {0}]   ;;  %s3791_s5 = inlined_call_operand.vmem [shape: f32[8,128], index: 5, kind: output, shape index: {1}]   ;;  %s3792_s6 = inlined_call_operand.vmem [shape: f32[8,128], index: 6, kind: output, shape index: {2}]  }
   0x1   :  { %s19_s23 = sshll.u32 %s3787_s1, 4  ;;  %s21_s25 = sshll.u32 %s2857_s24, 4  ;;  %s20_s23 = int_to_ptr.hbm [resolvable:$true] %s19_s23  ;;  %s22_s25 = int_to_ptr.vmem [resolvable:$true] %s21_s25 }
   0x2   :  { %s2859_s27 = smov 16  }
   0x3   :  { %27 = dma.hbm_to_vmem [thread:$0]  %s20_s23, 4096, %s22_s25, [#allocation5], %s2858_s26, %s2858_s26, %s2859_s27  }
   0x4   :  { %2855 = dma.done.wait [#allocation5], 4096  }
   0x5   :  { %2856 = vsyncadd [#allocation5], 4294963200  ;;  %v2403_v0 = vld [vmem:[#allocation4 + $0xe0] sm:$0xf]  ;;  %v2570_v1 = vld [vmem:[#allocation4 + $0xec] sm:$0xf0] }
   0x6   :  { %v2568_v2 = vld [vmem:[#allocation4 + $0xe4] sm:$0xf]  ;;  %v2898_v3 = vor.u32 %v2570_v1, %v2403_v0  ;;  %v2405_v4 = vld [vmem:[#allocation4 + $0xf0] sm:$0xf0]  ;;  %v2569_v5 = vld [vmem:[#allocation4 + $0xec] sm:$0xf] }
   0x7   :  { %v2413_v6 = vld [vmem:[#allocation4 + $0xf8] sm:$0xf0]  ;;  %v2900_v7 = vor.u32 %v2568_v2, %v2405_v4  ;;  %v2387_v9 = vld [vmem:[#allocation4 + $0xc0] sm:$0xf]  ;;  %v2566_v10 = vld [vmem:[#allocation4 + $0xcc] sm:$0xf0] }
   0x8   :  { %v2902_v8 = vor.u32 %v2569_v5, %v2413_v6  ;;  %v2564_v11 = vld [vmem:[#allocation4 + $0xc4] sm:$0xf]  ;;  %243 = vmatpush.bf16.msra.mxu0 %v2898_v3  ;;  %v2905_v12 = vor.u32 %v2566_v10, %v2387_v9  ;;  %v2389_v13 = vld [vmem:[#allocation4 + $0xd0] sm:$0xf0]  ;;  %v2565_v14 = vld [vmem:[#allocation4 + $0xcc] sm:$0xf] }
   0x9   :  { %v2397_v15 = vld [vmem:[#allocation4 + $0xd8] sm:$0xf0]  ;;  %256 = vmatpush.bf16.msra.mxu1 %v2900_v7  ;;  %v2909_v16 = vor.u32 %v2564_v11, %v2389_v13  ;;  %v2411_v18 = vld [vmem:[#allocation4 + $0xe8] sm:$0xf]  ;;  %v2571_v19 = vld [vmem:[#allocation4 + $0xf4] sm:$0xf0] }
   0xa   :  { %282 = vmatpush.bf16.msra.mxu3 %v2902_v8  ;;  %v2911_v17 = vor.u32 %v2565_v14, %v2397_v15  ;;  %v2371_v20 = vld [vmem:[#allocation4 + $0xa0] sm:$0xf]  ;;  %v2913_v21 = vor.u32 %v2571_v19, %v2411_v18  ;;  %v2562_v22 = vld [vmem:[#allocation4 + $0xac] sm:$0xf0]  ;;  %v2560_v23 = vld [vmem:[#allocation4 + $0xa4] sm:$0xf] }
   0xb   :  { %v2373_v24 = vld [vmem:[#allocation4 + $0xb0] sm:$0xf0]  ;;  %v2561_v25 = vld [vmem:[#allocation4 + $0xac] sm:$0xf]  ;;  %v2381_v26 = vld [vmem:[#allocation4 + $0xb8] sm:$0xf0]  ;;  %v2917_v28 = vor.u32 %v2562_v22, %v2371_v20 }
   0xc   :  { %v2395_v27 = vld [vmem:[#allocation4 + $0xc8] sm:$0xf]  ;;  %244 = vmatpush.bf16.msra.mxu0 %v2905_v12  ;;  %269 = vmatpush.bf16.msra.mxu2 %v2913_v21  ;;  %v2567_v29 = vld [vmem:[#allocation4 + $0xd4] sm:$0xf0]  ;;  %v2355_v30 = vld [vmem:[#allocation4 + $0x80] sm:$0xf]  ;;  %v2921_v32 = vor.u32 %v2560_v23, %v2373_v24  ;;  %v2923_v33 = vor.u32 %v2561_v25, %v2381_v26 }
   0xd   :  { %v2558_v31 = vld [vmem:[#allocation4 + $0x8c] sm:$0xf0]  ;;  %257 = vmatpush.bf16.msra.mxu1 %v2909_v16  ;;  %v2925_v34 = vor.u32 %v2567_v29, %v2395_v27  ;;  %v2556_v35 = vld [vmem:[#allocation4 + $0x84] sm:$0xf]  ;;  %v2357_v36 = vld [vmem:[#allocation4 + $0x90] sm:$0xf0] }
   0xe   :  { %283 = vmatpush.bf16.msra.mxu3 %v2911_v17  ;;  %v2557_v37 = vld [vmem:[#allocation4 + $0x8c] sm:$0xf]  ;;  %v2365_v38 = vld [vmem:[#allocation4 + $0x98] sm:$0xf0]  ;;  %v2379_v39 = vld [vmem:[#allocation4 + $0xa8] sm:$0xf]  ;;  %v2929_v41 = vor.u32 %v2558_v31, %v2355_v30  ;;  %v2935_v45 = vor.u32 %v2556_v35, %v2357_v36 }
   0xf   :  { %v2563_v40 = vld [vmem:[#allocation4 + $0xb4] sm:$0xf0]  ;;  %v2339_v43 = vld [vmem:[#allocation4 + $0x60] sm:$0xf]  ;;  %v2554_v44 = vld [vmem:[#allocation4 + $0x6c] sm:$0xf0]  ;;  %v2937_v46 = vor.u32 %v2557_v37, %v2365_v38 }
  0x10   :  { %245 = vmatpush.bf16.msra.mxu0 %v2917_v28  ;;  %270 = vmatpush.bf16.msra.mxu2 %v2925_v34  ;;  %v2931_v42 = vor.u32 %v2563_v40, %v2379_v39  ;;  %v2552_v47 = vld [vmem:[#allocation4 + $0x64] sm:$0xf]  ;;  %v2363_v48 = vld [vmem:[#allocation4 + $0x88] sm:$0xf]  ;;  %v2559_v49 = vld [vmem:[#allocation4 + $0x94] sm:$0xf0]  ;;  %v2941_v53 = vor.u32 %v2554_v44, %v2339_v43 }
  0x11   :  { %258 = vmatpush.bf16.msra.mxu1 %v2921_v32  ;;  %v2341_v50 = vld [vmem:[#allocation4 + $0x70] sm:$0xf0]  ;;  %v2553_v51 = vld [vmem:[#allocation4 + $0x6c] sm:$0xf]  ;;  %v2349_v52 = vld [vmem:[#allocation4 + $0x78] sm:$0xf0]  ;;  %v2943_v54 = vor.u32 %v2559_v49, %v2363_v48 }
  0x12   :  { %284 = vmatpush.bf16.msra.mxu3 %v2923_v33  ;;  %v2323_v55 = vld [vmem:[#allocation4 + $0x40] sm:$0xf]  ;;  %v2550_v56 = vld [vmem:[#allocation4 + $0x4c] sm:$0xf0]  ;;  %v2947_v57 = vor.u32 %v2552_v47, %v2341_v50  ;;  %v2949_v58 = vor.u32 %v2553_v51, %v2349_v52  ;;  %v2548_v59 = vld [vmem:[#allocation4 + $0x44] sm:$0xf] }
  0x13   :  { %v2347_v60 = vld [vmem:[#allocation4 + $0x68] sm:$0xf]  ;;  %v2555_v61 = vld [vmem:[#allocation4 + $0x74] sm:$0xf0]  ;;  %v2325_v62 = vld [vmem:[#allocation4 + $0x50] sm:$0xf0]  ;;  %v2953_v1 = vor.u32 %v2550_v56, %v2323_v55 }
  0x14   :  { %246 = vmatpush.bf16.msra.mxu0 %v2929_v41  ;;  %271 = vmatpush.bf16.msra.mxu2 %v2931_v42  ;;  %v2549_v63 = vld [vmem:[#allocation4 + $0x4c] sm:$0xf]  ;;  %v2333_v0 = vld [vmem:[#allocation4 + $0x58] sm:$0xf0]  ;;  %v2955_v2 = vor.u32 %v2555_v61, %v2347_v60  ;;  %v2307_v4 = vld [vmem:[#allocation4 + $0x20] sm:$0xf]  ;;  %v2959_v6 = vor.u32 %v2548_v59, %v2325_v62 }
  0x15   :  { %259 = vmatpush.bf16.msra.mxu1 %v2935_v45  ;;  %v2546_v5 = vld [vmem:[#allocation4 + $0x2c] sm:$0xf0]  ;;  %v2961_v9 = vor.u32 %v2549_v63, %v2333_v0  ;;  %v2544_v10 = vld [vmem:[#allocation4 + $0x24] sm:$0xf]  ;;  %v2331_v11 = vld [vmem:[#allocation4 + $0x48] sm:$0xf] }
  0x16   :  { %285 = vmatpush.bf16.msra.mxu3 %v2937_v46  ;;  %v2551_v13 = vld [vmem:[#allocation4 + $0x54] sm:$0xf0]  ;;  %v2309_v14 = vld [vmem:[#allocation4 + $0x30] sm:$0xf0]  ;;  %v2545_v15 = vld [vmem:[#allocation4 + $0x2c] sm:$0xf]  ;;  %v2965_v19 = vor.u32 %v2546_v5, %v2307_v4 }
  0x17   :  { %v2317_v18 = vld [vmem:[#allocation4 + $0x38] sm:$0xf0]  ;;  %v2967_v20 = vor.u32 %v2551_v13, %v2331_v11  ;;  %v2291_v22 = vld [vmem:[#allocation4] sm:$0xf]  ;;  %v2542_v23 = vld [vmem:[#allocation4 + $0xc] sm:$0xf0]  ;;  %v2971_v24 = vor.u32 %v2544_v10, %v2309_v14 }
  0x18   :  { %247 = vmatpush.bf16.msra.mxu0 %v2941_v53  ;;  %272 = vmatpush.bf16.msra.mxu2 %v2943_v54  ;;  %v2973_v25 = vor.u32 %v2545_v15, %v2317_v18  ;;  %v2540_v26 = vld [vmem:[#allocation4 + $0x4] sm:$0xf]  ;;  %v2315_v27 = vld [vmem:[#allocation4 + $0x28] sm:$0xf]  ;;  %v2547_v29 = vld [vmem:[#allocation4 + $0x34] sm:$0xf0]  ;;  %v2977_v36 = vor.u32 %v2542_v23, %v2291_v22 }
  0x19   :  { %260 = vmatpush.bf16.msra.mxu1 %v2947_v57  ;;  %v2293_v30 = vld [vmem:[#allocation4 + $0x10] sm:$0xf0]  ;;  %v2541_v31 = vld [vmem:[#allocation4 + $0xc] sm:$0xf]  ;;  %v2301_v35 = vld [vmem:[#allocation4 + $0x18] sm:$0xf0]  ;;  %v2982_v38 = vor.u32 %v2547_v29, %v2315_v27 }
  0x1a   :  { %286 = vmatpush.bf16.msra.mxu3 %v2949_v58  ;;  %v40_v37 = vld [vmem:[%s3788_s2] sm:$0xff]  ;;  %v2986_v39 = vor.u32 %v2540_v26, %v2293_v30  ;;  %v2988_v40 = vor.u32 %v2541_v31, %v2301_v35  ;;  %v2299_v43 = vld [vmem:[#allocation4 + $0x8] sm:$0xf]  ;;  %v2543_v44 = vld [vmem:[#allocation4 + $0x14] sm:$0xf0] }
  0x1b   :  { %v82_v47 = vpack.c.bf16 %v40_v37, %v40_v37  ;;  %v2994_v48 = vor.u32 %v2543_v44, %v2299_v43  ;;  %v78_v49 = vld [vmem:[%s3786_s0] sm:$0xff]  ;;  %v79_v50 = vld [vmem:[%s3786_s0 + $0x8] sm:$0xff]  ;;  %v81_v61 = vld [vmem:[%s3786_s0 + $0x18] sm:$0xff] }
  0x1c   :  { %248 = vmatpush.bf16.msra.mxu0 %v2953_v1  ;;  %273 = vmatpush.bf16.msra.mxu2 %v2955_v2  ;;  %v80_v18 = vld [vmem:[%s3786_s0 + $0x10] sm:$0xff] }
  0x1d   :  { %261 = vmatpush.bf16.msra.mxu1 %v2959_v6 }
  0x1e   :  { %287 = vmatpush.bf16.msra.mxu3 %v2961_v9 }
  0x20   :  { %249 = vmatpush.bf16.msra.mxu0 %v2965_v19  ;;  %274 = vmatpush.bf16.msra.mxu2 %v2967_v20 }
  0x21   :  { %262 = vmatpush.bf16.msra.mxu1 %v2971_v24 }
  0x22   :  { %288 = vmatpush.bf16.msra.mxu3 %v2973_v25 }
  0x24   :  { %250 = vmatpush.bf16.msra.mxu0 %v2977_v36  ;;  %275 = vmatpush.bf16.msra.mxu2 %v2982_v38 }
  0x25   :  { %263 = vmatpush.bf16.msra.mxu1 %v2986_v39 }
  0x26   :  { %289 = vmatpush.bf16.msra.mxu3 %v2988_v40 }
  0x27   :  { %251 = vmatmul.bf16.vlgmr.msra.gmra.mxu0 %v82_v47 }
  0x28   :  { %369 = vmatpush.bf16.msrb.mxu0 %v2898_v3  ;;  %264 = vmatmul.bf16.vlgmr.msra.gmra.mxu1 %v82_v47 }
  0x29   :  { %382 = vmatpush.bf16.msrb.mxu1 %v2900_v7  ;;  %290 = vmatmul.bf16.vlgmr.msra.gmra.mxu3 %v82_v47 }
  0x2a   :  { %408 = vmatpush.bf16.msrb.mxu3 %v2902_v8  ;;  %276 = vmatpush.bf16.msra.mxu2 %v2994_v48 }
  0x2c   :  { %370 = vmatpush.bf16.msrb.mxu0 %v2905_v12 }
  0x2d   :  { %383 = vmatpush.bf16.msrb.mxu1 %v2909_v16  ;;  %277 = vmatmul.bf16.vlgmr.msra.gmra.mxu2 %v82_v47 }
  0x2e   :  { %395 = vmatpush.bf16.msrb.mxu2 %v2913_v21  ;;  %409 = vmatpush.bf16.msrb.mxu3 %v2911_v17 }
  0x30   :  { %371 = vmatpush.bf16.msrb.mxu0 %v2917_v28 }
  0x31   :  { %384 = vmatpush.bf16.msrb.mxu1 %v2921_v32 }
  0x32   :  { %396 = vmatpush.bf16.msrb.mxu2 %v2925_v34  ;;  %410 = vmatpush.bf16.msrb.mxu3 %v2923_v33 }
  0x34   :  { %372 = vmatpush.bf16.msrb.mxu0 %v2929_v41 }
  0x35   :  { %385 = vmatpush.bf16.msrb.mxu1 %v2935_v45 }
  0x36   :  { %397 = vmatpush.bf16.msrb.mxu2 %v2931_v42  ;;  %411 = vmatpush.bf16.msrb.mxu3 %v2937_v46 }
  0x38   :  { %373 = vmatpush.bf16.msrb.mxu0 %v2941_v53 }
  0x39   :  { %386 = vmatpush.bf16.msrb.mxu1 %v2947_v57 }
  0x3a   :  { %398 = vmatpush.bf16.msrb.mxu2 %v2943_v54  ;;  %412 = vmatpush.bf16.msrb.mxu3 %v2949_v58 }
  0x3c   :  { %374 = vmatpush.bf16.msrb.mxu0 %v2953_v1 }
  0x3d   :  { %387 = vmatpush.bf16.msrb.mxu1 %v2959_v6 }
  0x3e   :  { %399 = vmatpush.bf16.msrb.mxu2 %v2955_v2  ;;  %413 = vmatpush.bf16.msrb.mxu3 %v2961_v9 }
  0x40   :  { %375 = vmatpush.bf16.msrb.mxu0 %v2965_v19 }
  0x41   :  { %388 = vmatpush.bf16.msrb.mxu1 %v2971_v24 }
  0x42   :  { %400 = vmatpush.bf16.msrb.mxu2 %v2967_v20  ;;  %414 = vmatpush.bf16.msrb.mxu3 %v2973_v25 }
  0x44   :  { %376 = vmatpush.bf16.msrb.mxu0 %v2977_v36 }
  0x45   :  { %389 = vmatpush.bf16.msrb.mxu1 %v2986_v39 }
  0x46   :  { %401 = vmatpush.bf16.msrb.mxu2 %v2982_v38  ;;  %415 = vmatpush.bf16.msrb.mxu3 %v2988_v40 }
  0x48   :  { %496 = vmatpush.bf16.msra.mxu0 %v2898_v3 }
  0x49   :  { %509 = vmatpush.bf16.msra.mxu1 %v2900_v7 }
  0x4a   :  { %535 = vmatpush.bf16.msra.mxu3 %v2902_v8  ;;  %402 = vmatpush.bf16.msrb.mxu2 %v2994_v48 }
  0x4c   :  { %497 = vmatpush.bf16.msra.mxu0 %v2905_v12 }
  0x4d   :  { %510 = vmatpush.bf16.msra.mxu1 %v2909_v16 }
  0x4e   :  { %522 = vmatpush.bf16.msra.mxu2 %v2913_v21  ;;  %536 = vmatpush.bf16.msra.mxu3 %v2911_v17 }
  0x50   :  { %498 = vmatpush.bf16.msra.mxu0 %v2917_v28 }
  0x51   :  { %511 = vmatpush.bf16.msra.mxu1 %v2921_v32 }
  0x52   :  { %523 = vmatpush.bf16.msra.mxu2 %v2925_v34  ;;  %537 = vmatpush.bf16.msra.mxu3 %v2923_v33 }
  0x54   :  { %499 = vmatpush.bf16.msra.mxu0 %v2929_v41 }
  0x55   :  { %512 = vmatpush.bf16.msra.mxu1 %v2935_v45 }
  0x56   :  { %524 = vmatpush.bf16.msra.mxu2 %v2931_v42  ;;  %538 = vmatpush.bf16.msra.mxu3 %v2937_v46 }
  0x58   :  { %500 = vmatpush.bf16.msra.mxu0 %v2941_v53 }
  0x59   :  { %513 = vmatpush.bf16.msra.mxu1 %v2947_v57 }
  0x5a   :  { %525 = vmatpush.bf16.msra.mxu2 %v2943_v54  ;;  %539 = vmatpush.bf16.msra.mxu3 %v2949_v58 }
  0x5c   :  { %501 = vmatpush.bf16.msra.mxu0 %v2953_v1 }
  0x5d   :  { %514 = vmatpush.bf16.msra.mxu1 %v2959_v6 }
  0x5e   :  { %526 = vmatpush.bf16.msra.mxu2 %v2955_v2  ;;  %540 = vmatpush.bf16.msra.mxu3 %v2961_v9 }
  0x60   :  { %502 = vmatpush.bf16.msra.mxu0 %v2965_v19 }
  0x61   :  { %515 = vmatpush.bf16.msra.mxu1 %v2971_v24 }
  0x62   :  { %527 = vmatpush.bf16.msra.mxu2 %v2967_v20  ;;  %541 = vmatpush.bf16.msra.mxu3 %v2973_v25 }
  0x64   :  { %503 = vmatpush.bf16.msra.mxu0 %v2977_v36 }
  0x65   :  { %516 = vmatpush.bf16.msra.mxu1 %v2986_v39 }
  0x66   :  { %528 = vmatpush.bf16.msra.mxu2 %v2982_v38  ;;  %542 = vmatpush.bf16.msra.mxu3 %v2988_v40 }
  0x6a   :  { %529 = vmatpush.bf16.msra.mxu2 %v2994_v48 }
  0xa4   :  { %v252_v51 = vpop.f32.mrf.mxu0 }
  0xa5   :  { %v295_v52 = vadd.f32 %v252_v51, %v78_v49  ;;  %v265_v55 = vpop.f32.mrf.mxu1 }
  0xa6   :  { %v296_v56 = vadd.f32 %v265_v55, %v79_v50 }
  0xa7   :  { %v2417_v59 = vmul.f32 -1.442695, %v295_v52 }
  0xa8   :  { %v2418_v60 = vmul.f32 -1.442695, %v296_v56 }
  0xa9   :  { %2575 = vpow2.f32 %v2417_v59 }
  0xaa   :  { %2577 = vpow2.f32 %v2418_v60 }
  0xac   :  { %v291_v62 = vpop.f32.mrf.mxu3  ;;  %v254_v0 = vpop.f32.mrf.mxu0 }
  0xad   :  { %v298_v63 = vadd.f32 %v291_v62, %v81_v61  ;;  %v267_v4 = vpop.f32.mrf.mxu1 }
  0xae   :  { %v42_v4 = vld [vmem:[%s3789_s3] sm:$0xff] }
  0xaf   :  { %v2419_v5 = vmul.f32 -1.442695, %v298_v63  ;;  %v2576_v10 = vpop.eup %2575 }
  0xb0   :  { %v278_v11 = vpop.f32.mrf.mxu2  ;;  %v2578_v13 = vpop.eup %2577  ;;  %v302_v14 = vadd.f32 1.0, %v2576_v10 }
  0xb1   :  { %2579 = vpow2.f32 %v2419_v5  ;;  %v321_v15 = vadd.f32 1.0, %v2578_v13  ;;  %v297_v26 = vadd.f32 %v278_v11, %v80_v18 }
  0xb2   :  { %2581 = vrcp.f32 %v302_v14  ;;  %v314_v47 = vand.u32 2147483648, %v302_v14  ;;  %v312_v51 = vand.u32 2147483647, %v302_v14  ;;  %vm308_vm2 = vweird.f32 %v302_v14 }
  0xb3   :  { %2583 = vrcp.f32 %v321_v15  ;;  %v333_v49 = vand.u32 2147483648, %v321_v15  ;;  %v331_v55 = vand.u32 2147483647, %v321_v15  ;;  %vm327_vm3 = vweird.f32 %v321_v15 }
  0xb4   :  { %v293_v22 = vpop.f32.mrf.mxu3  ;;  %v315_v62 = vor.u32 1.1754944e-38, %v314_v47  ;;  %vm313_vm6 = vcmp.eq.f32.partialorder %v312_v51, 8.507059e+37 }
  0xb5   :  { %v334_v0 = vor.u32 1.1754944e-38, %v333_v49  ;;  %vm332_vm7 = vcmp.eq.f32.partialorder %v331_v55, 8.507059e+37  ;;  %v2421_v49 = vld [vmem:[%s3786_s0 + $0x28] sm:$0xff] }
  0xb7   :  { %v2580_v23 = vpop.eup %2579 }
  0xb8   :  { %v341_v27 = vadd.f32 1.0, %v2580_v23  ;;  %v280_v29 = vpop.f32.mrf.mxu2  ;;  %v2582_v30 = vpop.eup %2581 }
  0xb9   :  { %v2584_v31 = vpop.eup %2583  ;;  %v304_v35 = vmul.f32 %v2582_v30, %v302_v14  ;;  %vm309_vm0 = vweird.f32 %v2582_v30 }
  0xba   :  { %2585 = vrcp.f32 %v341_v27  ;;  %v323_v37 = vmul.f32 %v2584_v31, %v321_v15  ;;  %vm328_vm1 = vweird.f32 %v2584_v31  ;;  %vm310_vm4 = vmor %vm308_vm2, %vm309_vm0  ;;  %v353_v29 = vand.u32 2147483648, %v341_v27 }
  0xbb   :  { %2587 = vtanh.f32 %v297_v26  ;;  %v305_v43 = vsub.f32 1.0, %v304_v35  ;;  %vm329_vm5 = vmor %vm327_vm3, %vm328_vm1  ;;  %vm347_vm9 = vweird.f32 %v341_v27  ;;  %v351_v35 = vand.u32 2147483647, %v341_v27 }
  0xbc   :  { %v324_v44 = vsub.f32 1.0, %v323_v37  ;;  %v354_v37 = vor.u32 1.1754944e-38, %v353_v29 }
  0xbd   :  { %v306_v50 = vmul.f32 %v2582_v30, %v305_v43  ;;  %vm352_vm11 = vcmp.eq.f32.partialorder %v351_v35, 8.507059e+37 }
  0xbe   :  { %v325_v52 = vmul.f32 %v2584_v31, %v324_v44 }
  0xbf   :  { %v307_v59 = vadd.f32 %v2582_v30, %v306_v50 }
  0xc0   :  { %v2586_v56 = vpop.eup %2585  ;;  %v326_v63 = vadd.f32 %v2584_v31, %v325_v52 }
  0xc1   :  { %v2588_v60 = vpop.eup %2587  ;;  %v343_v61 = vmul.f32 %v2586_v56, %v341_v27  ;;  %v311_v5 = vsel %vm310_vm4, %v2582_v30, %v307_v59  ;;  %vm348_vm8 = vweird.f32 %v2586_v56  ;;  %v2420_v27 = vld [vmem:[%s3786_s0 + $0x20] sm:$0xff] }
  0xc2   :  { %v316_v11 = vsel %vm313_vm6, %v315_v62, %v311_v5  ;;  %v330_v13 = vsel %vm329_vm5, %v2584_v31, %v326_v63  ;;  %vm349_vm10 = vmor %vm347_vm9, %vm348_vm8 }
  0xc3   :  { %v344_v10 = vsub.f32 1.0, %v343_v61  ;;  %v335_v18 = vsel %vm332_vm7, %v334_v0, %v330_v13  ;;  %v358_v14 = vmul.f32 %v2588_v60, %v316_v11  ;;  %v2423_v60 = vld [vmem:[%s3786_s0 + $0x38] sm:$0xff] }
  0xc4   :  { %v357_v15 = vmul.f32 %v335_v18, %v42_v4 }
  0xc5   :  { %v345_v22 = vmul.f32 %v2586_v56, %v344_v10 }
  0xc6   :  { %v3076_v23 = vadd.f32 %v358_v14, %v357_v15  ;;  %v2422_v15 = vld [vmem:[%s3786_s0 + $0x30] sm:$0xff] }
  0xc7   :  { %v346_v26 = vadd.f32 %v2586_v56, %v345_v22 }
  0xc8   :  { %2589 = vtanh.f32 %v3076_v23 }
  0xc9   :  { %v350_v30 = vsel %vm349_vm10, %v2586_v56, %v346_v26 }
  0xca   :  { %v355_v31 = vsel %vm352_vm11, %v354_v37, %v350_v30 }
  0xce   :  { %v2590_v43 = vpop.eup %2589 }
  0xcf   :  { %v361_v44 = vmul.f32 %v2590_v43, %v355_v31 }
  0xd1   :  { %v362_v47 = vpack.c.bf16 %v361_v44, %v361_v44 }
  0xd3   :  { %363 = vst [vmem:[%s3790_s4] sm:$0xf] %v362_v47  ;;  %377 = vmatmul.bf16.vlgmr.msrb.gmra.mxu0 %v362_v47  ;;  %390 = vmatmul.bf16.vlgmr.msrb.gmra.mxu1 %v362_v47 }
  0xd4   :  { %403 = vmatmul.bf16.vlgmr.msrb.gmra.mxu2 %v362_v47  ;;  %416 = vmatmul.bf16.vlgmr.msrb.gmra.mxu3 %v362_v47 }
  0xd5   :  { %623 = vmatpush.bf16.msrb.mxu0 %v2898_v3  ;;  %636 = vmatpush.bf16.msrb.mxu1 %v2900_v7 }
  0xd6   :  { %649 = vmatpush.bf16.msrb.mxu2 %v2913_v21  ;;  %662 = vmatpush.bf16.msrb.mxu3 %v2902_v8 }
  0xd9   :  { %624 = vmatpush.bf16.msrb.mxu0 %v2905_v12  ;;  %637 = vmatpush.bf16.msrb.mxu1 %v2909_v16 }
  0xda   :  { %650 = vmatpush.bf16.msrb.mxu2 %v2925_v34  ;;  %663 = vmatpush.bf16.msrb.mxu3 %v2911_v17 }
  0xdd   :  { %625 = vmatpush.bf16.msrb.mxu0 %v2917_v28  ;;  %638 = vmatpush.bf16.msrb.mxu1 %v2921_v32 }
  0xde   :  { %651 = vmatpush.bf16.msrb.mxu2 %v2931_v42  ;;  %664 = vmatpush.bf16.msrb.mxu3 %v2923_v33 }
  0xe1   :  { %626 = vmatpush.bf16.msrb.mxu0 %v2929_v41  ;;  %639 = vmatpush.bf16.msrb.mxu1 %v2935_v45 }
  0xe2   :  { %652 = vmatpush.bf16.msrb.mxu2 %v2943_v54  ;;  %665 = vmatpush.bf16.msrb.mxu3 %v2937_v46 }
  0xe5   :  { %627 = vmatpush.bf16.msrb.mxu0 %v2941_v53  ;;  %640 = vmatpush.bf16.msrb.mxu1 %v2947_v57 }
  0xe6   :  { %653 = vmatpush.bf16.msrb.mxu2 %v2955_v2  ;;  %666 = vmatpush.bf16.msrb.mxu3 %v2949_v58 }
  0xe9   :  { %628 = vmatpush.bf16.msrb.mxu0 %v2953_v1  ;;  %641 = vmatpush.bf16.msrb.mxu1 %v2959_v6 }
  0xea   :  { %654 = vmatpush.bf16.msrb.mxu2 %v2967_v20  ;;  %667 = vmatpush.bf16.msrb.mxu3 %v2961_v9 }
  0xed   :  { %629 = vmatpush.bf16.msrb.mxu0 %v2965_v19  ;;  %642 = vmatpush.bf16.msrb.mxu1 %v2971_v24 }
  0xee   :  { %655 = vmatpush.bf16.msrb.mxu2 %v2982_v38  ;;  %668 = vmatpush.bf16.msrb.mxu3 %v2973_v25 }
  0xf1   :  { %630 = vmatpush.bf16.msrb.mxu0 %v2977_v36  ;;  %643 = vmatpush.bf16.msrb.mxu1 %v2986_v39 }
  0xf2   :  { %656 = vmatpush.bf16.msrb.mxu2 %v2994_v48  ;;  %669 = vmatpush.bf16.msrb.mxu3 %v2988_v40 }
 0x150   :  { %v378_v50 = vpop.f32.mrf.mxu0  ;;  %v391_v51 = vpop.f32.mrf.mxu1 }
 0x151   :  { %v421_v52 = vadd.f32 %v2420_v27, %v378_v50  ;;  %v422_v55 = vadd.f32 %v2421_v49, %v391_v51 }
 0x153   :  { %v2424_v56 = vmul.f32 -1.442695, %v421_v52  ;;  %v2425_v59 = vmul.f32 -1.442695, %v422_v55 }
 0x155   :  { %2591 = vpow2.f32 %v2424_v56 }
 0x156   :  { %2593 = vpow2.f32 %v2425_v59 }
 0x157   :  { %v404_v61 = vpop.f32.mrf.mxu2  ;;  %v417_v62 = vpop.f32.mrf.mxu3 }
 0x158   :  { %v424_v63 = vadd.f32 %v2423_v60, %v417_v62  ;;  %v380_v0 = vpop.f32.mrf.mxu0  ;;  %v393_v4 = vpop.f32.mrf.mxu1  ;;  %v423_v30 = vadd.f32 %v2422_v15, %v404_v61 }
 0x15a   :  { %v2426_v5 = vmul.f32 -1.442695, %v424_v63 }
 0x15b   :  { %v2592_v10 = vpop.eup %2591 }
 0x15c   :  { %v2594_v11 = vpop.eup %2593  ;;  %v428_v13 = vadd.f32 1.0, %v2592_v10  ;;  %2595 = vpow2.f32 %v2426_v5 }
 0x15d   :  { %v447_v18 = vadd.f32 1.0, %v2594_v11 }
 0x15e   :  { %2597 = vrcp.f32 %v428_v13  ;;  %v440_v27 = vand.u32 2147483648, %v428_v13  ;;  %v438_v51 = vand.u32 2147483647, %v428_v13  ;;  %vm434_vm14 = vweird.f32 %v428_v13 }
 0x15f   :  { %2599 = vrcp.f32 %v447_v18  ;;  %v406_v14 = vpop.f32.mrf.mxu2  ;;  %v419_v22 = vpop.f32.mrf.mxu3  ;;  %v459_v49 = vand.u32 2147483648, %v447_v18  ;;  %v457_v55 = vand.u32 2147483647, %v447_v18  ;;  %vm453_vm15 = vweird.f32 %v447_v18 }
 0x160   :  { %v441_v60 = vor.u32 1.1754944e-38, %v440_v27  ;;  %vm439_vm2 = vcmp.eq.f32.partialorder %v438_v51, 8.507059e+37 }
 0x161   :  { %v460_v63 = vor.u32 1.1754944e-38, %v459_v49  ;;  %vm458_vm3 = vcmp.eq.f32.partialorder %v457_v55, 8.507059e+37 }
 0x162   :  { %v2596_v26 = vpop.eup %2595 }
 0x163   :  { %v467_v29 = vadd.f32 1.0, %v2596_v26 }
 0x164   :  { %v2598_v35 = vpop.eup %2597 }
 0x165   :  { %v2600_v37 = vpop.eup %2599  ;;  %v430_v43 = vmul.f32 %v2598_v35, %v428_v13  ;;  %2601 = vrcp.f32 %v467_v29  ;;  %vm435_vm12 = vweird.f32 %v2598_v35  ;;  %vm473_vm5 = vweird.f32 %v467_v29 }
 0x166   :  { %v449_v31 = vmul.f32 %v2600_v37, %v447_v18  ;;  %2603 = vtanh.f32 %v423_v30  ;;  %vm454_vm13 = vweird.f32 %v2600_v37  ;;  %vm436_vm0 = vmor %vm434_vm14, %vm435_vm12  ;;  %v479_v30 = vand.u32 2147483648, %v467_v29 }
 0x167   :  { %v431_v44 = vsub.f32 1.0, %v430_v43  ;;  %vm455_vm1 = vmor %vm453_vm15, %vm454_vm13 }
 0x168   :  { %v450_v47 = vsub.f32 1.0, %v449_v31  ;;  %v480_v31 = vor.u32 1.1754944e-38, %v479_v30 }
 0x169   :  { %v432_v50 = vmul.f32 %v2598_v35, %v431_v44 }
 0x16a   :  { %v451_v52 = vmul.f32 %v2600_v37, %v450_v47 }
 0x16b   :  { %v2602_v56 = vpop.eup %2601  ;;  %v433_v59 = vadd.f32 %v2598_v35, %v432_v50 }
 0x16c   :  { %v452_v61 = vadd.f32 %v2600_v37, %v451_v52  ;;  %v469_v62 = vmul.f32 %v2602_v56, %v467_v29  ;;  %v2604_v4 = vpop.eup %2603  ;;  %vm474_vm4 = vweird.f32 %v2602_v56 }
 0x16d   :  { %v437_v0 = vsel %vm436_vm0, %v2598_v35, %v433_v59  ;;  %v477_v35 = vand.u32 2147483647, %v467_v29  ;;  %vm475_vm6 = vmor %vm473_vm5, %vm474_vm4  ;;  %v2429_v29 = vld [vmem:[%s3786_s0 + $0x48] sm:$0xff]  ;;  %v2431_v59 = vld [vmem:[%s3786_s0 + $0x58] sm:$0xff] }
 0x16e   :  { %v442_v5 = vsel %vm439_vm2, %v441_v60, %v437_v0  ;;  %v456_v10 = vsel %vm455_vm1, %v2600_v37, %v452_v61  ;;  %v470_v11 = vsub.f32 1.0, %v469_v62 }
 0x16f   :  { %v461_v14 = vsel %vm458_vm3, %v460_v63, %v456_v10  ;;  %v484_v22 = vmul.f32 %v2604_v4, %v442_v5  ;;  %vm478_vm7 = vcmp.eq.f32.partialorder %v477_v35, 8.507059e+37 }
 0x170   :  { %v483_v15 = vmul.f32 %v461_v14, %v3076_v23  ;;  %v471_v26 = vmul.f32 %v2602_v56, %v470_v11  ;;  %v2428_v23 = vld [vmem:[%s3786_s0 + $0x40] sm:$0xff] }
 0x172   :  { %v3127_v13 = vadd.f32 %v484_v22, %v483_v15  ;;  %v472_v18 = vadd.f32 %v2602_v56, %v471_v26  ;;  %v2430_v26 = vld [vmem:[%s3786_s0 + $0x50] sm:$0xff] }
 0x174   :  { %2605 = vtanh.f32 %v3127_v13  ;;  %v476_v43 = vsel %vm475_vm6, %v2602_v56, %v472_v18 }
 0x175   :  { %v481_v44 = vsel %vm478_vm7, %v480_v31, %v476_v43 }
 0x17a   :  { %v2606_v37 = vpop.eup %2605 }
 0x17b   :  { %v487_v47 = vmul.f32 %v2606_v37, %v481_v44 }
 0x17d   :  { %v488_v27 = vpack.c.bf16 %v487_v47, %v487_v47 }
 0x17f   :  { %2427 = vst [vmem:[%s3790_s4 + $0x4] sm:$0xf] %v488_v27  ;;  %504 = vmatmul.bf16.vlgmr.msra.gmra.mxu0 %v488_v27  ;;  %517 = vmatmul.bf16.vlgmr.msra.gmra.mxu1 %v488_v27 }
 0x180   :  { %530 = vmatmul.bf16.vlgmr.msra.gmra.mxu2 %v488_v27  ;;  %543 = vmatmul.bf16.vlgmr.msra.gmra.mxu3 %v488_v27 }
 0x181   :  { %750 = vmatpush.bf16.msra.mxu0 %v2898_v3  ;;  %763 = vmatpush.bf16.msra.mxu1 %v2900_v7 }
 0x182   :  { %776 = vmatpush.bf16.msra.mxu2 %v2913_v21  ;;  %789 = vmatpush.bf16.msra.mxu3 %v2902_v8 }
 0x185   :  { %751 = vmatpush.bf16.msra.mxu0 %v2905_v12  ;;  %764 = vmatpush.bf16.msra.mxu1 %v2909_v16 }
 0x186   :  { %777 = vmatpush.bf16.msra.mxu2 %v2925_v34  ;;  %790 = vmatpush.bf16.msra.mxu3 %v2911_v17 }
 0x189   :  { %752 = vmatpush.bf16.msra.mxu0 %v2917_v28  ;;  %765 = vmatpush.bf16.msra.mxu1 %v2921_v32 }
 0x18a   :  { %778 = vmatpush.bf16.msra.mxu2 %v2931_v42  ;;  %791 = vmatpush.bf16.msra.mxu3 %v2923_v33 }
 0x18d   :  { %753 = vmatpush.bf16.msra.mxu0 %v2929_v41  ;;  %766 = vmatpush.bf16.msra.mxu1 %v2935_v45 }
 0x18e   :  { %779 = vmatpush.bf16.msra.mxu2 %v2943_v54  ;;  %792 = vmatpush.bf16.msra.mxu3 %v2937_v46 }
 0x191   :  { %754 = vmatpush.bf16.msra.mxu0 %v2941_v53  ;;  %767 = vmatpush.bf16.msra.mxu1 %v2947_v57 }
 0x192   :  { %780 = vmatpush.bf16.msra.mxu2 %v2955_v2  ;;  %793 = vmatpush.bf16.msra.mxu3 %v2949_v58 }
 0x195   :  { %755 = vmatpush.bf16.msra.mxu0 %v2953_v1  ;;  %768 = vmatpush.bf16.msra.mxu1 %v2959_v6 }
 0x196   :  { %781 = vmatpush.bf16.msra.mxu2 %v2967_v20  ;;  %794 = vmatpush.bf16.msra.mxu3 %v2961_v9 }
 0x199   :  { %756 = vmatpush.bf16.msra.mxu0 %v2965_v19  ;;  %769 = vmatpush.bf16.msra.mxu1 %v2971_v24 }
 0x19a   :  { %782 = vmatpush.bf16.msra.mxu2 %v2982_v38  ;;  %795 = vmatpush.bf16.msra.mxu3 %v2973_v25 }
 0x19d   :  { %757 = vmatpush.bf16.msra.mxu0 %v2977_v36  ;;  %770 = vmatpush.bf16.msra.mxu1 %v2986_v39 }
 0x19e   :  { %783 = vmatpush.bf16.msra.mxu2 %v2994_v48  ;;  %796 = vmatpush.bf16.msra.mxu3 %v2988_v40 }
 0x1fc   :  { %v505_v49 = vpop.f32.mrf.mxu0  ;;  %v518_v50 = vpop.f32.mrf.mxu1 }
 0x1fd   :  { %v548_v51 = vadd.f32 %v2428_v23, %v505_v49  ;;  %v549_v52 = vadd.f32 %v2429_v29, %v518_v50 }
 0x1ff   :  { %v2432_v55 = vmul.f32 -1.442695, %v548_v51  ;;  %v2433_v56 = vmul.f32 -1.442695, %v549_v52 }
 0x201   :  { %2607 = vpow2.f32 %v2432_v55 }
 0x202   :  { %2609 = vpow2.f32 %v2433_v56 }
 0x203   :  { %v531_v60 = vpop.f32.mrf.mxu2  ;;  %v544_v61 = vpop.f32.mrf.mxu3 }
 0x204   :  { %v551_v62 = vadd.f32 %v2431_v59, %v544_v61  ;;  %v507_v63 = vpop.f32.mrf.mxu0  ;;  %v520_v0 = vpop.f32.mrf.mxu1  ;;  %v550_v43 = vadd.f32 %v2430_v26, %v531_v60 }
 0x206   :  { %v2434_v4 = vmul.f32 -1.442695, %v551_v62 }
 0x207   :  { %v2608_v5 = vpop.eup %2607 }
 0x208   :  { %v2610_v10 = vpop.eup %2609  ;;  %v555_v11 = vadd.f32 1.0, %v2608_v5  ;;  %2611 = vpow2.f32 %v2434_v4 }
 0x209   :  { %v574_v14 = vadd.f32 1.0, %v2610_v10 }
 0x20a   :  { %2613 = vrcp.f32 %v555_v11  ;;  %v567_v23 = vand.u32 2147483648, %v555_v11  ;;  %v565_v50 = vand.u32 2147483647, %v555_v11  ;;  %vm561_vm10 = vweird.f32 %v555_v11 }
 0x20b   :  { %2615 = vrcp.f32 %v574_v14  ;;  %v533_v22 = vpop.f32.mrf.mxu2  ;;  %v546_v15 = vpop.f32.mrf.mxu3  ;;  %v586_v29 = vand.u32 2147483648, %v574_v14  ;;  %v584_v52 = vand.u32 2147483647, %v574_v14  ;;  %vm580_vm11 = vweird.f32 %v574_v14 }
 0x20c   :  { %v568_v59 = vor.u32 1.1754944e-38, %v567_v23  ;;  %vm566_vm14 = vcmp.eq.f32.partialorder %v565_v50, 8.507059e+37 }
 0x20d   :  { %v587_v62 = vor.u32 1.1754944e-38, %v586_v29  ;;  %vm585_vm15 = vcmp.eq.f32.partialorder %v584_v52, 8.507059e+37 }
 0x20e   :  { %v2612_v18 = vpop.eup %2611 }
 0x20f   :  { %v594_v30 = vadd.f32 1.0, %v2612_v18 }
 0x210   :  { %v2614_v35 = vpop.eup %2613 }
 0x211   :  { %v2616_v31 = vpop.eup %2615  ;;  %v557_v37 = vmul.f32 %v2614_v35, %v555_v11  ;;  %2617 = vrcp.f32 %v594_v30  ;;  %vm562_vm8 = vweird.f32 %v2614_v35  ;;  %vm600_vm1 = vweird.f32 %v594_v30 }
 0x212   :  { %v576_v44 = vmul.f32 %v2616_v31, %v574_v14  ;;  %2619 = vtanh.f32 %v550_v43  ;;  %vm581_vm9 = vweird.f32 %v2616_v31  ;;  %vm563_vm12 = vmor %vm561_vm10, %vm562_vm8  ;;  %v606_v43 = vand.u32 2147483648, %v594_v30 }
 0x213   :  { %v558_v47 = vsub.f32 1.0, %v557_v37  ;;  %vm582_vm13 = vmor %vm580_vm11, %vm581_vm9 }
 0x214   :  { %v577_v27 = vsub.f32 1.0, %v576_v44  ;;  %v607_v44 = vor.u32 1.1754944e-38, %v606_v43 }
 0x215   :  { %v559_v49 = vmul.f32 %v2614_v35, %v558_v47 }
 0x216   :  { %v578_v51 = vmul.f32 %v2616_v31, %v577_v27 }
 0x217   :  { %v2618_v55 = vpop.eup %2617  ;;  %v560_v56 = vadd.f32 %v2614_v35, %v559_v49 }
 0x218   :  { %v579_v60 = vadd.f32 %v2616_v31, %v578_v51  ;;  %v596_v61 = vmul.f32 %v2618_v55, %v594_v30  ;;  %v2620_v0 = vpop.eup %2619  ;;  %vm601_vm0 = vweird.f32 %v2618_v55 }
 0x219   :  { %v564_v63 = vsel %vm563_vm12, %v2614_v35, %v560_v56  ;;  %v604_v35 = vand.u32 2147483647, %v594_v30  ;;  %vm602_vm2 = vmor %vm600_vm1, %vm601_vm0  ;;  %v2437_v30 = vld [vmem:[%s3786_s0 + $0x68] sm:$0xff]  ;;  %v2439_v56 = vld [vmem:[%s3786_s0 + $0x78] sm:$0xff] }
 0x21a   :  { %v569_v4 = vsel %vm566_vm14, %v568_v59, %v564_v63  ;;  %v583_v5 = vsel %vm582_vm13, %v2616_v31, %v579_v60  ;;  %v597_v10 = vsub.f32 1.0, %v596_v61 }
 0x21b   :  { %v588_v22 = vsel %vm585_vm15, %v587_v62, %v583_v5  ;;  %v611_v15 = vmul.f32 %v2620_v0, %v569_v4  ;;  %vm605_vm3 = vcmp.eq.f32.partialorder %v604_v35, 8.507059e+37 }
 0x21c   :  { %v610_v26 = vmul.f32 %v588_v22, %v3127_v13  ;;  %v598_v18 = vmul.f32 %v2618_v55, %v597_v10  ;;  %v2436_v13 = vld [vmem:[%s3786_s0 + $0x60] sm:$0xff] }
 0x21e   :  { %v3178_v11 = vadd.f32 %v611_v15, %v610_v26  ;;  %v599_v14 = vadd.f32 %v2618_v55, %v598_v18  ;;  %v2438_v18 = vld [vmem:[%s3786_s0 + $0x70] sm:$0xff] }
 0x220   :  { %2621 = vtanh.f32 %v3178_v11  ;;  %v603_v37 = vsel %vm602_vm2, %v2618_v55, %v599_v14 }
 0x221   :  { %v608_v47 = vsel %vm605_vm3, %v607_v44, %v603_v37 }
 0x226   :  { %v2622_v31 = vpop.eup %2621 }
 0x227   :  { %v614_v27 = vmul.f32 %v2622_v31, %v608_v47 }
 0x229   :  { %v615_v23 = vpack.c.bf16 %v614_v27, %v614_v27 }
 0x22b   :  { %2435 = vst [vmem:[%s3790_s4 + $0x8] sm:$0xf] %v615_v23  ;;  %631 = vmatmul.bf16.vlgmr.msrb.gmra.mxu0 %v615_v23  ;;  %644 = vmatmul.bf16.vlgmr.msrb.gmra.mxu1 %v615_v23 }
 0x22c   :  { %657 = vmatmul.bf16.vlgmr.msrb.gmra.mxu2 %v615_v23  ;;  %670 = vmatmul.bf16.vlgmr.msrb.gmra.mxu3 %v615_v23 }
 0x22d   :  { %877 = vmatpush.bf16.msrb.mxu0 %v2898_v3  ;;  %890 = vmatpush.bf16.msrb.mxu1 %v2900_v7 }
 0x22e   :  { %903 = vmatpush.bf16.msrb.mxu2 %v2913_v21  ;;  %916 = vmatpush.bf16.msrb.mxu3 %v2902_v8 }
 0x231   :  { %878 = vmatpush.bf16.msrb.mxu0 %v2905_v12  ;;  %891 = vmatpush.bf16.msrb.mxu1 %v2909_v16 }
 0x232   :  { %904 = vmatpush.bf16.msrb.mxu2 %v2925_v34  ;;  %917 = vmatpush.bf16.msrb.mxu3 %v2911_v17 }
 0x235   :  { %879 = vmatpush.bf16.msrb.mxu0 %v2917_v28  ;;  %892 = vmatpush.bf16.msrb.mxu1 %v2921_v32 }
 0x236   :  { %905 = vmatpush.bf16.msrb.mxu2 %v2931_v42  ;;  %918 = vmatpush.bf16.msrb.mxu3 %v2923_v33 }
 0x239   :  { %880 = vmatpush.bf16.msrb.mxu0 %v2929_v41  ;;  %893 = vmatpush.bf16.msrb.mxu1 %v2935_v45 }
 0x23a   :  { %906 = vmatpush.bf16.msrb.mxu2 %v2943_v54  ;;  %919 = vmatpush.bf16.msrb.mxu3 %v2937_v46 }
 0x23d   :  { %881 = vmatpush.bf16.msrb.mxu0 %v2941_v53  ;;  %894 = vmatpush.bf16.msrb.mxu1 %v2947_v57 }
 0x23e   :  { %907 = vmatpush.bf16.msrb.mxu2 %v2955_v2  ;;  %920 = vmatpush.bf16.msrb.mxu3 %v2949_v58 }
 0x241   :  { %882 = vmatpush.bf16.msrb.mxu0 %v2953_v1  ;;  %895 = vmatpush.bf16.msrb.mxu1 %v2959_v6 }
 0x242   :  { %908 = vmatpush.bf16.msrb.mxu2 %v2967_v20  ;;  %921 = vmatpush.bf16.msrb.mxu3 %v2961_v9 }
 0x245   :  { %883 = vmatpush.bf16.msrb.mxu0 %v2965_v19  ;;  %896 = vmatpush.bf16.msrb.mxu1 %v2971_v24 }
 0x246   :  { %909 = vmatpush.bf16.msrb.mxu2 %v2982_v38  ;;  %922 = vmatpush.bf16.msrb.mxu3 %v2973_v25 }
 0x249   :  { %884 = vmatpush.bf16.msrb.mxu0 %v2977_v36  ;;  %897 = vmatpush.bf16.msrb.mxu1 %v2986_v39 }
 0x24a   :  { %910 = vmatpush.bf16.msrb.mxu2 %v2994_v48  ;;  %923 = vmatpush.bf16.msrb.mxu3 %v2988_v40 }
 0x2a8   :  { %v632_v29 = vpop.f32.mrf.mxu0  ;;  %v645_v49 = vpop.f32.mrf.mxu1 }
 0x2a9   :  { %v675_v50 = vadd.f32 %v2436_v13, %v632_v29  ;;  %v676_v51 = vadd.f32 %v2437_v30, %v645_v49 }
 0x2ab   :  { %v2440_v52 = vmul.f32 -1.442695, %v675_v50  ;;  %v2441_v55 = vmul.f32 -1.442695, %v676_v51 }
 0x2ad   :  { %2623 = vpow2.f32 %v2440_v52 }
 0x2ae   :  { %2625 = vpow2.f32 %v2441_v55 }
 0x2af   :  { %v658_v59 = vpop.f32.mrf.mxu2  ;;  %v671_v60 = vpop.f32.mrf.mxu3 }
 0x2b0   :  { %v678_v61 = vadd.f32 %v2439_v56, %v671_v60  ;;  %v634_v62 = vpop.f32.mrf.mxu0  ;;  %v647_v63 = vpop.f32.mrf.mxu1  ;;  %v677_v37 = vadd.f32 %v2438_v18, %v658_v59 }
 0x2b2   :  { %v2442_v0 = vmul.f32 -1.442695, %v678_v61 }
 0x2b3   :  { %v2624_v4 = vpop.eup %2623 }
 0x2b4   :  { %v2626_v5 = vpop.eup %2625  ;;  %v682_v10 = vadd.f32 1.0, %v2624_v4  ;;  %2627 = vpow2.f32 %v2442_v0 }
 0x2b5   :  { %v701_v22 = vadd.f32 1.0, %v2626_v5 }
 0x2b6   :  { %2629 = vrcp.f32 %v682_v10  ;;  %v694_v13 = vand.u32 2147483648, %v682_v10  ;;  %v692_v49 = vand.u32 2147483647, %v682_v10  ;;  %vm688_vm6 = vweird.f32 %v682_v10 }
 0x2b7   :  { %2631 = vrcp.f32 %v701_v22  ;;  %v660_v15 = vpop.f32.mrf.mxu2  ;;  %v673_v26 = vpop.f32.mrf.mxu3  ;;  %v713_v30 = vand.u32 2147483648, %v701_v22  ;;  %v711_v51 = vand.u32 2147483647, %v701_v22  ;;  %vm707_vm7 = vweird.f32 %v701_v22 }
 0x2b8   :  { %v695_v56 = vor.u32 1.1754944e-38, %v694_v13  ;;  %vm693_vm10 = vcmp.eq.f32.partialorder %v692_v49, 8.507059e+37 }
 0x2b9   :  { %v714_v61 = vor.u32 1.1754944e-38, %v713_v30  ;;  %vm712_vm11 = vcmp.eq.f32.partialorder %v711_v51, 8.507059e+37 }
 0x2ba   :  { %v2628_v14 = vpop.eup %2627 }
 0x2bb   :  { %v721_v43 = vadd.f32 1.0, %v2628_v14 }
 0x2bc   :  { %v2630_v35 = vpop.eup %2629 }
 0x2bd   :  { %v2632_v44 = vpop.eup %2631  ;;  %v684_v31 = vmul.f32 %v2630_v35, %v682_v10  ;;  %2633 = vrcp.f32 %v721_v43  ;;  %vm689_vm4 = vweird.f32 %v2630_v35  ;;  %vm727_vm13 = vweird.f32 %v721_v43 }
 0x2be   :  { %v703_v47 = vmul.f32 %v2632_v44, %v701_v22  ;;  %2635 = vtanh.f32 %v677_v37  ;;  %vm708_vm5 = vweird.f32 %v2632_v44  ;;  %vm690_vm8 = vmor %vm688_vm6, %vm689_vm4  ;;  %v733_v37 = vand.u32 2147483648, %v721_v43 }
 0x2bf   :  { %v685_v27 = vsub.f32 1.0, %v684_v31  ;;  %vm709_vm9 = vmor %vm707_vm7, %vm708_vm5 }
 0x2c0   :  { %v704_v23 = vsub.f32 1.0, %v703_v47  ;;  %v734_v47 = vor.u32 1.1754944e-38, %v733_v37 }
 0x2c1   :  { %v686_v29 = vmul.f32 %v2630_v35, %v685_v27 }
 0x2c2   :  { %v705_v50 = vmul.f32 %v2632_v44, %v704_v23 }
 0x2c3   :  { %v2634_v52 = vpop.eup %2633  ;;  %v687_v55 = vadd.f32 %v2630_v35, %v686_v29 }
 0x2c4   :  { %v706_v59 = vadd.f32 %v2632_v44, %v705_v50  ;;  %v723_v60 = vmul.f32 %v2634_v52, %v721_v43  ;;  %v2636_v63 = vpop.eup %2635  ;;  %vm728_vm12 = vweird.f32 %v2634_v52 }
 0x2c5   :  { %v691_v62 = vsel %vm690_vm8, %v2630_v35, %v687_v55  ;;  %v731_v35 = vand.u32 2147483647, %v721_v43  ;;  %vm729_vm14 = vmor %vm727_vm13, %vm728_vm12  ;;  %v2445_v43 = vld [vmem:[%s3786_s0 + $0x88] sm:$0xff]  ;;  %v2447_v55 = vld [vmem:[%s3786_s0 + $0x98] sm:$0xff] }
 0x2c6   :  { %v696_v0 = vsel %vm693_vm10, %v695_v56, %v691_v62  ;;  %v710_v4 = vsel %vm709_vm9, %v2632_v44, %v706_v59  ;;  %v724_v5 = vsub.f32 1.0, %v723_v60 }
 0x2c7   :  { %v715_v15 = vsel %vm712_vm11, %v714_v61, %v710_v4  ;;  %v738_v26 = vmul.f32 %v2636_v63, %v696_v0  ;;  %vm732_vm15 = vcmp.eq.f32.partialorder %v731_v35, 8.507059e+37 }
 0x2c8   :  { %v737_v18 = vmul.f32 %v715_v15, %v3178_v11  ;;  %v725_v14 = vmul.f32 %v2634_v52, %v724_v5  ;;  %v2444_v11 = vld [vmem:[%s3786_s0 + $0x80] sm:$0xff] }
 0x2ca   :  { %v3229_v10 = vadd.f32 %v738_v26, %v737_v18  ;;  %v726_v22 = vadd.f32 %v2634_v52, %v725_v14  ;;  %v2446_v14 = vld [vmem:[%s3786_s0 + $0x90] sm:$0xff] }
 0x2cc   :  { %2637 = vtanh.f32 %v3229_v10  ;;  %v730_v31 = vsel %vm729_vm14, %v2634_v52, %v726_v22 }
 0x2cd   :  { %v735_v27 = vsel %vm732_vm15, %v734_v47, %v730_v31 }
 0x2d2   :  { %v2638_v44 = vpop.eup %2637 }
 0x2d3   :  { %v741_v23 = vmul.f32 %v2638_v44, %v735_v27 }
 0x2d5   :  { %v742_v13 = vpack.c.bf16 %v741_v23, %v741_v23 }
 0x2d7   :  { %2443 = vst [vmem:[%s3790_s4 + $0xc] sm:$0xf] %v742_v13  ;;  %758 = vmatmul.bf16.vlgmr.msra.gmra.mxu0 %v742_v13  ;;  %771 = vmatmul.bf16.vlgmr.msra.gmra.mxu1 %v742_v13 }
 0x2d8   :  { %784 = vmatmul.bf16.vlgmr.msra.gmra.mxu2 %v742_v13  ;;  %797 = vmatmul.bf16.vlgmr.msra.gmra.mxu3 %v742_v13 }
 0x2d9   :  { %1004 = vmatpush.bf16.msra.mxu0 %v2898_v3  ;;  %1017 = vmatpush.bf16.msra.mxu1 %v2900_v7 }
 0x2da   :  { %1030 = vmatpush.bf16.msra.mxu2 %v2913_v21  ;;  %1043 = vmatpush.bf16.msra.mxu3 %v2902_v8 }
 0x2dd   :  { %1005 = vmatpush.bf16.msra.mxu0 %v2905_v12  ;;  %1018 = vmatpush.bf16.msra.mxu1 %v2909_v16 }
 0x2de   :  { %1031 = vmatpush.bf16.msra.mxu2 %v2925_v34  ;;  %1044 = vmatpush.bf16.msra.mxu3 %v2911_v17 }
 0x2e1   :  { %1006 = vmatpush.bf16.msra.mxu0 %v2917_v28  ;;  %1019 = vmatpush.bf16.msra.mxu1 %v2921_v32 }
 0x2e2   :  { %1032 = vmatpush.bf16.msra.mxu2 %v2931_v42  ;;  %1045 = vmatpush.bf16.msra.mxu3 %v2923_v33 }
 0x2e5   :  { %1007 = vmatpush.bf16.msra.mxu0 %v2929_v41  ;;  %1020 = vmatpush.bf16.msra.mxu1 %v2935_v45 }
 0x2e6   :  { %1033 = vmatpush.bf16.msra.mxu2 %v2943_v54  ;;  %1046 = vmatpush.bf16.msra.mxu3 %v2937_v46 }
 0x2e9   :  { %1008 = vmatpush.bf16.msra.mxu0 %v2941_v53  ;;  %1021 = vmatpush.bf16.msra.mxu1 %v2947_v57 }
 0x2ea   :  { %1034 = vmatpush.bf16.msra.mxu2 %v2955_v2  ;;  %1047 = vmatpush.bf16.msra.mxu3 %v2949_v58 }
 0x2ed   :  { %1009 = vmatpush.bf16.msra.mxu0 %v2953_v1  ;;  %1022 = vmatpush.bf16.msra.mxu1 %v2959_v6 }
 0x2ee   :  { %1035 = vmatpush.bf16.msra.mxu2 %v2967_v20  ;;  %1048 = vmatpush.bf16.msra.mxu3 %v2961_v9 }
 0x2f1   :  { %1010 = vmatpush.bf16.msra.mxu0 %v2965_v19  ;;  %1023 = vmatpush.bf16.msra.mxu1 %v2971_v24 }
 0x2f2   :  { %1036 = vmatpush.bf16.msra.mxu2 %v2982_v38  ;;  %1049 = vmatpush.bf16.msra.mxu3 %v2973_v25 }
 0x2f5   :  { %1011 = vmatpush.bf16.msra.mxu0 %v2977_v36  ;;  %1024 = vmatpush.bf16.msra.mxu1 %v2986_v39 }
 0x2f6   :  { %1037 = vmatpush.bf16.msra.mxu2 %v2994_v48  ;;  %1050 = vmatpush.bf16.msra.mxu3 %v2988_v40 }
 0x354   :  { %v759_v30 = vpop.f32.mrf.mxu0  ;;  %v772_v29 = vpop.f32.mrf.mxu1 }
 0x355   :  { %v802_v49 = vadd.f32 %v2444_v11, %v759_v30  ;;  %v803_v50 = vadd.f32 %v2445_v43, %v772_v29 }
 0x357   :  { %v2448_v51 = vmul.f32 -1.442695, %v802_v49  ;;  %v2449_v52 = vmul.f32 -1.442695, %v803_v50 }
 0x359   :  { %2639 = vpow2.f32 %v2448_v51 }
 0x35a   :  { %2641 = vpow2.f32 %v2449_v52 }
 0x35b   :  { %v785_v56 = vpop.f32.mrf.mxu2  ;;  %v798_v59 = vpop.f32.mrf.mxu3 }
 0x35c   :  { %v805_v60 = vadd.f32 %v2447_v55, %v798_v59  ;;  %v761_v61 = vpop.f32.mrf.mxu0  ;;  %v774_v62 = vpop.f32.mrf.mxu1  ;;  %v804_v31 = vadd.f32 %v2446_v14, %v785_v56 }
 0x35e   :  { %v2450_v63 = vmul.f32 -1.442695, %v805_v60 }
 0x35f   :  { %v2640_v0 = vpop.eup %2639 }
 0x360   :  { %v2642_v4 = vpop.eup %2641  ;;  %v809_v5 = vadd.f32 1.0, %v2640_v0  ;;  %2643 = vpow2.f32 %v2450_v63 }
 0x361   :  { %v828_v15 = vadd.f32 1.0, %v2642_v4 }
 0x362   :  { %2645 = vrcp.f32 %v809_v5  ;;  %v821_v11 = vand.u32 2147483648, %v809_v5  ;;  %v819_v29 = vand.u32 2147483647, %v809_v5  ;;  %vm815_vm2 = vweird.f32 %v809_v5 }
 0x363   :  { %2647 = vrcp.f32 %v828_v15  ;;  %v787_v26 = vpop.f32.mrf.mxu2  ;;  %v800_v18 = vpop.f32.mrf.mxu3  ;;  %v840_v43 = vand.u32 2147483648, %v828_v15  ;;  %v838_v50 = vand.u32 2147483647, %v828_v15  ;;  %vm834_vm3 = vweird.f32 %v828_v15 }
 0x364   :  { %v822_v55 = vor.u32 1.1754944e-38, %v821_v11  ;;  %vm820_vm6 = vcmp.eq.f32.partialorder %v819_v29, 8.507059e+37 }
 0x365   :  { %v841_v60 = vor.u32 1.1754944e-38, %v840_v43  ;;  %vm839_vm7 = vcmp.eq.f32.partialorder %v838_v50, 8.507059e+37 }
 0x366   :  { %v2644_v22 = vpop.eup %2643 }
 0x367   :  { %v848_v37 = vadd.f32 1.0, %v2644_v22 }
 0x368   :  { %v2646_v35 = vpop.eup %2645 }
 0x369   :  { %v2648_v47 = vpop.eup %2647  ;;  %v811_v44 = vmul.f32 %v2646_v35, %v809_v5  ;;  %2649 = vrcp.f32 %v848_v37  ;;  %vm816_vm0 = vweird.f32 %v2646_v35  ;;  %vm854_vm9 = vweird.f32 %v848_v37 }
 0x36a   :  { %v830_v27 = vmul.f32 %v2648_v47, %v828_v15  ;;  %2651 = vtanh.f32 %v804_v31  ;;  %vm835_vm1 = vweird.f32 %v2648_v47  ;;  %vm817_vm4 = vmor %vm815_vm2, %vm816_vm0  ;;  %v860_v31 = vand.u32 2147483648, %v848_v37 }
 0x36b   :  { %v812_v23 = vsub.f32 1.0, %v811_v44  ;;  %vm836_vm5 = vmor %vm834_vm3, %vm835_vm1 }
 0x36c   :  { %v831_v13 = vsub.f32 1.0, %v830_v27  ;;  %v861_v27 = vor.u32 1.1754944e-38, %v860_v31 }
 0x36d   :  { %v813_v30 = vmul.f32 %v2646_v35, %v812_v23 }
 0x36e   :  { %v832_v49 = vmul.f32 %v2648_v47, %v831_v13 }
 0x36f   :  { %v2650_v51 = vpop.eup %2649  ;;  %v814_v52 = vadd.f32 %v2646_v35, %v813_v30 }
 0x370   :  { %v833_v56 = vadd.f32 %v2648_v47, %v832_v49  ;;  %v850_v59 = vmul.f32 %v2650_v51, %v848_v37  ;;  %v2652_v62 = vpop.eup %2651  ;;  %vm855_vm8 = vweird.f32 %v2650_v51 }
 0x371   :  { %v818_v61 = vsel %vm817_vm4, %v2646_v35, %v814_v52  ;;  %v858_v35 = vand.u32 2147483647, %v848_v37  ;;  %vm856_vm10 = vmor %vm854_vm9, %vm855_vm8  ;;  %v2453_v37 = vld [vmem:[%s3786_s0 + $0xa8] sm:$0xff]  ;;  %v2455_v52 = vld [vmem:[%s3786_s0 + $0xb8] sm:$0xff] }
 0x372   :  { %v823_v63 = vsel %vm820_vm6, %v822_v55, %v818_v61  ;;  %v837_v0 = vsel %vm836_vm5, %v2648_v47, %v833_v56  ;;  %v851_v4 = vsub.f32 1.0, %v850_v59 }
 0x373   :  { %v842_v26 = vsel %vm839_vm7, %v841_v60, %v837_v0  ;;  %v865_v18 = vmul.f32 %v2652_v62, %v823_v63  ;;  %vm859_vm11 = vcmp.eq.f32.partialorder %v858_v35, 8.507059e+37 }
 0x374   :  { %v864_v14 = vmul.f32 %v842_v26, %v3229_v10  ;;  %v852_v22 = vmul.f32 %v2650_v51, %v851_v4  ;;  %v2452_v10 = vld [vmem:[%s3786_s0 + $0xa0] sm:$0xff] }
 0x376   :  { %v3280_v5 = vadd.f32 %v865_v18, %v864_v14  ;;  %v853_v15 = vadd.f32 %v2650_v51, %v852_v22  ;;  %v2454_v22 = vld [vmem:[%s3786_s0 + $0xb0] sm:$0xff] }
 0x378   :  { %2653 = vtanh.f32 %v3280_v5  ;;  %v857_v44 = vsel %vm856_vm10, %v2650_v51, %v853_v15 }
 0x379   :  { %v862_v23 = vsel %vm859_vm11, %v861_v27, %v857_v44 }
 0x37e   :  { %v2654_v47 = vpop.eup %2653 }
 0x37f   :  { %v868_v13 = vmul.f32 %v2654_v47, %v862_v23 }
 0x381   :  { %v869_v11 = vpack.c.bf16 %v868_v13, %v868_v13 }
 0x383   :  { %2451 = vst [vmem:[%s3790_s4 + $0x10] sm:$0xf] %v869_v11  ;;  %885 = vmatmul.bf16.vlgmr.msrb.gmra.mxu0 %v869_v11  ;;  %898 = vmatmul.bf16.vlgmr.msrb.gmra.mxu1 %v869_v11 }
 0x384   :  { %911 = vmatmul.bf16.vlgmr.msrb.gmra.mxu2 %v869_v11  ;;  %924 = vmatmul.bf16.vlgmr.msrb.gmra.mxu3 %v869_v11 }
 0x385   :  { %1131 = vmatpush.bf16.msrb.mxu0 %v2898_v3  ;;  %1144 = vmatpush.bf16.msrb.mxu1 %v2900_v7 }
 0x386   :  { %1157 = vmatpush.bf16.msrb.mxu2 %v2913_v21  ;;  %1170 = vmatpush.bf16.msrb.mxu3 %v2902_v8 }
 0x389   :  { %1132 = vmatpush.bf16.msrb.mxu0 %v2905_v12  ;;  %1145 = vmatpush.bf16.msrb.mxu1 %v2909_v16 }
 0x38a   :  { %1158 = vmatpush.bf16.msrb.mxu2 %v2925_v34  ;;  %1171 = vmatpush.bf16.msrb.mxu3 %v2911_v17 }
 0x38d   :  { %1133 = vmatpush.bf16.msrb.mxu0 %v2917_v28  ;;  %1146 = vmatpush.bf16.msrb.mxu1 %v2921_v32 }
 0x38e   :  { %1159 = vmatpush.bf16.msrb.mxu2 %v2931_v42  ;;  %1172 = vmatpush.bf16.msrb.mxu3 %v2923_v33 }
 0x391   :  { %1134 = vmatpush.bf16.msrb.mxu0 %v2929_v41  ;;  %1147 = vmatpush.bf16.msrb.mxu1 %v2935_v45 }
 0x392   :  { %1160 = vmatpush.bf16.msrb.mxu2 %v2943_v54  ;;  %1173 = vmatpush.bf16.msrb.mxu3 %v2937_v46 }
 0x395   :  { %1135 = vmatpush.bf16.msrb.mxu0 %v2941_v53  ;;  %1148 = vmatpush.bf16.msrb.mxu1 %v2947_v57 }
 0x396   :  { %1161 = vmatpush.bf16.msrb.mxu2 %v2955_v2  ;;  %1174 = vmatpush.bf16.msrb.mxu3 %v2949_v58 }
 0x399   :  { %1136 = vmatpush.bf16.msrb.mxu0 %v2953_v1  ;;  %1149 = vmatpush.bf16.msrb.mxu1 %v2959_v6 }
 0x39a   :  { %1162 = vmatpush.bf16.msrb.mxu2 %v2967_v20  ;;  %1175 = vmatpush.bf16.msrb.mxu3 %v2961_v9 }
 0x39d   :  { %1137 = vmatpush.bf16.msrb.mxu0 %v2965_v19  ;;  %1150 = vmatpush.bf16.msrb.mxu1 %v2971_v24 }
 0x39e   :  { %1163 = vmatpush.bf16.msrb.mxu2 %v2982_v38  ;;  %1176 = vmatpush.bf16.msrb.mxu3 %v2973_v25 }
 0x3a1   :  { %1138 = vmatpush.bf16.msrb.mxu0 %v2977_v36  ;;  %1151 = vmatpush.bf16.msrb.mxu1 %v2986_v39 }
 0x3a2   :  { %1164 = vmatpush.bf16.msrb.mxu2 %v2994_v48  ;;  %1177 = vmatpush.bf16.msrb.mxu3 %v2988_v40 }
 0x400   :  { %v886_v43 = vpop.f32.mrf.mxu0  ;;  %v899_v30 = vpop.f32.mrf.mxu1 }
 0x401   :  { %v929_v29 = vadd.f32 %v2452_v10, %v886_v43  ;;  %v930_v49 = vadd.f32 %v2453_v37, %v899_v30 }
 0x403   :  { %v2456_v50 = vmul.f32 -1.442695, %v929_v29  ;;  %v2457_v51 = vmul.f32 -1.442695, %v930_v49 }
 0x405   :  { %2655 = vpow2.f32 %v2456_v50 }
 0x406   :  { %2657 = vpow2.f32 %v2457_v51 }
 0x407   :  { %v912_v55 = vpop.f32.mrf.mxu2  ;;  %v925_v56 = vpop.f32.mrf.mxu3 }
 0x408   :  { %v932_v59 = vadd.f32 %v2455_v52, %v925_v56  ;;  %v888_v60 = vpop.f32.mrf.mxu0  ;;  %v901_v61 = vpop.f32.mrf.mxu1  ;;  %v931_v44 = vadd.f32 %v2454_v22, %v912_v55 }
 0x40a   :  { %v2458_v62 = vmul.f32 -1.442695, %v932_v59 }
 0x40b   :  { %v2656_v63 = vpop.eup %2655 }
 0x40c   :  { %v2658_v0 = vpop.eup %2657  ;;  %v936_v4 = vadd.f32 1.0, %v2656_v63  ;;  %2659 = vpow2.f32 %v2458_v62 }
 0x40d   :  { %v955_v26 = vadd.f32 1.0, %v2658_v0 }
 0x40e   :  { %2661 = vrcp.f32 %v936_v4  ;;  %v948_v10 = vand.u32 2147483648, %v936_v4  ;;  %v946_v30 = vand.u32 2147483647, %v936_v4  ;;  %vm942_vm14 = vweird.f32 %v936_v4 }
 0x40f   :  { %2663 = vrcp.f32 %v955_v26  ;;  %v914_v18 = vpop.f32.mrf.mxu2  ;;  %v927_v14 = vpop.f32.mrf.mxu3  ;;  %v967_v37 = vand.u32 2147483648, %v955_v26  ;;  %v965_v49 = vand.u32 2147483647, %v955_v26  ;;  %vm961_vm15 = vweird.f32 %v955_v26 }
 0x410   :  { %v949_v52 = vor.u32 1.1754944e-38, %v948_v10  ;;  %vm947_vm2 = vcmp.eq.f32.partialorder %v946_v30, 8.507059e+37 }
 0x411   :  { %v968_v59 = vor.u32 1.1754944e-38, %v967_v37  ;;  %vm966_vm3 = vcmp.eq.f32.partialorder %v965_v49, 8.507059e+37 }
 0x412   :  { %v2660_v15 = vpop.eup %2659 }
 0x413   :  { %v975_v31 = vadd.f32 1.0, %v2660_v15 }
 0x414   :  { %v2662_v35 = vpop.eup %2661 }
 0x415   :  { %v2664_v27 = vpop.eup %2663  ;;  %v938_v47 = vmul.f32 %v2662_v35, %v936_v4  ;;  %2665 = vrcp.f32 %v975_v31  ;;  %vm943_vm12 = vweird.f32 %v2662_v35  ;;  %vm981_vm5 = vweird.f32 %v975_v31 }
 0x416   :  { %v957_v23 = vmul.f32 %v2664_v27, %v955_v26  ;;  %2667 = vtanh.f32 %v931_v44  ;;  %vm962_vm13 = vweird.f32 %v2664_v27  ;;  %vm944_vm0 = vmor %vm942_vm14, %vm943_vm12  ;;  %v987_v44 = vand.u32 2147483648, %v975_v31 }
 0x417   :  { %v939_v13 = vsub.f32 1.0, %v938_v47  ;;  %vm963_vm1 = vmor %vm961_vm15, %vm962_vm13 }
 0x418   :  { %v958_v11 = vsub.f32 1.0, %v957_v23  ;;  %v988_v23 = vor.u32 1.1754944e-38, %v987_v44 }
 0x419   :  { %v940_v43 = vmul.f32 %v2662_v35, %v939_v13 }
 0x41a   :  { %v959_v29 = vmul.f32 %v2664_v27, %v958_v11 }
 0x41b   :  { %v2666_v50 = vpop.eup %2665  ;;  %v941_v51 = vadd.f32 %v2662_v35, %v940_v43 }
 0x41c   :  { %v960_v55 = vadd.f32 %v2664_v27, %v959_v29  ;;  %v977_v56 = vmul.f32 %v2666_v50, %v975_v31  ;;  %v2668_v61 = vpop.eup %2667  ;;  %vm982_vm4 = vweird.f32 %v2666_v50 }
 0x41d   :  { %v945_v60 = vsel %vm944_vm0, %v2662_v35, %v941_v51  ;;  %v985_v35 = vand.u32 2147483647, %v975_v31  ;;  %vm983_vm6 = vmor %vm981_vm5, %vm982_vm4  ;;  %v2461_v31 = vld [vmem:[%s3786_s0 + $0xc8] sm:$0xff]  ;;  %v2463_v51 = vld [vmem:[%s3786_s0 + $0xd8] sm:$0xff] }
 0x41e   :  { %v950_v62 = vsel %vm947_vm2, %v949_v52, %v945_v60  ;;  %v964_v63 = vsel %vm963_vm1, %v2664_v27, %v960_v55  ;;  %v978_v0 = vsub.f32 1.0, %v977_v56 }
 0x41f   :  { %v969_v18 = vsel %vm966_vm3, %v968_v59, %v964_v63  ;;  %v992_v14 = vmul.f32 %v2668_v61, %v950_v62  ;;  %vm986_vm7 = vcmp.eq.f32.partialorder %v985_v35, 8.507059e+37 }
 0x420   :  { %v991_v22 = vmul.f32 %v969_v18, %v3280_v5  ;;  %v979_v15 = vmul.f32 %v2666_v50, %v978_v0  ;;  %v2460_v5 = vld [vmem:[%s3786_s0 + $0xc0] sm:$0xff] }
 0x422   :  { %v3331_v4 = vadd.f32 %v992_v14, %v991_v22  ;;  %v980_v26 = vadd.f32 %v2666_v50, %v979_v15  ;;  %v2462_v15 = vld [vmem:[%s3786_s0 + $0xd0] sm:$0xff] }
 0x424   :  { %2669 = vtanh.f32 %v3331_v4  ;;  %v984_v47 = vsel %vm983_vm6, %v2666_v50, %v980_v26 }
 0x425   :  { %v989_v13 = vsel %vm986_vm7, %v988_v23, %v984_v47 }
 0x42a   :  { %v2670_v27 = vpop.eup %2669 }
 0x42b   :  { %v995_v11 = vmul.f32 %v2670_v27, %v989_v13 }
 0x42d   :  { %v996_v10 = vpack.c.bf16 %v995_v11, %v995_v11 }
 0x42f   :  { %2459 = vst [vmem:[%s3790_s4 + $0x14] sm:$0xf] %v996_v10  ;;  %1012 = vmatmul.bf16.vlgmr.msra.gmra.mxu0 %v996_v10  ;;  %1025 = vmatmul.bf16.vlgmr.msra.gmra.mxu1 %v996_v10 }
 0x430   :  { %1038 = vmatmul.bf16.vlgmr.msra.gmra.mxu2 %v996_v10  ;;  %1051 = vmatmul.bf16.vlgmr.msra.gmra.mxu3 %v996_v10 }
 0x431   :  { %1258 = vmatpush.bf16.msra.mxu0 %v2898_v3  ;;  %1271 = vmatpush.bf16.msra.mxu1 %v2900_v7 }
 0x432   :  { %1284 = vmatpush.bf16.msra.mxu2 %v2913_v21  ;;  %1297 = vmatpush.bf16.msra.mxu3 %v2902_v8 }
 0x435   :  { %1259 = vmatpush.bf16.msra.mxu0 %v2905_v12  ;;  %1272 = vmatpush.bf16.msra.mxu1 %v2909_v16 }
 0x436   :  { %1285 = vmatpush.bf16.msra.mxu2 %v2925_v34  ;;  %1298 = vmatpush.bf16.msra.mxu3 %v2911_v17 }
 0x439   :  { %1260 = vmatpush.bf16.msra.mxu0 %v2917_v28  ;;  %1273 = vmatpush.bf16.msra.mxu1 %v2921_v32 }
 0x43a   :  { %1286 = vmatpush.bf16.msra.mxu2 %v2931_v42  ;;  %1299 = vmatpush.bf16.msra.mxu3 %v2923_v33 }
 0x43d   :  { %1261 = vmatpush.bf16.msra.mxu0 %v2929_v41  ;;  %1274 = vmatpush.bf16.msra.mxu1 %v2935_v45 }
 0x43e   :  { %1287 = vmatpush.bf16.msra.mxu2 %v2943_v54  ;;  %1300 = vmatpush.bf16.msra.mxu3 %v2937_v46 }
 0x441   :  { %1262 = vmatpush.bf16.msra.mxu0 %v2941_v53  ;;  %1275 = vmatpush.bf16.msra.mxu1 %v2947_v57 }
 0x442   :  { %1288 = vmatpush.bf16.msra.mxu2 %v2955_v2  ;;  %1301 = vmatpush.bf16.msra.mxu3 %v2949_v58 }
 0x445   :  { %1263 = vmatpush.bf16.msra.mxu0 %v2953_v1  ;;  %1276 = vmatpush.bf16.msra.mxu1 %v2959_v6 }
 0x446   :  { %1289 = vmatpush.bf16.msra.mxu2 %v2967_v20  ;;  %1302 = vmatpush.bf16.msra.mxu3 %v2961_v9 }
 0x449   :  { %1264 = vmatpush.bf16.msra.mxu0 %v2965_v19  ;;  %1277 = vmatpush.bf16.msra.mxu1 %v2971_v24 }
 0x44a   :  { %1290 = vmatpush.bf16.msra.mxu2 %v2982_v38  ;;  %1303 = vmatpush.bf16.msra.mxu3 %v2973_v25 }
 0x44d   :  { %1265 = vmatpush.bf16.msra.mxu0 %v2977_v36  ;;  %1278 = vmatpush.bf16.msra.mxu1 %v2986_v39 }
 0x44e   :  { %1291 = vmatpush.bf16.msra.mxu2 %v2994_v48  ;;  %1304 = vmatpush.bf16.msra.mxu3 %v2988_v40 }
 0x4ac   :  { %v1013_v37 = vpop.f32.mrf.mxu0  ;;  %v1026_v43 = vpop.f32.mrf.mxu1 }
 0x4ad   :  { %v1056_v30 = vadd.f32 %v2460_v5, %v1013_v37  ;;  %v1057_v29 = vadd.f32 %v2461_v31, %v1026_v43 }
 0x4af   :  { %v2464_v49 = vmul.f32 -1.442695, %v1056_v30  ;;  %v2465_v50 = vmul.f32 -1.442695, %v1057_v29 }
 0x4b1   :  { %2671 = vpow2.f32 %v2464_v49 }
 0x4b2   :  { %2673 = vpow2.f32 %v2465_v50 }
 0x4b3   :  { %v1039_v52 = vpop.f32.mrf.mxu2  ;;  %v1052_v55 = vpop.f32.mrf.mxu3 }
 0x4b4   :  { %v1059_v56 = vadd.f32 %v2463_v51, %v1052_v55  ;;  %v1015_v59 = vpop.f32.mrf.mxu0  ;;  %v1028_v60 = vpop.f32.mrf.mxu1  ;;  %v1058_v47 = vadd.f32 %v2462_v15, %v1039_v52 }
 0x4b6   :  { %v2466_v61 = vmul.f32 -1.442695, %v1059_v56 }
 0x4b7   :  { %v2672_v62 = vpop.eup %2671 }
 0x4b8   :  { %v2674_v63 = vpop.eup %2673  ;;  %v1063_v0 = vadd.f32 1.0, %v2672_v62  ;;  %2675 = vpow2.f32 %v2466_v61 }
 0x4b9   :  { %v1082_v18 = vadd.f32 1.0, %v2674_v63 }
 0x4ba   :  { %2677 = vrcp.f32 %v1063_v0  ;;  %v1075_v5 = vand.u32 2147483648, %v1063_v0  ;;  %v1073_v43 = vand.u32 2147483647, %v1063_v0  ;;  %vm1069_vm10 = vweird.f32 %v1063_v0 }
 0x4bb   :  { %2679 = vrcp.f32 %v1082_v18  ;;  %v1041_v14 = vpop.f32.mrf.mxu2  ;;  %v1054_v22 = vpop.f32.mrf.mxu3  ;;  %v1094_v31 = vand.u32 2147483648, %v1082_v18  ;;  %v1092_v29 = vand.u32 2147483647, %v1082_v18  ;;  %vm1088_vm11 = vweird.f32 %v1082_v18 }
 0x4bc   :  { %v1076_v51 = vor.u32 1.1754944e-38, %v1075_v5  ;;  %vm1074_vm14 = vcmp.eq.f32.partialorder %v1073_v43, 8.507059e+37 }
 0x4bd   :  { %v1095_v56 = vor.u32 1.1754944e-38, %v1094_v31  ;;  %vm1093_vm15 = vcmp.eq.f32.partialorder %v1092_v29, 8.507059e+37 }
 0x4be   :  { %v2676_v26 = vpop.eup %2675 }
 0x4bf   :  { %v1102_v44 = vadd.f32 1.0, %v2676_v26 }
 0x4c0   :  { %v2678_v35 = vpop.eup %2677 }
 0x4c1   :  { %v2680_v23 = vpop.eup %2679  ;;  %v1065_v27 = vmul.f32 %v2678_v35, %v1063_v0  ;;  %2681 = vrcp.f32 %v1102_v44  ;;  %vm1070_vm8 = vweird.f32 %v2678_v35  ;;  %vm1108_vm1 = vweird.f32 %v1102_v44 }
 0x4c2   :  { %v1084_v13 = vmul.f32 %v2680_v23, %v1082_v18  ;;  %2683 = vtanh.f32 %v1058_v47  ;;  %vm1089_vm9 = vweird.f32 %v2680_v23  ;;  %vm1071_vm12 = vmor %vm1069_vm10, %vm1070_vm8  ;;  %v1114_v47 = vand.u32 2147483648, %v1102_v44 }
 0x4c3   :  { %v1066_v11 = vsub.f32 1.0, %v1065_v27  ;;  %vm1090_vm13 = vmor %vm1088_vm11, %vm1089_vm9 }
 0x4c4   :  { %v1085_v10 = vsub.f32 1.0, %v1084_v13  ;;  %v1115_v13 = vor.u32 1.1754944e-38, %v1114_v47 }
 0x4c5   :  { %v1067_v37 = vmul.f32 %v2678_v35, %v1066_v11 }
 0x4c6   :  { %v1086_v30 = vmul.f32 %v2680_v23, %v1085_v10 }
 0x4c7   :  { %v2682_v49 = vpop.eup %2681  ;;  %v1068_v50 = vadd.f32 %v2678_v35, %v1067_v37 }
 0x4c8   :  { %v1087_v52 = vadd.f32 %v2680_v23, %v1086_v30  ;;  %v1104_v55 = vmul.f32 %v2682_v49, %v1102_v44  ;;  %v2684_v60 = vpop.eup %2683  ;;  %vm1109_vm0 = vweird.f32 %v2682_v49 }
 0x4c9   :  { %v1072_v59 = vsel %vm1071_vm12, %v2678_v35, %v1068_v50  ;;  %v1112_v35 = vand.u32 2147483647, %v1102_v44  ;;  %vm1110_vm2 = vmor %vm1108_vm1, %vm1109_vm0  ;;  %v2469_v44 = vld [vmem:[%s3786_s0 + $0xe8] sm:$0xff]  ;;  %v2471_v50 = vld [vmem:[%s3786_s0 + $0xf8] sm:$0xff] }
 0x4ca   :  { %v1077_v61 = vsel %vm1074_vm14, %v1076_v51, %v1072_v59  ;;  %v1091_v62 = vsel %vm1090_vm13, %v2680_v23, %v1087_v52  ;;  %v1105_v63 = vsub.f32 1.0, %v1104_v55 }
 0x4cb   :  { %v1096_v14 = vsel %vm1093_vm15, %v1095_v56, %v1091_v62  ;;  %v1119_v22 = vmul.f32 %v2684_v60, %v1077_v61  ;;  %vm1113_vm3 = vcmp.eq.f32.partialorder %v1112_v35, 8.507059e+37 }
 0x4cc   :  { %v1118_v15 = vmul.f32 %v1096_v14, %v3331_v4  ;;  %v1106_v26 = vmul.f32 %v2682_v49, %v1105_v63  ;;  %v2468_v4 = vld [vmem:[%s3786_s0 + $0xe0] sm:$0xff] }
 0x4ce   :  { %v3382_v0 = vadd.f32 %v1119_v22, %v1118_v15  ;;  %v1107_v18 = vadd.f32 %v2682_v49, %v1106_v26  ;;  %v2470_v26 = vld [vmem:[%s3786_s0 + $0xf0] sm:$0xff] }
 0x4d0   :  { %2685 = vtanh.f32 %v3382_v0  ;;  %v1111_v27 = vsel %vm1110_vm2, %v2682_v49, %v1107_v18 }
 0x4d1   :  { %v1116_v11 = vsel %vm1113_vm3, %v1115_v13, %v1111_v27 }
 0x4d6   :  { %v2686_v23 = vpop.eup %2685 }
 0x4d7   :  { %v1122_v10 = vmul.f32 %v2686_v23, %v1116_v11 }
 0x4d9   :  { %v1123_v5 = vpack.c.bf16 %v1122_v10, %v1122_v10 }
 0x4db   :  { %2467 = vst [vmem:[%s3790_s4 + $0x18] sm:$0xf] %v1123_v5  ;;  %1139 = vmatmul.bf16.vlgmr.msrb.gmra.mxu0 %v1123_v5  ;;  %1152 = vmatmul.bf16.vlgmr.msrb.gmra.mxu1 %v1123_v5 }
 0x4dc   :  { %1165 = vmatmul.bf16.vlgmr.msrb.gmra.mxu2 %v1123_v5  ;;  %1178 = vmatmul.bf16.vlgmr.msrb.gmra.mxu3 %v1123_v5 }
 0x4dd   :  { %1385 = vmatpush.bf16.msrb.mxu0 %v2898_v3  ;;  %1398 = vmatpush.bf16.msrb.mxu1 %v2900_v7 }
 0x4de   :  { %1411 = vmatpush.bf16.msrb.mxu2 %v2913_v21  ;;  %1424 = vmatpush.bf16.msrb.mxu3 %v2902_v8 }
 0x4e1   :  { %1386 = vmatpush.bf16.msrb.mxu0 %v2905_v12  ;;  %1399 = vmatpush.bf16.msrb.mxu1 %v2909_v16 }
 0x4e2   :  { %1412 = vmatpush.bf16.msrb.mxu2 %v2925_v34  ;;  %1425 = vmatpush.bf16.msrb.mxu3 %v2911_v17 }
 0x4e5   :  { %1387 = vmatpush.bf16.msrb.mxu0 %v2917_v28  ;;  %1400 = vmatpush.bf16.msrb.mxu1 %v2921_v32 }
 0x4e6   :  { %1413 = vmatpush.bf16.msrb.mxu2 %v2931_v42  ;;  %1426 = vmatpush.bf16.msrb.mxu3 %v2923_v33 }
 0x4e9   :  { %1388 = vmatpush.bf16.msrb.mxu0 %v2929_v41  ;;  %1401 = vmatpush.bf16.msrb.mxu1 %v2935_v45 }
 0x4ea   :  { %1414 = vmatpush.bf16.msrb.mxu2 %v2943_v54  ;;  %1427 = vmatpush.bf16.msrb.mxu3 %v2937_v46 }
 0x4ed   :  { %1389 = vmatpush.bf16.msrb.mxu0 %v2941_v53  ;;  %1402 = vmatpush.bf16.msrb.mxu1 %v2947_v57 }
 0x4ee   :  { %1415 = vmatpush.bf16.msrb.mxu2 %v2955_v2  ;;  %1428 = vmatpush.bf16.msrb.mxu3 %v2949_v58 }
 0x4f1   :  { %1390 = vmatpush.bf16.msrb.mxu0 %v2953_v1  ;;  %1403 = vmatpush.bf16.msrb.mxu1 %v2959_v6 }
 0x4f2   :  { %1416 = vmatpush.bf16.msrb.mxu2 %v2967_v20  ;;  %1429 = vmatpush.bf16.msrb.mxu3 %v2961_v9 }
 0x4f5   :  { %1391 = vmatpush.bf16.msrb.mxu0 %v2965_v19  ;;  %1404 = vmatpush.bf16.msrb.mxu1 %v2971_v24 }
 0x4f6   :  { %1417 = vmatpush.bf16.msrb.mxu2 %v2982_v38  ;;  %1430 = vmatpush.bf16.msrb.mxu3 %v2973_v25 }
 0x4f9   :  { %1392 = vmatpush.bf16.msrb.mxu0 %v2977_v36  ;;  %1405 = vmatpush.bf16.msrb.mxu1 %v2986_v39 }
 0x4fa   :  { %1418 = vmatpush.bf16.msrb.mxu2 %v2994_v48  ;;  %1431 = vmatpush.bf16.msrb.mxu3 %v2988_v40 }
 0x558   :  { %v1140_v31 = vpop.f32.mrf.mxu0  ;;  %v1153_v37 = vpop.f32.mrf.mxu1 }
 0x559   :  { %v1183_v43 = vadd.f32 %v2468_v4, %v1140_v31  ;;  %v1184_v30 = vadd.f32 %v2469_v44, %v1153_v37 }
 0x55b   :  { %v2472_v29 = vmul.f32 -1.442695, %v1183_v43  ;;  %v2473_v49 = vmul.f32 -1.442695, %v1184_v30 }
 0x55d   :  { %2687 = vpow2.f32 %v2472_v29 }
 0x55e   :  { %2689 = vpow2.f32 %v2473_v49 }
 0x55f   :  { %v1166_v51 = vpop.f32.mrf.mxu2  ;;  %v1179_v52 = vpop.f32.mrf.mxu3 }
 0x560   :  { %v1186_v55 = vadd.f32 %v2471_v50, %v1179_v52  ;;  %v1142_v56 = vpop.f32.mrf.mxu0  ;;  %v1155_v59 = vpop.f32.mrf.mxu1  ;;  %v1185_v27 = vadd.f32 %v2470_v26, %v1166_v51 }
 0x562   :  { %v2474_v60 = vmul.f32 -1.442695, %v1186_v55 }
 0x563   :  { %v2688_v61 = vpop.eup %2687 }
 0x564   :  { %v2690_v62 = vpop.eup %2689  ;;  %v1190_v63 = vadd.f32 1.0, %v2688_v61  ;;  %2691 = vpow2.f32 %v2474_v60 }
 0x565   :  { %v1209_v14 = vadd.f32 1.0, %v2690_v62 }
 0x566   :  { %2693 = vrcp.f32 %v1190_v63  ;;  %v1202_v4 = vand.u32 2147483648, %v1190_v63  ;;  %v1200_v37 = vand.u32 2147483647, %v1190_v63  ;;  %vm1196_vm6 = vweird.f32 %v1190_v63 }
 0x567   :  { %2695 = vrcp.f32 %v1209_v14  ;;  %v1168_v22 = vpop.f32.mrf.mxu2  ;;  %v1181_v15 = vpop.f32.mrf.mxu3  ;;  %v1221_v44 = vand.u32 2147483648, %v1209_v14  ;;  %v1219_v30 = vand.u32 2147483647, %v1209_v14  ;;  %vm1215_vm7 = vweird.f32 %v1209_v14 }
 0x568   :  { %v1203_v50 = vor.u32 1.1754944e-38, %v1202_v4  ;;  %vm1201_vm10 = vcmp.eq.f32.partialorder %v1200_v37, 8.507059e+37 }
 0x569   :  { %v1222_v55 = vor.u32 1.1754944e-38, %v1221_v44  ;;  %vm1220_vm11 = vcmp.eq.f32.partialorder %v1219_v30, 8.507059e+37 }
 0x56a   :  { %v2692_v18 = vpop.eup %2691 }
 0x56b   :  { %v1229_v47 = vadd.f32 1.0, %v2692_v18 }
 0x56c   :  { %v2694_v35 = vpop.eup %2693 }
 0x56d   :  { %v2696_v13 = vpop.eup %2695  ;;  %v1192_v23 = vmul.f32 %v2694_v35, %v1190_v63  ;;  %2697 = vrcp.f32 %v1229_v47  ;;  %vm1197_vm4 = vweird.f32 %v2694_v35  ;;  %vm1235_vm13 = vweird.f32 %v1229_v47 }
 0x56e   :  { %v1211_v11 = vmul.f32 %v2696_v13, %v1209_v14  ;;  %2699 = vtanh.f32 %v1185_v27  ;;  %vm1216_vm5 = vweird.f32 %v2696_v13  ;;  %vm1198_vm8 = vmor %vm1196_vm6, %vm1197_vm4  ;;  %v1241_v27 = vand.u32 2147483648, %v1229_v47 }
 0x56f   :  { %v1193_v10 = vsub.f32 1.0, %v1192_v23  ;;  %vm1217_vm9 = vmor %vm1215_vm7, %vm1216_vm5 }
 0x570   :  { %v1212_v5 = vsub.f32 1.0, %v1211_v11  ;;  %v1242_v11 = vor.u32 1.1754944e-38, %v1241_v27 }
 0x571   :  { %v1194_v31 = vmul.f32 %v2694_v35, %v1193_v10 }
 0x572   :  { %v1213_v43 = vmul.f32 %v2696_v13, %v1212_v5 }
 0x573   :  { %v2698_v29 = vpop.eup %2697  ;;  %v1195_v49 = vadd.f32 %v2694_v35, %v1194_v31 }
 0x574   :  { %v1214_v51 = vadd.f32 %v2696_v13, %v1213_v43  ;;  %v1231_v52 = vmul.f32 %v2698_v29, %v1229_v47  ;;  %v2700_v59 = vpop.eup %2699  ;;  %vm1236_vm12 = vweird.f32 %v2698_v29 }
 0x575   :  { %v1199_v56 = vsel %vm1198_vm8, %v2694_v35, %v1195_v49  ;;  %v1239_v35 = vand.u32 2147483647, %v1229_v47  ;;  %vm1237_vm14 = vmor %vm1235_vm13, %vm1236_vm12  ;;  %v2477_v47 = vld [vmem:[%s3786_s0 + $0x108] sm:$0xff]  ;;  %v2479_v49 = vld [vmem:[%s3786_s0 + $0x118] sm:$0xff] }
 0x576   :  { %v1204_v60 = vsel %vm1201_vm10, %v1203_v50, %v1199_v56  ;;  %v1218_v61 = vsel %vm1217_vm9, %v2696_v13, %v1214_v51  ;;  %v1232_v62 = vsub.f32 1.0, %v1231_v52 }
 0x577   :  { %v1223_v22 = vsel %vm1220_vm11, %v1222_v55, %v1218_v61  ;;  %v1246_v15 = vmul.f32 %v2700_v59, %v1204_v60  ;;  %vm1240_vm15 = vcmp.eq.f32.partialorder %v1239_v35, 8.507059e+37 }
 0x578   :  { %v1245_v26 = vmul.f32 %v1223_v22, %v3382_v0  ;;  %v1233_v18 = vmul.f32 %v2698_v29, %v1232_v62  ;;  %v2476_v0 = vld [vmem:[%s3786_s0 + $0x100] sm:$0xff] }
 0x57a   :  { %v3433_v63 = vadd.f32 %v1246_v15, %v1245_v26  ;;  %v1234_v14 = vadd.f32 %v2698_v29, %v1233_v18  ;;  %v2478_v18 = vld [vmem:[%s3786_s0 + $0x110] sm:$0xff] }
 0x57c   :  { %2701 = vtanh.f32 %v3433_v63  ;;  %v1238_v23 = vsel %vm1237_vm14, %v2698_v29, %v1234_v14 }
 0x57d   :  { %v1243_v10 = vsel %vm1240_vm15, %v1242_v11, %v1238_v23 }
 0x582   :  { %v2702_v13 = vpop.eup %2701 }
 0x583   :  { %v1249_v5 = vmul.f32 %v2702_v13, %v1243_v10 }
 0x585   :  { %v1250_v4 = vpack.c.bf16 %v1249_v5, %v1249_v5 }
 0x587   :  { %2475 = vst [vmem:[%s3790_s4 + $0x1c] sm:$0xf] %v1250_v4  ;;  %1266 = vmatmul.bf16.vlgmr.msra.gmra.mxu0 %v1250_v4  ;;  %1279 = vmatmul.bf16.vlgmr.msra.gmra.mxu1 %v1250_v4 }
 0x588   :  { %1292 = vmatmul.bf16.vlgmr.msra.gmra.mxu2 %v1250_v4  ;;  %1305 = vmatmul.bf16.vlgmr.msra.gmra.mxu3 %v1250_v4 }
 0x589   :  { %1512 = vmatpush.bf16.msra.mxu0 %v2898_v3  ;;  %1525 = vmatpush.bf16.msra.mxu1 %v2900_v7 }
 0x58a   :  { %1538 = vmatpush.bf16.msra.mxu2 %v2913_v21  ;;  %1551 = vmatpush.bf16.msra.mxu3 %v2902_v8 }
 0x58d   :  { %1513 = vmatpush.bf16.msra.mxu0 %v2905_v12  ;;  %1526 = vmatpush.bf16.msra.mxu1 %v2909_v16 }
 0x58e   :  { %1539 = vmatpush.bf16.msra.mxu2 %v2925_v34  ;;  %1552 = vmatpush.bf16.msra.mxu3 %v2911_v17 }
 0x591   :  { %1514 = vmatpush.bf16.msra.mxu0 %v2917_v28  ;;  %1527 = vmatpush.bf16.msra.mxu1 %v2921_v32 }
 0x592   :  { %1540 = vmatpush.bf16.msra.mxu2 %v2931_v42  ;;  %1553 = vmatpush.bf16.msra.mxu3 %v2923_v33 }
 0x595   :  { %1515 = vmatpush.bf16.msra.mxu0 %v2929_v41  ;;  %1528 = vmatpush.bf16.msra.mxu1 %v2935_v45 }
 0x596   :  { %1541 = vmatpush.bf16.msra.mxu2 %v2943_v54  ;;  %1554 = vmatpush.bf16.msra.mxu3 %v2937_v46 }
 0x599   :  { %1516 = vmatpush.bf16.msra.mxu0 %v2941_v53  ;;  %1529 = vmatpush.bf16.msra.mxu1 %v2947_v57 }
 0x59a   :  { %1542 = vmatpush.bf16.msra.mxu2 %v2955_v2  ;;  %1555 = vmatpush.bf16.msra.mxu3 %v2949_v58 }
 0x59d   :  { %1517 = vmatpush.bf16.msra.mxu0 %v2953_v1  ;;  %1530 = vmatpush.bf16.msra.mxu1 %v2959_v6 }
 0x59e   :  { %1543 = vmatpush.bf16.msra.mxu2 %v2967_v20  ;;  %1556 = vmatpush.bf16.msra.mxu3 %v2961_v9 }
 0x5a1   :  { %1518 = vmatpush.bf16.msra.mxu0 %v2965_v19  ;;  %1531 = vmatpush.bf16.msra.mxu1 %v2971_v24 }
 0x5a2   :  { %1544 = vmatpush.bf16.msra.mxu2 %v2982_v38  ;;  %1557 = vmatpush.bf16.msra.mxu3 %v2973_v25 }
 0x5a5   :  { %1519 = vmatpush.bf16.msra.mxu0 %v2977_v36  ;;  %1532 = vmatpush.bf16.msra.mxu1 %v2986_v39 }
 0x5a6   :  { %1545 = vmatpush.bf16.msra.mxu2 %v2994_v48  ;;  %1558 = vmatpush.bf16.msra.mxu3 %v2988_v40 }
 0x604   :  { %v1267_v44 = vpop.f32.mrf.mxu0  ;;  %v1280_v31 = vpop.f32.mrf.mxu1 }
 0x605   :  { %v1310_v37 = vadd.f32 %v2476_v0, %v1267_v44  ;;  %v1311_v43 = vadd.f32 %v2477_v47, %v1280_v31 }
 0x607   :  { %v2480_v30 = vmul.f32 -1.442695, %v1310_v37  ;;  %v2481_v29 = vmul.f32 -1.442695, %v1311_v43 }
 0x609   :  { %2703 = vpow2.f32 %v2480_v30 }
 0x60a   :  { %2705 = vpow2.f32 %v2481_v29 }
 0x60b   :  { %v1293_v50 = vpop.f32.mrf.mxu2  ;;  %v1306_v51 = vpop.f32.mrf.mxu3 }
 0x60c   :  { %v1313_v52 = vadd.f32 %v2479_v49, %v1306_v51  ;;  %v1269_v55 = vpop.f32.mrf.mxu0  ;;  %v1282_v56 = vpop.f32.mrf.mxu1  ;;  %v1312_v23 = vadd.f32 %v2478_v18, %v1293_v50 }
 0x60e   :  { %v2482_v59 = vmul.f32 -1.442695, %v1313_v52 }
 0x60f   :  { %v2704_v60 = vpop.eup %2703 }
 0x610   :  { %v2706_v61 = vpop.eup %2705  ;;  %v1317_v62 = vadd.f32 1.0, %v2704_v60  ;;  %2707 = vpow2.f32 %v2482_v59 }
 0x611   :  { %v1336_v22 = vadd.f32 1.0, %v2706_v61 }
 0x612   :  { %2709 = vrcp.f32 %v1317_v62  ;;  %v1329_v0 = vand.u32 2147483648, %v1317_v62  ;;  %v1327_v31 = vand.u32 2147483647, %v1317_v62  ;;  %vm1323_vm2 = vweird.f32 %v1317_v62 }
 0x613   :  { %2711 = vrcp.f32 %v1336_v22  ;;  %v1295_v15 = vpop.f32.mrf.mxu2  ;;  %v1308_v26 = vpop.f32.mrf.mxu3  ;;  %v1348_v47 = vand.u32 2147483648, %v1336_v22  ;;  %v1346_v43 = vand.u32 2147483647, %v1336_v22  ;;  %vm1342_vm3 = vweird.f32 %v1336_v22 }
 0x614   :  { %v1330_v49 = vor.u32 1.1754944e-38, %v1329_v0  ;;  %vm1328_vm6 = vcmp.eq.f32.partialorder %v1327_v31, 8.507059e+37 }
 0x615   :  { %v1349_v52 = vor.u32 1.1754944e-38, %v1348_v47  ;;  %vm1347_vm7 = vcmp.eq.f32.partialorder %v1346_v43, 8.507059e+37 }
 0x616   :  { %v2708_v14 = vpop.eup %2707 }
 0x617   :  { %v1356_v27 = vadd.f32 1.0, %v2708_v14 }
 0x618   :  { %v2710_v35 = vpop.eup %2709 }
 0x619   :  { %v2712_v11 = vpop.eup %2711  ;;  %v1319_v13 = vmul.f32 %v2710_v35, %v1317_v62  ;;  %2713 = vrcp.f32 %v1356_v27  ;;  %vm1324_vm0 = vweird.f32 %v2710_v35  ;;  %vm1362_vm9 = vweird.f32 %v1356_v27 }
 0x61a   :  { %v1338_v10 = vmul.f32 %v2712_v11, %v1336_v22  ;;  %2715 = vtanh.f32 %v1312_v23  ;;  %vm1343_vm1 = vweird.f32 %v2712_v11  ;;  %vm1325_vm4 = vmor %vm1323_vm2, %vm1324_vm0  ;;  %v1368_v23 = vand.u32 2147483648, %v1356_v27 }
 0x61b   :  { %v1320_v5 = vsub.f32 1.0, %v1319_v13  ;;  %vm1344_vm5 = vmor %vm1342_vm3, %vm1343_vm1 }
 0x61c   :  { %v1339_v4 = vsub.f32 1.0, %v1338_v10  ;;  %v1369_v10 = vor.u32 1.1754944e-38, %v1368_v23 }
 0x61d   :  { %v1321_v44 = vmul.f32 %v2710_v35, %v1320_v5 }
 0x61e   :  { %v1340_v37 = vmul.f32 %v2712_v11, %v1339_v4 }
 0x61f   :  { %v2714_v30 = vpop.eup %2713  ;;  %v1322_v29 = vadd.f32 %v2710_v35, %v1321_v44 }
 0x620   :  { %v1341_v50 = vadd.f32 %v2712_v11, %v1340_v37  ;;  %v1358_v51 = vmul.f32 %v2714_v30, %v1356_v27  ;;  %v2716_v56 = vpop.eup %2715  ;;  %vm1363_vm8 = vweird.f32 %v2714_v30 }
 0x621   :  { %v1326_v55 = vsel %vm1325_vm4, %v2710_v35, %v1322_v29  ;;  %v1366_v35 = vand.u32 2147483647, %v1356_v27  ;;  %vm1364_vm10 = vmor %vm1362_vm9, %vm1363_vm8  ;;  %v2485_v27 = vld [vmem:[%s3786_s0 + $0x128] sm:$0xff]  ;;  %v2487_v29 = vld [vmem:[%s3786_s0 + $0x138] sm:$0xff] }
 0x622   :  { %v1331_v59 = vsel %vm1328_vm6, %v1330_v49, %v1326_v55  ;;  %v1345_v60 = vsel %vm1344_vm5, %v2712_v11, %v1341_v50  ;;  %v1359_v61 = vsub.f32 1.0, %v1358_v51 }
 0x623   :  { %v1350_v15 = vsel %vm1347_vm7, %v1349_v52, %v1345_v60  ;;  %v1373_v26 = vmul.f32 %v2716_v56, %v1331_v59  ;;  %vm1367_vm11 = vcmp.eq.f32.partialorder %v1366_v35, 8.507059e+37 }
 0x624   :  { %v1372_v18 = vmul.f32 %v1350_v15, %v3433_v63  ;;  %v1360_v14 = vmul.f32 %v2714_v30, %v1359_v61  ;;  %v2484_v63 = vld [vmem:[%s3786_s0 + $0x120] sm:$0xff] }
 0x626   :  { %v3484_v62 = vadd.f32 %v1373_v26, %v1372_v18  ;;  %v1361_v22 = vadd.f32 %v2714_v30, %v1360_v14  ;;  %v2486_v14 = vld [vmem:[%s3786_s0 + $0x130] sm:$0xff] }
 0x628   :  { %2717 = vtanh.f32 %v3484_v62  ;;  %v1365_v13 = vsel %vm1364_vm10, %v2714_v30, %v1361_v22 }
 0x629   :  { %v1370_v5 = vsel %vm1367_vm11, %v1369_v10, %v1365_v13 }
 0x62e   :  { %v2718_v11 = vpop.eup %2717 }
 0x62f   :  { %v1376_v4 = vmul.f32 %v2718_v11, %v1370_v5 }
 0x631   :  { %v1377_v0 = vpack.c.bf16 %v1376_v4, %v1376_v4 }
 0x633   :  { %2483 = vst [vmem:[%s3790_s4 + $0x20] sm:$0xf] %v1377_v0  ;;  %1393 = vmatmul.bf16.vlgmr.msrb.gmra.mxu0 %v1377_v0  ;;  %1406 = vmatmul.bf16.vlgmr.msrb.gmra.mxu1 %v1377_v0 }
 0x634   :  { %1419 = vmatmul.bf16.vlgmr.msrb.gmra.mxu2 %v1377_v0  ;;  %1432 = vmatmul.bf16.vlgmr.msrb.gmra.mxu3 %v1377_v0 }
 0x635   :  { %1639 = vmatpush.bf16.msrb.mxu0 %v2898_v3  ;;  %1652 = vmatpush.bf16.msrb.mxu1 %v2900_v7 }
 0x636   :  { %1665 = vmatpush.bf16.msrb.mxu2 %v2913_v21  ;;  %1678 = vmatpush.bf16.msrb.mxu3 %v2902_v8 }
 0x639   :  { %1640 = vmatpush.bf16.msrb.mxu0 %v2905_v12  ;;  %1653 = vmatpush.bf16.msrb.mxu1 %v2909_v16 }
 0x63a   :  { %1666 = vmatpush.bf16.msrb.mxu2 %v2925_v34  ;;  %1679 = vmatpush.bf16.msrb.mxu3 %v2911_v17 }
 0x63d   :  { %1641 = vmatpush.bf16.msrb.mxu0 %v2917_v28  ;;  %1654 = vmatpush.bf16.msrb.mxu1 %v2921_v32 }
 0x63e   :  { %1667 = vmatpush.bf16.msrb.mxu2 %v2931_v42  ;;  %1680 = vmatpush.bf16.msrb.mxu3 %v2923_v33 }
 0x641   :  { %1642 = vmatpush.bf16.msrb.mxu0 %v2929_v41  ;;  %1655 = vmatpush.bf16.msrb.mxu1 %v2935_v45 }
 0x642   :  { %1668 = vmatpush.bf16.msrb.mxu2 %v2943_v54  ;;  %1681 = vmatpush.bf16.msrb.mxu3 %v2937_v46 }
 0x645   :  { %1643 = vmatpush.bf16.msrb.mxu0 %v2941_v53  ;;  %1656 = vmatpush.bf16.msrb.mxu1 %v2947_v57 }
 0x646   :  { %1669 = vmatpush.bf16.msrb.mxu2 %v2955_v2  ;;  %1682 = vmatpush.bf16.msrb.mxu3 %v2949_v58 }
 0x649   :  { %1644 = vmatpush.bf16.msrb.mxu0 %v2953_v1  ;;  %1657 = vmatpush.bf16.msrb.mxu1 %v2959_v6 }
 0x64a   :  { %1670 = vmatpush.bf16.msrb.mxu2 %v2967_v20  ;;  %1683 = vmatpush.bf16.msrb.mxu3 %v2961_v9 }
 0x64d   :  { %1645 = vmatpush.bf16.msrb.mxu0 %v2965_v19  ;;  %1658 = vmatpush.bf16.msrb.mxu1 %v2971_v24 }
 0x64e   :  { %1671 = vmatpush.bf16.msrb.mxu2 %v2982_v38  ;;  %1684 = vmatpush.bf16.msrb.mxu3 %v2973_v25 }
 0x651   :  { %1646 = vmatpush.bf16.msrb.mxu0 %v2977_v36  ;;  %1659 = vmatpush.bf16.msrb.mxu1 %v2986_v39 }
 0x652   :  { %1672 = vmatpush.bf16.msrb.mxu2 %v2994_v48  ;;  %1685 = vmatpush.bf16.msrb.mxu3 %v2988_v40 }
 0x6b0   :  { %v1394_v47 = vpop.f32.mrf.mxu0  ;;  %v1407_v44 = vpop.f32.mrf.mxu1 }
 0x6b1   :  { %v1437_v31 = vadd.f32 %v2484_v63, %v1394_v47  ;;  %v1438_v37 = vadd.f32 %v2485_v27, %v1407_v44 }
 0x6b3   :  { %v2488_v43 = vmul.f32 -1.442695, %v1437_v31  ;;  %v2489_v30 = vmul.f32 -1.442695, %v1438_v37 }
 0x6b5   :  { %2719 = vpow2.f32 %v2488_v43 }
 0x6b6   :  { %2721 = vpow2.f32 %v2489_v30 }
 0x6b7   :  { %v1420_v49 = vpop.f32.mrf.mxu2  ;;  %v1433_v50 = vpop.f32.mrf.mxu3 }
 0x6b8   :  { %v1440_v51 = vadd.f32 %v2487_v29, %v1433_v50  ;;  %v1396_v52 = vpop.f32.mrf.mxu0  ;;  %v1409_v55 = vpop.f32.mrf.mxu1  ;;  %v1439_v13 = vadd.f32 %v2486_v14, %v1420_v49 }
 0x6ba   :  { %v2490_v56 = vmul.f32 -1.442695, %v1440_v51 }
 0x6bb   :  { %v2720_v59 = vpop.eup %2719 }
 0x6bc   :  { %v2722_v60 = vpop.eup %2721  ;;  %v1444_v61 = vadd.f32 1.0, %v2720_v59  ;;  %2723 = vpow2.f32 %v2490_v56 }
 0x6bd   :  { %v1463_v15 = vadd.f32 1.0, %v2722_v60 }
 0x6be   :  { %2725 = vrcp.f32 %v1444_v61  ;;  %v1456_v63 = vand.u32 2147483648, %v1444_v61  ;;  %v1454_v44 = vand.u32 2147483647, %v1444_v61  ;;  %vm1450_vm14 = vweird.f32 %v1444_v61 }
 0x6bf   :  { %2727 = vrcp.f32 %v1463_v15  ;;  %v1422_v26 = vpop.f32.mrf.mxu2  ;;  %v1435_v18 = vpop.f32.mrf.mxu3  ;;  %v1475_v27 = vand.u32 2147483648, %v1463_v15  ;;  %v1473_v37 = vand.u32 2147483647, %v1463_v15  ;;  %vm1469_vm15 = vweird.f32 %v1463_v15 }
 0x6c0   :  { %v1457_v29 = vor.u32 1.1754944e-38, %v1456_v63  ;;  %vm1455_vm2 = vcmp.eq.f32.partialorder %v1454_v44, 8.507059e+37 }
 0x6c1   :  { %v1476_v51 = vor.u32 1.1754944e-38, %v1475_v27  ;;  %vm1474_vm3 = vcmp.eq.f32.partialorder %v1473_v37, 8.507059e+37 }
 0x6c2   :  { %v2724_v22 = vpop.eup %2723 }
 0x6c3   :  { %v1483_v23 = vadd.f32 1.0, %v2724_v22 }
 0x6c4   :  { %v2726_v35 = vpop.eup %2725 }
 0x6c5   :  { %v2728_v10 = vpop.eup %2727  ;;  %v1446_v11 = vmul.f32 %v2726_v35, %v1444_v61  ;;  %2729 = vrcp.f32 %v1483_v23  ;;  %vm1451_vm12 = vweird.f32 %v2726_v35  ;;  %vm1489_vm5 = vweird.f32 %v1483_v23 }
 0x6c6   :  { %v1465_v5 = vmul.f32 %v2728_v10, %v1463_v15  ;;  %2731 = vtanh.f32 %v1439_v13  ;;  %vm1470_vm13 = vweird.f32 %v2728_v10  ;;  %vm1452_vm0 = vmor %vm1450_vm14, %vm1451_vm12  ;;  %v1495_v13 = vand.u32 2147483648, %v1483_v23 }
 0x6c7   :  { %v1447_v4 = vsub.f32 1.0, %v1446_v11  ;;  %vm1471_vm1 = vmor %vm1469_vm15, %vm1470_vm13 }
 0x6c8   :  { %v1466_v0 = vsub.f32 1.0, %v1465_v5  ;;  %v1496_v5 = vor.u32 1.1754944e-38, %v1495_v13 }
 0x6c9   :  { %v1448_v47 = vmul.f32 %v2726_v35, %v1447_v4 }
 0x6ca   :  { %v1467_v31 = vmul.f32 %v2728_v10, %v1466_v0 }
 0x6cb   :  { %v2730_v43 = vpop.eup %2729  ;;  %v1449_v30 = vadd.f32 %v2726_v35, %v1448_v47 }
 0x6cc   :  { %v1468_v49 = vadd.f32 %v2728_v10, %v1467_v31  ;;  %v1485_v50 = vmul.f32 %v2730_v43, %v1483_v23  ;;  %v2732_v55 = vpop.eup %2731  ;;  %vm1490_vm4 = vweird.f32 %v2730_v43 }
 0x6cd   :  { %v1453_v52 = vsel %vm1452_vm0, %v2726_v35, %v1449_v30  ;;  %v1493_v35 = vand.u32 2147483647, %v1483_v23  ;;  %vm1491_vm6 = vmor %vm1489_vm5, %vm1490_vm4  ;;  %v2493_v23 = vld [vmem:[%s3786_s0 + $0x148] sm:$0xff]  ;;  %v2495_v30 = vld [vmem:[%s3786_s0 + $0x158] sm:$0xff] }
 0x6ce   :  { %v1458_v56 = vsel %vm1455_vm2, %v1457_v29, %v1453_v52  ;;  %v1472_v59 = vsel %vm1471_vm1, %v2728_v10, %v1468_v49  ;;  %v1486_v60 = vsub.f32 1.0, %v1485_v50 }
 0x6cf   :  { %v1477_v26 = vsel %vm1474_vm3, %v1476_v51, %v1472_v59  ;;  %v1500_v18 = vmul.f32 %v2732_v55, %v1458_v56  ;;  %vm1494_vm7 = vcmp.eq.f32.partialorder %v1493_v35, 8.507059e+37 }
 0x6d0   :  { %v1499_v14 = vmul.f32 %v1477_v26, %v3484_v62  ;;  %v1487_v22 = vmul.f32 %v2730_v43, %v1486_v60  ;;  %v2492_v62 = vld [vmem:[%s3786_s0 + $0x140] sm:$0xff] }
 0x6d2   :  { %v3535_v61 = vadd.f32 %v1500_v18, %v1499_v14  ;;  %v1488_v15 = vadd.f32 %v2730_v43, %v1487_v22  ;;  %v2494_v22 = vld [vmem:[%s3786_s0 + $0x150] sm:$0xff] }
 0x6d4   :  { %2733 = vtanh.f32 %v3535_v61  ;;  %v1492_v11 = vsel %vm1491_vm6, %v2730_v43, %v1488_v15 }
 0x6d5   :  { %v1497_v4 = vsel %vm1494_vm7, %v1496_v5, %v1492_v11 }
 0x6da   :  { %v2734_v10 = vpop.eup %2733 }
 0x6db   :  { %v1503_v0 = vmul.f32 %v2734_v10, %v1497_v4 }
 0x6dd   :  { %v1504_v63 = vpack.c.bf16 %v1503_v0, %v1503_v0 }
 0x6df   :  { %2491 = vst [vmem:[%s3790_s4 + $0x24] sm:$0xf] %v1504_v63  ;;  %1520 = vmatmul.bf16.vlgmr.msra.gmra.mxu0 %v1504_v63  ;;  %1533 = vmatmul.bf16.vlgmr.msra.gmra.mxu1 %v1504_v63 }
 0x6e0   :  { %1546 = vmatmul.bf16.vlgmr.msra.gmra.mxu2 %v1504_v63  ;;  %1559 = vmatmul.bf16.vlgmr.msra.gmra.mxu3 %v1504_v63 }
 0x6e1   :  { %1766 = vmatpush.bf16.msra.mxu0 %v2898_v3  ;;  %1779 = vmatpush.bf16.msra.mxu1 %v2900_v7 }
 0x6e2   :  { %1792 = vmatpush.bf16.msra.mxu2 %v2913_v21  ;;  %1805 = vmatpush.bf16.msra.mxu3 %v2902_v8 }
 0x6e5   :  { %1767 = vmatpush.bf16.msra.mxu0 %v2905_v12  ;;  %1780 = vmatpush.bf16.msra.mxu1 %v2909_v16 }
 0x6e6   :  { %1793 = vmatpush.bf16.msra.mxu2 %v2925_v34  ;;  %1806 = vmatpush.bf16.msra.mxu3 %v2911_v17 }
 0x6e9   :  { %1768 = vmatpush.bf16.msra.mxu0 %v2917_v28  ;;  %1781 = vmatpush.bf16.msra.mxu1 %v2921_v32 }
 0x6ea   :  { %1794 = vmatpush.bf16.msra.mxu2 %v2931_v42  ;;  %1807 = vmatpush.bf16.msra.mxu3 %v2923_v33 }
 0x6ed   :  { %1769 = vmatpush.bf16.msra.mxu0 %v2929_v41  ;;  %1782 = vmatpush.bf16.msra.mxu1 %v2935_v45 }
 0x6ee   :  { %1795 = vmatpush.bf16.msra.mxu2 %v2943_v54  ;;  %1808 = vmatpush.bf16.msra.mxu3 %v2937_v46 }
 0x6f1   :  { %1770 = vmatpush.bf16.msra.mxu0 %v2941_v53  ;;  %1783 = vmatpush.bf16.msra.mxu1 %v2947_v57 }
 0x6f2   :  { %1796 = vmatpush.bf16.msra.mxu2 %v2955_v2  ;;  %1809 = vmatpush.bf16.msra.mxu3 %v2949_v58 }
 0x6f5   :  { %1771 = vmatpush.bf16.msra.mxu0 %v2953_v1  ;;  %1784 = vmatpush.bf16.msra.mxu1 %v2959_v6 }
 0x6f6   :  { %1797 = vmatpush.bf16.msra.mxu2 %v2967_v20  ;;  %1810 = vmatpush.bf16.msra.mxu3 %v2961_v9 }
 0x6f9   :  { %1772 = vmatpush.bf16.msra.mxu0 %v2965_v19  ;;  %1785 = vmatpush.bf16.msra.mxu1 %v2971_v24 }
 0x6fa   :  { %1798 = vmatpush.bf16.msra.mxu2 %v2982_v38  ;;  %1811 = vmatpush.bf16.msra.mxu3 %v2973_v25 }
 0x6fd   :  { %1773 = vmatpush.bf16.msra.mxu0 %v2977_v36  ;;  %1786 = vmatpush.bf16.msra.mxu1 %v2986_v39 }
 0x6fe   :  { %1799 = vmatpush.bf16.msra.mxu2 %v2994_v48  ;;  %1812 = vmatpush.bf16.msra.mxu3 %v2988_v40 }
 0x75c   :  { %v1521_v27 = vpop.f32.mrf.mxu0  ;;  %v1534_v47 = vpop.f32.mrf.mxu1 }
 0x75d   :  { %v1564_v44 = vadd.f32 %v2492_v62, %v1521_v27  ;;  %v1565_v31 = vadd.f32 %v2493_v23, %v1534_v47 }
 0x75f   :  { %v2496_v37 = vmul.f32 -1.442695, %v1564_v44  ;;  %v2497_v43 = vmul.f32 -1.442695, %v1565_v31 }
 0x761   :  { %2735 = vpow2.f32 %v2496_v37 }
 0x762   :  { %2737 = vpow2.f32 %v2497_v43 }
 0x763   :  { %v1547_v29 = vpop.f32.mrf.mxu2  ;;  %v1560_v49 = vpop.f32.mrf.mxu3 }
 0x764   :  { %v1567_v50 = vadd.f32 %v2495_v30, %v1560_v49  ;;  %v1523_v51 = vpop.f32.mrf.mxu0  ;;  %v1536_v52 = vpop.f32.mrf.mxu1  ;;  %v1566_v11 = vadd.f32 %v2494_v22, %v1547_v29 }
 0x766   :  { %v2498_v55 = vmul.f32 -1.442695, %v1567_v50 }
 0x767   :  { %v2736_v56 = vpop.eup %2735 }
 0x768   :  { %v2738_v59 = vpop.eup %2737  ;;  %v1571_v60 = vadd.f32 1.0, %v2736_v56  ;;  %2739 = vpow2.f32 %v2498_v55 }
 0x769   :  { %v1590_v26 = vadd.f32 1.0, %v2738_v59 }
 0x76a   :  { %2741 = vrcp.f32 %v1571_v60  ;;  %v1583_v62 = vand.u32 2147483648, %v1571_v60  ;;  %v1581_v47 = vand.u32 2147483647, %v1571_v60  ;;  %vm1577_vm10 = vweird.f32 %v1571_v60 }
 0x76b   :  { %2743 = vrcp.f32 %v1590_v26  ;;  %v1549_v18 = vpop.f32.mrf.mxu2  ;;  %v1562_v14 = vpop.f32.mrf.mxu3  ;;  %v1602_v23 = vand.u32 2147483648, %v1590_v26  ;;  %v1600_v31 = vand.u32 2147483647, %v1590_v26  ;;  %vm1596_vm11 = vweird.f32 %v1590_v26 }
 0x76c   :  { %v1584_v30 = vor.u32 1.1754944e-38, %v1583_v62  ;;  %vm1582_vm14 = vcmp.eq.f32.partialorder %v1581_v47, 8.507059e+37 }
 0x76d   :  { %v1603_v50 = vor.u32 1.1754944e-38, %v1602_v23  ;;  %vm1601_vm15 = vcmp.eq.f32.partialorder %v1600_v31, 8.507059e+37 }
 0x76e   :  { %v2740_v15 = vpop.eup %2739 }
 0x76f   :  { %v1610_v13 = vadd.f32 1.0, %v2740_v15 }
 0x770   :  { %v2742_v35 = vpop.eup %2741 }
 0x771   :  { %v2744_v5 = vpop.eup %2743  ;;  %v1573_v10 = vmul.f32 %v2742_v35, %v1571_v60  ;;  %2745 = vrcp.f32 %v1610_v13  ;;  %vm1578_vm8 = vweird.f32 %v2742_v35  ;;  %vm1616_vm1 = vweird.f32 %v1610_v13 }
 0x772   :  { %v1592_v4 = vmul.f32 %v2744_v5, %v1590_v26  ;;  %2747 = vtanh.f32 %v1566_v11  ;;  %vm1597_vm9 = vweird.f32 %v2744_v5  ;;  %vm1579_vm12 = vmor %vm1577_vm10, %vm1578_vm8  ;;  %v1622_v11 = vand.u32 2147483648, %v1610_v13 }
 0x773   :  { %v1574_v0 = vsub.f32 1.0, %v1573_v10  ;;  %vm1598_vm13 = vmor %vm1596_vm11, %vm1597_vm9 }
 0x774   :  { %v1593_v63 = vsub.f32 1.0, %v1592_v4  ;;  %v1623_v4 = vor.u32 1.1754944e-38, %v1622_v11 }
 0x775   :  { %v1575_v27 = vmul.f32 %v2742_v35, %v1574_v0 }
 0x776   :  { %v1594_v44 = vmul.f32 %v2744_v5, %v1593_v63 }
 0x777   :  { %v2746_v37 = vpop.eup %2745  ;;  %v1576_v43 = vadd.f32 %v2742_v35, %v1575_v27 }
 0x778   :  { %v1595_v29 = vadd.f32 %v2744_v5, %v1594_v44  ;;  %v1612_v49 = vmul.f32 %v2746_v37, %v1610_v13  ;;  %v2748_v52 = vpop.eup %2747  ;;  %vm1617_vm0 = vweird.f32 %v2746_v37 }
 0x779   :  { %v1580_v51 = vsel %vm1579_vm12, %v2742_v35, %v1576_v43  ;;  %v1620_v35 = vand.u32 2147483647, %v1610_v13  ;;  %vm1618_vm2 = vmor %vm1616_vm1, %vm1617_vm0  ;;  %v2501_v13 = vld [vmem:[%s3786_s0 + $0x168] sm:$0xff]  ;;  %v2503_v43 = vld [vmem:[%s3786_s0 + $0x178] sm:$0xff] }
 0x77a   :  { %v1585_v55 = vsel %vm1582_vm14, %v1584_v30, %v1580_v51  ;;  %v1599_v56 = vsel %vm1598_vm13, %v2744_v5, %v1595_v29  ;;  %v1613_v59 = vsub.f32 1.0, %v1612_v49 }
 0x77b   :  { %v1604_v18 = vsel %vm1601_vm15, %v1603_v50, %v1599_v56  ;;  %v1627_v14 = vmul.f32 %v2748_v52, %v1585_v55  ;;  %vm1621_vm3 = vcmp.eq.f32.partialorder %v1620_v35, 8.507059e+37 }
 0x77c   :  { %v1626_v22 = vmul.f32 %v1604_v18, %v3535_v61  ;;  %v1614_v15 = vmul.f32 %v2746_v37, %v1613_v59  ;;  %v2500_v61 = vld [vmem:[%s3786_s0 + $0x160] sm:$0xff] }
 0x77e   :  { %v3586_v60 = vadd.f32 %v1627_v14, %v1626_v22  ;;  %v1615_v26 = vadd.f32 %v2746_v37, %v1614_v15  ;;  %v2502_v15 = vld [vmem:[%s3786_s0 + $0x170] sm:$0xff] }
 0x780   :  { %2749 = vtanh.f32 %v3586_v60  ;;  %v1619_v10 = vsel %vm1618_vm2, %v2746_v37, %v1615_v26 }
 0x781   :  { %v1624_v0 = vsel %vm1621_vm3, %v1623_v4, %v1619_v10 }
 0x786   :  { %v2750_v5 = vpop.eup %2749 }
 0x787   :  { %v1630_v63 = vmul.f32 %v2750_v5, %v1624_v0 }
 0x789   :  { %v1631_v62 = vpack.c.bf16 %v1630_v63, %v1630_v63 }
 0x78b   :  { %2499 = vst [vmem:[%s3790_s4 + $0x28] sm:$0xf] %v1631_v62  ;;  %1647 = vmatmul.bf16.vlgmr.msrb.gmra.mxu0 %v1631_v62  ;;  %1660 = vmatmul.bf16.vlgmr.msrb.gmra.mxu1 %v1631_v62 }
 0x78c   :  { %1673 = vmatmul.bf16.vlgmr.msrb.gmra.mxu2 %v1631_v62  ;;  %1686 = vmatmul.bf16.vlgmr.msrb.gmra.mxu3 %v1631_v62 }
 0x78d   :  { %1893 = vmatpush.bf16.msrb.mxu0 %v2898_v3  ;;  %1906 = vmatpush.bf16.msrb.mxu1 %v2900_v7 }
 0x78e   :  { %1919 = vmatpush.bf16.msrb.mxu2 %v2913_v21  ;;  %1932 = vmatpush.bf16.msrb.mxu3 %v2902_v8 }
 0x791   :  { %1894 = vmatpush.bf16.msrb.mxu0 %v2905_v12  ;;  %1907 = vmatpush.bf16.msrb.mxu1 %v2909_v16 }
 0x792   :  { %1920 = vmatpush.bf16.msrb.mxu2 %v2925_v34  ;;  %1933 = vmatpush.bf16.msrb.mxu3 %v2911_v17 }
 0x795   :  { %1895 = vmatpush.bf16.msrb.mxu0 %v2917_v28  ;;  %1908 = vmatpush.bf16.msrb.mxu1 %v2921_v32 }
 0x796   :  { %1921 = vmatpush.bf16.msrb.mxu2 %v2931_v42  ;;  %1934 = vmatpush.bf16.msrb.mxu3 %v2923_v33 }
 0x799   :  { %1896 = vmatpush.bf16.msrb.mxu0 %v2929_v41  ;;  %1909 = vmatpush.bf16.msrb.mxu1 %v2935_v45 }
 0x79a   :  { %1922 = vmatpush.bf16.msrb.mxu2 %v2943_v54  ;;  %1935 = vmatpush.bf16.msrb.mxu3 %v2937_v46 }
 0x79d   :  { %1897 = vmatpush.bf16.msrb.mxu0 %v2941_v53  ;;  %1910 = vmatpush.bf16.msrb.mxu1 %v2947_v57 }
 0x79e   :  { %1923 = vmatpush.bf16.msrb.mxu2 %v2955_v2  ;;  %1936 = vmatpush.bf16.msrb.mxu3 %v2949_v58 }
 0x7a1   :  { %1898 = vmatpush.bf16.msrb.mxu0 %v2953_v1  ;;  %1911 = vmatpush.bf16.msrb.mxu1 %v2959_v6 }
 0x7a2   :  { %1924 = vmatpush.bf16.msrb.mxu2 %v2967_v20  ;;  %1937 = vmatpush.bf16.msrb.mxu3 %v2961_v9 }
 0x7a5   :  { %1899 = vmatpush.bf16.msrb.mxu0 %v2965_v19  ;;  %1912 = vmatpush.bf16.msrb.mxu1 %v2971_v24 }
 0x7a6   :  { %1925 = vmatpush.bf16.msrb.mxu2 %v2982_v38  ;;  %1938 = vmatpush.bf16.msrb.mxu3 %v2973_v25 }
 0x7a9   :  { %1900 = vmatpush.bf16.msrb.mxu0 %v2977_v36  ;;  %1913 = vmatpush.bf16.msrb.mxu1 %v2986_v39 }
 0x7aa   :  { %1926 = vmatpush.bf16.msrb.mxu2 %v2994_v48  ;;  %1939 = vmatpush.bf16.msrb.mxu3 %v2988_v40 }
 0x808   :  { %v1648_v23 = vpop.f32.mrf.mxu0  ;;  %v1661_v27 = vpop.f32.mrf.mxu1 }
 0x809   :  { %v1691_v47 = vadd.f32 %v2500_v61, %v1648_v23  ;;  %v1692_v44 = vadd.f32 %v2501_v13, %v1661_v27 }
 0x80b   :  { %v2504_v31 = vmul.f32 -1.442695, %v1691_v47  ;;  %v2505_v37 = vmul.f32 -1.442695, %v1692_v44 }
 0x80d   :  { %2751 = vpow2.f32 %v2504_v31 }
 0x80e   :  { %2753 = vpow2.f32 %v2505_v37 }
 0x80f   :  { %v1674_v30 = vpop.f32.mrf.mxu2  ;;  %v1687_v29 = vpop.f32.mrf.mxu3 }
 0x810   :  { %v1694_v49 = vadd.f32 %v2503_v43, %v1687_v29  ;;  %v1650_v50 = vpop.f32.mrf.mxu0  ;;  %v1663_v51 = vpop.f32.mrf.mxu1  ;;  %v1693_v10 = vadd.f32 %v2502_v15, %v1674_v30 }
 0x812   :  { %v2506_v52 = vmul.f32 -1.442695, %v1694_v49 }
 0x813   :  { %v2752_v55 = vpop.eup %2751 }
 0x814   :  { %v2754_v56 = vpop.eup %2753  ;;  %v1698_v59 = vadd.f32 1.0, %v2752_v55  ;;  %2755 = vpow2.f32 %v2506_v52 }
 0x815   :  { %v1717_v18 = vadd.f32 1.0, %v2754_v56 }
 0x816   :  { %2757 = vrcp.f32 %v1698_v59  ;;  %v1710_v61 = vand.u32 2147483648, %v1698_v59  ;;  %v1708_v27 = vand.u32 2147483647, %v1698_v59  ;;  %vm1704_vm6 = vweird.f32 %v1698_v59 }
 0x817   :  { %2759 = vrcp.f32 %v1717_v18  ;;  %v1676_v14 = vpop.f32.mrf.mxu2  ;;  %v1689_v22 = vpop.f32.mrf.mxu3  ;;  %v1729_v13 = vand.u32 2147483648, %v1717_v18  ;;  %v1727_v44 = vand.u32 2147483647, %v1717_v18  ;;  %vm1723_vm7 = vweird.f32 %v1717_v18 }
 0x818   :  { %v1711_v43 = vor.u32 1.1754944e-38, %v1710_v61  ;;  %vm1709_vm10 = vcmp.eq.f32.partialorder %v1708_v27, 8.507059e+37 }
 0x819   :  { %v1730_v49 = vor.u32 1.1754944e-38, %v1729_v13  ;;  %vm1728_vm11 = vcmp.eq.f32.partialorder %v1727_v44, 8.507059e+37 }
 0x81a   :  { %v2756_v26 = vpop.eup %2755 }
 0x81b   :  { %v1737_v11 = vadd.f32 1.0, %v2756_v26 }
 0x81c   :  { %v2758_v35 = vpop.eup %2757 }
 0x81d   :  { %v2760_v4 = vpop.eup %2759  ;;  %v1700_v5 = vmul.f32 %v2758_v35, %v1698_v59  ;;  %2761 = vrcp.f32 %v1737_v11  ;;  %vm1705_vm4 = vweird.f32 %v2758_v35  ;;  %vm1743_vm13 = vweird.f32 %v1737_v11 }
 0x81e   :  { %v1719_v0 = vmul.f32 %v2760_v4, %v1717_v18  ;;  %2763 = vtanh.f32 %v1693_v10  ;;  %vm1724_vm5 = vweird.f32 %v2760_v4  ;;  %vm1706_vm8 = vmor %vm1704_vm6, %vm1705_vm4  ;;  %v1749_v10 = vand.u32 2147483648, %v1737_v11 }
 0x81f   :  { %v1701_v63 = vsub.f32 1.0, %v1700_v5  ;;  %vm1725_vm9 = vmor %vm1723_vm7, %vm1724_vm5 }
 0x820   :  { %v1720_v62 = vsub.f32 1.0, %v1719_v0  ;;  %v1750_v0 = vor.u32 1.1754944e-38, %v1749_v10 }
 0x821   :  { %v1702_v23 = vmul.f32 %v2758_v35, %v1701_v63 }
 0x822   :  { %v1721_v47 = vmul.f32 %v2760_v4, %v1720_v62 }
 0x823   :  { %v2762_v31 = vpop.eup %2761  ;;  %v1703_v37 = vadd.f32 %v2758_v35, %v1702_v23 }
 0x824   :  { %v1722_v30 = vadd.f32 %v2760_v4, %v1721_v47  ;;  %v1739_v29 = vmul.f32 %v2762_v31, %v1737_v11  ;;  %v2764_v51 = vpop.eup %2763  ;;  %vm1744_vm12 = vweird.f32 %v2762_v31 }
 0x825   :  { %v1707_v50 = vsel %vm1706_vm8, %v2758_v35, %v1703_v37  ;;  %v1747_v35 = vand.u32 2147483647, %v1737_v11  ;;  %vm1745_vm14 = vmor %vm1743_vm13, %vm1744_vm12  ;;  %v2509_v11 = vld [vmem:[%s3786_s0 + $0x188] sm:$0xff]  ;;  %v2511_v37 = vld [vmem:[%s3786_s0 + $0x198] sm:$0xff] }
 0x826   :  { %v1712_v52 = vsel %vm1709_vm10, %v1711_v43, %v1707_v50  ;;  %v1726_v55 = vsel %vm1725_vm9, %v2760_v4, %v1722_v30  ;;  %v1740_v56 = vsub.f32 1.0, %v1739_v29 }
 0x827   :  { %v1731_v14 = vsel %vm1728_vm11, %v1730_v49, %v1726_v55  ;;  %v1754_v22 = vmul.f32 %v2764_v51, %v1712_v52  ;;  %vm1748_vm15 = vcmp.eq.f32.partialorder %v1747_v35, 8.507059e+37 }
 0x828   :  { %v1753_v15 = vmul.f32 %v1731_v14, %v3586_v60  ;;  %v1741_v26 = vmul.f32 %v2762_v31, %v1740_v56  ;;  %v2508_v60 = vld [vmem:[%s3786_s0 + $0x180] sm:$0xff] }
 0x82a   :  { %v3637_v59 = vadd.f32 %v1754_v22, %v1753_v15  ;;  %v1742_v18 = vadd.f32 %v2762_v31, %v1741_v26  ;;  %v2510_v26 = vld [vmem:[%s3786_s0 + $0x190] sm:$0xff] }
 0x82c   :  { %2765 = vtanh.f32 %v3637_v59  ;;  %v1746_v5 = vsel %vm1745_vm14, %v2762_v31, %v1742_v18 }
 0x82d   :  { %v1751_v63 = vsel %vm1748_vm15, %v1750_v0, %v1746_v5 }
 0x832   :  { %v2766_v4 = vpop.eup %2765 }
 0x833   :  { %v1757_v62 = vmul.f32 %v2766_v4, %v1751_v63 }
 0x835   :  { %v1758_v61 = vpack.c.bf16 %v1757_v62, %v1757_v62 }
 0x837   :  { %2507 = vst [vmem:[%s3790_s4 + $0x2c] sm:$0xf] %v1758_v61  ;;  %1774 = vmatmul.bf16.vlgmr.msra.gmra.mxu0 %v1758_v61  ;;  %1787 = vmatmul.bf16.vlgmr.msra.gmra.mxu1 %v1758_v61 }
 0x838   :  { %1800 = vmatmul.bf16.vlgmr.msra.gmra.mxu2 %v1758_v61  ;;  %1813 = vmatmul.bf16.vlgmr.msra.gmra.mxu3 %v1758_v61 }
 0x839   :  { %2020 = vmatpush.bf16.msra.mxu0 %v2898_v3  ;;  %2033 = vmatpush.bf16.msra.mxu1 %v2900_v7 }
 0x83a   :  { %2046 = vmatpush.bf16.msra.mxu2 %v2913_v21  ;;  %2059 = vmatpush.bf16.msra.mxu3 %v2902_v8 }
 0x83d   :  { %2021 = vmatpush.bf16.msra.mxu0 %v2905_v12  ;;  %2034 = vmatpush.bf16.msra.mxu1 %v2909_v16 }
 0x83e   :  { %2047 = vmatpush.bf16.msra.mxu2 %v2925_v34  ;;  %2060 = vmatpush.bf16.msra.mxu3 %v2911_v17 }
 0x841   :  { %2022 = vmatpush.bf16.msra.mxu0 %v2917_v28  ;;  %2035 = vmatpush.bf16.msra.mxu1 %v2921_v32 }
 0x842   :  { %2048 = vmatpush.bf16.msra.mxu2 %v2931_v42  ;;  %2061 = vmatpush.bf16.msra.mxu3 %v2923_v33 }
 0x845   :  { %2023 = vmatpush.bf16.msra.mxu0 %v2929_v41  ;;  %2036 = vmatpush.bf16.msra.mxu1 %v2935_v45 }
 0x846   :  { %2049 = vmatpush.bf16.msra.mxu2 %v2943_v54  ;;  %2062 = vmatpush.bf16.msra.mxu3 %v2937_v46 }
 0x849   :  { %2024 = vmatpush.bf16.msra.mxu0 %v2941_v53  ;;  %2037 = vmatpush.bf16.msra.mxu1 %v2947_v57 }
 0x84a   :  { %2050 = vmatpush.bf16.msra.mxu2 %v2955_v2  ;;  %2063 = vmatpush.bf16.msra.mxu3 %v2949_v58 }
 0x84d   :  { %2025 = vmatpush.bf16.msra.mxu0 %v2953_v1  ;;  %2038 = vmatpush.bf16.msra.mxu1 %v2959_v6 }
 0x84e   :  { %2051 = vmatpush.bf16.msra.mxu2 %v2967_v20  ;;  %2064 = vmatpush.bf16.msra.mxu3 %v2961_v9 }
 0x851   :  { %2026 = vmatpush.bf16.msra.mxu0 %v2965_v19  ;;  %2039 = vmatpush.bf16.msra.mxu1 %v2971_v24 }
 0x852   :  { %2052 = vmatpush.bf16.msra.mxu2 %v2982_v38  ;;  %2065 = vmatpush.bf16.msra.mxu3 %v2973_v25 }
 0x855   :  { %2027 = vmatpush.bf16.msra.mxu0 %v2977_v36  ;;  %2040 = vmatpush.bf16.msra.mxu1 %v2986_v39 }
 0x856   :  { %2053 = vmatpush.bf16.msra.mxu2 %v2994_v48  ;;  %2066 = vmatpush.bf16.msra.mxu3 %v2988_v40 }
 0x8b4   :  { %v1775_v13 = vpop.f32.mrf.mxu0  ;;  %v1788_v23 = vpop.f32.mrf.mxu1 }
 0x8b5   :  { %v1818_v27 = vadd.f32 %v2508_v60, %v1775_v13  ;;  %v1819_v47 = vadd.f32 %v2509_v11, %v1788_v23 }
 0x8b7   :  { %v2512_v44 = vmul.f32 -1.442695, %v1818_v27  ;;  %v2513_v31 = vmul.f32 -1.442695, %v1819_v47 }
 0x8b9   :  { %2767 = vpow2.f32 %v2512_v44 }
 0x8ba   :  { %2769 = vpow2.f32 %v2513_v31 }
 0x8bb   :  { %v1801_v43 = vpop.f32.mrf.mxu2  ;;  %v1814_v30 = vpop.f32.mrf.mxu3 }
 0x8bc   :  { %v1821_v29 = vadd.f32 %v2511_v37, %v1814_v30  ;;  %v1777_v49 = vpop.f32.mrf.mxu0  ;;  %v1790_v50 = vpop.f32.mrf.mxu1  ;;  %v1820_v5 = vadd.f32 %v2510_v26, %v1801_v43 }
 0x8be   :  { %v2514_v51 = vmul.f32 -1.442695, %v1821_v29 }
 0x8bf   :  { %v2768_v52 = vpop.eup %2767 }
 0x8c0   :  { %v2770_v55 = vpop.eup %2769  ;;  %v1825_v56 = vadd.f32 1.0, %v2768_v52  ;;  %2771 = vpow2.f32 %v2514_v51 }
 0x8c1   :  { %v1844_v14 = vadd.f32 1.0, %v2770_v55 }
 0x8c2   :  { %2773 = vrcp.f32 %v1825_v56  ;;  %v1837_v60 = vand.u32 2147483648, %v1825_v56  ;;  %v1835_v23 = vand.u32 2147483647, %v1825_v56  ;;  %vm1831_vm2 = vweird.f32 %v1825_v56 }
 0x8c3   :  { %2775 = vrcp.f32 %v1844_v14  ;;  %v1803_v22 = vpop.f32.mrf.mxu2  ;;  %v1816_v15 = vpop.f32.mrf.mxu3  ;;  %v1856_v11 = vand.u32 2147483648, %v1844_v14  ;;  %v1854_v47 = vand.u32 2147483647, %v1844_v14  ;;  %vm1850_vm3 = vweird.f32 %v1844_v14 }
 0x8c4   :  { %v1838_v37 = vor.u32 1.1754944e-38, %v1837_v60  ;;  %vm1836_vm6 = vcmp.eq.f32.partialorder %v1835_v23, 8.507059e+37 }
 0x8c5   :  { %v1857_v29 = vor.u32 1.1754944e-38, %v1856_v11  ;;  %vm1855_vm7 = vcmp.eq.f32.partialorder %v1854_v47, 8.507059e+37 }
 0x8c6   :  { %v2772_v18 = vpop.eup %2771 }
 0x8c7   :  { %v1864_v10 = vadd.f32 1.0, %v2772_v18 }
 0x8c8   :  { %v2774_v35 = vpop.eup %2773 }
 0x8c9   :  { %v2776_v0 = vpop.eup %2775  ;;  %v1827_v4 = vmul.f32 %v2774_v35, %v1825_v56  ;;  %2777 = vrcp.f32 %v1864_v10  ;;  %vm1832_vm0 = vweird.f32 %v2774_v35  ;;  %vm1870_vm9 = vweird.f32 %v1864_v10 }
 0x8ca   :  { %v1846_v63 = vmul.f32 %v2776_v0, %v1844_v14  ;;  %2779 = vtanh.f32 %v1820_v5  ;;  %vm1851_vm1 = vweird.f32 %v2776_v0  ;;  %vm1833_vm4 = vmor %vm1831_vm2, %vm1832_vm0  ;;  %v1876_v5 = vand.u32 2147483648, %v1864_v10 }
 0x8cb   :  { %v1828_v62 = vsub.f32 1.0, %v1827_v4  ;;  %vm1852_vm5 = vmor %vm1850_vm3, %vm1851_vm1 }
 0x8cc   :  { %v1847_v61 = vsub.f32 1.0, %v1846_v63  ;;  %v1877_v63 = vor.u32 1.1754944e-38, %v1876_v5 }
 0x8cd   :  { %v1829_v13 = vmul.f32 %v2774_v35, %v1828_v62 }
 0x8ce   :  { %v1848_v27 = vmul.f32 %v2776_v0, %v1847_v61 }
 0x8cf   :  { %v2778_v44 = vpop.eup %2777  ;;  %v1830_v31 = vadd.f32 %v2774_v35, %v1829_v13 }
 0x8d0   :  { %v1849_v43 = vadd.f32 %v2776_v0, %v1848_v27  ;;  %v1866_v30 = vmul.f32 %v2778_v44, %v1864_v10  ;;  %v2780_v50 = vpop.eup %2779  ;;  %vm1871_vm8 = vweird.f32 %v2778_v44 }
 0x8d1   :  { %v1834_v49 = vsel %vm1833_vm4, %v2774_v35, %v1830_v31  ;;  %v1874_v35 = vand.u32 2147483647, %v1864_v10  ;;  %vm1872_vm10 = vmor %vm1870_vm9, %vm1871_vm8 }
 0x8d2   :  { %v1839_v51 = vsel %vm1836_vm6, %v1838_v37, %v1834_v49  ;;  %v1853_v52 = vsel %vm1852_vm5, %v2776_v0, %v1849_v43  ;;  %v1867_v55 = vsub.f32 1.0, %v1866_v30 }
 0x8d3   :  { %v1858_v22 = vsel %vm1855_vm7, %v1857_v29, %v1853_v52  ;;  %v1881_v15 = vmul.f32 %v2780_v50, %v1839_v51  ;;  %vm1875_vm11 = vcmp.eq.f32.partialorder %v1874_v35, 8.507059e+37 }
 0x8d4   :  { %v1880_v26 = vmul.f32 %v1858_v22, %v3637_v59  ;;  %v1868_v18 = vmul.f32 %v2778_v44, %v1867_v55 }
 0x8d6   :  { %v3688_v56 = vadd.f32 %v1881_v15, %v1880_v26  ;;  %v1869_v14 = vadd.f32 %v2778_v44, %v1868_v18 }
 0x8d8   :  { %2781 = vtanh.f32 %v3688_v56  ;;  %v1873_v4 = vsel %vm1872_vm10, %v2778_v44, %v1869_v14 }
 0x8d9   :  { %v1878_v62 = vsel %vm1875_vm11, %v1877_v63, %v1873_v4 }
 0x8de   :  { %v2782_v0 = vpop.eup %2781 }
 0x8df   :  { %v1884_v61 = vmul.f32 %v2782_v0, %v1878_v62 }
 0x8e1   :  { %v1885_v60 = vpack.c.bf16 %v1884_v61, %v1884_v61 }
 0x8e3   :  { %2515 = vst [vmem:[%s3790_s4 + $0x30] sm:$0xf] %v1885_v60  ;;  %1901 = vmatmul.bf16.vlgmr.msrb.gmra.mxu0 %v1885_v60  ;;  %1914 = vmatmul.bf16.vlgmr.msrb.gmra.mxu1 %v1885_v60 }
 0x8e4   :  { %1927 = vmatmul.bf16.vlgmr.msrb.gmra.mxu2 %v1885_v60  ;;  %1940 = vmatmul.bf16.vlgmr.msrb.gmra.mxu3 %v1885_v60  ;;  %v2525_v60 = vld [vmem:[%s3786_s0 + $0x1c8] sm:$0xff] }
 0x8e5   :  { %2147 = vmatpush.bf16.msrb.mxu0 %v2898_v3  ;;  %2160 = vmatpush.bf16.msrb.mxu1 %v2900_v7  ;;  %v2516_v3 = vld [vmem:[%s3786_s0 + $0x1a0] sm:$0xff]  ;;  %v2517_v7 = vld [vmem:[%s3786_s0 + $0x1a8] sm:$0xff] }
 0x8e6   :  { %2173 = vmatpush.bf16.msrb.mxu2 %v2913_v21  ;;  %2186 = vmatpush.bf16.msrb.mxu3 %v2902_v8 }
 0x8e9   :  { %2148 = vmatpush.bf16.msrb.mxu0 %v2905_v12  ;;  %2161 = vmatpush.bf16.msrb.mxu1 %v2909_v16 }
 0x8ea   :  { %2174 = vmatpush.bf16.msrb.mxu2 %v2925_v34  ;;  %2187 = vmatpush.bf16.msrb.mxu3 %v2911_v17 }
 0x8ed   :  { %2149 = vmatpush.bf16.msrb.mxu0 %v2917_v28  ;;  %2162 = vmatpush.bf16.msrb.mxu1 %v2921_v32  ;;  %v2519_v32 = vld [vmem:[%s3786_s0 + $0x1b8] sm:$0xff] }
 0x8ee   :  { %2175 = vmatpush.bf16.msrb.mxu2 %v2931_v42  ;;  %2188 = vmatpush.bf16.msrb.mxu3 %v2923_v33 }
 0x8f1   :  { %2150 = vmatpush.bf16.msrb.mxu0 %v2929_v41  ;;  %2163 = vmatpush.bf16.msrb.mxu1 %v2935_v45 }
 0x8f2   :  { %2176 = vmatpush.bf16.msrb.mxu2 %v2943_v54  ;;  %2189 = vmatpush.bf16.msrb.mxu3 %v2937_v46 }
 0x8f5   :  { %2151 = vmatpush.bf16.msrb.mxu0 %v2941_v53  ;;  %2164 = vmatpush.bf16.msrb.mxu1 %v2947_v57 }
 0x8f6   :  { %2177 = vmatpush.bf16.msrb.mxu2 %v2955_v2  ;;  %2190 = vmatpush.bf16.msrb.mxu3 %v2949_v58 }
 0x8f9   :  { %2152 = vmatpush.bf16.msrb.mxu0 %v2953_v1  ;;  %2165 = vmatpush.bf16.msrb.mxu1 %v2959_v6  ;;  %v2518_v6 = vld [vmem:[%s3786_s0 + $0x1b0] sm:$0xff] }
 0x8fa   :  { %2178 = vmatpush.bf16.msrb.mxu2 %v2967_v20  ;;  %2191 = vmatpush.bf16.msrb.mxu3 %v2961_v9 }
 0x8fd   :  { %2153 = vmatpush.bf16.msrb.mxu0 %v2965_v19  ;;  %2166 = vmatpush.bf16.msrb.mxu1 %v2971_v24 }
 0x8fe   :  { %2179 = vmatpush.bf16.msrb.mxu2 %v2982_v38  ;;  %2192 = vmatpush.bf16.msrb.mxu3 %v2973_v25 }
 0x901   :  { %2154 = vmatpush.bf16.msrb.mxu0 %v2977_v36  ;;  %2167 = vmatpush.bf16.msrb.mxu1 %v2986_v39 }
 0x902   :  { %2180 = vmatpush.bf16.msrb.mxu2 %v2994_v48  ;;  %2193 = vmatpush.bf16.msrb.mxu3 %v2988_v40 }
 0x960   :  { %v1902_v8 = vpop.f32.mrf.mxu0  ;;  %v1915_v12 = vpop.f32.mrf.mxu1 }
 0x961   :  { %v1945_v16 = vadd.f32 %v2516_v3, %v1902_v8  ;;  %v1946_v17 = vadd.f32 %v2517_v7, %v1915_v12 }
 0x963   :  { %v2520_v21 = vmul.f32 -1.442695, %v1945_v16  ;;  %v2521_v28 = vmul.f32 -1.442695, %v1946_v17 }
 0x965   :  { %2783 = vpow2.f32 %v2520_v21  ;;  %v2527_v21 = vld [vmem:[%s3786_s0 + $0x1d8] sm:$0xff] }
 0x966   :  { %2785 = vpow2.f32 %v2521_v28 }
 0x967   :  { %v1928_v33 = vpop.f32.mrf.mxu2  ;;  %v1941_v34 = vpop.f32.mrf.mxu3 }
 0x968   :  { %v1948_v41 = vadd.f32 %v2519_v32, %v1941_v34  ;;  %v1904_v42 = vpop.f32.mrf.mxu0  ;;  %v1917_v45 = vpop.f32.mrf.mxu1  ;;  %v1947_v24 = vadd.f32 %v2518_v6, %v1928_v33 }
 0x96a   :  { %v2522_v46 = vmul.f32 -1.442695, %v1948_v41 }
 0x96b   :  { %v2784_v53 = vpop.eup %2783 }
 0x96c   :  { %v2786_v54 = vpop.eup %2785  ;;  %v1952_v57 = vadd.f32 1.0, %v2784_v53  ;;  %2787 = vpow2.f32 %v2522_v46 }
 0x96d   :  { %v1971_v58 = vadd.f32 1.0, %v2786_v54 }
 0x96e   :  { %2789 = vrcp.f32 %v1952_v57  ;;  %v1964_v48 = vand.u32 2147483648, %v1952_v57  ;;  %v1962_v11 = vand.u32 2147483647, %v1952_v57  ;;  %vm1958_vm14 = vweird.f32 %v1952_v57 }
 0x96f   :  { %2791 = vrcp.f32 %v1971_v58  ;;  %v1930_v1 = vpop.f32.mrf.mxu2  ;;  %v1943_v2 = vpop.f32.mrf.mxu3  ;;  %v1983_v59 = vand.u32 2147483648, %v1971_v58  ;;  %v1981_v23 = vand.u32 2147483647, %v1971_v58  ;;  %vm1977_vm15 = vweird.f32 %v1971_v58 }
 0x970   :  { %v1965_v44 = vor.u32 1.1754944e-38, %v1964_v48  ;;  %vm1963_vm2 = vcmp.eq.f32.partialorder %v1962_v11, 8.507059e+37  ;;  %v2526_v1 = vld [vmem:[%s3786_s0 + $0x1d0] sm:$0xff] }
 0x971   :  { %v1984_v43 = vor.u32 1.1754944e-38, %v1983_v59  ;;  %vm1982_vm3 = vcmp.eq.f32.partialorder %v1981_v23, 8.507059e+37 }
 0x972   :  { %v2788_v9 = vpop.eup %2787 }
 0x973   :  { %v1991_v19 = vadd.f32 1.0, %v2788_v9 }
 0x974   :  { %v2790_v20 = vpop.eup %2789 }
 0x975   :  { %v2792_v25 = vpop.eup %2791  ;;  %v1954_v36 = vmul.f32 %v2790_v20, %v1952_v57  ;;  %2793 = vrcp.f32 %v1991_v19  ;;  %vm1959_vm12 = vweird.f32 %v2790_v20  ;;  %v2003_v14 = vand.u32 2147483648, %v1991_v19 }
 0x976   :  { %v1973_v38 = vmul.f32 %v2792_v25, %v1971_v58  ;;  %2795 = vtanh.f32 %v1947_v24  ;;  %vm1978_vm13 = vweird.f32 %v2792_v25  ;;  %vm1960_vm0 = vmor %vm1958_vm14, %vm1959_vm12  ;;  %vm1997_vm5 = vweird.f32 %v1991_v19 }
 0x977   :  { %v1955_v39 = vsub.f32 1.0, %v1954_v36  ;;  %vm1979_vm1 = vmor %vm1977_vm15, %vm1978_vm13  ;;  %v2001_v5 = vand.u32 2147483647, %v1991_v19  ;;  %v2004_v4 = vor.u32 1.1754944e-38, %v2003_v14 }
 0x978   :  { %v1974_v40 = vsub.f32 1.0, %v1973_v38 }
 0x979   :  { %v1956_v10 = vmul.f32 %v2790_v20, %v1955_v39  ;;  %vm2002_vm7 = vcmp.eq.f32.partialorder %v2001_v5, 8.507059e+37 }
 0x97a   :  { %v1975_v13 = vmul.f32 %v2792_v25, %v1974_v40 }
 0x97b   :  { %v2794_v27 = vpop.eup %2793  ;;  %v1957_v47 = vadd.f32 %v2790_v20, %v1956_v10 }
 0x97c   :  { %v1976_v31 = vadd.f32 %v2792_v25, %v1975_v13  ;;  %v1993_v37 = vmul.f32 %v2794_v27, %v1991_v19  ;;  %v2796_v29 = vpop.eup %2795  ;;  %vm1998_vm4 = vweird.f32 %v2794_v27 }
 0x97d   :  { %v1961_v30 = vsel %vm1960_vm0, %v2790_v20, %v1957_v47  ;;  %vm1999_vm6 = vmor %vm1997_vm5, %vm1998_vm4 }
 0x97e   :  { %v1966_v49 = vsel %vm1963_vm2, %v1965_v44, %v1961_v30  ;;  %v1980_v50 = vsel %vm1979_vm1, %v2792_v25, %v1976_v31  ;;  %v1994_v51 = vsub.f32 1.0, %v1993_v37 }
 0x97f   :  { %v1985_v52 = vsel %vm1982_vm3, %v1984_v43, %v1980_v50  ;;  %v2008_v55 = vmul.f32 %v2796_v29, %v1966_v49 }
 0x980   :  { %v2007_v22 = vmul.f32 %v1985_v52, %v3688_v56  ;;  %v1995_v15 = vmul.f32 %v2794_v27, %v1994_v51  ;;  %v2524_v56 = vld [vmem:[%s3786_s0 + $0x1c0] sm:$0xff] }
 0x982   :  { %v3739_v26 = vadd.f32 %v2008_v55, %v2007_v22  ;;  %v1996_v18 = vadd.f32 %v2794_v27, %v1995_v15 }
 0x984   :  { %2797 = vtanh.f32 %v3739_v26  ;;  %v2000_v35 = vsel %vm1999_vm6, %v2794_v27, %v1996_v18 }
 0x985   :  { %v2005_v0 = vsel %vm2002_vm7, %v2004_v4, %v2000_v35 }
 0x98a   :  { %v2798_v63 = vpop.eup %2797 }
 0x98b   :  { %v2011_v62 = vmul.f32 %v2798_v63, %v2005_v0 }
 0x98d   :  { %v2012_v61 = vpack.c.bf16 %v2011_v62, %v2011_v62 }
 0x98f   :  { %2523 = vst [vmem:[%s3790_s4 + $0x34] sm:$0xf] %v2012_v61  ;;  %2028 = vmatmul.bf16.vlgmr.msra.gmra.mxu0 %v2012_v61  ;;  %2041 = vmatmul.bf16.vlgmr.msra.gmra.mxu1 %v2012_v61 }
 0x990   :  { %2054 = vmatmul.bf16.vlgmr.msra.gmra.mxu2 %v2012_v61  ;;  %2067 = vmatmul.bf16.vlgmr.msra.gmra.mxu3 %v2012_v61  ;;  %v2533_v61 = vld [vmem:[%s3786_s0 + $0x1e8] sm:$0xff] }
 0xa0c   :  { %v2029_v3 = vpop.f32.mrf.mxu0  ;;  %v2042_v7 = vpop.f32.mrf.mxu1 }
 0xa0d   :  { %v2072_v8 = vadd.f32 %v2524_v56, %v2029_v3  ;;  %v2073_v12 = vadd.f32 %v2525_v60, %v2042_v7 }
 0xa0f   :  { %v2528_v16 = vmul.f32 -1.442695, %v2072_v8  ;;  %v2529_v17 = vmul.f32 -1.442695, %v2073_v12 }
 0xa11   :  { %2799 = vpow2.f32 %v2528_v16  ;;  %v2535_v16 = vld [vmem:[%s3786_s0 + $0x1f8] sm:$0xff] }
 0xa12   :  { %2801 = vpow2.f32 %v2529_v17 }
 0xa13   :  { %v2055_v28 = vpop.f32.mrf.mxu2  ;;  %v2068_v32 = vpop.f32.mrf.mxu3 }
 0xa14   :  { %v2075_v33 = vadd.f32 %v2527_v21, %v2068_v32  ;;  %v2031_v34 = vpop.f32.mrf.mxu0  ;;  %v2044_v41 = vpop.f32.mrf.mxu1  ;;  %v2074_v19 = vadd.f32 %v2526_v1, %v2055_v28 }
 0xa16   :  { %v2530_v42 = vmul.f32 -1.442695, %v2075_v33 }
 0xa17   :  { %v2800_v45 = vpop.eup %2799 }
 0xa18   :  { %v2802_v46 = vpop.eup %2801  ;;  %v2079_v53 = vadd.f32 1.0, %v2800_v45  ;;  %2803 = vpow2.f32 %v2530_v42 }
 0xa19   :  { %v2098_v54 = vadd.f32 1.0, %v2802_v46 }
 0xa1a   :  { %2805 = vrcp.f32 %v2079_v53  ;;  %v2091_v39 = vand.u32 2147483648, %v2079_v53  ;;  %v2089_v59 = vand.u32 2147483647, %v2079_v53  ;;  %vm2085_vm10 = vweird.f32 %v2079_v53 }
 0xa1b   :  { %2807 = vrcp.f32 %v2098_v54  ;;  %v2057_v57 = vpop.f32.mrf.mxu2  ;;  %v2070_v58 = vpop.f32.mrf.mxu3  ;;  %v2110_v40 = vand.u32 2147483648, %v2098_v54  ;;  %v2108_v11 = vand.u32 2147483647, %v2098_v54  ;;  %vm2104_vm11 = vweird.f32 %v2098_v54 }
 0xa1c   :  { %v2092_v27 = vor.u32 1.1754944e-38, %v2091_v39  ;;  %vm2090_vm14 = vcmp.eq.f32.partialorder %v2089_v59, 8.507059e+37  ;;  %v2534_v57 = vld [vmem:[%s3786_s0 + $0x1f0] sm:$0xff] }
 0xa1d   :  { %v2111_v31 = vor.u32 1.1754944e-38, %v2110_v40  ;;  %vm2109_vm15 = vcmp.eq.f32.partialorder %v2108_v11, 8.507059e+37 }
 0xa1e   :  { %v2804_v2 = vpop.eup %2803 }
 0xa1f   :  { %v2118_v6 = vadd.f32 1.0, %v2804_v2 }
 0xa20   :  { %v2806_v9 = vpop.eup %2805 }
 0xa21   :  { %v2808_v20 = vpop.eup %2807  ;;  %v2081_v24 = vmul.f32 %v2806_v9, %v2079_v53  ;;  %2809 = vrcp.f32 %v2118_v6  ;;  %vm2086_vm8 = vweird.f32 %v2806_v9  ;;  %v2130_v18 = vand.u32 2147483648, %v2118_v6 }
 0xa22   :  { %v2100_v25 = vmul.f32 %v2808_v20, %v2098_v54  ;;  %2811 = vtanh.f32 %v2074_v19  ;;  %vm2105_vm9 = vweird.f32 %v2808_v20  ;;  %vm2087_vm12 = vmor %vm2085_vm10, %vm2086_vm8  ;;  %vm2124_vm1 = vweird.f32 %v2118_v6 }
 0xa23   :  { %v2082_v36 = vsub.f32 1.0, %v2081_v24  ;;  %vm2106_vm13 = vmor %vm2104_vm11, %vm2105_vm9  ;;  %v2128_v14 = vand.u32 2147483647, %v2118_v6  ;;  %v2131_v35 = vor.u32 1.1754944e-38, %v2130_v18 }
 0xa24   :  { %v2101_v38 = vsub.f32 1.0, %v2100_v25 }
 0xa25   :  { %v2083_v48 = vmul.f32 %v2806_v9, %v2082_v36  ;;  %vm2129_vm3 = vcmp.eq.f32.partialorder %v2128_v14, 8.507059e+37 }
 0xa26   :  { %v2102_v10 = vmul.f32 %v2808_v20, %v2101_v38 }
 0xa27   :  { %v2810_v13 = vpop.eup %2809  ;;  %v2084_v23 = vadd.f32 %v2806_v9, %v2083_v48 }
 0xa28   :  { %v2103_v47 = vadd.f32 %v2808_v20, %v2102_v10  ;;  %v2120_v44 = vmul.f32 %v2810_v13, %v2118_v6  ;;  %v2812_v43 = vpop.eup %2811  ;;  %vm2125_vm0 = vweird.f32 %v2810_v13 }
 0xa29   :  { %v2088_v37 = vsel %vm2087_vm12, %v2806_v9, %v2084_v23  ;;  %vm2126_vm2 = vmor %vm2124_vm1, %vm2125_vm0 }
 0xa2a   :  { %v2093_v30 = vsel %vm2090_vm14, %v2092_v27, %v2088_v37  ;;  %v2107_v29 = vsel %vm2106_vm13, %v2808_v20, %v2103_v47  ;;  %v2121_v49 = vsub.f32 1.0, %v2120_v44 }
 0xa2b   :  { %v2112_v50 = vsel %vm2109_vm15, %v2111_v31, %v2107_v29  ;;  %v2135_v51 = vmul.f32 %v2812_v43, %v2093_v30 }
 0xa2c   :  { %v2134_v52 = vmul.f32 %v2112_v50, %v3739_v26  ;;  %v2122_v55 = vmul.f32 %v2810_v13, %v2121_v49  ;;  %v2532_v26 = vld [vmem:[%s3786_s0 + $0x1e0] sm:$0xff] }
 0xa2e   :  { %v3758_v22 = vadd.f32 %v2135_v51, %v2134_v52  ;;  %v2123_v15 = vadd.f32 %v2810_v13, %v2122_v55 }
 0xa30   :  { %2813 = vtanh.f32 %v3758_v22  ;;  %v2127_v5 = vsel %vm2126_vm2, %v2810_v13, %v2123_v15 }
 0xa31   :  { %v2132_v63 = vsel %vm2129_vm3, %v2131_v35, %v2127_v5 }
 0xa36   :  { %v2814_v4 = vpop.eup %2813 }
 0xa37   :  { %v2138_v0 = vmul.f32 %v2814_v4, %v2132_v63 }
 0xa39   :  { %v2139_v62 = vpack.c.bf16 %v2138_v0, %v2138_v0 }
 0xa3b   :  { %2531 = vst [vmem:[%s3790_s4 + $0x38] sm:$0xf] %v2139_v62  ;;  %2155 = vmatmul.bf16.vlgmr.msrb.gmra.mxu0 %v2139_v62  ;;  %2168 = vmatmul.bf16.vlgmr.msrb.gmra.mxu1 %v2139_v62 }
 0xa3c   :  { %2181 = vmatmul.bf16.vlgmr.msrb.gmra.mxu2 %v2139_v62  ;;  %2194 = vmatmul.bf16.vlgmr.msrb.gmra.mxu3 %v2139_v62 }
 0xab8   :  { %v2156_v56 = vpop.f32.mrf.mxu0  ;;  %v2169_v60 = vpop.f32.mrf.mxu1 }
 0xab9   :  { %v2199_v3 = vadd.f32 %v2532_v26, %v2156_v56  ;;  %v2200_v7 = vadd.f32 %v2533_v61, %v2169_v60 }
 0xabb   :  { %v2536_v8 = vmul.f32 -1.442695, %v2199_v3  ;;  %v2537_v12 = vmul.f32 -1.442695, %v2200_v7 }
 0xabd   :  { %2815 = vpow2.f32 %v2536_v8 }
 0xabe   :  { %2817 = vpow2.f32 %v2537_v12 }
 0xabf   :  { %v2182_v17 = vpop.f32.mrf.mxu2  ;;  %v2195_v21 = vpop.f32.mrf.mxu3 }
 0xac0   :  { %v2202_v28 = vadd.f32 %v2535_v16, %v2195_v21  ;;  %v2158_v32 = vpop.f32.mrf.mxu0  ;;  %v2171_v33 = vpop.f32.mrf.mxu1  ;;  %v2201_v6 = vadd.f32 %v2534_v57, %v2182_v17 }
 0xac2   :  { %v2538_v34 = vmul.f32 -1.442695, %v2202_v28 }
 0xac3   :  { %v2816_v41 = vpop.eup %2815 }
 0xac4   :  { %v2818_v42 = vpop.eup %2817  ;;  %v2206_v45 = vadd.f32 1.0, %v2816_v41  ;;  %2819 = vpow2.f32 %v2538_v34 }
 0xac5   :  { %v2225_v46 = vadd.f32 1.0, %v2818_v42 }
 0xac6   :  { %2821 = vrcp.f32 %v2206_v45  ;;  %v2218_v36 = vand.u32 2147483648, %v2206_v45  ;;  %v2216_v40 = vand.u32 2147483647, %v2206_v45  ;;  %vm2212_vm6 = vweird.f32 %v2206_v45 }
 0xac7   :  { %2823 = vrcp.f32 %v2225_v46  ;;  %v2184_v53 = vpop.f32.mrf.mxu2  ;;  %v2197_v54 = vpop.f32.mrf.mxu3  ;;  %v2237_v38 = vand.u32 2147483648, %v2225_v46  ;;  %v2235_v59 = vand.u32 2147483647, %v2225_v46  ;;  %vm2231_vm7 = vweird.f32 %v2225_v46 }
 0xac8   :  { %v2219_v13 = vor.u32 1.1754944e-38, %v2218_v36  ;;  %vm2217_vm10 = vcmp.eq.f32.partialorder %v2216_v40, 8.507059e+37 }
 0xac9   :  { %v2238_v47 = vor.u32 1.1754944e-38, %v2237_v38  ;;  %vm2236_vm11 = vcmp.eq.f32.partialorder %v2235_v59, 8.507059e+37 }
 0xaca   :  { %v2820_v58 = vpop.eup %2819 }
 0xacb   :  { %v2245_v1 = vadd.f32 1.0, %v2820_v58 }
 0xacc   :  { %v2822_v2 = vpop.eup %2821 }
 0xacd   :  { %v2824_v9 = vpop.eup %2823  ;;  %v2208_v19 = vmul.f32 %v2822_v2, %v2206_v45  ;;  %2825 = vrcp.f32 %v2245_v1  ;;  %vm2213_vm4 = vweird.f32 %v2822_v2  ;;  %v2257_v15 = vand.u32 2147483648, %v2245_v1 }
 0xace   :  { %v2227_v20 = vmul.f32 %v2824_v9, %v2225_v46  ;;  %2827 = vtanh.f32 %v2201_v6  ;;  %vm2232_vm5 = vweird.f32 %v2824_v9  ;;  %vm2214_vm8 = vmor %vm2212_vm6, %vm2213_vm4  ;;  %vm2251_vm13 = vweird.f32 %v2245_v1 }
 0xacf   :  { %v2209_v24 = vsub.f32 1.0, %v2208_v19  ;;  %vm2233_vm9 = vmor %vm2231_vm7, %vm2232_vm5  ;;  %v2255_v18 = vand.u32 2147483647, %v2245_v1  ;;  %v2258_v5 = vor.u32 1.1754944e-38, %v2257_v15 }
 0xad0   :  { %v2228_v25 = vsub.f32 1.0, %v2227_v20 }
 0xad1   :  { %v2210_v39 = vmul.f32 %v2822_v2, %v2209_v24  ;;  %vm2256_vm15 = vcmp.eq.f32.partialorder %v2255_v18, 8.507059e+37 }
 0xad2   :  { %v2229_v48 = vmul.f32 %v2824_v9, %v2228_v25 }
 0xad3   :  { %v2826_v10 = vpop.eup %2825  ;;  %v2211_v11 = vadd.f32 %v2822_v2, %v2210_v39 }
 0xad4   :  { %v2230_v23 = vadd.f32 %v2824_v9, %v2229_v48  ;;  %v2247_v27 = vmul.f32 %v2826_v10, %v2245_v1  ;;  %v2828_v31 = vpop.eup %2827  ;;  %vm2252_vm12 = vweird.f32 %v2826_v10 }
 0xad5   :  { %v2215_v44 = vsel %vm2214_vm8, %v2822_v2, %v2211_v11  ;;  %vm2253_vm14 = vmor %vm2251_vm13, %vm2252_vm12 }
 0xad6   :  { %v2220_v37 = vsel %vm2217_vm10, %v2219_v13, %v2215_v44  ;;  %v2234_v43 = vsel %vm2233_vm9, %v2824_v9, %v2230_v23  ;;  %v2248_v30 = vsub.f32 1.0, %v2247_v27 }
 0xad7   :  { %v2239_v29 = vsel %vm2236_vm11, %v2238_v47, %v2234_v43  ;;  %v2262_v49 = vmul.f32 %v2828_v31, %v2220_v37 }
 0xad8   :  { %v2261_v50 = vmul.f32 %v2239_v29, %v3758_v22  ;;  %v2249_v51 = vmul.f32 %v2826_v10, %v2248_v30 }
 0xada   :  { %v2263_v52 = vadd.f32 %v2262_v49, %v2261_v50  ;;  %v2250_v55 = vadd.f32 %v2826_v10, %v2249_v51 }
 0xadc   :  { %2829 = vtanh.f32 %v2263_v52  ;;  %2275 = vst [vmem:[%s3792_s6] sm:$0xff] %v2263_v52  ;;  %v2254_v14 = vsel %vm2253_vm14, %v2826_v10, %v2250_v55 }
 0xadd   :  { %v2259_v4 = vsel %vm2256_vm15, %v2258_v5, %v2254_v14 }
 0xae2   :  { %v2830_v35 = vpop.eup %2829 }
 0xae3   :  { %v2265_v63 = vmul.f32 %v2830_v35, %v2259_v4 }
 0xae5   :  { %v2266_v22 = vpack.c.bf16 %v2265_v63, %v2265_v63  ;;  %2274 = vst [vmem:[%s3791_s5] sm:$0xff] %v2265_v63 }
 0xae7   :  { %2539 = vst [vmem:[%s3790_s4 + $0x3c] sm:$0xf] %v2266_v22 }
 0xae8   :  { %2288 = vsyncpa [#allocation5], 1 }

</bundles_post_ra>
